<compile_context>
chip_gen: v6e
topology: v6e:2x2x1
jax: 0.10.0
libtpu: 0.0.40
codegen_flags: <defaults>
</compile_context>

<pallas_src>
import functools

import jax
import jax.numpy as jnp
from jax.experimental import pallas as pl
from jax.experimental.pallas import tpu as pltpu

_LANE = 128
_SUBLANE = 8
_VMEM_TARGET = 40 * 1024 * 1024      # per-step working-set target (v7x-safe)


# ---------------------------------------------------------------------------
# Row-tiled linear kernel (node qkv projection); weight resident in VMEM.
# ---------------------------------------------------------------------------
def _linear_kernel(x_ref, w_ref, o_ref):
    o_ref[...] = jnp.dot(x_ref[...], w_ref[...],
                         preferred_element_type=jnp.float32).astype(o_ref.dtype)


def linear(x, w, *, block_rows=512, out_dtype=jnp.float32):
    """x: (M, K) @ w: (K, N) -> (M, N), tiled over rows."""
    M, K = x.shape
    N = w.shape[1]
    bm = M if M <= block_rows else block_rows
    return pl.pallas_call(
        _linear_kernel,
        out_shape=jax.ShapeDtypeStruct((M, N), out_dtype),
        grid=(pl.cdiv(M, bm),),
        in_specs=[pl.BlockSpec((bm, K), lambda i: (i, 0)),
                  pl.BlockSpec((K, N), lambda i: (0, 0))],
        out_specs=pl.BlockSpec((bm, N), lambda i: (i, 0)),
        compiler_params=pltpu.CompilerParams(
            dimension_semantics=("parallel",)),
    )(x, w)


# ---------------------------------------------------------------------------
# Weight column permutation: per-head interleaved (h, {q,k,v}, dh) ->
# contiguous [Q | K | V] blocks, each in '(h d)' head-major order.  Done once
# on the tiny weights so the big activations are never split / transposed.
# ---------------------------------------------------------------------------
def _permute_qkv_columns(w, n_heads, d_hid, n_chunks=3):
    in_f, out_f = w.shape
    dh = d_hid // n_heads
    assert out_f == n_chunks * d_hid
    w = w.reshape(in_f, n_heads, n_chunks, dh)
    w = jnp.transpose(w, (0, 2, 1, 3))
    return w.reshape(in_f, n_chunks * d_hid)


# ---------------------------------------------------------------------------
# VMEM sizing: pessimistic per-grid-step footprint (assume <128 minor dims are
# padded to 128 lanes), used both to pick q_tile and to set vmem_limit_bytes.
# ---------------------------------------------------------------------------
def _pad(v, m):
    return ((v + m - 1) // m) * m


def _vmem_estimate(q_tile, n, d_edge, d_hid, n_heads, d_node,
                   edge_itemsize, attn_itemsize, with_attn):
    f32 = 4
    est = 0
    # Double-buffered pipeline blocks.
    est += 2 * q_tile * n * _pad(d_edge, _LANE) * edge_itemsize       # edge tile
    est += 2 * _pad(q_tile, _SUBLANE) * _pad(d_hid, _LANE) * f32      # q tile
    est += 2 * _pad(n, _SUBLANE) * _pad(2 * d_hid, _LANE) * f32       # kv
    est += 2 * _pad(q_tile, _SUBLANE) * _pad(d_node, _LANE) * f32     # out
    if with_attn:
        est += (2 * n_heads * _pad(q_tile, _SUBLANE)
                * _pad(n, _LANE) * attn_itemsize)
    # Resident weights.
    est += _pad(d_edge, _SUBLANE) * _pad(3 * d_hid, _LANE) * f32
    est += _pad(d_hid, _SUBLANE) * _pad(d_node, _LANE) * f32
    # Large in-kernel temporaries: qkv_e + ~3 live (TI, N, d_hid) f32 arrays.
    est += q_tile * n * _pad(3 * d_hid, _LANE) * f32
    est += 3 * q_tile * n * _pad(d_hid, _LANE) * f32
    return est


def _choose_q_tile(n, q_block, est_fn):
    cands = [t for t in range(_SUBLANE, n + 1, _SUBLANE)
             if n % t == 0 and t <= max(q_block, _SUBLANE)]
    if not cands:
        # TODO(synk): pad the query axis instead when N is not a multiple of 8.
        return n
    for t in sorted(cands, reverse=True):
        if est_fn(t) <= _VMEM_TARGET:
            return t
    return min(cands)


# ---------------------------------------------------------------------------
# Fused RT attention kernel: one (batch, query-tile) per grid step, all heads,
# edge qkv projection + attention + proj_out epilogue fused.
# ---------------------------------------------------------------------------
def _rt_attn_kernel(q_ref, kv_ref, edge_ref, w_edge_ref, w_proj_ref, b_proj_ref,
                    out_ref, *attn_refs, scale, n_heads, d_hid, mxu_dtype):
    f32 = jnp.float32
    attn_ref = attn_refs[0] if attn_refs else None
    q_tile = q_ref.shape[1]
    n_keys = kv_ref.shape[1]
    d_edge = edge_ref.shape[-1]
    dh = d_hid // n_heads

    qn = q_ref[0].astype(f32)                               # (TI, d_hid)
    kv = kv_ref[0].astype(f32)                              # (N, 2*d_hid) [K|V]
    kn = kv[:, :d_hid]
    vn = kv[:, d_hid:]

    # Fused edge qkv projection on the MXU; raw edge features enter VMEM once.
    # MXU operands are cast in-kernel (no extra HBM copy), f32 accumulation.
    edge2d = edge_ref[0].reshape(q_tile * n_keys, d_edge).astype(mxu_dtype)
    qkv_e = jnp.dot(edge2d, w_edge_ref[...].astype(mxu_dtype),
                    preferred_element_type=f32)             # (TI*N, 3*d_hid)
    qkv_e = qkv_e.reshape(q_tile, n_keys, 3 * d_hid)

    # Additive structure of the module, all heads at once (d_hid lanes):
    #   q = qn + qe ; k = kn + ke ; v = vn + ve
    q_full = qn[:, None, :] + qkv_e[:, :, :d_hid]           # (TI, N, d_hid)
    k_full = kn[None, :, :] + qkv_e[:, :, d_hid:2 * d_hid]
    v_full = vn[None, :, :] + qkv_e[:, :, 2 * d_hid:]
    prod = q_full * k_full                                   # (TI, N, d_hid)

    out_cols = []
    for h in range(n_heads):                                 # static unroll
        lo, hi = h * dh, (h + 1) * dh
        dots = scale * jnp.sum(prod[:, :, lo:hi], axis=-1)   # (TI, N)
        dots = dots - jnp.max(dots, axis=-1, keepdims=True)
        e = jnp.exp(dots)
        attn_h = e / jnp.sum(e, axis=-1, keepdims=True)      # exact softmax
        if attn_ref is not None:
            attn_ref[0, h] = attn_h.astype(attn_ref.dtype)
        out_cols.append(jnp.sum(attn_h[:, :, None] * v_full[:, :, lo:hi],
                                axis=1))                     # (TI, dh)

    out_tile = jnp.concatenate(out_cols, axis=-1)            # (TI, d_hid) '(h d)'
    # Fused proj_out epilogue: tiny resident weight, write (B, N, d_node).
    proj = jnp.dot(out_tile, w_proj_ref[...].astype(f32),
                   preferred_element_type=f32) + b_proj_ref[...].astype(f32)
    out_ref[0] = proj.astype(out_ref.dtype)


def rt_attention(q_node, kv_node, edge_features, w_edge, w_proj, b_proj, *,
                 scale, n_heads, d_hid, q_block=128, return_attn=True,
                 attn_dtype=jnp.float32, out_dtype=jnp.float32,
                 edge_mxu_dtype=None):
    """q_node: (B,N,d_hid); kv_node: (B,N,2*d_hid) packed [K|V] head-major;
    edge_features: (B,N,N,d_edge) raw (any streaming dtype);
    w_edge: (d_edge, 3*d_hid) permuted.  Returns out (B,N,d_node)
    [, attn (B,H,N,N)]."""
    B, N, _ = q_node.shape
    d_edge = edge_features.shape[-1]
    d_node = w_proj.shape[1]
    mxu_dt = edge_mxu_dtype if edge_mxu_dtype is not None else edge_features.dtype

    est_fn = lambda t: _vmem_estimate(
        t, N, d_edge, d_hid, n_heads, d_node,
        jnp.dtype(edge_features.dtype).itemsize,
        jnp.dtype(attn_dtype).itemsize, return_attn)
    q_tile = _choose_q_tile(N, q_block, est_fn)
    grid = (B, N // q_tile)
    # TODO(synk): flash-style key-dim tiling for very large N (keys untiled).

    kern = functools.partial(_rt_attn_kernel, scale=scale, n_heads=n_heads,
                             d_hid=d_hid, mxu_dtype=mxu_dt)
    in_specs = [
        pl.BlockSpec((1, q_tile, d_hid), lambda b, i: (b, i, 0)),
        pl.BlockSpec((1, N, 2 * d_hid), lambda b, i: (b, 0, 0)),
        pl.BlockSpec((1, q_tile, N, d_edge), lambda b, i: (b, i, 0, 0)),
        pl.BlockSpec((d_edge, 3 * d_hid), lambda b, i: (0, 0)),
        pl.BlockSpec((d_hid, d_node), lambda b, i: (0, 0)),
        pl.BlockSpec((1, d_node), lambda b, i: (0, 0)),
    ]
    out_spec = pl.BlockSpec((1, q_tile, d_node), lambda b, i: (b, i, 0))
    if return_attn:
        out_shape = (jax.ShapeDtypeStruct((B, N, d_node), out_dtype),
                     jax.ShapeDtypeStruct((B, n_heads, N, N), attn_dtype))
        out_specs = (out_spec,
                     pl.BlockSpec((1, n_heads, q_tile, N),
                                  lambda b, i: (b, 0, i, 0)))
    else:
        out_shape = jax.ShapeDtypeStruct((B, N, d_node), out_dtype)
        out_specs = out_spec

    vmem_limit = int(min(max(32 * 1024 * 1024, est_fn(q_tile) + (16 << 20)),
                         96 * 1024 * 1024))
    return pl.pallas_call(
        kern,
        out_shape=out_shape,
        grid=grid,
        in_specs=in_specs,
        out_specs=out_specs,
        compiler_params=pltpu.CompilerParams(
            dimension_semantics=("parallel", "parallel"),
            vmem_limit_bytes=vmem_limit),
    )(q_node, kv_node, edge_features, w_edge, w_proj, b_proj)


# ---------------------------------------------------------------------------
# Full forward (RTAttention.forward, modulate_v=None path).
# ---------------------------------------------------------------------------
def rt_attention_forward(params, node_features, edge_features, mask=None, *,
                         n_heads=4, d_hid=None, q_block=128, return_attn=True,
                         attn_dtype=jnp.float32, edge_mxu_dtype=None):
    """`mask` is accepted but unused (as in the PyTorch forward).
    edge_features are streamed in whatever dtype the producer emits (bf16 on
    v5e/v6e/v7x halves the dominant HBM read); edge_mxu_dtype only changes the
    in-kernel MXU operand dtype (accumulation stays f32)."""
    del mask
    B, N, d_node = node_features.shape
    assert edge_features.shape[:3] == (B, N, N)
    w_qkv_node = params['w_qkv_node']
    w_qkv_edge = params['w_qkv_edge']
    if d_hid is None:
        d_hid = w_qkv_node.shape[1] // 3
    scale = 1.0 / (d_hid ** 0.5)
    # TODO(synk): modulate_v path (edge_factor=4, v = v_node*e3 + e2) not
    #             implemented; module default modulate_v=None uses 3 chunks.

    mxu_dt = edge_mxu_dtype if edge_mxu_dtype is not None else edge_features.dtype

    # One-time tiny weight-column permutation -> packed [Q|K|V] head-major.
    w_node_p = _permute_qkv_columns(w_qkv_node, n_heads, d_hid)
    w_edge_p = _permute_qkv_columns(w_qkv_edge, n_heads, d_hid).astype(mxu_dt)

    # Node projections: q rows and packed [K|V] (no duplicated packed stream).
    node2d = node_features.reshape(B * N, d_node)
    q_node = linear(node2d, w_node_p[:, :d_hid]).reshape(B, N, d_hid)
    kv_node = linear(node2d, w_node_p[:, d_hid:]).reshape(B, N, 2 * d_hid)

    return rt_attention(q_node, kv_node, edge_features, w_edge_p,
                        params['w_proj'], params['b_proj'],
                        scale=scale, n_heads=n_heads, d_hid=d_hid,
                        q_block=q_block, return_attn=return_attn,
                        attn_dtype=attn_dtype, edge_mxu_dtype=mxu_dt)


# ---------------------------------------------------------------------------
# Deterministic parameter init (xavier_uniform weights, zero bias).
# ---------------------------------------------------------------------------
def xavier_uniform(key, in_f, out_f):
    bound = (6.0 / (in_f + out_f)) ** 0.5
    return jax.random.uniform(key, (in_f, out_f), jnp.float32, -bound, bound)


if __name__ == "__main__":
    B, N = 2, 16
    d_node, d_edge, d_hid, n_heads = 32, 16, 32, 4

    key = jax.random.PRNGKey(0)
    k1, k2, k3, k4, k5 = jax.random.split(key, 5)
    params = {
        'w_qkv_node': xavier_uniform(k1, d_node, 3 * d_hid),   # bias=False
        'w_qkv_edge': xavier_uniform(k2, d_edge, 3 * d_hid),   # bias=False
        'w_proj': xavier_uniform(k3, d_hid, d_node),
        'b_proj': jnp.zeros((1, d_node), jnp.float32),
    }
    node = jax.random.normal(k4, (B, N, d_node), jnp.float32)
    edge = jax.random.normal(k5, (B, N, N, d_edge), jnp.float32)
    mask = jnp.ones((B, N, N), jnp.float32)   # unused by forward (as in torch)

    # Pure-JAX reference with PyTorch semantics and the ORIGINAL weights.
    def ref_forward(node, edge):
        dh = d_hid // n_heads
        qkvn = (node @ params['w_qkv_node']).reshape(B, N, n_heads, 3 * dh)
        qkvn = qkvn.transpose(0, 2, 1, 3)
        qn, kn, vn = jnp.split(qkvn, 3, -1)
        qkve = (edge @ params['w_qkv_edge']).reshape(B, N, N, n_heads, 3 * dh)
        qkve = qkve.transpose(0, 3, 1, 2, 4)
        qe, ke, ve = jnp.split(qkve, 3, -1)
        q = qn[:, :, :, None, :] + qe
        k = kn[:, :, None, :, :] + ke
        v = vn[:, :, None, :, :] + ve
        dots = (1.0 / d_hid ** 0.5) * jnp.sum(q * k, -1)
        a = jax.nn.softmax(dots, -1)
        o = jnp.einsum('bhij,bhijd->bhid', a, v)
        o = o.transpose(0, 2, 1, 3).reshape(B, N, d_hid)
        return o @ params['w_proj'] + params['b_proj'][0], a

    ref_out, ref_attn = ref_forward(node, edge)

    # 1) Exact f32 path with attn returned (module semantics).
    fwd = jax.jit(functools.partial(rt_attention_forward,
                                    n_heads=n_heads, d_hid=d_hid))
    out, attn = fwd(params, node, edge, mask)
    jax.block_until_ready((out, attn))
    assert out.shape == (B, N, d_node) and attn.shape == (B, n_heads, N, N)
    assert jnp.allclose(out, ref_out, atol=5e-3, rtol=5e-3), \
        float(jnp.max(jnp.abs(out - ref_out)))
    assert jnp.allclose(attn, ref_attn, atol=5e-3, rtol=5e-3), \
        float(jnp.max(jnp.abs(attn - ref_attn)))

    # 2) Fast path: producer-supplied bf16 edge features (halves the dominant
    #    HBM read, no wrapper-side cast) and the attn writeback skipped.
    edge_bf16 = edge.astype(jnp.bfloat16)      # stands in for the producer
    fwd_fast = jax.jit(functools.partial(rt_attention_forward,
                                         n_heads=n_heads, d_hid=d_hid,
                                         return_attn=False))
    out_fast = fwd_fast(params, node, edge_bf16, mask)
    jax.block_until_ready(out_fast)
    assert out_fast.shape == (B, N, d_node)
    assert jnp.allclose(out_fast, ref_out, atol=6e-2, rtol=6e-2), \
        float(jnp.max(jnp.abs(out_fast - ref_out)))

    print("KERNEL_OK")
</pallas_src>

<mosaic_0001>
module attributes {stable_mosaic.version = 11 : i64} {
  func.func @_linear_kernel(%arg0: i32, %arg1: memref<32x32xf32, #tpu.memory_space<vmem>>, %arg2: memref<32x64xf32, #tpu.memory_space<vmem>>, %arg3: memref<32x64xf32, #tpu.memory_space<vmem>>) attributes {dimension_semantics = [#tpu.dimension_semantics<parallel>], iteration_bounds = array<i64: 1>, scalar_prefetch = 0 : i64, scratch_operands = 0 : i64, tpu.core_type = #tpu.core_type<tc>, window_params = [{transform_indices = @transform_0, window_bounds = array<i64: 32, 32>}, {pipeline_mode = #tpu.pipeline_mode<synchronous>, transform_indices = @transform_1, window_bounds = array<i64: 32, 64>}, {transform_indices = @transform_2, window_bounds = array<i64: 32, 64>}]} {
    %c0 = arith.constant 0 : index
    %c0_0 = arith.constant 0 : index
    %0 = vector.load %arg1[%c0, %c0_0] : memref<32x32xf32, #tpu.memory_space<vmem>>, vector<32x32xf32>
    %c0_1 = arith.constant 0 : index
    %c0_2 = arith.constant 0 : index
    %1 = vector.load %arg2[%c0_1, %c0_2] : memref<32x64xf32, #tpu.memory_space<vmem>>, vector<32x64xf32>
    %cst = arith.constant dense<0.000000e+00> : vector<32x64xf32>
    %2 = tpu.matmul %0, %1, %cst {dimension_numbers = #tpu.dot_dimension_numbers<[1], [0], [0], [1], [0, 0, 1, 1], [], []>} : vector<32x32xf32>, vector<32x64xf32>, vector<32x64xf32> -> vector<32x64xf32>
    %c0_3 = arith.constant 0 : index
    %c0_4 = arith.constant 0 : index
    %3 = vector.load %arg3[%c0_3, %c0_4] : memref<32x64xf32, #tpu.memory_space<vmem>>, vector<32x64xf32>
    tpu.vector_store %arg3[%c0_3, %c0_4], %2 {strides = array<i32>} : memref<32x64xf32, #tpu.memory_space<vmem>>, vector<32x64xf32>,
    return
  }
  func.func @transform_0(%arg0: i32) -> (i32, i32) {
    %c0_i32 = arith.constant 0 : i32
    %c0_i32_0 = arith.constant 0 : i32
    return %arg0, %c0_i32 : i32, i32
  }
  func.func @transform_1(%arg0: i32) -> (i32, i32) {
    %c0_i32 = arith.constant 0 : i32
    %c0_i32_0 = arith.constant 0 : i32
    %c0_i32_1 = arith.constant 0 : i32
    return %c0_i32, %c0_i32_0 : i32, i32
  }
  func.func @transform_2(%arg0: i32) -> (i32, i32) {
    %c0_i32 = arith.constant 0 : i32
    %c0_i32_0 = arith.constant 0 : i32
    return %arg0, %c0_i32 : i32, i32
  }
}

module attributes {stable_mosaic.version = 11 : i64} {
  func.func @_linear_kernel(%arg0: i32, %arg1: memref<32x32xf32, #tpu.memory_space<vmem>>, %arg2: memref<32x32xf32, #tpu.memory_space<vmem>>, %arg3: memref<32x32xf32, #tpu.memory_space<vmem>>) attributes {dimension_semantics = [#tpu.dimension_semantics<parallel>], iteration_bounds = array<i64: 1>, scalar_prefetch = 0 : i64, scratch_operands = 0 : i64, tpu.core_type = #tpu.core_type<tc>, window_params = [{transform_indices = @transform_0, window_bounds = array<i64: 32, 32>}, {pipeline_mode = #tpu.pipeline_mode<synchronous>, transform_indices = @transform_1, window_bounds = array<i64: 32, 32>}, {transform_indices = @transform_2, window_bounds = array<i64: 32, 32>}]} {
    %c0 = arith.constant 0 : index
    %c0_0 = arith.constant 0 : index
    %0 = vector.load %arg1[%c0, %c0_0] : memref<32x32xf32, #tpu.memory_space<vmem>>, vector<32x32xf32>
    %c0_1 = arith.constant 0 : index
    %c0_2 = arith.constant 0 : index
    %1 = vector.load %arg2[%c0_1, %c0_2] : memref<32x32xf32, #tpu.memory_space<vmem>>, vector<32x32xf32>
    %cst = arith.constant dense<0.000000e+00> : vector<32x32xf32>
    %2 = tpu.matmul %0, %1, %cst {dimension_numbers = #tpu.dot_dimension_numbers<[1], [0], [0], [1], [0, 0, 1, 1], [], []>} : vector<32x32xf32>, vector<32x32xf32>, vector<32x32xf32> -> vector<32x32xf32>
    %c0_3 = arith.constant 0 : index
    %c0_4 = arith.constant 0 : index
    %3 = vector.load %arg3[%c0_3, %c0_4] : memref<32x32xf32, #tpu.memory_space<vmem>>, vector<32x32xf32>
    tpu.vector_store %arg3[%c0_3, %c0_4], %2 {strides = array<i32>} : memref<32x32xf32, #tpu.memory_space<vmem>>, vector<32x32xf32>,
    return
  }
  func.func @transform_0(%arg0: i32) -> (i32, i32) {
    %c0_i32 = arith.constant 0 : i32
    %c0_i32_0 = arith.constant 0 : i32
    return %arg0, %c0_i32 : i32, i32
  }
  func.func @transform_1(%arg0: i32) -> (i32, i32) {
    %c0_i32 = arith.constant 0 : i32
    %c0_i32_0 = arith.constant 0 : i32
    %c0_i32_1 = arith.constant 0 : i32
    return %c0_i32, %c0_i32_0 : i32, i32
  }
  func.func @transform_2(%arg0: i32) -> (i32, i32) {
    %c0_i32 = arith.constant 0 : i32
    %c0_i32_0 = arith.constant 0 : i32
    return %arg0, %c0_i32 : i32, i32
  }
}

module attributes {stable_mosaic.version = 11 : i64} {
  func.func @_rt_attn_kernel(%arg0: i32, %arg1: i32, %arg2: memref<1x16x32xf32, #tpu.memory_space<vmem>>, %arg3: memref<1x16x64xf32, #tpu.memory_space<vmem>>, %arg4: memref<1x16x16x16xf32, #tpu.memory_space<vmem>>, %arg5: memref<16x96xf32, #tpu.memory_space<vmem>>, %arg6: memref<32x32xf32, #tpu.memory_space<vmem>>, %arg7: memref<1x32xf32, #tpu.memory_space<vmem>>, %arg8: memref<1x16x32xf32, #tpu.memory_space<vmem>>, %arg9: memref<1x4x16x16xf32, #tpu.memory_space<vmem>>) attributes {dimension_semantics = [#tpu.dimension_semantics<parallel>, #tpu.dimension_semantics<parallel>], iteration_bounds = array<i64: 2, 1>, scalar_prefetch = 0 : i64, scratch_operands = 0 : i64, tpu.core_type = #tpu.core_type<tc>, window_params = [{transform_indices = @transform_0, window_bounds = array<i64: 1, 16, 32>}, {transform_indices = @transform_1, window_bounds = array<i64: 1, 16, 64>}, {transform_indices = @transform_2, window_bounds = array<i64: 1, 16, 16, 16>}, {pipeline_mode = #tpu.pipeline_mode<synchronous>, transform_indices = @transform_3, window_bounds = array<i64: 16, 96>}, {pipeline_mode = #tpu.pipeline_mode<synchronous>, transform_indices = @transform_4, window_bounds = array<i64: 32, 32>}, {pipeline_mode = #tpu.pipeline_mode<synchronous>, transform_indices = @transform_5, window_bounds = array<i64: 1, 32>}, {transform_indices = @transform_6, window_bounds = array<i64: 1, 16, 32>}, {transform_indices = @transform_7, window_bounds = array<i64: 1, 4, 16, 16>}]} {
    %c0 = arith.constant 0 : index
    %c0_0 = arith.constant 0 : index
    %c0_1 = arith.constant 0 : index
    %0 = vector.load %arg2[%c0, %c0_0, %c0_1] : memref<1x16x32xf32, #tpu.memory_space<vmem>>, vector<1x16x32xf32>
    %1 = vector.shape_cast %0 : vector<1x16x32xf32> to vector<16x32xf32>
    %c0_2 = arith.constant 0 : index
    %c0_3 = arith.constant 0 : index
    %c0_4 = arith.constant 0 : index
    %2 = vector.load %arg3[%c0_2, %c0_3, %c0_4] : memref<1x16x64xf32, #tpu.memory_space<vmem>>, vector<1x16x64xf32>
    %3 = vector.shape_cast %2 : vector<1x16x64xf32> to vector<16x64xf32>
    %4 = vector.extract_strided_slice %3 {offsets = [0, 0], sizes = [16, 32], strides = [1, 1]} : vector<16x64xf32> to vector<16x32xf32>
    %5 = vector.extract_strided_slice %3 {offsets = [0, 32], sizes = [16, 32], strides = [1, 1]} : vector<16x64xf32> to vector<16x32xf32>
    %c0_5 = arith.constant 0 : index
    %c0_6 = arith.constant 0 : index
    %c0_7 = arith.constant 0 : index
    %c0_8 = arith.constant 0 : index
    %6 = vector.load %arg4[%c0_5, %c0_6, %c0_7, %c0_8] : memref<1x16x16x16xf32, #tpu.memory_space<vmem>>, vector<1x16x16x16xf32>
    %7 = vector.shape_cast %6 : vector<1x16x16x16xf32> to vector<16x16x16xf32>
    %8 = vector.shape_cast %7 : vector<16x16x16xf32> to vector<256x16xf32>
    %c0_9 = arith.constant 0 : index
    %c0_10 = arith.constant 0 : index
    %9 = vector.load %arg5[%c0_9, %c0_10] : memref<16x96xf32, #tpu.memory_space<vmem>>, vector<16x96xf32>
    %cst = arith.constant dense<0.000000e+00> : vector<256x96xf32>
    %10 = tpu.matmul %8, %9, %cst {dimension_numbers = #tpu.dot_dimension_numbers<[1], [0], [0], [1], [0, 0, 1, 1], [], []>} : vector<256x16xf32>, vector<16x96xf32>, vector<256x96xf32> -> vector<256x96xf32>
    %11 = vector.shape_cast %10 : vector<256x96xf32> to vector<16x16x96xf32>
    %12 = vector.shape_cast %1 : vector<16x32xf32> to vector<16x1x32xf32>
    %13 = vector.extract_strided_slice %11 {offsets = [0, 0, 0], sizes = [16, 16, 32], strides = [1, 1, 1]} : vector<16x16x96xf32> to vector<16x16x32xf32>
    %14 = vector.broadcast %12 : vector<16x1x32xf32> to vector<16x16x32xf32>
    %15 = arith.addf %14, %13 : vector<16x16x32xf32>
    %16 = vector.shape_cast %4 : vector<16x32xf32> to vector<1x16x32xf32>
    %17 = vector.extract_strided_slice %11 {offsets = [0, 0, 32], sizes = [16, 16, 32], strides = [1, 1, 1]} : vector<16x16x96xf32> to vector<16x16x32xf32>
    %18 = vector.broadcast %16 : vector<1x16x32xf32> to vector<16x16x32xf32>
    %19 = arith.addf %18, %17 : vector<16x16x32xf32>
    %20 = vector.shape_cast %5 : vector<16x32xf32> to vector<1x16x32xf32>
    %21 = vector.extract_strided_slice %11 {offsets = [0, 0, 64], sizes = [16, 16, 32], strides = [1, 1, 1]} : vector<16x16x96xf32> to vector<16x16x32xf32>
    %22 = vector.broadcast %20 : vector<1x16x32xf32> to vector<16x16x32xf32>
    %23 = arith.addf %22, %21 : vector<16x16x32xf32>
    %24 = arith.mulf %15, %19 : vector<16x16x32xf32>
    %25 = vector.extract_strided_slice %24 {offsets = [0, 0, 0], sizes = [16, 16, 8], strides = [1, 1, 1]} : vector<16x16x32xf32> to vector<16x16x8xf32>
    %cst_11 = arith.constant dense<0.000000e+00> : vector<16x16xf32>
    %26 = vector.multi_reduction <add>, %25, %cst_11 [2] : vector<16x16x8xf32> to vector<16x16xf32>
    %cst_12 = arith.constant 0.176776692 : f32
    %27 = vector.broadcast %cst_12 : f32 to vector<16x16xf32>
    %28 = arith.mulf %27, %26 : vector<16x16xf32>
    %cst_13 = arith.constant dense<0xFF800000> : vector<16xf32>
    %29 = vector.multi_reduction <maximumf>, %28, %cst_13 [1] : vector<16x16xf32> to vector<16xf32>
    %30 = vector.shape_cast %29 : vector<16xf32> to vector<16x1xf32>
    %31 = vector.broadcast %30 : vector<16x1xf32> to vector<16x16xf32>
    %32 = arith.subf %28, %31 : vector<16x16xf32>
    %33 = math.exp %32 : vector<16x16xf32>
    %cst_14 = arith.constant dense<0.000000e+00> : vector<16xf32>
    %34 = vector.multi_reduction <add>, %33, %cst_14 [1] : vector<16x16xf32> to vector<16xf32>
    %35 = vector.shape_cast %34 : vector<16xf32> to vector<16x1xf32>
    %36 = vector.broadcast %35 : vector<16x1xf32> to vector<16x16xf32>
    %37 = arith.divf %33, %36 : vector<16x16xf32>
    %c0_15 = arith.constant 0 : index
    %c0_16 = arith.constant 0 : index
    %c0_17 = arith.constant 0 : index
    %c0_18 = arith.constant 0 : index
    %38 = vector.load %arg9[%c0_15, %c0_16, %c0_17, %c0_18] : memref<1x4x16x16xf32, #tpu.memory_space<vmem>>, vector<1x1x16x16xf32>
    %39 = vector.shape_cast %38 : vector<1x1x16x16xf32> to vector<16x16xf32>
    %40 = vector.shape_cast %37 : vector<16x16xf32> to vector<1x1x16x16xf32>
    tpu.vector_store %arg9[%c0_15, %c0_16, %c0_17, %c0_18], %40 {strides = array<i32>} : memref<1x4x16x16xf32, #tpu.memory_space<vmem>>, vector<1x1x16x16xf32>,
    %41 = vector.shape_cast %37 : vector<16x16xf32> to vector<16x16x1xf32>
    %42 = vector.extract_strided_slice %23 {offsets = [0, 0, 0], sizes = [16, 16, 8], strides = [1, 1, 1]} : vector<16x16x32xf32> to vector<16x16x8xf32>
    %43 = vector.broadcast %41 : vector<16x16x1xf32> to vector<16x16x8xf32>
    %44 = arith.mulf %43, %42 : vector<16x16x8xf32>
    %cst_19 = arith.constant dense<0.000000e+00> : vector<16x8xf32>
    %45 = vector.multi_reduction <add>, %44, %cst_19 [1] : vector<16x16x8xf32> to vector<16x8xf32>
    %46 = vector.extract_strided_slice %24 {offsets = [0, 0, 8], sizes = [16, 16, 8], strides = [1, 1, 1]} : vector<16x16x32xf32> to vector<16x16x8xf32>
    %cst_20 = arith.constant dense<0.000000e+00> : vector<16x16xf32>
    %47 = vector.multi_reduction <add>, %46, %cst_20 [2] : vector<16x16x8xf32> to vector<16x16xf32>
    %cst_21 = arith.constant 0.176776692 : f32
    %48 = vector.broadcast %cst_21 : f32 to vector<16x16xf32>
    %49 = arith.mulf %48, %47 : vector<16x16xf32>
    %cst_22 = arith.constant dense<0xFF800000> : vector<16xf32>
    %50 = vector.multi_reduction <maximumf>, %49, %cst_22 [1] : vector<16x16xf32> to vector<16xf32>
    %51 = vector.shape_cast %50 : vector<16xf32> to vector<16x1xf32>
    %52 = vector.broadcast %51 : vector<16x1xf32> to vector<16x16xf32>
    %53 = arith.subf %49, %52 : vector<16x16xf32>
    %54 = math.exp %53 : vector<16x16xf32>
    %cst_23 = arith.constant dense<0.000000e+00> : vector<16xf32>
    %55 = vector.multi_reduction <add>, %54, %cst_23 [1] : vector<16x16xf32> to vector<16xf32>
    %56 = vector.shape_cast %55 : vector<16xf32> to vector<16x1xf32>
    %57 = vector.broadcast %56 : vector<16x1xf32> to vector<16x16xf32>
    %58 = arith.divf %54, %57 : vector<16x16xf32>
    %c0_24 = arith.constant 0 : index
    %c1 = arith.constant 1 : index
    %c0_25 = arith.constant 0 : index
    %c0_26 = arith.constant 0 : index
    %59 = vector.load %arg9[%c0_24, %c1, %c0_25, %c0_26] : memref<1x4x16x16xf32, #tpu.memory_space<vmem>>, vector<1x1x16x16xf32>
    %60 = vector.shape_cast %59 : vector<1x1x16x16xf32> to vector<16x16xf32>
    %61 = vector.shape_cast %58 : vector<16x16xf32> to vector<1x1x16x16xf32>
    tpu.vector_store %arg9[%c0_24, %c1, %c0_25, %c0_26], %61 {strides = array<i32>} : memref<1x4x16x16xf32, #tpu.memory_space<vmem>>, vector<1x1x16x16xf32>,
    %62 = vector.shape_cast %58 : vector<16x16xf32> to vector<16x16x1xf32>
    %63 = vector.extract_strided_slice %23 {offsets = [0, 0, 8], sizes = [16, 16, 8], strides = [1, 1, 1]} : vector<16x16x32xf32> to vector<16x16x8xf32>
    %64 = vector.broadcast %62 : vector<16x16x1xf32> to vector<16x16x8xf32>
    %65 = arith.mulf %64, %63 : vector<16x16x8xf32>
    %cst_27 = arith.constant dense<0.000000e+00> : vector<16x8xf32>
    %66 = vector.multi_reduction <add>, %65, %cst_27 [1] : vector<16x16x8xf32> to vector<16x8xf32>
    %67 = vector.extract_strided_slice %24 {offsets = [0, 0, 16], sizes = [16, 16, 8], strides = [1, 1, 1]} : vector<16x16x32xf32> to vector<16x16x8xf32>
    %cst_28 = arith.constant dense<0.000000e+00> : vector<16x16xf32>
    %68 = vector.multi_reduction <add>, %67, %cst_28 [2] : vector<16x16x8xf32> to vector<16x16xf32>
    %cst_29 = arith.constant 0.176776692 : f32
    %69 = vector.broadcast %cst_29 : f32 to vector<16x16xf32>
    %70 = arith.mulf %69, %68 : vector<16x16xf32>
    %cst_30 = arith.constant dense<0xFF800000> : vector<16xf32>
    %71 = vector.multi_reduction <maximumf>, %70, %cst_30 [1] : vector<16x16xf32> to vector<16xf32>
    %72 = vector.shape_cast %71 : vector<16xf32> to vector<16x1xf32>
    %73 = vector.broadcast %72 : vector<16x1xf32> to vector<16x16xf32>
    %74 = arith.subf %70, %73 : vector<16x16xf32>
    %75 = math.exp %74 : vector<16x16xf32>
    %cst_31 = arith.constant dense<0.000000e+00> : vector<16xf32>
    %76 = vector.multi_reduction <add>, %75, %cst_31 [1] : vector<16x16xf32> to vector<16xf32>
    %77 = vector.shape_cast %76 : vector<16xf32> to vector<16x1xf32>
    %78 = vector.broadcast %77 : vector<16x1xf32> to vector<16x16xf32>
    %79 = arith.divf %75, %78 : vector<16x16xf32>
    %c0_32 = arith.constant 0 : index
    %c2 = arith.constant 2 : index
    %c0_33 = arith.constant 0 : index
    %c0_34 = arith.constant 0 : index
    %80 = vector.load %arg9[%c0_32, %c2, %c0_33, %c0_34] : memref<1x4x16x16xf32, #tpu.memory_space<vmem>>, vector<1x1x16x16xf32>
    %81 = vector.shape_cast %80 : vector<1x1x16x16xf32> to vector<16x16xf32>
    %82 = vector.shape_cast %79 : vector<16x16xf32> to vector<1x1x16x16xf32>
    tpu.vector_store %arg9[%c0_32, %c2, %c0_33, %c0_34], %82 {strides = array<i32>} : memref<1x4x16x16xf32, #tpu.memory_space<vmem>>, vector<1x1x16x16xf32>,
    %83 = vector.shape_cast %79 : vector<16x16xf32> to vector<16x16x1xf32>
    %84 = vector.extract_strided_slice %23 {offsets = [0, 0, 16], sizes = [16, 16, 8], strides = [1, 1, 1]} : vector<16x16x32xf32> to vector<16x16x8xf32>
    %85 = vector.broadcast %83 : vector<16x16x1xf32> to vector<16x16x8xf32>
    %86 = arith.mulf %85, %84 : vector<16x16x8xf32>
    %cst_35 = arith.constant dense<0.000000e+00> : vector<16x8xf32>
    %87 = vector.multi_reduction <add>, %86, %cst_35 [1] : vector<16x16x8xf32> to vector<16x8xf32>
    %88 = vector.extract_strided_slice %24 {offsets = [0, 0, 24], sizes = [16, 16, 8], strides = [1, 1, 1]} : vector<16x16x32xf32> to vector<16x16x8xf32>
    %cst_36 = arith.constant dense<0.000000e+00> : vector<16x16xf32>
    %89 = vector.multi_reduction <add>, %88, %cst_36 [2] : vector<16x16x8xf32> to vector<16x16xf32>
    %cst_37 = arith.constant 0.176776692 : f32
    %90 = vector.broadcast %cst_37 : f32 to vector<16x16xf32>
    %91 = arith.mulf %90, %89 : vector<16x16xf32>
    %cst_38 = arith.constant dense<0xFF800000> : vector<16xf32>
    %92 = vector.multi_reduction <maximumf>, %91, %cst_38 [1] : vector<16x16xf32> to vector<16xf32>
    %93 = vector.shape_cast %92 : vector<16xf32> to vector<16x1xf32>
    %94 = vector.broadcast %93 : vector<16x1xf32> to vector<16x16xf32>
    %95 = arith.subf %91, %94 : vector<16x16xf32>
    %96 = math.exp %95 : vector<16x16xf32>
    %cst_39 = arith.constant dense<0.000000e+00> : vector<16xf32>
    %97 = vector.multi_reduction <add>, %96, %cst_39 [1] : vector<16x16xf32> to vector<16xf32>
    %98 = vector.shape_cast %97 : vector<16xf32> to vector<16x1xf32>
    %99 = vector.broadcast %98 : vector<16x1xf32> to vector<16x16xf32>
    %100 = arith.divf %96, %99 : vector<16x16xf32>
    %c0_40 = arith.constant 0 : index
    %c3 = arith.constant 3 : index
    %c0_41 = arith.constant 0 : index
    %c0_42 = arith.constant 0 : index
    %101 = vector.load %arg9[%c0_40, %c3, %c0_41, %c0_42] : memref<1x4x16x16xf32, #tpu.memory_space<vmem>>, vector<1x1x16x16xf32>
    %102 = vector.shape_cast %101 : vector<1x1x16x16xf32> to vector<16x16xf32>
    %103 = vector.shape_cast %100 : vector<16x16xf32> to vector<1x1x16x16xf32>
    tpu.vector_store %arg9[%c0_40, %c3, %c0_41, %c0_42], %103 {strides = array<i32>} : memref<1x4x16x16xf32, #tpu.memory_space<vmem>>, vector<1x1x16x16xf32>,
    %104 = vector.shape_cast %100 : vector<16x16xf32> to vector<16x16x1xf32>
    %105 = vector.extract_strided_slice %23 {offsets = [0, 0, 24], sizes = [16, 16, 8], strides = [1, 1, 1]} : vector<16x16x32xf32> to vector<16x16x8xf32>
    %106 = vector.broadcast %104 : vector<16x16x1xf32> to vector<16x16x8xf32>
    %107 = arith.mulf %106, %105 : vector<16x16x8xf32>
    %cst_43 = arith.constant dense<0.000000e+00> : vector<16x8xf32>
    %108 = vector.multi_reduction <add>, %107, %cst_43 [1] : vector<16x16x8xf32> to vector<16x8xf32>
    %109 = tpu.concatenate %45, %66, %87, %108 in 1 : vector<16x8xf32>, vector<16x8xf32>, vector<16x8xf32>, vector<16x8xf32> -> vector<16x32xf32>
    %c0_44 = arith.constant 0 : index
    %c0_45 = arith.constant 0 : index
    %110 = vector.load %arg6[%c0_44, %c0_45] : memref<32x32xf32, #tpu.memory_space<vmem>>, vector<32x32xf32>
    %cst_46 = arith.constant dense<0.000000e+00> : vector<16x32xf32>
    %111 = tpu.matmul %109, %110, %cst_46 {dimension_numbers = #tpu.dot_dimension_numbers<[1], [0], [0], [1], [0, 0, 1, 1], [], []>} : vector<16x32xf32>, vector<32x32xf32>, vector<16x32xf32> -> vector<16x32xf32>
    %c0_47 = arith.constant 0 : index
    %c0_48 = arith.constant 0 : index
    %112 = vector.load %arg7[%c0_47, %c0_48] : memref<1x32xf32, #tpu.memory_space<vmem>>, vector<1x32xf32>
    %113 = vector.broadcast %112 : vector<1x32xf32> to vector<16x32xf32>
    %114 = arith.addf %111, %113 : vector<16x32xf32>
    %c0_49 = arith.constant 0 : index
    %c0_50 = arith.constant 0 : index
    %c0_51 = arith.constant 0 : index
    %115 = vector.load %arg8[%c0_49, %c0_50, %c0_51] : memref<1x16x32xf32, #tpu.memory_space<vmem>>, vector<1x16x32xf32>
    %116 = vector.shape_cast %115 : vector<1x16x32xf32> to vector<16x32xf32>
    %117 = vector.shape_cast %114 : vector<16x32xf32> to vector<1x16x32xf32>
    tpu.vector_store %arg8[%c0_49, %c0_50, %c0_51], %117 {strides = array<i32>} : memref<1x16x32xf32, #tpu.memory_space<vmem>>, vector<1x16x32xf32>,
    return
  }
  func.func @transform_0(%arg0: i32, %arg1: i32) -> (i32, i32, i32) {
    %c0_i32 = arith.constant 0 : i32
    %c0_i32_0 = arith.constant 0 : i32
    return %arg0, %arg1, %c0_i32 : i32, i32, i32
  }
  func.func @transform_1(%arg0: i32, %arg1: i32) -> (i32, i32, i32) {
    %c0_i32 = arith.constant 0 : i32
    %c0_i32_0 = arith.constant 0 : i32
    %c0_i32_1 = arith.constant 0 : i32
    return %arg0, %c0_i32, %c0_i32_0 : i32, i32, i32
  }
  func.func @transform_2(%arg0: i32, %arg1: i32) -> (i32, i32, i32, i32) {
    %c0_i32 = arith.constant 0 : i32
    %c0_i32_0 = arith.constant 0 : i32
    %c0_i32_1 = arith.constant 0 : i32
    return %arg0, %arg1, %c0_i32, %c0_i32_0 : i32, i32, i32, i32
  }
  func.func @transform_3(%arg0: i32, %arg1: i32) -> (i32, i32) {
    %c0_i32 = arith.constant 0 : i32
    %c0_i32_0 = arith.constant 0 : i32
    %c0_i32_1 = arith.constant 0 : i32
    return %c0_i32, %c0_i32_0 : i32, i32
  }
  func.func @transform_4(%arg0: i32, %arg1: i32) -> (i32, i32) {
    %c0_i32 = arith.constant 0 : i32
    %c0_i32_0 = arith.constant 0 : i32
    %c0_i32_1 = arith.constant 0 : i32
    return %c0_i32, %c0_i32_0 : i32, i32
  }
  func.func @transform_5(%arg0: i32, %arg1: i32) -> (i32, i32) {
    %c0_i32 = arith.constant 0 : i32
    %c0_i32_0 = arith.constant 0 : i32
    %c0_i32_1 = arith.constant 0 : i32
    return %c0_i32, %c0_i32_0 : i32, i32
  }
  func.func @transform_6(%arg0: i32, %arg1: i32) -> (i32, i32, i32) {
    %c0_i32 = arith.constant 0 : i32
    %c0_i32_0 = arith.constant 0 : i32
    return %arg0, %arg1, %c0_i32 : i32, i32, i32
  }
  func.func @transform_7(%arg0: i32, %arg1: i32) -> (i32, i32, i32, i32) {
    %c0_i32 = arith.constant 0 : i32
    %c0_i32_0 = arith.constant 0 : i32
    %c0_i32_1 = arith.constant 0 : i32
    return %arg0, %c0_i32, %arg1, %c0_i32_0 : i32, i32, i32, i32
  }
}

</mosaic_0001>

<bundles_post_ra>
// kernel: rt_attention_forward.4
= control target key start
LH: loop header
LB: loop body
LE: loop exit
PB: predicated region body
PF: predicated region fallthrough
CT: control target
= control target key end

     0   :  { %vm19_vm0 = vcmask 261120   ;;  %vm117_vm1 = vcmask 523264   ;;  %s211_s1 = inlined_call_operand.vmem [shape: f32[32,64], index: 1, kind: input, shape index: {}]   ;;  %s212_s0 = inlined_call_operand.vmem [shape: f32[32,32], index: 0, kind: input, shape index: {}]   ;;  %s213_s2 = inlined_call_operand.vmem [shape: f32[32,64], index: 2, kind: output, shape index: {}]  }
   0x1   :  { %v18_v0 = vld [vmem:[%s211_s1 + $0x18] sm:$0xff]  ;;  %v17_v1 = vld [vmem:[%s211_s1 + $0x10] sm:$0xff]  ;;  %v16_v2 = vld [vmem:[%s211_s1 + $0x8] sm:$0xff] }
   0x2   :  { %138 = vmatprep.subr.mxu0 %v18_v0  ;;  %152 = vmatprep.subr.mxu1 %v18_v0  ;;  %v15_v3 = vld [vmem:[%s211_s1] sm:$0xff]  ;;  %v13_v5 = vld [vmem:[%s212_s0 + $0x10] sm:$0xff]  ;;  %v12_v6 = vld [vmem:[%s212_s0 + $0x8] sm:$0xff] }
   0x3   :  { %139 = vmatpush3.msra.mxu0 %v18_v0  ;;  %156 = vmatpush3.msra.mxu1 %v18_v0  ;;  %v11_v4 = vld [vmem:[%s212_s0] sm:$0xff]  ;;  %v14_v7 = vld [vmem:[%s212_s0 + $0x18] sm:$0xff] }
   0x4   :  { %140 = vmatprep.subr.mxu0 %v17_v1  ;;  %153 = vmatprep.subr.mxu1 %v17_v1 }
   0x5   :  { %141 = vmatpush3.msra.mxu0 %v17_v1  ;;  %157 = vmatpush3.msra.mxu1 %v17_v1 }
   0x6   :  { %142 = vmatprep.subr.mxu0 %v16_v2  ;;  %154 = vmatprep.subr.mxu1 %v16_v2 }
   0x7   :  { %143 = vmatpush3.msra.mxu0 %v16_v2  ;;  %158 = vmatpush3.msra.mxu1 %v16_v2 }
   0x8   :  { %144 = vmatprep.subr.mxu0 %v15_v3  ;;  %155 = vmatprep.subr.mxu1 %v15_v3 }
   0x9   :  { %145 = vmatpush3.msra.mxu0 %v15_v3  ;;  %159 = vmatpush3.msra.mxu1 %v15_v3 }
   0xa   :  { %146 = vmatprep.mubr.msk.f32.mxu0 %vm19_vm0, %v11_v4  ;;  %149 = vmatprep.mubr.msk.f32.mxu1 %vm19_vm0, %v13_v5 }
   0xb   :  { %147 = vmatmul.mubr.msk.f32.vlgmr.msra.gmra.mxu0 %vm19_vm0, %v12_v6  ;;  %150 = vmatmul.mubr.msk.f32.vlgmr.msra.gmra.mxu1 %vm19_vm0, %v14_v7 }
  0xcb   :  { %v148_v8 = vpop.f32.mrf.mxu0  ;;  %v151_v9 = vpop.f32.mrf.mxu1 }
  0xcc   :  { %119 = vst.msk [vmem:[%s213_s2 + $0x8] sm:$0xff] %vm117_vm1, %v148_v8  ;;  %121 = vst.msk [vmem:[%s213_s2 + $0x18] sm:$0xff] %vm117_vm1, %v151_v9 }
  0xcd   :  { %v98_v10 = vpop.f32.mrf.mxu0  ;;  %v108_v11 = vpop.f32.mrf.mxu1 }
  0xce   :  { %118 = vst.msk [vmem:[%s213_s2] sm:$0xff] %vm117_vm1, %v98_v10  ;;  %120 = vst.msk [vmem:[%s213_s2 + $0x10] sm:$0xff] %vm117_vm1, %v108_v11 }

// kernel: rt_attention_forward.3
= control target key start
LH: loop header
LB: loop body
LE: loop exit
PB: predicated region body
PF: predicated region fallthrough
CT: control target
= control target key end

     0   :  { %vm19_vm0 = vcmask 261120   ;;  %s218_s1 = inlined_call_operand.vmem [shape: f32[32,32], index: 1, kind: input, shape index: {}]   ;;  %s219_s0 = inlined_call_operand.vmem [shape: f32[32,32], index: 0, kind: input, shape index: {}]   ;;  %s220_s2 = inlined_call_operand.vmem [shape: f32[32,32], index: 2, kind: output, shape index: {}]  }
   0x1   :  { %v18_v0 = vld [vmem:[%s218_s1 + $0x18] sm:$0xff]  ;;  %v17_v1 = vld [vmem:[%s218_s1 + $0x10] sm:$0xff]  ;;  %v16_v2 = vld [vmem:[%s218_s1 + $0x8] sm:$0xff] }
   0x2   :  { %137 = vmatprep.subr.mxu0 %v18_v0  ;;  %151 = vmatprep.subr.mxu1 %v18_v0  ;;  %v15_v3 = vld [vmem:[%s218_s1] sm:$0xff]  ;;  %v13_v5 = vld [vmem:[%s219_s0 + $0x10] sm:$0xff]  ;;  %v12_v6 = vld [vmem:[%s219_s0 + $0x8] sm:$0xff] }
   0x3   :  { %138 = vmatpush3.msra.mxu0 %v18_v0  ;;  %155 = vmatpush3.msra.mxu1 %v18_v0  ;;  %v11_v4 = vld [vmem:[%s219_s0] sm:$0xff]  ;;  %v14_v7 = vld [vmem:[%s219_s0 + $0x18] sm:$0xff] }
   0x4   :  { %139 = vmatprep.subr.mxu0 %v17_v1  ;;  %152 = vmatprep.subr.mxu1 %v17_v1 }
   0x5   :  { %140 = vmatpush3.msra.mxu0 %v17_v1  ;;  %156 = vmatpush3.msra.mxu1 %v17_v1 }
   0x6   :  { %141 = vmatprep.subr.mxu0 %v16_v2  ;;  %153 = vmatprep.subr.mxu1 %v16_v2 }
   0x7   :  { %142 = vmatpush3.msra.mxu0 %v16_v2  ;;  %157 = vmatpush3.msra.mxu1 %v16_v2 }
   0x8   :  { %143 = vmatprep.subr.mxu0 %v15_v3  ;;  %154 = vmatprep.subr.mxu1 %v15_v3 }
   0x9   :  { %144 = vmatpush3.msra.mxu0 %v15_v3  ;;  %158 = vmatpush3.msra.mxu1 %v15_v3 }
   0xa   :  { %145 = vmatprep.mubr.msk.f32.mxu0 %vm19_vm0, %v11_v4  ;;  %148 = vmatprep.mubr.msk.f32.mxu1 %vm19_vm0, %v13_v5 }
   0xb   :  { %146 = vmatmul.mubr.msk.f32.vlgmr.msra.gmra.mxu0 %vm19_vm0, %v12_v6  ;;  %149 = vmatmul.mubr.msk.f32.vlgmr.msra.gmra.mxu1 %vm19_vm0, %v14_v7 }
  0xcb   :  { %v147_v8 = vpop.f32.mrf.mxu0  ;;  %v150_v9 = vpop.f32.mrf.mxu1 }
  0xcc   :  { %118 = vst.msk [vmem:[%s220_s2 + $0x8] sm:$0xff] %vm19_vm0, %v147_v8  ;;  %120 = vst.msk [vmem:[%s220_s2 + $0x18] sm:$0xff] %vm19_vm0, %v150_v9 }
  0xcd   :  { %v98_v10 = vpop.f32.mrf.mxu0  ;;  %v108_v11 = vpop.f32.mrf.mxu1 }
  0xce   :  { %117 = vst.msk [vmem:[%s220_s2] sm:$0xff] %vm19_vm0, %v98_v10  ;;  %119 = vst.msk [vmem:[%s220_s2 + $0x10] sm:$0xff] %vm19_vm0, %v108_v11 }

// kernel: rt_attention_forward.5
= control target key start
LH: loop header
LB: loop body
LE: loop exit
PB: predicated region body
PF: predicated region fallthrough
CT: control target
= control target key end

     0   :  { %13 = vsyncpa [#allocation3], 0  ;;  %s13159_s0 = inlined_call_operand.vmem [shape: f32[2,16,32], index: 0, kind: input, shape index: {}]   ;;  %s13160_s1 = inlined_call_operand.vmem [shape: f32[2,16,64], index: 1, kind: input, shape index: {}]   ;;  %s13161_s2 = inlined_call_operand.vmem [shape: f32[2,16,16,16], index: 2, kind: input, shape index: {}]   ;;  %s13162_s3 = inlined_call_operand.vmem [shape: f32[16,96], index: 3, kind: input, shape index: {}]   ;;  %s13163_s4 = inlined_call_operand.vmem [shape: f32[32,32], index: 4, kind: input, shape index: {}]   ;;  %s13164_s5 = inlined_call_operand.vmem [shape: f32[1,32], index: 5, kind: input, shape index: {}]   ;;  %s13165_s6 = inlined_call_operand.hbm [shape: f32[2,16,32], index: 6, kind: output, shape index: {0}]   ;;  %s13166_s7 = inlined_call_operand.hbm [shape: f32[2,4,16,16], index: 7, kind: output, shape index: {1}]  }
   0x1   :  { %15 = vsyncpa [#allocation3 + $0x1], 0 }
   0x2   :  { %16 = vsyncpa [#allocation5], 0 }
   0x3   :  { %18 = vsyncpa [#allocation5 + $0x1], 0  ;;  %s8408_s24 = smov 0   ;;  %s8410_s25 = smov 0  }
   0x4   :  { %s8412_s26 = smov 0   ;;  %s8414_s27 = smov 0  }
   0x5   :  { %s8416_s28 = smov 0   ;;  %s8418_s29 = smov 0  }
   0x6 LB: > { %s7620_s30 = sadd.s32 4294967295, %s8356_s29   ;;  %s7621_s8 = sadd.s32 4294967294, %s8356_s29   ;;  %s8356_s29 = sphi %s8418_s29, %s24_s29   ;;  %s8352_s28 = sphi %s8416_s28, %s14346_s28   ;;  %s8348_s27 = sphi %s8414_s27, %s14345_s27   ;;  %s8344_s26 = sphi %s8412_s26, %s14344_s26   ;;  %s8340_s25 = sphi %s8410_s25, %s14343_s25   ;;  %s8336_s24 = sphi %s8408_s24, %s14342_s24  }
   0x7   : > { %s36_s9 = sadd.s32 1, %s8352_s28  ;;  %s190_s10 = sadd.s32 1, %s8344_s26 }
   0x8   : > { %p38_p0 = scmp.ge.s32.totalorder %s36_s9, 2  ;;  %p200_p1 = scmp.ne.s32.totalorder %s8344_s26, %s8340_s25 }
   0x9   : > { %p201_p2 = scmp.eq.s32.totalorder %s7620_s30, 1  ;;  %p206_p3 = scmp.ne.s32.totalorder %s8340_s25, %s8336_s24 }
   0xa   : > { %s14348_s9 = smov (%p38_p0, %s36_s9), 0  ;;  %p207_p5 = scmp.eq.s32.totalorder %s7621_s8, 1 }
   0xb   : > { %p8448_p4 = por %p201_p2, %p200_p1  ;;  %s185_s12 = ssub.s32 %s8352_s28, %s14348_s9 }
   0xc   : > { %p7624_p6 = scmp.ge.s32.totalorder %s8356_s29, 1  ;;  %p188_p7 = scmp.eq.s32.totalorder %s185_s12, 0 }
   0xd   : > { %p8455_p8 = por %p207_p5, %p206_p3  ;;  %p297_p9 = scmp.lt.s32.totalorder %s8356_s29, 3 }
   0xe   : > { %s8461_s14 = scalar_select %p188_p7, %s8344_s26, %s190_s10  }
   0xf   : > { %p298_p10 = pnand %p7624_p6, %p297_p9 }
  0x11   : > { %301 = sbr.rel (%p298_p10) target bundleno = 2977 (0xba1), region = 44 }
  0x16   : > { %v418_v0 = vld [vmem:[%s13162_s3 + $0x8] sm:$0xff]  ;;  %v417_v1 = vld [vmem:[%s13162_s3] sm:$0xff]  ;;  %p354_p11 = scmp.lt.s32.totalorder %s8348_s27, 1  ;;  %vm419_vm0 = vcmask 130048   ;;  %v8358_v34 = vmov 1966171168   ;;  %v13167_v36 = vlaneseq }
  0x17   : > { %7727 = vmatprep.subr.mxu0 %v418_v0  ;;  %7790 = vmatprep.subr.mxu1 %v418_v0  ;;  %v745_v35 = vunpack.c.l.s4 %v8358_v34  ;;  %s8359_s15 = smov 96   ;;  %vm1145_vm1 = vcmask 64512   ;;  %s8362_s21 = smov 104   ;;  %vm1317_vm2 = vcmask 130112   ;;  %vm1454_vm3 = vcmask 1041409  }
  0x18   : > { %7728 = vmatpush3.msra.mxu0 %v418_v0  ;;  %7792 = vmatpush3.msra.mxu1 %v418_v0  ;;  %s8471_s19 = scalar_select %p354_p11, %s8348_s27, 1  ;;  %v8545_v38 = vshrl.u32 %v13167_v36, 7  ;;  %vm1456_vm4 = vcmask 1042434   ;;  %vm1458_vm5 = vcmask 1043459   ;;  %vm1460_vm6 = vcmask 1044484  }
  0x19   : > { %7729 = vmatprep.subr.mxu0 %v417_v1  ;;  %7791 = vmatprep.subr.mxu1 %v417_v1  ;;  %v746_v37 = vunpack.c.0.s8 %v745_v35  ;;  %vm1462_vm7 = vcmask 1045509   ;;  %vm1464_vm8 = vcmask 1046534   ;;  %vm1466_vm9 = vcmask 1047559   ;;  %s11155_s22 = sand.u32 1, %s8340_s25   ;;  %s8364_s17 = smov [#allocation4]  }
  0x1a   : > { %7730 = vmatpush3.msra.mxu0 %v417_v1  ;;  %7793 = vmatpush3.msra.mxu1 %v417_v1  ;;  %s7684_s20 = sshll.u32 %s8471_s19, 8  ;;  %s7682_s30 = sshll.u32 %s8471_s19, 4  ;;  %13554 = vst [vmem:[#allocation8_spill] sm:$0xff] %v8545_v38  ;;  %v8564_v59 = vsub.s32 0, %v8545_v38  ;;  %vm2439_vm10 = vcmask 326912   ;;  %vm5519_vm11 = vcmask 458112  }
  0x1b   : > { %s8477_s23 = scalar_lea.vmem %s13161_s2, %s7684_s20  ;;  %s361_s12 = scalar_lea.vmem %s13159_s0, %s7682_s30  ;;  %v749_v39 = vsub.s32 %v746_v37, %v8545_v38  ;;  %vm3995_vm12 = vcmask 392512   ;;  %vm7043_vm13 = vcmask 523712   ;;  %vm7336_vm14 = vcmask 195584  }
  0x1c   : > { %v385_v2 = vld [vmem:[%s8477_s23] sm:$0xff]  ;;  %v403_v3 = vld [vmem:[%s8477_s23 + $0x90] sm:$0xff]  ;;  %v386_v4 = vld [vmem:[%s8477_s23 + $0x8] sm:$0xff]  ;;  %13555 = vst [vmem:[#allocation9_spill] sm:$0xff] %v8564_v59  ;;  %s367_s18 = scalar_lea.vmem %s13160_s1, %s7682_s30  ;;  %s8360_s19 = smov 120   ;;  %vm7350_vm15 = vcmask 261120  }
  0x1d   : > { %7731 = vmatprep.mubr.msk.f32.mxu0 %vm419_vm0, %v385_v2  ;;  %7758 = vmatprep.mubr.msk.f32.mxu1 %vm419_vm0, %v403_v3  ;;  %v404_v5 = vld [vmem:[%s8477_s23 + $0x98] sm:$0xff]  ;;  %v387_v6 = vld [vmem:[%s8477_s23 + $0x10] sm:$0xff]  ;;  %v405_v7 = vld [vmem:[%s8477_s23 + $0xa0] sm:$0xff]  ;;  %s8361_s20 = smov 112  }
  0x1e   : > { %7732 = vmatmul.mubr.msk.f32.vlgmr.msra.gmra.mxu0 %vm419_vm0, %v386_v4  ;;  %7759 = vmatmul.mubr.msk.f32.vlgmr.msra.gmra.mxu1 %vm419_vm0, %v404_v5  ;;  %v388_v8 = vld [vmem:[%s8477_s23 + $0x18] sm:$0xff]  ;;  %v406_v9 = vld [vmem:[%s8477_s23 + $0xa8] sm:$0xff]  ;;  %v389_v10 = vld [vmem:[%s8477_s23 + $0x20] sm:$0xff] }
  0x1f   : > { %7734 = vmatprep.mubr.msk.f32.mxu0 %vm419_vm0, %v387_v6  ;;  %7761 = vmatprep.mubr.msk.f32.mxu1 %vm419_vm0, %v405_v7  ;;  %v407_v11 = vld [vmem:[%s8477_s23 + $0xb0] sm:$0xff]  ;;  %v390_v12 = vld [vmem:[%s8477_s23 + $0x28] sm:$0xff]  ;;  %v408_v13 = vld [vmem:[%s8477_s23 + $0xb8] sm:$0xff] }
  0x20   : > { %v391_v14 = vld [vmem:[%s8477_s23 + $0x30] sm:$0xff]  ;;  %v409_v15 = vld [vmem:[%s8477_s23 + $0xc0] sm:$0xff]  ;;  %v392_v16 = vld [vmem:[%s8477_s23 + $0x38] sm:$0xff] }
  0x21   : > { %v410_v17 = vld [vmem:[%s8477_s23 + $0xc8] sm:$0xff]  ;;  %v393_v18 = vld [vmem:[%s8477_s23 + $0x40] sm:$0xff]  ;;  %v411_v19 = vld [vmem:[%s8477_s23 + $0xd0] sm:$0xff] }
  0x22   : > { %7735 = vmatmul.mubr.msk.f32.gmra.mxu0 %vm419_vm0, %v388_v8  ;;  %7762 = vmatmul.mubr.msk.f32.gmra.mxu1 %vm419_vm0, %v406_v9  ;;  %v394_v20 = vld [vmem:[%s8477_s23 + $0x48] sm:$0xff]  ;;  %v412_v21 = vld [vmem:[%s8477_s23 + $0xd8] sm:$0xff]  ;;  %v395_v22 = vld [vmem:[%s8477_s23 + $0x50] sm:$0xff] }
  0x23   : > { %7737 = vmatprep.mubr.msk.f32.mxu0 %vm419_vm0, %v389_v10  ;;  %7764 = vmatprep.mubr.msk.f32.mxu1 %vm419_vm0, %v407_v11  ;;  %v413_v23 = vld [vmem:[%s8477_s23 + $0xe0] sm:$0xff]  ;;  %v396_v24 = vld [vmem:[%s8477_s23 + $0x58] sm:$0xff]  ;;  %v414_v25 = vld [vmem:[%s8477_s23 + $0xe8] sm:$0xff] }
  0x24   : > { %v397_v26 = vld [vmem:[%s8477_s23 + $0x60] sm:$0xff]  ;;  %v415_v27 = vld [vmem:[%s8477_s23 + $0xf0] sm:$0xff]  ;;  %v398_v28 = vld [vmem:[%s8477_s23 + $0x68] sm:$0xff] }
  0x25   : > { %v416_v29 = vld [vmem:[%s8477_s23 + $0xf8] sm:$0xff]  ;;  %v399_v30 = vld [vmem:[%s8477_s23 + $0x70] sm:$0xff]  ;;  %v401_v32 = vld [vmem:[%s8477_s23 + $0x80] sm:$0xff] }
  0x26   : > { %7738 = vmatmul.mubr.msk.f32.gmra.mxu0 %vm419_vm0, %v390_v12  ;;  %7765 = vmatmul.mubr.msk.f32.gmra.mxu1 %vm419_vm0, %v408_v13  ;;  %v400_v31 = vld [vmem:[%s8477_s23 + $0x78] sm:$0xff]  ;;  %v402_v33 = vld [vmem:[%s8477_s23 + $0x88] sm:$0xff]  ;;  %v381_v40 = vld [vmem:[%s361_s12] sm:$0xff]  ;;  %s7626_s23 = sshll.u32 %s11155_s22, 6 }
  0x27   : > { %7740 = vmatprep.mubr.msk.f32.mxu0 %vm419_vm0, %v391_v14  ;;  %7767 = vmatprep.mubr.msk.f32.mxu1 %vm419_vm0, %v409_v15  ;;  %v382_v41 = vld [vmem:[%s361_s12 + $0x8] sm:$0xff]  ;;  %v750_v42 = vrot.slane %v381_v40, %v749_v39  ;;  %v743_v50 = vcombine.high %v381_v40, %v381_v40  ;;  %s11199_s30 = scalar_lea.vmem [#allocation4], %s7626_s23  ;;  %s7440_s12 = scalar_lea.sflag [#allocation5], %s11155_s22 }
  0x28   : > { %v799_v43 = vrot.slane %v382_v41, %v749_v39  ;;  %v792_v47 = vcombine.high %v382_v41, %v382_v41  ;;  %s7473_s10 = sshll.u32 %s11199_s30, 4  ;;  %s13071_s10 = int_to_ptr.vmem [resolvable:$true] %s7473_s10 }
  0x29   : > { %v758_v44 = vcombine.high %v750_v42, %v750_v42  ;;  %v757_v51 = vrot.slane %v743_v50, %v749_v39  ;;  %v766_v58 = vrot.slane %v750_v42, %v749_v39  ;;  %s8250_s16 = scalar_lea.vmem %s13071_s10, 1024 }
  0x2a   : > { %7741 = vmatmul.mubr.msk.f32.gmra.mxu0 %vm419_vm0, %v392_v16  ;;  %7768 = vmatmul.mubr.msk.f32.gmra.mxu1 %vm419_vm0, %v410_v17  ;;  %v8553_v45 = vrot.slane %v799_v43, %v749_v39  ;;  %v806_v48 = vrot.slane %v792_v47, %v749_v39  ;;  %v807_v57 = vcombine.high %v799_v43, %v799_v43  ;;  %p8251_p12 = scmp.ne.s32.totalorder %s13071_s10, %s8250_s16 }
  0x2b   : > { %7743 = vmatprep.mubr.msk.f32.mxu0 %vm419_vm0, %v393_v18  ;;  %7770 = vmatprep.mubr.msk.f32.mxu1 %vm419_vm0, %v411_v19  ;;  %v780_v46 = vrot.slane %v758_v44, %v749_v39  ;;  %v8557_v52 = vrot.slane %v757_v51, %v749_v39  ;;  %v759_v55 = vcombine.high %v757_v51, %v757_v51 }
  0x2c   : > { %v8555_v49 = vrot.slane %v806_v48, %v749_v39  ;;  %v808_v53 = vcombine.high %v806_v48, %v806_v48  ;;  %v829_v60 = vrot.slane %v807_v57, %v749_v39  ;;  %v837_v61 = vcombine.high %v8553_v45, %v8553_v45  ;;  %p8252_p13 = pnand %p8251_p12, %p8448_p4 }
  0x2d   : > { %v8561_v56 = vrot.slane %v759_v55, %v749_v39  ;;  %v844_v62 = vrot.slane %v766_v58, %v8564_v59  ;;  %v848_v2 = vrot.slane %v780_v46, %v8564_v59  ;;  %v788_v4 = vcombine.high %v766_v58, %v766_v58 }
  0x2e   : > { %7744 = vmatmul.mubr.msk.f32.gmra.mxu0 %vm419_vm0, %v394_v20  ;;  %7771 = vmatmul.mubr.msk.f32.gmra.mxu1 %vm419_vm0, %v412_v21  ;;  %v8559_v54 = vrot.slane %v808_v53, %v749_v39  ;;  %v880_v63 = vrot.slane %v829_v60, %v8564_v59  ;;  %v884_v3 = vrot.slane %v837_v61, %v8564_v59  ;;  %p8253_p0 = pneg %p8252_p13 }
  0x2f   : > { %7746 = vmatprep.mubr.msk.f32.mxu0 %vm419_vm0, %v395_v22  ;;  %7773 = vmatprep.mubr.msk.f32.mxu1 %vm419_vm0, %v413_v23  ;;  %v839_v7 = vcombine.high %v829_v60, %v829_v60  ;;  %v852_v14 = vrot.slane %v788_v4, %v8564_v59  ;;  %v790_v15 = vcombine.high %v780_v46, %v780_v46 }
  0x30   : > { %v860_v35 = vrot.slane %v8557_v52, %v8564_v59  ;;  %v896_v37 = vrot.slane %v8559_v54, %v8564_v59  ;;  %v838_v41 = vcombine.high %v8555_v49, %v8555_v49  ;;  %v864_v50 = vrot.slane %v8561_v56, %v8564_v59 }
  0x31   : > { %v888_v18 = vrot.slane %v839_v7, %v8564_v59  ;;  %v789_v51 = vcombine.high %v8557_v52, %v8557_v52  ;;  %v840_v53 = vcombine.high %v8559_v54, %v8559_v54 }
  0x32   : > { %7747 = vmatmul.mubr.msk.f32.gmra.mxu0 %vm419_vm0, %v396_v24  ;;  %7774 = vmatmul.mubr.msk.f32.gmra.mxu1 %vm419_vm0, %v414_v25  ;;  %v856_v25 = vrot.slane %v790_v15, %v8564_v59  ;;  %v900_v57 = vrot.slane %v838_v41, %v8564_v59 }
  0x33   : > { %7749 = vmatprep.mubr.msk.f32.mxu0 %vm419_vm0, %v397_v26  ;;  %7776 = vmatprep.mubr.msk.f32.mxu1 %vm419_vm0, %v415_v27  ;;  %v868_v54 = vrot.slane %v789_v51, %v8564_v59 }
  0x36   : > { %7750 = vmatmul.mubr.msk.f32.gmra.mxu0 %vm419_vm0, %v398_v28  ;;  %7777 = vmatmul.mubr.msk.f32.gmra.mxu1 %vm419_vm0, %v416_v29  ;;  %v892_v28 = vrot.slane %v8555_v49, %v8564_v59 }
  0x37   : > { %7752 = vmatprep.mubr.msk.f32.mxu0 %vm419_vm0, %v399_v30 }
  0x3a   : > { %7753 = vmatmul.mubr.msk.f32.gmra.mxu0 %vm419_vm0, %v400_v31 }
  0x3b   : > { %7755 = vmatprep.mubr.msk.f32.mxu0 %vm419_vm0, %v401_v32 }
  0x3e   : > { %7756 = vmatmul.mubr.msk.f32.gmra.mxu0 %vm419_vm0, %v402_v33 }
  0xde   : > { %v7733_v0 = vpop.f32.mrf.mxu0  ;;  %v7760_v1 = vpop.f32.mrf.mxu1 }
  0xdf   : > { %v8572_v5 = vadd.f32 %v7733_v0, %v844_v62  ;;  %v8574_v6 = vadd.f32 %v7760_v1, %v880_v63  ;;  %1023 = vrot.lane.b32.xlu1 %v7760_v1, %s8359_s15  ;;  %987 = vrot.lane.b32.xlu0 %v7733_v0, %s8359_s15  ;;  %v8642_v0 = vrot.slane %v840_v53, %v8564_v59 }
  0xe0   : > { %v582_v8 = vpop.f32.mrf.mxu0  ;;  %v672_v9 = vpop.f32.mrf.mxu1 }
  0xe1   : > { %v8578_v10 = vadd.f32 %v844_v62, %v582_v8  ;;  %v8580_v11 = vadd.f32 %v880_v63, %v672_v9 }
  0xe2   : > { %v7736_v12 = vpop.f32.mrf.mxu0  ;;  %v7763_v13 = vpop.f32.mrf.mxu1 }
  0xe3   : > { %v8583_v16 = vadd.f32 %v7736_v12, %v848_v2  ;;  %985 = vrot.lane.b32.xlu0 %v582_v8, %s8359_s15  ;;  %991 = vrot.lane.b32.xlu1 %v7736_v12, %s8359_s15  ;;  %v8587_v17 = vadd.f32 %v7763_v13, %v884_v3 }
  0xe4   : > { %v592_v19 = vpop.f32.mrf.mxu0  ;;  %v682_v20 = vpop.f32.mrf.mxu1 }
  0xe5   : > { %v8590_v21 = vadd.f32 %v848_v2, %v592_v19  ;;  %v8592_v22 = vadd.f32 %v884_v3, %v682_v20  ;;  %v791_v3 = vcombine.high %v8561_v56, %v8561_v56 }
  0xe6   : > { %v7739_v23 = vpop.f32.mrf.mxu0  ;;  %v7766_v24 = vpop.f32.mrf.mxu1 }
  0xe7   : > { %1021 = vrot.lane.b32.xlu0 %v672_v9, %s8359_s15  ;;  %1027 = vrot.lane.b32.xlu1 %v7763_v13, %s8359_s15  ;;  %v8597_v26 = vadd.f32 %v7739_v23, %v852_v14  ;;  %v8599_v27 = vadd.f32 %v7766_v24, %v888_v18 }
  0xe8   : > { %v602_v29 = vpop.f32.mrf.mxu0  ;;  %v692_v30 = vpop.f32.mrf.mxu1 }
  0xe9   : > { %v8603_v31 = vadd.f32 %v852_v14, %v602_v29  ;;  %v8605_v32 = vadd.f32 %v888_v18, %v692_v30  ;;  %v872_v18 = vrot.slane %v791_v3, %v8564_v59 }
  0xea   : > { %v7742_v33 = vpop.f32.mrf.mxu0  ;;  %v7769_v34 = vpop.f32.mrf.mxu1 }
  0xeb   : > { %1025 = vrot.lane.b32.xlu0 %v682_v20, %s8359_s15  ;;  %989 = vrot.lane.b32.xlu1 %v592_v19, %s8359_s15  ;;  %v8613_v39 = vadd.f32 %v7742_v33, %v856_v25  ;;  %v8615_v40 = vadd.f32 %v7769_v34, %v892_v28 }
  0xec   : > { %v612_v42 = vpop.f32.mrf.mxu0  ;;  %v702_v43 = vpop.f32.mrf.mxu1 }
  0xed   : > { %v8619_v44 = vadd.f32 %v856_v25, %v612_v42  ;;  %v8621_v46 = vadd.f32 %v892_v28, %v702_v43 }
  0xee   : > { %v7745_v47 = vpop.f32.mrf.mxu0  ;;  %v7772_v48 = vpop.f32.mrf.mxu1 }
  0xef   : > { %995 = vrot.lane.b32.xlu1 %v7739_v23, %s8359_s15  ;;  %993 = vrot.lane.b32.xlu0 %v602_v29, %s8359_s15  ;;  %v8631_v49 = vadd.f32 %v7745_v47, %v860_v35  ;;  %v8633_v55 = vadd.f32 %v7772_v48, %v896_v37 }
  0xf0   : > { %v622_v58 = vpop.f32.mrf.mxu0  ;;  %v712_v60 = vpop.f32.mrf.mxu1 }
  0xf1   : > { %v8636_v61 = vadd.f32 %v860_v35, %v622_v58  ;;  %v8638_v62 = vadd.f32 %v896_v37, %v712_v60 }
  0xf2   : > { %v7748_v52 = vpop.f32.mrf.mxu0  ;;  %v7775_v63 = vpop.f32.mrf.mxu1 }
  0xf3   : > { %1031 = vrot.lane.b32.xlu1 %v7766_v24, %s8359_s15  ;;  %1029 = vrot.lane.b32.xlu0 %v692_v30, %s8359_s15  ;;  %v8646_v1 = vadd.f32 %v7748_v52, %v864_v50  ;;  %v8648_v2 = vadd.f32 %v7775_v63, %v900_v57  ;;  %v876_v24 = vrot.slane %v8553_v45, %v8564_v59 }
  0xf4   : > { %v632_v4 = vpop.f32.mrf.mxu0  ;;  %v722_v7 = vpop.f32.mrf.mxu1 }
  0xf5   : > { %v8652_v8 = vadd.f32 %v864_v50, %v632_v4  ;;  %v8654_v9 = vadd.f32 %v900_v57, %v722_v7 }
  0xf6   : > { %v7751_v12 = vpop.f32.mrf.mxu0  ;;  %v7778_v13 = vpop.f32.mrf.mxu1 }
  0xf7   : > { %999 = vrot.lane.b32.xlu1 %v7742_v33, %s8359_s15  ;;  %997 = vrot.lane.b32.xlu0 %v612_v42, %s8359_s15  ;;  %v8658_v14 = vadd.f32 %v7751_v12, %v868_v54  ;;  %v8661_v15 = vadd.f32 %v7778_v13, %v8642_v0 }
  0xf8   : > { %v642_v56 = vpop.f32.mrf.mxu0  ;;  %v8688_v45 = vpop.f32.mrf.mxu1 }
  0xf9   : > { %v8664_v19 = vadd.f32 %v868_v54, %v642_v56 }
  0xfa   : > { %v7754_v20 = vpop.f32.mrf.mxu0 }
  0xfb   : > { %1035 = vrot.lane.b32.xlu1 %v7769_v34, %s8359_s15  ;;  %1033 = vrot.lane.b32.xlu0 %v702_v43, %s8359_s15  ;;  %v8668_v23 = vadd.f32 %v7754_v20, %v872_v18  ;;  %v8702_v34 = vld [vmem:[%s367_s18 + $0x8] sm:$0xff] }
  0xfc   : > { %v652_v25 = vpop.f32.mrf.mxu0 }
  0xfd   : > { %v8672_v28 = vadd.f32 %v872_v18, %v652_v25 }
  0xfe   : > { %v7757_v29 = vpop.f32.mrf.mxu0 }
  0xff   : > { %1003 = vrot.lane.b32.xlu1 %v7745_v47, %s8359_s15  ;;  %1001 = vrot.lane.b32.xlu0 %v622_v58, %s8359_s15  ;;  %v8676_v30 = vadd.f32 %v7757_v29, %v876_v24 }
 0x100   : > { %v662_v33 = vpop.f32.mrf.mxu0 }
 0x101   : > { %v8678_v35 = vadd.f32 %v876_v24, %v662_v33 }
 0x103   : > { %1039 = vrot.lane.b32.xlu1 %v7772_v48, %s8359_s15  ;;  %1037 = vrot.lane.b32.xlu0 %v712_v60, %s8359_s15 }
 0x107   : > { %1007 = vrot.lane.b32.xlu1 %v7748_v52, %s8359_s15  ;;  %1005 = vrot.lane.b32.xlu0 %v632_v4, %s8359_s15 }
 0x10b   : > { %1043 = vrot.lane.b32.xlu1 %v7775_v63, %s8359_s15  ;;  %1041 = vrot.lane.b32.xlu0 %v722_v7, %s8359_s15 }
 0x10f   : > { %1011 = vrot.lane.b32.xlu1 %v7751_v12, %s8359_s15  ;;  %1009 = vrot.lane.b32.xlu0 %v642_v56, %s8359_s15 }
 0x113   : > { %1047 = vrot.lane.b32.xlu1 %v7778_v13, %s8359_s15  ;;  %1045 = vrot.lane.b32.xlu0 %v8688_v45, %s8359_s15 }
 0x117   : > { %1015 = vrot.lane.b32.xlu1 %v7754_v20, %s8359_s15  ;;  %1013 = vrot.lane.b32.xlu0 %v652_v25, %s8359_s15 }
 0x11b   : > { %1019 = vrot.lane.b32.xlu1 %v7757_v29, %s8359_s15  ;;  %1017 = vrot.lane.b32.xlu0 %v662_v33, %s8359_s15 }
 0x151   : > { %v1024_v37 = vpop.permute.xlu1 %1023  ;;  %v988_v41 = vpop.permute.xlu0 %987 }
 0x152   : > { %v8705_v42 = vadd.f32 %v1024_v37, %v8702_v34  ;;  %v8708_v43 = vadd.f32 %v988_v41, %v8702_v34 }
 0x154   : > { %13556 = vst [vmem:[#allocation10_spill] sm:$0xff] %v8705_v42  ;;  %13557 = vst [vmem:[#allocation11_spill] sm:$0xff] %v8708_v43  ;;  %v8712_v47 = vmul.f32 %v8708_v43, %v8572_v5  ;;  %v8716_v48 = vmul.f32 %v8705_v42, %v8574_v6  ;;  %v8728_v6 = vld [vmem:[%s367_s18] sm:$0xff]  ;;  %s8254_s18 = sshll.u32 %s8364_s17, 4  ;;  %s8255_s18 = int_to_ptr.vmem [resolvable:$false] %s8254_s18 }
 0x155   : > { %v986_v5 = vpop.permute.xlu0 %985  ;;  %v992_v63 = vpop.permute.xlu1 %991  ;;  %p8257_p1 = scmp.lt.s32.totalorder %s13071_s10, %s8255_s18 }
 0x156   : > { %2618 = vrot.lane.b32.xlu1 %v8712_v47, %s8360_s19  ;;  %v1203_v50 = vsel %vm1145_vm1, %v8716_v48, 0.0  ;;  %v8731_v51 = vadd.f32 %v986_v5, %v8728_v6 }
 0x157   : > { %1204 = vadd.xlane.f32.xlu0 %v1203_v50 }
 0x158   : > { %13558 = vst [vmem:[#allocation12_spill] sm:$0xff] %v8731_v51  ;;  %v8738_v58 = vmul.f32 %v8731_v51, %v8578_v10  ;;  %v1149_v10 = vsel %vm1145_vm1, %v8712_v47, 0.0 }
 0x159   : > { %v1022_v53 = vpop.permute.xlu0 %1021  ;;  %v1028_v54 = vpop.permute.xlu1 %1027 }
 0x15a   : > { %2654 = vrot.lane.b32.xlu1 %v8716_v48, %s8360_s19  ;;  %v8734_v57 = vadd.f32 %v1022_v53, %v8728_v6  ;;  %v8760_v3 = vadd.f32 %v1028_v54, %v8702_v34  ;;  %v1146_v4 = vsel %vm1145_vm1, %v8738_v58, 0.0 }
 0x15c   : > { %13559 = vst [vmem:[#allocation13_spill] sm:$0xff] %v8734_v57  ;;  %v8744_v60 = vmul.f32 %v8734_v57, %v8580_v11  ;;  %v8757_v11 = vadd.f32 %v992_v63, %v8702_v34  ;;  %13561 = vst [vmem:[#allocation15_spill] sm:$0xff] %v8760_v3  ;;  %v8774_v13 = vmul.f32 %v8760_v3, %v8587_v17 }
 0x15d   : > { %v1026_v17 = vpop.permute.xlu0 %1025 }
 0x15e   : > { %4142 = vrot.lane.b32.xlu1 %v8712_v47, %s8361_s20  ;;  %v1200_v52 = vsel %vm1145_vm1, %v8744_v60, 0.0  ;;  %13560 = vst [vmem:[#allocation14_spill] sm:$0xff] %v8757_v11  ;;  %v8766_v7 = vmul.f32 %v8757_v11, %v8583_v16  ;;  %v1209_v18 = vsel %vm1145_vm1, %v8774_v13, 0.0  ;;  %v990_v16 = vpop.permute.xlu1 %989  ;;  %v8788_v20 = vadd.f32 %v1026_v17, %v8728_v6 }
 0x15f   : > { %v8785_v56 = vadd.f32 %v990_v16, %v8728_v6 }
 0x160   : > { %v1155_v12 = vsel %vm1145_vm1, %v8766_v7, 0.0  ;;  %13563 = vst [vmem:[#allocation17_spill] sm:$0xff] %v8788_v20  ;;  %v8798_v25 = vmul.f32 %v8788_v20, %v8592_v22 }
 0x161   : > { %13562 = vst [vmem:[#allocation16_spill] sm:$0xff] %v8785_v56  ;;  %v8792_v24 = vmul.f32 %v8785_v56, %v8590_v21  ;;  %v994_v53 = vpop.permute.xlu0 %993 }
 0x162   : > { %4178 = vrot.lane.b32.xlu1 %v8716_v48, %s8361_s20  ;;  %v1206_v21 = vsel %vm1145_vm1, %v8798_v25, 0.0  ;;  %v996_v29 = vpop.permute.xlu1 %995 }
 0x163   : > { %v8809_v33 = vadd.f32 %v996_v29, %v8702_v34  ;;  %v1152_v5 = vsel %vm1145_vm1, %v8792_v24, 0.0 }
 0x165   : > { %13564 = vst [vmem:[#allocation18_spill] sm:$0xff] %v8809_v33  ;;  %v8816_v41 = vmul.f32 %v8809_v33, %v8597_v26 }
 0x166   : > { %v1032_v37 = vpop.permute.xlu1 %1031 }
 0x167   : > { %v8812_v22 = vadd.f32 %v1032_v37, %v8702_v34  ;;  %v1161_v26 = vsel %vm1145_vm1, %v8816_v41, 0.0 }
 0x169   : > { %13565 = vst [vmem:[#allocation19_spill] sm:$0xff] %v8812_v22  ;;  %v8822_v50 = vmul.f32 %v8812_v22, %v8599_v27 }
 0x16b   : > { %13566 = vst [vmem:[#allocation20_spill] sm:$0xff] %v8822_v50  ;;  %v1215_v27 = vsel %vm1145_vm1, %v8822_v50, 0.0 }
 0x16d   : > { %2616 = vrot.lane.b32.xlu0 %v8738_v58, %s8360_s19 }
 0x171   : > { %2652 = vrot.lane.b32.xlu0 %v8744_v60, %s8360_s19 }
 0x175   : > { %4140 = vrot.lane.b32.xlu0 %v8738_v58, %s8361_s20 }
 0x179   : > { %4176 = vrot.lane.b32.xlu0 %v8744_v60, %s8361_s20 }
 0x186   : > { %1150 = vadd.xlane.f32.xlu1 %v1149_v10  ;;  %v8837_v10 = vadd.f32 %v994_v53, %v8728_v6 }
 0x188   : > { %13567 = vst [vmem:[#allocation21_spill] sm:$0xff] %v8837_v10  ;;  %v8844_v54 = vmul.f32 %v8837_v10, %v8603_v31 }
 0x18a   : > { %1201 = vadd.xlane.f32.xlu1 %v1200_v52  ;;  %v1030_v52 = vpop.permute.xlu0 %1029  ;;  %v1158_v31 = vsel %vm1145_vm1, %v8844_v54, 0.0 }
 0x18b   : > { %v8840_v63 = vadd.f32 %v1030_v52, %v8728_v6 }
 0x18d   : > { %13568 = vst [vmem:[#allocation22_spill] sm:$0xff] %v8840_v63 }
 0x198   : > { %1147 = vadd.xlane.f32.xlu0 %v1146_v4  ;;  %v8850_v4 = vmul.f32 %v8840_v63, %v8605_v32 }
 0x19a   : > { %13569 = vst [vmem:[#allocation23_spill] sm:$0xff] %v8850_v4 }
 0x19b   : > { %2622 = vrot.lane.b32.xlu1 %v8766_v7, %s8360_s19 }
 0x19c   : > { %1156 = vadd.xlane.f32.xlu0 %v1155_v12  ;;  %v1212_v12 = vsel %vm1145_vm1, %v8850_v4, 0.0 }
 0x19f   : > { %2658 = vrot.lane.b32.xlu1 %v8774_v13, %s8360_s19 }
 0x1a0   : > { %1210 = vadd.xlane.f32.xlu0 %v1209_v18  ;;  %v1000_v18 = vpop.permute.xlu1 %999 }
 0x1a1   : > { %v8863_v32 = vadd.f32 %v1000_v18, %v8702_v34 }
 0x1a3   : > { %4146 = vrot.lane.b32.xlu1 %v8766_v7, %s8361_s20  ;;  %13570 = vst [vmem:[#allocation24_spill] sm:$0xff] %v8863_v32 }
 0x1a4   : > { %v1036_v16 = vpop.permute.xlu1 %1035 }
 0x1a5   : > { %v8866_v17 = vadd.f32 %v1036_v16, %v8702_v34 }
 0x1a7   : > { %4182 = vrot.lane.b32.xlu1 %v8774_v13, %s8361_s20  ;;  %13571 = vst [vmem:[#allocation25_spill] sm:$0xff] %v8866_v17  ;;  %v8876_v29 = vmul.f32 %v8866_v17, %v8615_v40 }
 0x1a9   : > { %13572 = vst [vmem:[#allocation26_spill] sm:$0xff] %v8876_v29 }
 0x1b6   : > { %2620 = vrot.lane.b32.xlu0 %v8792_v24, %s8360_s19 }
 0x1ba   : > { %2656 = vrot.lane.b32.xlu0 %v8798_v25, %s8360_s19 }
 0x1be   : > { %4144 = vrot.lane.b32.xlu0 %v8792_v24, %s8361_s20 }
 0x1c2   : > { %4180 = vrot.lane.b32.xlu0 %v8798_v25, %s8361_s20 }
 0x1cb   : > { %1207 = vadd.xlane.f32.xlu1 %v1206_v21  ;;  %v8870_v21 = vmul.f32 %v8863_v32, %v8613_v39  ;;  %v1221_v39 = vsel %vm1145_vm1, %v8876_v29, 0.0 }
 0x1cd   : > { %v1167_v37 = vsel %vm1145_vm1, %v8870_v21, 0.0 }
 0x1dc   : > { %2626 = vrot.lane.b32.xlu1 %v8816_v41, %s8360_s19 }
 0x1e0   : > { %2662 = vrot.lane.b32.xlu1 %v8822_v50, %s8360_s19 }
 0x1e1   : > { %1153 = vadd.xlane.f32.xlu0 %v1152_v5  ;;  %v998_v5 = vpop.permute.xlu0 %997 }
 0x1e2   : > { %v8889_v40 = vadd.f32 %v998_v5, %v8728_v6 }
 0x1e4   : > { %4150 = vrot.lane.b32.xlu1 %v8816_v41, %s8361_s20  ;;  %13573 = vst [vmem:[#allocation27_spill] sm:$0xff] %v8889_v40  ;;  %v8896_v53 = vmul.f32 %v8889_v40, %v8619_v44 }
 0x1e5   : > { %1162 = vadd.xlane.f32.xlu0 %v1161_v26  ;;  %v1034_v26 = vpop.permute.xlu0 %1033 }
 0x1e6   : > { %v1164_v44 = vsel %vm1145_vm1, %v8896_v53, 0.0 }
 0x1e8   : > { %4186 = vrot.lane.b32.xlu1 %v8822_v50, %s8361_s20 }
 0x1e9   : > { %1216 = vadd.xlane.f32.xlu0 %v1215_v27  ;;  %v8892_v27 = vadd.f32 %v1034_v26, %v8728_v6  ;;  %v1002_v26 = vpop.permute.xlu0 %1001 }
 0x1eb   : > { %13574 = vst [vmem:[#allocation28_spill] sm:$0xff] %v8892_v27  ;;  %v8902_v52 = vmul.f32 %v8892_v27, %v8621_v46 }
 0x1ed   : > { %13575 = vst [vmem:[#allocation29_spill] sm:$0xff] %v8902_v52 }
 0x1ff   : > { %2624 = vrot.lane.b32.xlu0 %v8844_v54, %s8360_s19 }
 0x203   : > { %2660 = vrot.lane.b32.xlu0 %v8850_v4, %s8360_s19 }
 0x207   : > { %4148 = vrot.lane.b32.xlu0 %v8844_v54, %s8361_s20 }
 0x20b   : > { %4184 = vrot.lane.b32.xlu0 %v8850_v4, %s8361_s20 }
 0x20c   : > { %1159 = vadd.xlane.f32.xlu1 %v1158_v31  ;;  %v1218_v31 = vsel %vm1145_vm1, %v8902_v52, 0.0 }
 0x210   : > { %1213 = vadd.xlane.f32.xlu1 %v1212_v12  ;;  %v1004_v12 = vpop.permute.xlu1 %1003 }
 0x211   : > { %v8915_v46 = vadd.f32 %v1004_v12, %v8702_v34 }
 0x213   : > { %13576 = vst [vmem:[#allocation30_spill] sm:$0xff] %v8915_v46 }
 0x214   : > { %v1040_v18 = vpop.permute.xlu1 %1039 }
 0x215   : > { %v8918_v16 = vadd.f32 %v1040_v18, %v8702_v34 }
 0x217   : > { %13577 = vst [vmem:[#allocation31_spill] sm:$0xff] %v8918_v16 }
 0x221   : > { %2630 = vrot.lane.b32.xlu1 %v8870_v21, %s8360_s19 }
 0x225   : > { %2666 = vrot.lane.b32.xlu1 %v8876_v29, %s8360_s19 }
 0x229   : > { %4154 = vrot.lane.b32.xlu1 %v8870_v21, %s8361_s20 }
 0x22a   : > { %1168 = vadd.xlane.f32.xlu0 %v1167_v37  ;;  %v8922_v37 = vmul.f32 %v8915_v46, %v8631_v49 }
 0x22c   : > { %13578 = vst [vmem:[#allocation32_spill] sm:$0xff] %v8922_v37  ;;  %v1173_v5 = vsel %vm1145_vm1, %v8922_v37, 0.0 }
 0x22d   : > { %4190 = vrot.lane.b32.xlu1 %v8876_v29, %s8361_s20 }
 0x22e   : > { %1222 = vadd.xlane.f32.xlu0 %v1221_v39  ;;  %v8928_v39 = vmul.f32 %v8918_v16, %v8633_v55  ;;  %v8941_v55 = vadd.f32 %v1002_v26, %v8728_v6 }
 0x230   : > { %13579 = vst [vmem:[#allocation33_spill] sm:$0xff] %v8928_v39  ;;  %v1227_v49 = vsel %vm1145_vm1, %v8928_v39, 0.0  ;;  %13580 = vst [vmem:[#allocation34_spill] sm:$0xff] %v8941_v55  ;;  %v8948_v12 = vmul.f32 %v8941_v55, %v8636_v61 }
 0x232   : > { %13582 = vst [vmem:[#allocation36_spill] sm:$0xff] %v8948_v12  ;;  %v1170_v61 = vsel %vm1145_vm1, %v8948_v12, 0.0 }
 0x244   : > { %2628 = vrot.lane.b32.xlu0 %v8896_v53, %s8360_s19 }
 0x248   : > { %2664 = vrot.lane.b32.xlu0 %v8902_v52, %s8360_s19 }
 0x24c   : > { %4152 = vrot.lane.b32.xlu0 %v8896_v53, %s8361_s20 }
 0x250   : > { %4188 = vrot.lane.b32.xlu0 %v8902_v52, %s8361_s20 }
 0x251   : > { %1165 = vadd.xlane.f32.xlu1 %v1164_v44  ;;  %v1038_v44 = vpop.permute.xlu0 %1037 }
 0x255   : > { %1219 = vadd.xlane.f32.xlu1 %v1218_v31  ;;  %v8944_v31 = vadd.f32 %v1038_v44, %v8728_v6 }
 0x257   : > { %13581 = vst [vmem:[#allocation35_spill] sm:$0xff] %v8944_v31  ;;  %v8954_v18 = vmul.f32 %v8944_v31, %v8638_v62 }
 0x259   : > { %13583 = vst [vmem:[#allocation37_spill] sm:$0xff] %v8954_v18 }
 0x266   : > { %2634 = vrot.lane.b32.xlu1 %v8922_v37, %s8360_s19 }
 0x26a   : > { %2670 = vrot.lane.b32.xlu1 %v8928_v39, %s8360_s19 }
 0x26e   : > { %4158 = vrot.lane.b32.xlu1 %v8922_v37, %s8361_s20 }
 0x26f   : > { %1174 = vadd.xlane.f32.xlu0 %v1173_v5  ;;  %v1224_v5 = vsel %vm1145_vm1, %v8954_v18, 0.0 }
 0x272   : > { %4194 = vrot.lane.b32.xlu1 %v8928_v39, %s8361_s20 }
 0x273   : > { %1228 = vadd.xlane.f32.xlu0 %v1227_v49  ;;  %v1008_v49 = vpop.permute.xlu1 %1007 }
 0x274   : > { %v8967_v62 = vadd.f32 %v1008_v49, %v8702_v34  ;;  %v1006_v49 = vpop.permute.xlu0 %1005 }
 0x276   : > { %13584 = vst [vmem:[#allocation38_spill] sm:$0xff] %v8967_v62  ;;  %v8974_v36 = vmul.f32 %v8967_v62, %v8646_v1 }
 0x277   : > { %v1044_v26 = vpop.permute.xlu1 %1043 }
 0x278   : > { %v8970_v44 = vadd.f32 %v1044_v26, %v8702_v34  ;;  %13586 = vst [vmem:[#allocation40_spill] sm:$0xff] %v8974_v36  ;;  %v1042_v26 = vpop.permute.xlu0 %1041 }
 0x27a   : > { %13585 = vst [vmem:[#allocation39_spill] sm:$0xff] %v8970_v44 }
 0x289   : > { %2632 = vrot.lane.b32.xlu0 %v8948_v12, %s8360_s19 }
 0x28d   : > { %2668 = vrot.lane.b32.xlu0 %v8954_v18, %s8360_s19 }
 0x291   : > { %4156 = vrot.lane.b32.xlu0 %v8948_v12, %s8361_s20 }
 0x295   : > { %4192 = vrot.lane.b32.xlu0 %v8954_v18, %s8361_s20 }
 0x296   : > { %1171 = vadd.xlane.f32.xlu1 %v1170_v61  ;;  %v8980_v61 = vmul.f32 %v8970_v44, %v8648_v2  ;;  %v8993_v2 = vadd.f32 %v1006_v49, %v8728_v6  ;;  %v8996_v44 = vadd.f32 %v1042_v26, %v8728_v6  ;;  %v1012_v49 = vpop.permute.xlu1 %1011 }
 0x297   : > { %v9019_v26 = vadd.f32 %v1012_v49, %v8702_v34 }
 0x298   : > { %13587 = vst [vmem:[#allocation41_spill] sm:$0xff] %v8980_v61  ;;  %v1233_v1 = vsel %vm1145_vm1, %v8980_v61, 0.0  ;;  %13588 = vst [vmem:[#allocation42_spill] sm:$0xff] %v8993_v2  ;;  %v9000_v16 = vmul.f32 %v8993_v2, %v8652_v8 }
 0x299   : > { %13589 = vst [vmem:[#allocation43_spill] sm:$0xff] %v8996_v44  ;;  %13592 = vst [vmem:[#allocation46_spill] sm:$0xff] %v9019_v26  ;;  %v9026_v27 = vmul.f32 %v9019_v26, %v8658_v14 }
 0x29a   : > { %1225 = vadd.xlane.f32.xlu1 %v1224_v5  ;;  %v1179_v5 = vsel %vm1145_vm1, %v8974_v36, 0.0  ;;  %13590 = vst [vmem:[#allocation44_spill] sm:$0xff] %v9000_v16  ;;  %v1176_v8 = vsel %vm1145_vm1, %v9000_v16, 0.0 }
 0x29b   : > { %13594 = vst [vmem:[#allocation48_spill] sm:$0xff] %v9026_v27 }
 0x2ab   : > { %2638 = vrot.lane.b32.xlu1 %v8974_v36, %s8360_s19 }
 0x2af   : > { %2674 = vrot.lane.b32.xlu1 %v8980_v61, %s8360_s19 }
 0x2b3   : > { %4162 = vrot.lane.b32.xlu1 %v8974_v36, %s8361_s20 }
 0x2b4   : > { %1180 = vadd.xlane.f32.xlu0 %v1179_v5  ;;  %v9006_v5 = vmul.f32 %v8996_v44, %v8654_v9  ;;  %v1010_v9 = vpop.permute.xlu0 %1009  ;;  %v1048_v44 = vpop.permute.xlu1 %1047 }
 0x2b5   : > { %v9022_v31 = vadd.f32 %v1048_v44, %v8702_v34  ;;  %v1185_v44 = vsel %vm1145_vm1, %v9026_v27, 0.0  ;;  %v9053_v63 = vadd.f32 %v1010_v9, %v8728_v6 }
 0x2b6   : > { %13591 = vst [vmem:[#allocation45_spill] sm:$0xff] %v9006_v5 }
 0x2b7   : > { %4198 = vrot.lane.b32.xlu1 %v8980_v61, %s8361_s20  ;;  %13593 = vst [vmem:[#allocation47_spill] sm:$0xff] %v9022_v31  ;;  %13596 = vst [vmem:[#allocation50_spill] sm:$0xff] %v9053_v63  ;;  %v9062_v20 = vmul.f32 %v9053_v63, %v8664_v19 }
 0x2b8   : > { %1234 = vadd.xlane.f32.xlu0 %v1233_v1  ;;  %v1230_v1 = vsel %vm1145_vm1, %v9006_v5, 0.0  ;;  %v1046_v17 = vpop.permute.xlu0 %1045  ;;  %v1016_v42 = vpop.permute.xlu1 %1015 }
 0x2b9   : > { %13598 = vst [vmem:[#allocation52_spill] sm:$0xff] %v9062_v20  ;;  %v9098_v46 = vadd.f32 %v1016_v42, %v8702_v34 }
 0x2bb   : > { %13601 = vst [vmem:[#allocation55_spill] sm:$0xff] %v9098_v46  ;;  %v9108_v40 = vmul.f32 %v9098_v46, %v8668_v23 }
 0x2bd   : > { %13602 = vst [vmem:[#allocation56_spill] sm:$0xff] %v9108_v40  ;;  %v1191_v42 = vsel %vm1145_vm1, %v9108_v40, 0.0 }
 0x2ce   : > { %2636 = vrot.lane.b32.xlu0 %v9000_v16, %s8360_s19 }
 0x2d2   : > { %2672 = vrot.lane.b32.xlu0 %v9006_v5, %s8360_s19 }
 0x2d6   : > { %4160 = vrot.lane.b32.xlu0 %v9000_v16, %s8361_s20 }
 0x2da   : > { %4196 = vrot.lane.b32.xlu0 %v9006_v5, %s8361_s20 }
 0x2db   : > { %1177 = vadd.xlane.f32.xlu1 %v1176_v8  ;;  %v9032_v8 = vmul.f32 %v9022_v31, %v8661_v15 }
 0x2dd   : > { %13595 = vst [vmem:[#allocation49_spill] sm:$0xff] %v9032_v8  ;;  %v1239_v15 = vsel %vm1145_vm1, %v9032_v8, 0.0 }
 0x2df   : > { %1231 = vadd.xlane.f32.xlu1 %v1230_v1  ;;  %v1014_v1 = vpop.permute.xlu0 %1013 }
 0x2e0   : > { %v9133_v51 = vadd.f32 %v1014_v1, %v8728_v6 }
 0x2e2   : > { %13605 = vst [vmem:[#allocation59_spill] sm:$0xff] %v9133_v51 }
 0x2e3   : > { %v9040_v14 = vpop.permute.xlu0 %1017 }
 0x2e4   : > { %v9200_v50 = vadd.f32 %v9040_v14, %v8728_v6 }
 0x2e6   : > { %13611 = vst [vmem:[#allocation65_spill] sm:$0xff] %v9200_v50 }
 0x2e7   : > { %v9046_v49 = vpop.xlane.xlu0 %1204 }
 0x2eb   : > { %v9048_v31 = vpop.permute.xlu0 %2616 }
 0x2ef   : > { %v9050_v22 = vpop.permute.xlu0 %2652 }
 0x2f0   : > { %2642 = vrot.lane.b32.xlu1 %v9026_v27, %s8360_s19 }
 0x2f3   : > { %v9055_v3 = vpop.permute.xlu0 %4140 }
 0x2f4   : > { %2678 = vrot.lane.b32.xlu1 %v9032_v8, %s8360_s19 }
 0x2f7   : > { %v9071_v9 = vpop.permute.xlu0 %4176 }
 0x2f8   : > { %4166 = vrot.lane.b32.xlu1 %v9026_v27, %s8361_s20 }
 0x2f9   : > { %1186 = vadd.xlane.f32.xlu0 %v1185_v44  ;;  %v9058_v44 = vadd.f32 %v1046_v17, %v8728_v6  ;;  %v1020_v17 = vpop.permute.xlu1 %1019 }
 0x2fb   : > { %13597 = vst [vmem:[#allocation51_spill] sm:$0xff] %v9058_v44  ;;  %v9075_v26 = vpop.xlane.xlu0 %1147 }
 0x2fc   : > { %4202 = vrot.lane.b32.xlu1 %v9032_v8, %s8361_s20 }
 0x2fd   : > { %1240 = vadd.xlane.f32.xlu0 %v1239_v15  ;;  %v951_v15 = vadd.f32 %v8642_v0, %v8688_v45  ;;  %v9079_v19 = vpop.permute.xlu1 %2618  ;;  %v1182_v0 = vsel %vm1145_vm1, %v9062_v20, 0.0 }
 0x2ff   : > { %v9069_v57 = vmul.f32 %v9058_v44, %v951_v15  ;;  %v9085_v45 = vpop.xlane.xlu0 %1156 }
 0x300   : > { %13600 = vst [vmem:[#allocation54_spill] sm:$0xff] %v9085_v45 }
 0x301   : > { %13599 = vst [vmem:[#allocation53_spill] sm:$0xff] %v9069_v57  ;;  %v9087_v15 = vpop.permute.xlu1 %2654  ;;  %v1236_v44 = vsel %vm1145_vm1, %v9069_v57, 0.0 }
 0x303   : > { %v9091_v63 = vpop.xlane.xlu0 %1210 }
 0x305   : > { %v9093_v62 = vpop.permute.xlu1 %4142 }
 0x306   : > { %v4239_v45 = vsel %vm1145_vm1, %v9093_v62, 0.0 }
 0x307   : > { %v9095_v2 = vpop.permute.xlu0 %2620 }
 0x309   : > { %v9100_v55 = vpop.permute.xlu1 %4178 }
 0x30b   : > { %v9102_v32 = vpop.permute.xlu0 %2656 }
 0x30c   : > { %v2772_v62 = vsel %vm1145_vm1, %v9102_v32, 0.0 }
 0x313   : > { %2640 = vrot.lane.b32.xlu0 %v9062_v20, %s8360_s19 }
 0x317   : > { %2676 = vrot.lane.b32.xlu0 %v9069_v57, %s8360_s19 }
 0x31b   : > { %4164 = vrot.lane.b32.xlu0 %v9062_v20, %s8361_s20  ;;  %v9166_v20 = vadd.f32 %v1020_v17, %v8702_v34 }
 0x31d   : > { %13607 = vst [vmem:[#allocation61_spill] sm:$0xff] %v9166_v20  ;;  %v9172_v52 = vmul.f32 %v9166_v20, %v8676_v30 }
 0x31f   : > { %4200 = vrot.lane.b32.xlu0 %v9069_v57, %s8361_s20  ;;  %v1197_v17 = vsel %vm1145_vm1, %v9172_v52, 0.0 }
 0x320   : > { %1183 = vadd.xlane.f32.xlu1 %v1182_v0  ;;  %v9104_v0 = vpop.xlane.xlu1 %1150 }
 0x324   : > { %1237 = vadd.xlane.f32.xlu1 %v1236_v44  ;;  %v9112_v44 = vpop.permute.xlu0 %4144  ;;  %v9114_v33 = vpop.xlane.xlu1 %1201 }
 0x328   : > { %v9120_v10 = vpop.permute.xlu0 %4180  ;;  %v9122_v11 = vpop.permute.xlu1 %2622 }
 0x32c   : > { %v9124_v23 = vpop.xlane.xlu0 %1153  ;;  %v9126_v46 = vpop.permute.xlu1 %2658 }
 0x32d   : > { %13603 = vst [vmem:[#allocation57_spill] sm:$0xff] %v9124_v23 }
 0x330   : > { %v9128_v56 = vpop.xlane.xlu0 %1162  ;;  %v9130_v43 = vpop.permute.xlu1 %4146 }
 0x331   : > { %13604 = vst [vmem:[#allocation58_spill] sm:$0xff] %v9128_v56 }
 0x334   : > { %v9135_v59 = vpop.xlane.xlu0 %1216  ;;  %v9137_v57 = vpop.permute.xlu1 %4182 }
 0x335   : > { %2646 = vrot.lane.b32.xlu1 %v9108_v40, %s8360_s19 }
 0x338   : > { %v9143_v8 = vpop.permute.xlu0 %2624  ;;  %v9147_v5 = vpop.xlane.xlu1 %1207 }
 0x339   : > { %4170 = vrot.lane.b32.xlu1 %v9108_v40, %s8361_s20  ;;  %v2724_v32 = vsel %vm1145_vm1, %v9143_v8, 0.0 }
 0x33c   : > { %v9151_v1 = vpop.permute.xlu0 %2660  ;;  %v9153_v61 = vpop.permute.xlu1 %2626 }
 0x33e   : > { %1192 = vadd.xlane.f32.xlu0 %v1191_v42  ;;  %v9141_v42 = vmul.f32 %v9133_v51, %v8672_v28 }
 0x340   : > { %13606 = vst [vmem:[#allocation60_spill] sm:$0xff] %v9141_v42  ;;  %v1188_v40 = vsel %vm1145_vm1, %v9141_v42, 0.0  ;;  %v9157_v28 = vpop.permute.xlu0 %4148  ;;  %v9159_v51 = vpop.permute.xlu1 %2662 }
 0x341   : > { %v4248_v8 = vsel %vm1145_vm1, %v9157_v28, 0.0 }
 0x344   : > { %v9161_v18 = vpop.permute.xlu0 %4184  ;;  %v9163_v39 = vpop.permute.xlu1 %4150 }
 0x348   : > { %v9168_v27 = vpop.xlane.xlu0 %1168  ;;  %v9174_v29 = vpop.permute.xlu1 %4186 }
 0x349   : > { %13608 = vst [vmem:[#allocation62_spill] sm:$0xff] %v9168_v27  ;;  %v9208_v27 = vmul.f32 %v9200_v50, %v8678_v35 }
 0x34b   : > { %v1194_v56 = vsel %vm1145_vm1, %v9208_v27, 0.0 }
 0x354   : > { %2644 = vrot.lane.b32.xlu0 %v9141_v42, %s8360_s19 }
 0x358   : > { %4168 = vrot.lane.b32.xlu0 %v9141_v42, %s8361_s20  ;;  %v9180_v42 = vpop.xlane.xlu1 %1159 }
 0x359   : > { %13610 = vst [vmem:[#allocation64_spill] sm:$0xff] %v9180_v42 }
 0x35c   : > { %v9188_v16 = vpop.xlane.xlu1 %1213 }
 0x35d   : > { %1189 = vadd.xlane.f32.xlu1 %v1188_v40  ;;  %v9178_v40 = vpop.xlane.xlu0 %1222 }
 0x35e   : > { %13609 = vst [vmem:[#allocation63_spill] sm:$0xff] %v9178_v40 }
 0x360   : > { %v9192_v20 = vpop.permute.xlu1 %2630 }
 0x361   : > { %v9184_v34 = vpop.permute.xlu0 %2628 }
 0x362   : > { %v2730_v28 = vsel %vm1145_vm1, %v9184_v34, 0.0  ;;  %v4299_v34 = vsel %vm1145_vm1, %v9137_v57, 0.0  ;;  %v4242_v57 = vsel %vm1145_vm1, %v9112_v44, 0.0  ;;  %v2781_v44 = vsel %vm1145_vm1, %v9159_v51, 0.0 }
 0x363   : > { %v4305_v51 = vsel %vm1145_vm1, %v9174_v29, 0.0 }
 0x364   : > { %v9196_v4 = vpop.permute.xlu1 %2666 }
 0x365   : > { %v9190_v30 = vpop.permute.xlu0 %2664 }
 0x368   : > { %v9204_v37 = vpop.permute.xlu1 %4154 }
 0x369   : > { %v9194_v36 = vpop.permute.xlu0 %4152 }
 0x36c   : > { %v9214_v42 = vpop.permute.xlu1 %4190 }
 0x36d   : > { %v9202_v12 = vpop.permute.xlu0 %4188 }
 0x36e   : > { %2650 = vrot.lane.b32.xlu1 %v9172_v52, %s8360_s19 }
 0x370   : > { %v9220_v14 = vpop.xlane.xlu1 %1165 }
 0x371   : > { %13614 = vst [vmem:[#allocation68_spill] sm:$0xff] %v9220_v14  ;;  %v2766_v14 = vsel %vm1145_vm1, %v9050_v22, 0.0  ;;  %v4296_v22 = vsel %vm1145_vm1, %v9120_v10, 0.0 }
 0x372   : > { %4174 = vrot.lane.b32.xlu1 %v9172_v52, %s8361_s20 }
 0x374   : > { %v9226_v50 = vpop.xlane.xlu1 %1219 }
 0x375   : > { %13615 = vst [vmem:[#allocation69_spill] sm:$0xff] %v9226_v50  ;;  %v2769_v50 = vsel %vm1145_vm1, %v9087_v15, 0.0 }
 0x377   : > { %1198 = vadd.xlane.f32.xlu0 %v1197_v17  ;;  %v9210_v17 = vpop.xlane.xlu0 %1174 }
 0x378   : > { %13612 = vst [vmem:[#allocation66_spill] sm:$0xff] %v9210_v17  ;;  %v2715_v17 = vsel %vm1145_vm1, %v9079_v19, 0.0  ;;  %v4290_v19 = vsel %vm1145_vm1, %v9071_v9, 0.0 }
 0x37b   : > { %v9218_v6 = vpop.xlane.xlu0 %1228 }
 0x37c   : > { %13613 = vst [vmem:[#allocation67_spill] sm:$0xff] %v9218_v6  ;;  %v9234_v6 = vpop.permute.xlu1 %2634 }
 0x37f   : > { %v9224_v35 = vpop.permute.xlu0 %2632 }
 0x380   : > { %v9240_v23 = vpop.permute.xlu1 %2670 }
 0x383   : > { %v9232_v40 = vpop.permute.xlu0 %2668 }
 0x38d   : > { %2648 = vrot.lane.b32.xlu0 %v9208_v27, %s8360_s19  ;;  %s8256_s19 = scalar_lea.vmem %s8255_s18, 2048 }
 0x38e   : > { %p8258_p2 = scmp.lt.s32.totalorder %s8256_s19, %s8250_s16 }
 0x390   : > { %p8259_p3 = por %p8258_p2, %p8257_p1 }
 0x391   : > { %4172 = vrot.lane.b32.xlu0 %v9208_v27, %s8361_s20 }
 0x392   : > { %p8260_p5 = pnand %p8259_p3, %p8253_p0 }
 0x396   : > { %1195 = vadd.xlane.f32.xlu1 %v1194_v56  ;;  %v9238_v56 = vpop.permute.xlu0 %4156 }
 0x39a   : > { %2716 = vadd.xlane.f32.xlu1 %v2715_v17  ;;  %v9246_v17 = vpop.permute.xlu0 %4192 }
 0x39e   : > { %4240 = vadd.xlane.f32.xlu1 %v4239_v45  ;;  %v9248_v45 = vpop.permute.xlu1 %4158 }
 0x3a2   : > { %2767 = vadd.xlane.f32.xlu1 %v2766_v14  ;;  %v9252_v14 = vpop.xlane.xlu0 %1180  ;;  %v9256_v9 = vpop.permute.xlu1 %4194 }
 0x3a6   : > { %4291 = vadd.xlane.f32.xlu1 %v4290_v19  ;;  %v4293_v19 = vsel %vm1145_vm1, %v9100_v55, 0.0  ;;  %v9264_v10 = vpop.xlane.xlu1 %1171  ;;  %v4236_v55 = vsel %vm1145_vm1, %v9055_v3, 0.0  ;;  %v2784_v3 = vsel %vm1145_vm1, %v9190_v30, 0.0  ;;  %v4308_v30 = vsel %vm1145_vm1, %v9202_v12, 0.0 }
 0x3a7   : > { %v2790_v12 = vsel %vm1145_vm1, %v9232_v40, 0.0  ;;  %v4314_v40 = vsel %vm1145_vm1, %v9246_v17, 0.0  ;;  %v2733_v17 = vsel %vm1145_vm1, %v9192_v20, 0.0 }
 0x3aa   : > { %2773 = vadd.xlane.f32.xlu1 %v2772_v62  ;;  %v9262_v62 = vpop.xlane.xlu0 %1234 }
 0x3ae   : > { %4297 = vadd.xlane.f32.xlu1 %v4296_v22  ;;  %v2778_v22 = vsel %vm1145_vm1, %v9151_v1, 0.0  ;;  %v2637_v15 = vpop.permute.xlu0 %2636  ;;  %v2721_v1 = vsel %vm1145_vm1, %v9122_v11, 0.0  ;;  %v4245_v11 = vsel %vm1145_vm1, %v9130_v43, 0.0 }
 0x3b0   : > { %2770 = vadd.xlane.f32.xlu0 %v2769_v50  ;;  %v2712_v50 = vsel %vm1145_vm1, %v9048_v31, 0.0 }
 0x3b2   : > { %2725 = vadd.xlane.f32.xlu1 %v2724_v32  ;;  %v9272_v32 = vpop.xlane.xlu1 %1225  ;;  %v2673_v31 = vpop.permute.xlu0 %2672 }
 0x3b4   : > { %4294 = vadd.xlane.f32.xlu0 %v4293_v19  ;;  %v4302_v19 = vsel %vm1145_vm1, %v9161_v18, 0.0 }
 0x3b6   : > { %2779 = vadd.xlane.f32.xlu1 %v2778_v22  ;;  %v9280_v22 = vpop.permute.xlu1 %2638  ;;  %v4161_v18 = vpop.permute.xlu0 %4160 }
 0x3b8   : > { %2713 = vadd.xlane.f32.xlu0 %v2712_v50  ;;  %v2775_v50 = vsel %vm1145_vm1, %v9126_v46, 0.0 }
 0x3ba   : > { %4249 = vadd.xlane.f32.xlu1 %v4248_v8  ;;  %v9288_v8 = vpop.permute.xlu1 %2674  ;;  %v4197_v46 = vpop.permute.xlu0 %4196 }
 0x3bc   : > { %4237 = vadd.xlane.f32.xlu0 %v4236_v55  ;;  %v4254_v55 = vsel %vm1145_vm1, %v9194_v36, 0.0  ;;  %v2736_v36 = vsel %vm1145_vm1, %v9224_v35, 0.0  ;;  %v4260_v35 = vsel %vm1145_vm1, %v9238_v56, 0.0 }
 0x3be   : > { %4303 = vadd.xlane.f32.xlu1 %v4302_v19  ;;  %v9296_v19 = vpop.permute.xlu1 %4162  ;;  %v9302_v43 = vpop.xlane.xlu0 %1186 }
 0x3c0   : > { %2722 = vadd.xlane.f32.xlu0 %v2721_v1  ;;  %v2718_v1 = vsel %vm1145_vm1, %v9095_v2, 0.0 }
 0x3c2   : > { %2731 = vadd.xlane.f32.xlu1 %v2730_v28  ;;  %v9306_v28 = vpop.permute.xlu1 %4198 }
 0x3c4   : > { %2776 = vadd.xlane.f32.xlu0 %v2775_v50  ;;  %v9312_v50 = vpop.xlane.xlu0 %1240 }
 0x3c6   : > { %2785 = vadd.xlane.f32.xlu1 %v2784_v3  ;;  %v9314_v2 = vpop.xlane.xlu1 %1177  ;;  %v2727_v3 = vsel %vm1145_vm1, %v9153_v61, 0.0  ;;  %v2742_v61 = vsel %vm1145_vm1, %v2637_v15, 0.0  ;;  %v2787_v15 = vsel %vm1145_vm1, %v9196_v4, 0.0 }
 0x3c8   : > { %4246 = vadd.xlane.f32.xlu0 %v4245_v11  ;;  %v2641_v11 = vpop.permute.xlu0 %2640 }
 0x3c9   : > { %v2748_v20 = vsel %vm1145_vm1, %v2641_v11, 0.0 }
 0x3ca   : > { %4255 = vadd.xlane.f32.xlu1 %v4254_v55  ;;  %v9322_v55 = vpop.xlane.xlu1 %1231 }
 0x3cc   : > { %4300 = vadd.xlane.f32.xlu0 %v4299_v34  ;;  %v4251_v34 = vsel %vm1145_vm1, %v9163_v39, 0.0  ;;  %v4266_v39 = vsel %vm1145_vm1, %v4161_v18, 0.0  ;;  %v4311_v18 = vsel %vm1145_vm1, %v9214_v42, 0.0 }
 0x3ce   : > { %4309 = vadd.xlane.f32.xlu1 %v4308_v30  ;;  %v2677_v30 = vpop.permute.xlu0 %2676  ;;  %v2643_v56 = vpop.permute.xlu1 %2642 }
 0x3d0   : > { %2719 = vadd.xlane.f32.xlu0 %v2718_v1  ;;  %v2796_v1 = vsel %vm1145_vm1, %v2673_v31, 0.0  ;;  %v4257_v31 = vsel %vm1145_vm1, %v9204_v37, 0.0 }
 0x3d2   : > { %2737 = vadd.xlane.f32.xlu1 %v2736_v36  ;;  %v4165_v36 = vpop.permute.xlu0 %4164 }
 0x3d3   : > { %v4272_v11 = vsel %vm1145_vm1, %v4165_v36, 0.0  ;;  %v2745_v36 = vsel %vm1145_vm1, %v9280_v22, 0.0 }
 0x3d4   : > { %4243 = vadd.xlane.f32.xlu0 %v4242_v57  ;;  %v2679_v57 = vpop.permute.xlu1 %2678 }
 0x3d5   : > { %v2805_v22 = vsel %vm1145_vm1, %v2679_v57, 0.0 }
 0x3d6   : > { %2791 = vadd.xlane.f32.xlu1 %v2790_v12  ;;  %v4320_v12 = vsel %vm1145_vm1, %v4197_v46, 0.0  ;;  %v4201_v29 = vpop.permute.xlu0 %4200  ;;  %v2739_v46 = vsel %vm1145_vm1, %v9234_v6, 0.0  ;;  %v4263_v6 = vsel %vm1145_vm1, %v9248_v45, 0.0  ;;  %v2799_v45 = vsel %vm1145_vm1, %v9288_v8, 0.0 }
 0x3d8   : > { %2728 = vadd.xlane.f32.xlu0 %v2727_v3  ;;  %v4167_v3 = vpop.permute.xlu1 %4166 }
 0x3d9   : > { %v4275_v8 = vsel %vm1145_vm1, %v4167_v3, 0.0 }
 0x3da   : > { %4261 = vadd.xlane.f32.xlu1 %v4260_v35  ;;  %v9341_v35 = vpop.xlane.xlu0 %1192 }
 0x3dc   : > { %2782 = vadd.xlane.f32.xlu0 %v2781_v44  ;;  %v4203_v4 = vpop.permute.xlu1 %4202  ;;  %v2802_v44 = vsel %vm1145_vm1, %v2677_v30, 0.0 }
 0x3de   : > { %4315 = vadd.xlane.f32.xlu1 %v4314_v40  ;;  %v2645_v40 = vpop.permute.xlu0 %2644 }
 0x3df   : > { %v2754_v42 = vsel %vm1145_vm1, %v2645_v40, 0.0 }
 0x3e0   : > { %4252 = vadd.xlane.f32.xlu0 %v4251_v34  ;;  %v9348_v37 = vpop.xlane.xlu1 %1183  ;;  %v2793_v34 = vsel %vm1145_vm1, %v9240_v23, 0.0  ;;  %v4326_v23 = vsel %vm1145_vm1, %v4201_v29, 0.0 }
 0x3e2   : > { %2743 = vadd.xlane.f32.xlu1 %v2742_v61  ;;  %v4169_v61 = vpop.permute.xlu0 %4168 }
 0x3e4   : > { %4306 = vadd.xlane.f32.xlu0 %v4305_v51  ;;  %v9354_v30 = vpop.xlane.xlu1 %1237  ;;  %v4278_v51 = vsel %vm1145_vm1, %v4169_v61, 0.0  ;;  %v4329_v61 = vsel %vm1145_vm1, %v4203_v4, 0.0 }
 0x3e6   : > { %2797 = vadd.xlane.f32.xlu1 %v2796_v1  ;;  %v4317_v1 = vsel %vm1145_vm1, %v9256_v9, 0.0  ;;  %v2751_v9 = vsel %vm1145_vm1, %v2643_v56, 0.0 }
 0x3e8   : > { %2734 = vadd.xlane.f32.xlu0 %v2733_v17  ;;  %v2647_v17 = vpop.permute.xlu1 %2646 }
 0x3ea   : > { %4267 = vadd.xlane.f32.xlu1 %v4266_v39 }
 0x3ec   : > { %2788 = vadd.xlane.f32.xlu0 %v2787_v15  ;;  %v4171_v39 = vpop.permute.xlu1 %4170 }
 0x3ed   : > { %v4281_v56 = vsel %vm1145_vm1, %v4171_v39, 0.0 }
 0x3ee   : > { %4321 = vadd.xlane.f32.xlu1 %v4320_v12  ;;  %v4269_v12 = vsel %vm1145_vm1, %v9296_v19, 0.0 }
 0x3f0   : > { %4258 = vadd.xlane.f32.xlu0 %v4257_v31  ;;  %v9366_v15 = vpop.xlane.xlu1 %1189 }
 0x3f2   : > { %2749 = vadd.xlane.f32.xlu1 %v2748_v20 }
 0x3f4   : > { %4312 = vadd.xlane.f32.xlu0 %v4311_v18  ;;  %v2651_v29 = vpop.permute.xlu1 %2650  ;;  %v2757_v18 = vsel %vm1145_vm1, %v2647_v17, 0.0 }
 0x3f6   : > { %2803 = vadd.xlane.f32.xlu1 %v2802_v44 }
 0x3f8   : > { %2740 = vadd.xlane.f32.xlu0 %v2739_v46  ;;  %v4175_v31 = vpop.permute.xlu1 %4174 }
 0x3f9   : > { %v4287_v3 = vsel %vm1145_vm1, %v4175_v31, 0.0 }
 0x3fa   : > { %4273 = vadd.xlane.f32.xlu1 %v4272_v11 }
 0x3fc   : > { %2794 = vadd.xlane.f32.xlu0 %v2793_v34  ;;  %v4323_v34 = vsel %vm1145_vm1, %v9306_v28, 0.0 }
 0x3fe   : > { %2755 = vadd.xlane.f32.xlu1 %v2754_v42 }
 0x400   : > { %4264 = vadd.xlane.f32.xlu0 %v4263_v6  ;;  %v1199_v57 = vpop.xlane.xlu0 %1198 }
 0x402   : > { %4279 = vadd.xlane.f32.xlu1 %v4278_v51 }
 0x404   : > { %4318 = vadd.xlane.f32.xlu0 %v4317_v1  ;;  %v2649_v40 = vpop.permute.xlu0 %2648 }
 0x405   : > { %v2760_v17 = vsel %vm1145_vm1, %v2649_v40, 0.0 }
 0x406   : > { %4327 = vadd.xlane.f32.xlu1 %v4326_v23 }
 0x408   : > { %2746 = vadd.xlane.f32.xlu0 %v2745_v36  ;;  %v4173_v6 = vpop.permute.xlu0 %4172 }
 0x409   : > { %v4284_v28 = vsel %vm1145_vm1, %v4173_v6, 0.0 }
 0x40c   : > { %2800 = vadd.xlane.f32.xlu0 %v2799_v45 }
 0x410   : > { %4270 = vadd.xlane.f32.xlu0 %v4269_v12 }
 0x414   : > { %2752 = vadd.xlane.f32.xlu0 %v2751_v9 }
 0x417   : > { %5664 = vrot.lane.b32.xlu1 %v8738_v58, %s8362_s21  ;;  %v2763_v58 = vsel %vm1145_vm1, %v2651_v29, 0.0 }
 0x418   : > { %2806 = vadd.xlane.f32.xlu0 %v2805_v22 }
 0x41c   : > { %4276 = vadd.xlane.f32.xlu0 %v4275_v8 }
 0x41f   : > { %v1196_v20 = vpop.xlane.xlu1 %1195 }
 0x420   : > { %2758 = vadd.xlane.f32.xlu0 %v2757_v18 }
 0x423   : > { %v9376_v19 = vpop.xlane.xlu1 %2716 }
 0x424   : > { %4282 = vadd.xlane.f32.xlu0 %v4281_v56  ;;  %v9449_v56 = vmul.f32 0.17677669, %v1196_v20  ;;  %v9471_v20 = vmul.f32 0.17677669, %v9046_v49  ;;  %v9489_v49 = vmul.f32 0.17677669, %v9091_v63 }
 0x425   : > { %v9506_v63 = vmul.f32 0.17677669, %v9135_v59 }
 0x426   : > { %13617 = vst [vmem:[#allocation70_spill] sm:$0xff] %v9449_v56  ;;  %13620 = vst [vmem:[#allocation73_spill] sm:$0xff] %v9471_v20 }
 0x427   : > { %v9379_v44 = vpop.xlane.xlu1 %4240  ;;  %13622 = vst [vmem:[#allocation75_spill] sm:$0xff] %v9489_v49  ;;  %13625 = vst [vmem:[#allocation78_spill] sm:$0xff] %v9506_v63 }
 0x428   : > { %2764 = vadd.xlane.f32.xlu0 %v2763_v58 }
 0x42b   : > { %v9382_v46 = vpop.xlane.xlu1 %2767 }
 0x42c   : > { %4288 = vadd.xlane.f32.xlu0 %v4287_v3  ;;  %v9463_v3 = vmul.f32 0.17677669, %v1199_v57 }
 0x42e   : > { %13619 = vst [vmem:[#allocation72_spill] sm:$0xff] %v9463_v3 }
 0x42f   : > { %v9385_v11 = vpop.xlane.xlu1 %4291 }
 0x430   : > { %4324 = vadd.xlane.f32.xlu0 %v4323_v34 }
 0x433   : > { %v9389_v42 = vpop.xlane.xlu1 %2773 }
 0x434   : > { %4330 = vadd.xlane.f32.xlu0 %v4329_v61 }
 0x437   : > { %v9392_v51 = vpop.xlane.xlu1 %4297 }
 0x439   : > { %v9394_v1 = vpop.xlane.xlu0 %2770 }
 0x43b   : > { %2761 = vadd.xlane.f32.xlu1 %v2760_v17  ;;  %v9397_v23 = vpop.xlane.xlu1 %2725 }
 0x43d   : > { %v9399_v36 = vpop.xlane.xlu0 %4294 }
 0x43f   : > { %4285 = vadd.xlane.f32.xlu1 %v4284_v28  ;;  %v9404_v45 = vpop.xlane.xlu1 %2779 }
 0x441   : > { %v9402_v39 = vpop.xlane.xlu0 %2713 }
 0x443   : > { %v9408_v12 = vpop.xlane.xlu1 %4249 }
 0x445   : > { %v9406_v4 = vpop.xlane.xlu0 %4237 }
 0x447   : > { %v9416_v22 = vpop.xlane.xlu1 %4303 }
 0x449   : > { %v9410_v9 = vpop.xlane.xlu0 %2722 }
 0x44a   : > { %5666 = vrot.lane.b32.xlu0 %v8712_v47, %s8362_s21 }
 0x44b   : > { %v9426_v8 = vpop.xlane.xlu1 %2731 }
 0x44d   : > { %v9414_v29 = vpop.xlane.xlu0 %2776 }
 0x44e   : > { %5670 = vrot.lane.b32.xlu0 %v8766_v7, %s8362_s21 }
 0x450   : > { %5668 = vrot.lane.b32.xlu1 %v8792_v24, %s8362_s21  ;;  %v9438_v24 = vpop.xlane.xlu1 %2785 }
 0x451   : > { %v9422_v31 = vpop.xlane.xlu0 %4246 }
 0x452   : > { %5674 = vrot.lane.b32.xlu0 %v8816_v41, %s8362_s21  ;;  %v13616_v41 = vlaneseq }
 0x454   : > { %5672 = vrot.lane.b32.xlu1 %v8844_v54, %s8362_s21  ;;  %v1307_v18 = vand.u32 127, %v13616_v41  ;;  %v9503_v41 = vmul.f32 0.17677669, %v9075_v26 }
 0x455   : > { %v9430_v47 = vpop.xlane.xlu0 %4300 }
 0x456   : > { %5698 = vrot.lane.b32.xlu0 %v9172_v52, %s8362_s21  ;;  %v1312_v52 = vadd.s32 4294967288, %v1307_v18  ;;  %13624 = vst [vmem:[#allocation77_spill] sm:$0xff] %v9503_v41 }
 0x458   : > { %5696 = vrot.lane.b32.xlu1 %v9208_v27, %s8362_s21  ;;  %v9451_v27 = vpop.xlane.xlu1 %4255 }
 0x459   : > { %v9436_v7 = vpop.xlane.xlu0 %2719 }
 0x45a   : > { %5702 = vrot.lane.b32.xlu0 %v8716_v48, %s8362_s21  ;;  %v9458_v48 = vsub.s32 %v1307_v18, %v8545_v38  ;;  %v9509_v18 = vmul.f32 0.17677669, %v9104_v0  ;;  %v13631_v0 = vld [vmem:[#allocation63_spill] sm:$0xff] }
 0x45c   : > { %5700 = vrot.lane.b32.xlu1 %v8744_v60, %s8362_s21  ;;  %v9461_v60 = vmul.f32 0.17677669, %v9114_v33  ;;  %v9478_v33 = vmul.f32 0.17677669, %v9147_v5  ;;  %v9486_v34 = vpop.xlane.xlu1 %4309  ;;  %v9494_v5 = vmul.f32 0.17677669, %v9188_v16 }
 0x45d   : > { %v9445_v54 = vpop.xlane.xlu0 %4243  ;;  %13626 = vst [vmem:[#allocation79_spill] sm:$0xff] %v9509_v18 }
 0x45e   : > { %5678 = vrot.lane.b32.xlu0 %v8870_v21, %s8362_s21  ;;  %13618 = vst [vmem:[#allocation71_spill] sm:$0xff] %v9461_v60  ;;  %v9468_v21 = vsub.s32 %v1312_v52, %v8545_v38  ;;  %13621 = vst [vmem:[#allocation74_spill] sm:$0xff] %v9478_v33  ;;  %v1403_v6 = vrot.slane %v9478_v33, %v9458_v48  ;;  %v13627_v52 = vld [vmem:[#allocation69_spill] sm:$0xff]  ;;  %v1412_v26 = vrot.slane %v9494_v5, %v9458_v48 }
 0x45f   : > { %13623 = vst [vmem:[#allocation76_spill] sm:$0xff] %v9494_v5 }
 0x460   : > { %5676 = vrot.lane.b32.xlu1 %v8896_v53, %s8362_s21  ;;  %v1385_v53 = vrot.slane %v9449_v56, %v9458_v48  ;;  %v1389_v40 = vrot.slane %v9463_v3, %v9468_v21  ;;  %v1407_v16 = vrot.slane %v9489_v49, %v9468_v21  ;;  %v9526_v3 = vmul.f32 0.17677669, %v13631_v0  ;;  %v13638_v56 = vld [vmem:[#allocation67_spill] sm:$0xff] }
 0x461   : > { %v9455_v58 = vpop.xlane.xlu0 %2728 }
 0x462   : > { %5706 = vrot.lane.b32.xlu0 %v8774_v13, %s8362_s21  ;;  %v1394_v13 = vrot.slane %v9461_v60, %v9458_v48  ;;  %v1390_v61 = vsel %vm1317_vm2, %v1389_v40, %v1385_v53  ;;  %v9514_v53 = vmul.f32 0.17677669, %v13627_v52  ;;  %v1408_v59 = vsel %vm1317_vm2, %v1407_v16, %v1403_v6  ;;  %13632 = vst [vmem:[#allocation63_spill] sm:$0xff] %v9526_v3  ;;  %v13634_v16 = vld [vmem:[#allocation54_spill] sm:$0xff] }
 0x463   : > { %v1311_v52 = vrot.slane %v9503_v41, %v9458_v48  ;;  %v1316_v6 = vrot.slane %v9509_v18, %v9468_v21  ;;  %v9541_v5 = vmul.f32 0.17677669, %v13634_v16  ;;  %v13636_v60 = vld [vmem:[#allocation58_spill] sm:$0xff]  ;;  %v1425_v16 = vrot.slane %v9526_v3, %v9468_v21 }
 0x464   : > { %5704 = vrot.lane.b32.xlu1 %v8798_v25, %s8362_s21  ;;  %v1398_v25 = vrot.slane %v9471_v20, %v9468_v21  ;;  %13628 = vst [vmem:[#allocation69_spill] sm:$0xff] %v9514_v53  ;;  %v13629_v20 = vld [vmem:[#allocation57_spill] sm:$0xff]  ;;  %v1421_v0 = vrot.slane %v9514_v53, %v9458_v48  ;;  %v9560_v41 = vmul.f32 0.17677669, %v9322_v55  ;;  %v9574_v3 = vmul.f32 0.17677669, %v9262_v62 }
 0x465   : > { %v9480_v57 = vpop.xlane.xlu0 %2782  ;;  %13635 = vst [vmem:[#allocation54_spill] sm:$0xff] %v9541_v5  ;;  %v13644_v55 = vld [vmem:[#allocation68_spill] sm:$0xff] }
 0x466   : > { %v1399_v28 = vsel %vm1317_vm2, %v1398_v25, %v1394_v13  ;;  %v9518_v13 = vmul.f32 0.17677669, %v13629_v20  ;;  %v9522_v25 = vpop.xlane.xlu1 %2737  ;;  %v1416_v20 = vrot.slane %v9506_v63, %v9468_v21  ;;  %v9548_v63 = vmul.f32 0.17677669, %v13636_v60  ;;  %13642 = vst [vmem:[#allocation81_spill] sm:$0xff] %v9560_v41  ;;  %13643 = vst [vmem:[#allocation82_spill] sm:$0xff] %v9574_v3 }
 0x467   : > { %v1468_v40 = vsel %vm1454_vm3, %v1399_v28, %v1390_v61  ;;  %v9535_v61 = vmul.f32 0.17677669, %v9272_v32  ;;  %v1318_v60 = vsel %vm1317_vm2, %v1316_v6, %v1311_v52  ;;  %v9577_v38 = vmul.f32 0.17677669, %v13644_v55 }
 0x468   : > { %13630 = vst [vmem:[#allocation57_spill] sm:$0xff] %v9518_v13  ;;  %v1469_v28 = vsel %vm1456_vm4, %v1408_v59, %v1468_v40  ;;  %v1322_v33 = vrot.slane %v9518_v13, %v9458_v48  ;;  %13637 = vst [vmem:[#allocation58_spill] sm:$0xff] %v9548_v63  ;;  %v1417_v32 = vsel %vm1317_vm2, %v1416_v20, %v1412_v26  ;;  %v9552_v40 = vmul.f32 0.17677669, %v13638_v56  ;;  %v13640_v59 = vld [vmem:[#allocation64_spill] sm:$0xff] }
 0x469   : > { %v9499_v17 = vpop.xlane.xlu0 %4252  ;;  %13633 = vst [vmem:[#allocation80_spill] sm:$0xff] %v9535_v61  ;;  %v9555_v18 = vmul.f32 0.17677669, %v13640_v59  ;;  %v1470_v13 = vsel %vm1458_vm5, %v1417_v32, %v1469_v28  ;;  %v1430_v26 = vrot.slane %v9535_v61, %v9458_v48  ;;  %v1326_v20 = vrot.slane %v9541_v5, %v9468_v21  ;;  %13645 = vst [vmem:[#allocation68_spill] sm:$0xff] %v9577_v38 }
 0x46a   : > { %13639 = vst [vmem:[#allocation67_spill] sm:$0xff] %v9552_v40  ;;  %v9568_v56 = vpop.xlane.xlu1 %2791  ;;  %v1426_v59 = vsel %vm1317_vm2, %v1425_v16, %v1421_v0  ;;  %v1434_v52 = vrot.slane %v9552_v40, %v9468_v21  ;;  %v9582_v28 = vmul.f32 0.17677669, %v9354_v30  ;;  %v1335_v0 = vrot.slane %v9548_v63, %v9468_v21  ;;  %v13652_v63 = vld [vmem:[#allocation66_spill] sm:$0xff] }
 0x46b   : > { %13641 = vst [vmem:[#allocation64_spill] sm:$0xff] %v9555_v18  ;;  %v1471_v6 = vsel %vm1460_vm6, %v1426_v59, %v1470_v13  ;;  %v1327_v32 = vsel %vm1317_vm2, %v1326_v20, %v1322_v33  ;;  %v1331_v62 = vrot.slane %v9555_v18, %v9458_v48  ;;  %v1439_v16 = vrot.slane %v9560_v41, %v9458_v48  ;;  %v13649_v33 = vld [vmem:[#allocation62_spill] sm:$0xff] }
 0x46c   : > { %13646 = vst [vmem:[#allocation83_spill] sm:$0xff] %v9582_v28  ;;  %v9595_v40 = vmul.f32 0.17677669, %v9264_v10  ;;  %v1435_v30 = vsel %vm1317_vm2, %v1434_v52, %v1430_v26  ;;  %v9599_v13 = vmul.f32 0.17677669, %v9312_v50  ;;  %v1443_v59 = vrot.slane %v9574_v3, %v9468_v21 }
 0x46d   : > { %v9528_v49 = vpop.xlane.xlu0 %4306  ;;  %v9602_v20 = vmul.f32 0.17677669, %v13649_v33  ;;  %v9607_v61 = vmul.f32 0.17677669, %v9314_v2  ;;  %v1472_v41 = vsel %vm1462_vm7, %v1435_v30, %v1471_v6  ;;  %v1340_v10 = vrot.slane %v9577_v38, %v9458_v48 }
 0x46e   : > { %13647 = vst [vmem:[#allocation84_spill] sm:$0xff] %v9595_v40  ;;  %13648 = vst [vmem:[#allocation85_spill] sm:$0xff] %v9599_v13  ;;  %v9613_v26 = vmul.f32 0.17677669, %v13652_v63  ;;  %v9616_v50 = vmul.f32 0.17677669, %v9348_v37  ;;  %v1448_v52 = vrot.slane %v9582_v28, %v9458_v48  ;;  %v9620_v33 = vpop.xlane.xlu1 %4261  ;;  %v1444_v30 = vsel %vm1317_vm2, %v1443_v59, %v1439_v16 }
 0x46f   : > { %13650 = vst [vmem:[#allocation62_spill] sm:$0xff] %v9602_v20  ;;  %13651 = vst [vmem:[#allocation86_spill] sm:$0xff] %v9607_v61  ;;  %v9623_v3 = vmul.f32 0.17677669, %v9252_v14  ;;  %v9626_v2 = vmul.f32 0.17677669, %v9366_v15  ;;  %v1349_v37 = vrot.slane %v9595_v40, %v9458_v48  ;;  %v1452_v28 = vrot.slane %v9599_v13, %v9468_v21 }
 0x470   : > { %13653 = vst [vmem:[#allocation66_spill] sm:$0xff] %v9613_v26  ;;  %13654 = vst [vmem:[#allocation87_spill] sm:$0xff] %v9616_v50  ;;  %v9634_v63 = vmul.f32 0.17677669, %v9302_v43  ;;  %v1473_v14 = vsel %vm1464_vm8, %v1444_v30, %v1472_v41  ;;  %v1336_v38 = vsel %vm1317_vm2, %v1335_v0, %v1331_v62  ;;  %v1344_v15 = vrot.slane %v9602_v20, %v9468_v21 }
 0x471   : > { %v9562_v53 = vpop.xlane.xlu0 %2734  ;;  %13655 = vst [vmem:[#allocation88_spill] sm:$0xff] %v9623_v3  ;;  %13656 = vst [vmem:[#allocation89_spill] sm:$0xff] %v9626_v2  ;;  %v1358_v16 = vrot.slane %v9607_v61, %v9458_v48  ;;  %v9645_v59 = vmul.f32 0.17677669, %v9341_v35  ;;  %v1353_v43 = vrot.slane %v9613_v26, %v9468_v21  ;;  %v1367_v40 = vrot.slane %v9616_v50, %v9458_v48  ;;  %v13672_v50 = vld [vmem:[#allocation37_spill] sm:$0xff] }
 0x472   : > { %13657 = vst [vmem:[#allocation90_spill] sm:$0xff] %v9634_v63  ;;  %v1453_v13 = vsel %vm1317_vm2, %v1452_v28, %v1448_v52  ;;  %v1345_v41 = vsel %vm1317_vm2, %v1344_v15, %v1340_v10  ;;  %v1362_v0 = vrot.slane %v9623_v3, %v9468_v21  ;;  %v1376_v62 = vrot.slane %v9626_v2, %v9458_v48  ;;  %v9664_v52 = vpop.xlane.xlu1 %4315  ;;  %v13675_v61 = vld [vmem:[#allocation41_spill] sm:$0xff] }
 0x473   : > { %13658 = vst [vmem:[#allocation91_spill] sm:$0xff] %v9645_v59  ;;  %v1474_v35 = vsel %vm1466_vm9, %v1453_v13, %v1473_v14  ;;  %v1455_v26 = vsel %vm1454_vm3, %v1327_v32, %v1318_v60  ;;  %v1354_v20 = vsel %vm1317_vm2, %v1353_v43, %v1349_v37  ;;  %v1371_v28 = vrot.slane %v9634_v63, %v9468_v21 }
 0x474   : > { %v1457_v10 = vsel %vm1456_vm4, %v1336_v38, %v1455_v26  ;;  %v1363_v15 = vsel %vm1317_vm2, %v1362_v0, %v1358_v16  ;;  %v1380_v3 = vrot.slane %v9645_v59, %v9468_v21  ;;  %v1480_v13 = vsel %vm419_vm0, %v1474_v35, -inf  ;;  %v13668_v59 = vld [vmem:[#allocation48_spill] sm:$0xff] }
 0x475   : > { %v9592_v55 = vpop.xlane.xlu0 %2788  ;;  %v1459_v2 = vsel %vm1458_vm5, %v1345_v41, %v1457_v10  ;;  %v1372_v60 = vsel %vm1317_vm2, %v1371_v28, %v1367_v40  ;;  %v13659_v10 = vld [vmem:[#allocation32_spill] sm:$0xff] }
 0x476   : > { %v1381_v37 = vsel %vm1317_vm2, %v1380_v3, %v1376_v62  ;;  %v1461_v14 = vsel %vm1460_vm6, %v1354_v20, %v1459_v2  ;;  %v9679_v16 = vpop.xlane.xlu1 %2743 }
 0x477   : > { %v1463_v38 = vsel %vm1462_vm7, %v1363_v15, %v1461_v14 }
 0x478   : > { %v1465_v26 = vsel %vm1464_vm8, %v1372_v60, %v1463_v38  ;;  %v13662_v60 = vld [vmem:[#allocation20_spill] sm:$0xff]  ;;  %v13663_v38 = vld [vmem:[#allocation23_spill] sm:$0xff] }
 0x479   : > { %v9628_v6 = vpop.xlane.xlu0 %4258  ;;  %v1467_v43 = vsel %vm1466_vm9, %v1381_v37, %v1465_v26  ;;  %v13664_v26 = vld [vmem:[#allocation40_spill] sm:$0xff] }
 0x47a   : > { %v1477_v0 = vsel %vm419_vm0, %v1467_v43, -inf  ;;  %v9687_v35 = vpop.xlane.xlu1 %2797  ;;  %v13665_v43 = vld [vmem:[#allocation44_spill] sm:$0xff] }
 0x47d   : > { %v9657_v30 = vpop.xlane.xlu0 %4312 }
 0x47e   : > { %v9691_v20 = vpop.xlane.xlu1 %4267 }
 0x481   : > { %v9673_v32 = vpop.xlane.xlu0 %2740  ;;  %1481 = vmax.xlane.f32.xlu0 %v1480_v13  ;;  %v13661_v13 = vld [vmem:[#allocation36_spill] sm:$0xff] }
 0x482   : > { %v9697_v28 = vpop.xlane.xlu1 %4321 }
 0x485   : > { %v9682_v41 = vpop.xlane.xlu0 %2794 }
 0x486   : > { %v9707_v37 = vpop.xlane.xlu1 %2749 }
 0x488   : > { %1478 = vmax.xlane.f32.xlu1 %v1477_v0 }
 0x489   : > { %v9685_v40 = vpop.xlane.xlu0 %4264 }
 0x48a   : > { %v9717_v0 = vpop.xlane.xlu1 %2803 }
 0x48d   : > { %v9689_v3 = vpop.xlane.xlu0 %4318 }
 0x491   : > { %v9693_v2 = vpop.xlane.xlu0 %2746 }
 0x495   : > { %v9695_v62 = vpop.xlane.xlu0 %2800 }
 0x497   : > { %5682 = vrot.lane.b32.xlu0 %v13659_v10, %s8362_s21 }
 0x499   : > { %v9701_v15 = vpop.xlane.xlu0 %4270  ;;  %5680 = vrot.lane.b32.xlu1 %v13661_v13, %s8362_s21  ;;  %v13666_v13 = vld [vmem:[#allocation26_spill] sm:$0xff] }
 0x49a   : > { %13660 = vst [vmem:[#allocation32_spill] sm:$0xff] %v9701_v15  ;;  %v9769_v15 = vmul.f32 0.17677669, %v9402_v39 }
 0x49b   : > { %5710 = vrot.lane.b32.xlu0 %v13662_v60, %s8362_s21  ;;  %v13667_v60 = vld [vmem:[#allocation29_spill] sm:$0xff] }
 0x49c   : > { %13683 = vst [vmem:[#allocation48_spill] sm:$0xff] %v9769_v15 }
 0x49d   : > { %v9709_v14 = vpop.xlane.xlu0 %2752  ;;  %5708 = vrot.lane.b32.xlu1 %v13663_v38, %s8362_s21  ;;  %v9727_v38 = vpop.xlane.xlu1 %4273 }
 0x49f   : > { %5686 = vrot.lane.b32.xlu0 %v13664_v26, %s8362_s21  ;;  %v13670_v26 = vld [vmem:[#allocation52_spill] sm:$0xff] }
 0x4a1   : > { %5684 = vrot.lane.b32.xlu1 %v13665_v43, %s8362_s21  ;;  %v9719_v10 = vpop.xlane.xlu0 %2806  ;;  %v13671_v43 = vld [vmem:[#allocation33_spill] sm:$0xff] }
 0x4a3   : > { %5714 = vrot.lane.b32.xlu0 %v13666_v13, %s8362_s21  ;;  %v9737_v13 = vpop.xlane.xlu1 %2755 }
 0x4a5   : > { %5712 = vrot.lane.b32.xlu1 %v13667_v60, %s8362_s21  ;;  %v9729_v63 = vpop.xlane.xlu0 %4276  ;;  %v13673_v60 = vld [vmem:[#allocation56_spill] sm:$0xff] }
 0x4a6   : > { %13669 = vst [vmem:[#allocation36_spill] sm:$0xff] %v9729_v63  ;;  %v9755_v63 = vmul.f32 0.17677669, %v9376_v19  ;;  %v9775_v19 = vmul.f32 0.17677669, %v9389_v42 }
 0x4a7   : > { %5690 = vrot.lane.b32.xlu0 %v13668_v59, %s8362_s21  ;;  %v13674_v59 = vld [vmem:[#allocation60_spill] sm:$0xff]  ;;  %v9750_v5 = vpop.xlane.xlu1 %4279 }
 0x4a8   : > { %13678 = vst [vmem:[#allocation40_spill] sm:$0xff] %v9755_v63  ;;  %13685 = vst [vmem:[#allocation33_spill] sm:$0xff] %v9775_v19  ;;  %v2879_v39 = vrot.slane %v9755_v63, %v9468_v21  ;;  %v2875_v63 = vrot.slane %v9769_v15, %v9458_v48  ;;  %v9820_v15 = vmul.f32 0.17677669, %v9408_v12 }
 0x4a9   : > { %5688 = vrot.lane.b32.xlu1 %v13670_v26, %s8362_s21  ;;  %v9739_v18 = vpop.xlane.xlu0 %2758  ;;  %v8363_v26 = vmov 0  }
 0x4aa   : > { %7863 = vset.pattern.permute.xlu1 %v8363_v26  ;;  %7862 = vset.pattern.permute.xlu0 %v8363_v26  ;;  %v9772_v26 = vmul.f32 0.17677669, %v9385_v11  ;;  %v9790_v11 = vmul.f32 0.17677669, %v9397_v23 }
 0x4ab   : > { %5718 = vrot.lane.b32.xlu0 %v13671_v43, %s8362_s21  ;;  %v9748_v43 = vmul.f32 0.17677669, %v9394_v1  ;;  %v9766_v1 = vmul.f32 0.17677669, %v9382_v46  ;;  %v9785_v46 = vmul.f32 0.17677669, %v9406_v4  ;;  %v9805_v23 = vpop.xlane.xlu1 %4327 }
 0x4ac   : > { %13684 = vst [vmem:[#allocation52_spill] sm:$0xff] %v9772_v26  ;;  %13689 = vst [vmem:[#allocation60_spill] sm:$0xff] %v9790_v11  ;;  %v9801_v4 = vmul.f32 0.17677669, %v9404_v45 }
 0x4ad   : > { %5716 = vrot.lane.b32.xlu1 %v13672_v50, %s8362_s21  ;;  %13676 = vst [vmem:[#allocation20_spill] sm:$0xff] %v9748_v43  ;;  %v9752_v50 = vpop.xlane.xlu0 %4282  ;;  %13682 = vst [vmem:[#allocation29_spill] sm:$0xff] %v9766_v1 }
 0x4ae   : > { %13677 = vst [vmem:[#allocation23_spill] sm:$0xff] %v9752_v50  ;;  %13688 = vst [vmem:[#allocation56_spill] sm:$0xff] %v9785_v46  ;;  %v2974_v12 = vrot.slane %v9801_v4, %v9458_v48 }
 0x4af   : > { %5694 = vrot.lane.b32.xlu0 %v13673_v60, %s8362_s21  ;;  %v9758_v60 = vmul.f32 0.17677669, %v9399_v36  ;;  %v9778_v36 = vmul.f32 0.17677669, %v9392_v51  ;;  %v13690_v51 = vld [vmem:[#allocation53_spill] sm:$0xff]  ;;  %13691 = vst [vmem:[#allocation41_spill] sm:$0xff] %v9801_v4 }
 0x4b0   : > { %13694 = vst [vmem:[#allocation53_spill] sm:$0xff] %v9820_v15 }
 0x4b1   : > { %5692 = vrot.lane.b32.xlu1 %v13674_v59, %s8362_s21  ;;  %13679 = vst [vmem:[#allocation44_spill] sm:$0xff] %v9758_v60  ;;  %v13680_v59 = vld [vmem:[#allocation45_spill] sm:$0xff]  ;;  %13686 = vst [vmem:[#allocation37_spill] sm:$0xff] %v9778_v36  ;;  %v4484_v42 = vrot.slane %v9758_v60, %v9468_v21  ;;  %v2765_v50 = vpop.xlane.xlu0 %2764  ;;  %v4480_v60 = vrot.slane %v9772_v26, %v9458_v48  ;;  %v9825_v26 = vmul.f32 0.17677669, %v9436_v7 }
 0x4b2   : > { %13692 = vst [vmem:[#allocation45_spill] sm:$0xff] %v9805_v23  ;;  %v4399_v23 = vrot.slane %v9785_v46, %v9458_v48  ;;  %v9842_v7 = vmul.f32 0.17677669, %v9410_v9  ;;  %v9845_v46 = vmul.f32 0.17677669, %v9445_v54 }
 0x4b3   : > { %5722 = vrot.lane.b32.xlu0 %v13675_v61, %s8362_s21  ;;  %v9763_v61 = vmul.f32 0.17677669, %v9379_v44  ;;  %v2960_v44 = vrot.slane %v9748_v43, %v9468_v21  ;;  %v2956_v43 = vrot.slane %v9766_v1, %v9458_v48  ;;  %v9814_v1 = vmul.f32 0.17677669, %v9414_v29 }
 0x4b4   : > { %v9833_v29 = vmul.f32 0.17677669, %v9416_v22  ;;  %13697 = vst [vmem:[#allocation94_spill] sm:$0xff] %v9842_v7  ;;  %13698 = vst [vmem:[#allocation95_spill] sm:$0xff] %v9845_v46  ;;  %v9862_v54 = vmul.f32 0.17677669, %v9422_v31  ;;  %v2888_v31 = vrot.slane %v9842_v7, %v9468_v21  ;;  %v4408_v4 = vrot.slane %v9845_v46, %v9458_v48 }
 0x4b5   : > { %5720 = vrot.lane.b32.xlu1 %v13680_v59, %s8362_s21  ;;  %13681 = vst [vmem:[#allocation26_spill] sm:$0xff] %v9763_v61  ;;  %v13687_v59 = vld [vmem:[#allocation49_spill] sm:$0xff]  ;;  %v9817_v45 = vsel %vm1317_vm2, %v2960_v44, %v2956_v43  ;;  %v9836_v43 = vmul.f32 0.17677669, %v9430_v47  ;;  %v2880_v44 = vsel %vm1317_vm2, %v2879_v39, %v2875_v63  ;;  %v2969_v22 = vrot.slane %v9814_v1, %v9468_v21  ;;  %v9866_v39 = vpop.permute.xlu1 %5664 }
 0x4b6   : > { %13693 = vst [vmem:[#allocation49_spill] sm:$0xff] %v9814_v1  ;;  %13695 = vst [vmem:[#allocation92_spill] sm:$0xff] %v9833_v29  ;;  %v9853_v47 = vmul.f32 0.17677669, %v9438_v24  ;;  %v4417_v63 = vrot.slane %v9820_v15, %v9458_v48  ;;  %v4289_v1 = vpop.xlane.xlu0 %4288  ;;  %v9886_v24 = vmul.f32 0.17677669, %v9499_v17 }
 0x4b7   : > { %5726 = vrot.lane.b32.xlu0 %v13687_v59, %s8362_s21  ;;  %v4403_v59 = vrot.slane %v9763_v61, %v9468_v21  ;;  %v4489_v61 = vrot.slane %v9778_v36, %v9458_v48  ;;  %v9830_v36 = vsel %vm1317_vm2, %v4484_v42, %v4480_v60  ;;  %13696 = vst [vmem:[#allocation93_spill] sm:$0xff] %v9836_v43  ;;  %v9848_v60 = vmul.f32 0.17677669, %v9426_v8 }
 0x4b8   : > { %v9856_v42 = vmul.f32 0.17677669, %v9455_v58  ;;  %13701 = vst [vmem:[#allocation98_spill] sm:$0xff] %v9862_v54  ;;  %v2884_v8 = vrot.slane %v9825_v26, %v9458_v48  ;;  %v9871_v58 = vmul.f32 0.17677669, %v9451_v27  ;;  %v4493_v15 = vrot.slane %v9836_v43, %v9468_v21  ;;  %13704 = vst [vmem:[#allocation101_spill] sm:$0xff] %v9886_v24 }
 0x4b9   : > { %5724 = vrot.lane.b32.xlu1 %v13690_v51, %s8362_s21  ;;  %v2965_v51 = vrot.slane %v9775_v19, %v9458_v48  ;;  %v2893_v19 = vrot.slane %v9790_v11, %v9458_v48  ;;  %13699 = vst [vmem:[#allocation96_spill] sm:$0xff] %v9848_v60  ;;  %v4404_v9 = vsel %vm1317_vm2, %v4403_v59, %v4399_v23  ;;  %v9876_v59 = vmul.f32 0.17677669, %v9486_v34 }
 0x4ba   : > { %13700 = vst [vmem:[#allocation97_spill] sm:$0xff] %v9856_v42  ;;  %13702 = vst [vmem:[#allocation99_spill] sm:$0xff] %v9871_v58  ;;  %v9881_v23 = vmul.f32 0.17677669, %v9522_v25  ;;  %v2902_v27 = vrot.slane %v9848_v60, %v9458_v48  ;;  %v2897_v7 = vrot.slane %v9856_v42, %v9468_v21  ;;  %v4412_v25 = vrot.slane %v9862_v54, %v9468_v21  ;;  %v9923_v54 = vpop.xlane.xlu0 %4324 }
 0x4bb   : > { %13703 = vst [vmem:[#allocation100_spill] sm:$0xff] %v9876_v59  ;;  %v9891_v43 = vsel %vm1317_vm2, %v2969_v22, %v2965_v51  ;;  %v2889_v46 = vsel %vm1317_vm2, %v2888_v31, %v2884_v8  ;;  %v9901_v17 = vmul.f32 0.17677669, %v9568_v56  ;;  %v9904_v11 = vmul.f32 0.17677669, %v9480_v57 }
 0x4bc   : > { %v4426_v51 = vrot.slane %v9871_v58, %v9458_v48  ;;  %v9909_v22 = vsel %vm1317_vm2, %v4493_v15, %v4489_v61  ;;  %v4413_v56 = vsel %vm1317_vm2, %v4412_v25, %v4408_v4  ;;  %v9919_v57 = vmul.f32 0.17677669, %v9620_v33 }
 0x4bd   : > { %v4421_v31 = vrot.slane %v9886_v24, %v9468_v21  ;;  %v3016_v15 = vsel %vm1454_vm3, %v2889_v46, %v2880_v44  ;;  %v2898_v61 = vsel %vm1317_vm2, %v2897_v7, %v2893_v19  ;;  %v9930_v34 = vmul.f32 0.17677669, %v2765_v50 }
 0x4be   : > { %13705 = vst [vmem:[#allocation102_spill] sm:$0xff] %v9919_v57  ;;  %v2978_v33 = vrot.slane %v9904_v11, %v9468_v21  ;;  %v9937_v25 = vmul.f32 0.17677669, %v9664_v52  ;;  %v9940_v8 = vmul.f32 0.17677669, %v9528_v49  ;;  %v4540_v19 = vsel %vm1454_vm3, %v4413_v56, %v4404_v9 }
 0x4bf   : > { %v3017_v7 = vsel %vm1456_vm4, %v2898_v61, %v3016_v15  ;;  %v4422_v4 = vsel %vm1317_vm2, %v4421_v31, %v4417_v63  ;;  %v9955_v49 = vmul.f32 0.17677669, %v9679_v16  ;;  %v2951_v56 = vrot.slane %v9930_v34, %v9468_v21  ;;  %v9974_v31 = vpop.xlane.xlu0 %4330 }
 0x4c0   : > { %13706 = vst [vmem:[#allocation103_spill] sm:$0xff] %v9937_v25  ;;  %13707 = vst [vmem:[#allocation104_spill] sm:$0xff] %v9940_v8  ;;  %v2979_v15 = vsel %vm1317_vm2, %v2978_v33, %v2974_v12  ;;  %v4502_v16 = vrot.slane %v9940_v8, %v9468_v21  ;;  %v9972_v63 = vmul.f32 0.17677669, %v9687_v35  ;;  %v9979_v52 = vmul.f32 0.17677669, %v9673_v32 }
 0x4c1   : > { %v4541_v33 = vsel %vm1456_vm4, %v4422_v4, %v4540_v19  ;;  %v9988_v35 = vmul.f32 0.17677669, %v9691_v20  ;;  %v9991_v8 = vmul.f32 0.17677669, %v9657_v30  ;;  %v13714_v19 = vrot.slane %v9833_v29, %v9458_v48  ;;  %v13754_v29 = vld [vmem:[#allocation68_spill] sm:$0xff] }
 0x4c2   : > { %v10009_v30 = vmul.f32 0.17677669, %v9682_v41  ;;  %v2915_v61 = vrot.slane %v9979_v52, %v9468_v21 }
 0x4c3   : > { %13711 = vst [vmem:[#allocation108_spill] sm:$0xff] %v9988_v35  ;;  %13712 = vst [vmem:[#allocation109_spill] sm:$0xff] %v9991_v8  ;;  %v4503_v20 = vsel %vm1317_vm2, %v4502_v16, %v13714_v19  ;;  %v4511_v41 = vrot.slane %v9991_v8, %v9468_v21  ;;  %v13729_v8 = vld [vmem:[#allocation23_spill] sm:$0xff] }
 0x4c4   : > { %v2762_v60 = vpop.xlane.xlu1 %2761 }
 0x4c5   : > { %v9913_v42 = vmul.f32 0.17677669, %v2762_v60  ;;  %v9928_v60 = vmul.f32 0.17677669, %v9562_v53  ;;  %v9944_v53 = vmul.f32 0.17677669, %v9628_v6 }
 0x4c6   : > { %v9960_v6 = vmul.f32 0.17677669, %v9592_v55 }
 0x4c7   : > { %13708 = vst [vmem:[#allocation105_spill] sm:$0xff] %v9944_v53  ;;  %v2947_v50 = vrot.slane %v9913_v42, %v9458_v48  ;;  %v2906_v9 = vrot.slane %v9928_v60, %v9468_v21  ;;  %v4430_v55 = vrot.slane %v9944_v53, %v9468_v21 }
 0x4c8   : > { %v4286_v46 = vpop.xlane.xlu1 %4285  ;;  %v2987_v32 = vrot.slane %v9960_v6, %v9468_v21 }
 0x4c9   : > { %v9948_v44 = vmul.f32 0.17677669, %v4286_v46  ;;  %v9964_v46 = vmul.f32 0.17677669, %v4289_v1  ;;  %v2952_v1 = vsel %vm1317_vm2, %v2951_v56, %v2947_v50  ;;  %v2907_v24 = vsel %vm1317_vm2, %v2906_v9, %v2902_v27 }
 0x4ca   : > { %v9997_v50 = vmul.f32 0.17677669, %v9697_v28  ;;  %v10006_v56 = vmul.f32 0.17677669, %v9707_v37  ;;  %v3023_v27 = vsel %vm1454_vm3, %v9817_v45, %v2952_v1  ;;  %v4431_v9 = vsel %vm1317_vm2, %v4430_v55, %v4426_v51  ;;  %v5667_v1 = vpop.permute.xlu0 %5666 }
 0x4cb   : > { %13709 = vst [vmem:[#allocation106_spill] sm:$0xff] %v9948_v44  ;;  %13710 = vst [vmem:[#allocation107_spill] sm:$0xff] %v9964_v46  ;;  %v4471_v12 = vrot.slane %v9948_v44, %v9458_v48  ;;  %v4475_v4 = vrot.slane %v9964_v46, %v9468_v21  ;;  %v3018_v16 = vsel %vm1458_vm5, %v2907_v24, %v3017_v7  ;;  %v10025_v45 = vmul.f32 0.17677669, %v9717_v0 }
 0x4cc   : > { %13713 = vst [vmem:[#allocation110_spill] sm:$0xff] %v9997_v50  ;;  %v5669_v19 = vpop.permute.xlu1 %5668  ;;  %v13715_v51 = vrot.slane %v9853_v47, %v9458_v48  ;;  %v10034_v24 = vmul.f32 0.17677669, %v9727_v38  ;;  %v3024_v7 = vsel %vm1456_vm4, %v9891_v43, %v3023_v27  ;;  %v2929_v0 = vrot.slane %v10006_v56, %v9458_v48 }
 0x4cd   : > { %v4476_v46 = vsel %vm1317_vm2, %v4475_v4, %v4471_v12  ;;  %v10039_v4 = vsel %vm1458_vm5, %v4431_v9, %v4541_v33  ;;  %v2996_v37 = vrot.slane %v10009_v30, %v9468_v21  ;;  %v10052_v12 = vmul.f32 0.17677669, %v9737_v13 }
 0x4ce   : > { %v2988_v55 = vsel %vm1317_vm2, %v2987_v32, %v13715_v51  ;;  %13716 = vst [vmem:[#allocation111_spill] sm:$0xff] %v10034_v24  ;;  %v4547_v32 = vsel %vm1454_vm3, %v9830_v36, %v4476_v46  ;;  %v13717_v51 = vrot.slane %v9881_v23, %v9458_v48  ;;  %v10055_v43 = vmul.f32 0.17677669, %v9685_v40 }
 0x4cf   : > { %v5763_v33 = vsel %vm1145_vm1, %v5667_v1, 0.0  ;;  %v13719_v27 = vrot.slane %v9876_v59, %v9458_v48  ;;  %v3010_v36 = vrot.slane %v10025_v45, %v9458_v48  ;;  %v10065_v46 = vmul.f32 0.17677669, %v9695_v62 }
 0x4d0   : > { %v2916_v38 = vsel %vm1317_vm2, %v2915_v61, %v13717_v51  ;;  %13718 = vst [vmem:[#allocation112_spill] sm:$0xff] %v10055_v43  ;;  %v3025_v13 = vsel %vm1458_vm5, %v2979_v15, %v3024_v7  ;;  %v10071_v61 = vmul.f32 0.17677669, %v9689_v3  ;;  %v10074_v1 = vmul.f32 0.17677669, %v9693_v2  ;;  %v5673_v7 = vpop.permute.xlu1 %5672 }
 0x4d1   : > { %v4512_v9 = vsel %vm1317_vm2, %v4511_v41, %v13719_v27  ;;  %v4548_v41 = vsel %vm1456_vm4, %v9909_v22, %v4547_v32  ;;  %v13721_v51 = vrot.slane %v9901_v17, %v9458_v48  ;;  %v10086_v15 = vmul.f32 0.17677669, %v9719_v10 }
 0x4d2   : > { %13720 = vst [vmem:[#allocation113_spill] sm:$0xff] %v10071_v61  ;;  %v3019_v3 = vsel %vm1460_vm6, %v2916_v38, %v3018_v16  ;;  %v2938_v2 = vrot.slane %v10052_v12, %v9458_v48  ;;  %v4439_v22 = vrot.slane %v10055_v43, %v9468_v21  ;;  %v5766_v32 = vsel %vm1145_vm1, %v5669_v19, 0.0 }
 0x4d3   : > { %v2997_v62 = vsel %vm1317_vm2, %v2996_v37, %v13721_v51  ;;  %v3026_v27 = vsel %vm1460_vm6, %v2988_v55, %v3025_v13  ;;  %v10098_v37 = vmul.f32 0.17677669, %v9739_v18  ;;  %v10101_v10 = vmul.f32 0.17677669, %v9923_v54  ;;  %v5671_v13 = vpop.permute.xlu0 %5670  ;;  %v13724_v51 = vld [vmem:[#allocation32_spill] sm:$0xff] }
 0x4d4   : > { %v4549_v16 = vsel %vm1458_vm5, %v4503_v20, %v4548_v41  ;;  %v10105_v38 = vmul.f32 0.17677669, %v9750_v5  ;;  %v4520_v19 = vrot.slane %v10071_v61, %v9468_v21  ;;  %v2924_v55 = vrot.slane %v10074_v1, %v9468_v21  ;;  %v13726_v41 = vld [vmem:[#allocation36_spill] sm:$0xff] }
 0x4d5   : > { %13722 = vst [vmem:[#allocation114_spill] sm:$0xff] %v10101_v10  ;;  %v5760_v18 = vsel %vm1145_vm1, %v9866_v39, 0.0  ;;  %v10114_v40 = vmul.f32 0.17677669, %v13724_v51  ;;  %v3014_v5 = vrot.slane %v10086_v15, %v9468_v21  ;;  %v3027_v20 = vsel %vm1462_vm7, %v2997_v62, %v3026_v27  ;;  %v5697_v27 = vpop.permute.xlu1 %5696 }
 0x4d6   : > { %5764 = vadd.xlane.f32.xlu0 %v5763_v33  ;;  %v10083_v33 = vmul.f32 0.17677669, %v9709_v14  ;;  %v3005_v14 = vrot.slane %v10065_v46, %v9468_v21  ;;  %13723 = vst [vmem:[#allocation115_spill] sm:$0xff] %v10105_v38  ;;  %v10125_v28 = vmul.f32 0.17677669, %v9974_v31  ;;  %v5772_v39 = vsel %vm1145_vm1, %v5673_v7, 0.0 }
 0x4d7   : > { %13725 = vst [vmem:[#allocation32_spill] sm:$0xff] %v10114_v40  ;;  %v4550_v51 = vsel %vm1460_vm6, %v4512_v9, %v4549_v16  ;;  %v2942_v61 = vrot.slane %v10098_v37, %v9468_v21  ;;  %v10132_v59 = vmul.f32 0.17677669, %v13729_v8  ;;  %v4529_v62 = vrot.slane %v10101_v10, %v9468_v21  ;;  %v13733_v16 = vld [vmem:[#allocation45_spill] sm:$0xff] }
 0x4d8   : > { %v2933_v54 = vrot.slane %v10083_v33, %v9468_v21  ;;  %13728 = vst [vmem:[#allocation116_spill] sm:$0xff] %v10125_v28  ;;  %v13731_v31 = vrot.slane %v9972_v63, %v9458_v48  ;;  %v13732_v7 = vrot.slane %v9937_v25, %v9458_v48  ;;  %v13735_v8 = vrot.slane %v9955_v49, %v9458_v48 }
 0x4d9   : > { %13730 = vst [vmem:[#allocation23_spill] sm:$0xff] %v10132_v59  ;;  %v4448_v43 = vrot.slane %v10114_v40, %v9468_v21 }
 0x4da   : > { %5767 = vadd.xlane.f32.xlu0 %v5766_v32  ;;  %v10122_v32 = vmul.f32 0.17677669, %v13726_v41  ;;  %v4521_v9 = vsel %vm1317_vm2, %v4520_v19, %v13732_v7  ;;  %v10145_v41 = vmul.f32 0.17677669, %v13733_v16  ;;  %v2925_v10 = vsel %vm1317_vm2, %v2924_v55, %v13735_v8  ;;  %v5675_v16 = vpop.permute.xlu0 %5674 }
 0x4db   : > { %v4551_v25 = vsel %vm1462_vm7, %v4521_v9, %v4550_v51  ;;  %v4538_v7 = vrot.slane %v10125_v28, %v9468_v21  ;;  %v5808_v55 = vsel %vm1145_vm1, %v5697_v27, 0.0  ;;  %v13737_v9 = vrot.slane %v9919_v57, %v9458_v48 }
 0x4dc   : > { %13727 = vst [vmem:[#allocation36_spill] sm:$0xff] %v10122_v32  ;;  %13734 = vst [vmem:[#allocation45_spill] sm:$0xff] %v10145_v41  ;;  %v4457_v19 = vrot.slane %v10122_v32, %v9468_v21 }
 0x4dd   : > { %5761 = vadd.xlane.f32.xlu1 %v5760_v18  ;;  %v3006_v18 = vsel %vm1317_vm2, %v3005_v14, %v13731_v31  ;;  %v5769_v14 = vsel %vm1145_vm1, %v5671_v13, 0.0  ;;  %v2934_v31 = vsel %vm1317_vm2, %v2933_v54, %v2929_v0  ;;  %v2943_v13 = vsel %vm1317_vm2, %v2942_v61, %v2938_v2 }
 0x4de   : > { %5773 = vadd.xlane.f32.xlu0 %v5772_v39  ;;  %v3028_v39 = vsel %vm1464_vm8, %v3006_v18, %v3027_v20  ;;  %v3015_v20 = vsel %vm1317_vm2, %v3014_v5, %v3010_v36  ;;  %v4466_v18 = vrot.slane %v10132_v59, %v9468_v21  ;;  %v13736_v54 = vrot.slane %v9997_v50, %v9458_v48  ;;  %v13752_v59 = vld [vmem:[#allocation58_spill] sm:$0xff] }
 0x4df   : > { %v3029_v0 = vsel %vm1466_vm9, %v3015_v20, %v3028_v39  ;;  %v4440_v27 = vsel %vm1317_vm2, %v4439_v22, %v13737_v9  ;;  %v4534_v36 = vrot.slane %v10145_v41, %v9458_v48  ;;  %v3020_v5 = vsel %vm1462_vm7, %v2925_v10, %v3019_v3 }
 0x4e0   : > { %v4530_v51 = vsel %vm1317_vm2, %v4529_v62, %v13736_v54  ;;  %v4462_v61 = vrot.slane %v10105_v38, %v9458_v48  ;;  %v13738_v2 = vrot.slane %v9988_v35, %v9458_v48  ;;  %v5775_v39 = vsel %vm1145_vm1, %v5675_v16, 0.0 }
 0x4e1   : > { %5770 = vadd.xlane.f32.xlu1 %v5769_v14  ;;  %v4552_v8 = vsel %vm1464_vm8, %v4530_v51, %v4551_v25  ;;  %v3021_v14 = vsel %vm1464_vm8, %v2934_v31, %v3020_v5  ;;  %v3035_v22 = vsel %vm419_vm0, %v3029_v0, -inf  ;;  %v4539_v3 = vsel %vm1317_vm2, %v4538_v7, %v4534_v36  ;;  %v5699_v51 = vpop.permute.xlu0 %5698  ;;  %v13740_v5 = vld [vmem:[#allocation9_spill] sm:$0xff] }
 0x4e2   : > { %5809 = vadd.xlane.f32.xlu0 %v5808_v55  ;;  %v4449_v62 = vsel %vm1317_vm2, %v4448_v43, %v13738_v2  ;;  %v3022_v55 = vsel %vm1466_vm9, %v2943_v13, %v3021_v14  ;;  %v13739_v25 = vrot.slane %v10034_v24, %v9458_v48  ;;  %v4553_v20 = vsel %vm1466_vm9, %v4539_v3, %v4552_v8  ;;  %v13742_v14 = vld [vmem:[#allocation77_spill] sm:$0xff] }
 0x4e3   : > { %v4467_v43 = vsel %vm1317_vm2, %v4466_v18, %v4462_v61  ;;  %v4543_v31 = vsel %vm1460_vm6, %v4440_v27, %v10039_v4  ;;  %v3032_v0 = vsel %vm419_vm0, %v3022_v55, -inf  ;;  %v4559_v7 = vsel %vm419_vm0, %v4553_v20, -inf  ;;  %v10205_v4 = vpop.permute.xlu1 %5700  ;;  %v13741_v61 = vld [vmem:[#allocation8_spill] sm:$0xff]  ;;  %v13743_v55 = vld [vmem:[#allocation79_spill] sm:$0xff] }
 0x4e4   : > { %v4458_v10 = vsel %vm1317_vm2, %v4457_v19, %v13739_v25  ;;  %v4544_v16 = vsel %vm1462_vm7, %v4449_v62, %v4543_v31  ;;  %v5811_v18 = vsel %vm1145_vm1, %v5699_v51, 0.0  ;;  %v10213_v2 = vsub.s32 1, %v13741_v61 }
 0x4e5   : > { %5776 = vadd.xlane.f32.xlu1 %v5775_v39  ;;  %v4545_v13 = vsel %vm1464_vm8, %v4458_v10, %v4544_v16  ;;  %v10215_v62 = vpop.permute.xlu0 %5702  ;;  %v10221_v25 = vsub.s32 5, %v13741_v61  ;;  %v13745_v10 = vld [vmem:[#allocation57_spill] sm:$0xff]  ;;  %v10270_v38 = vsub.s32 4, %v13741_v61 }
 0x4e6   : > { %3036 = vmax.xlane.f32.xlu0 %v3035_v22  ;;  %v4546_v54 = vsel %vm1466_vm9, %v4467_v43, %v4545_v13 }
 0x4e7   : > { %v4556_v19 = vsel %vm419_vm0, %v4546_v54, -inf  ;;  %v10207_v9 = vpop.permute.xlu1 %5676  ;;  %13744 = vst [vmem:[#allocation9_spill] sm:$0xff] %v10221_v25  ;;  %13756 = vst [vmem:[#allocation57_spill] sm:$0xff] %v10270_v38 }
 0x4e9   : > { %3033 = vmax.xlane.f32.xlu1 %v3032_v0  ;;  %v10224_v31 = vpop.permute.xlu0 %5678  ;;  %v10227_v0 = vsub.s32 2, %v13741_v61 }
 0x4ea   : > { %4560 = vmax.xlane.f32.xlu0 %v4559_v7  ;;  %v10233_v7 = vsub.s32 6, %v13741_v61 }
 0x4eb   : > { %v10209_v27 = vpop.permute.xlu1 %5704 }
 0x4ec   : > { %13746 = vst [vmem:[#allocation8_spill] sm:$0xff] %v10233_v7 }
 0x4ed   : > { %4557 = vmax.xlane.f32.xlu1 %v4556_v19  ;;  %v13747_v19 = vld [vmem:[#allocation54_spill] sm:$0xff] }
 0x4f1   : > { %5812 = vadd.xlane.f32.xlu1 %v5811_v18 }
 0x511   : > { %v1479_v36 = vpop.xlane.xlu1 %1478 }
 0x512   : > { %v1488_v8 = vrot.slane %v1479_v36, %v13740_v5  ;;  %v1492_v39 = vrot.slane %v1479_v36, %v10213_v2  ;;  %v10230_v13 = vrot.slane %v1479_v36, %v10221_v25  ;;  %v1496_v54 = vrot.slane %v1479_v36, %v10227_v0 }
 0x514   : > { %v1565_v22 = vsub.f32 %v13742_v14, %v1488_v8  ;;  %v1566_v3 = vsub.f32 %v13743_v55, %v1488_v8  ;;  %v1567_v20 = vsub.f32 %v13745_v10, %v1492_v39  ;;  %v1568_v51 = vsub.f32 %v13747_v19, %v1492_v39  ;;  %v13748_v14 = vld [vmem:[#allocation86_spill] sm:$0xff]  ;;  %v10242_v55 = vpop.permute.xlu0 %5706  ;;  %v13750_v10 = vld [vmem:[#allocation64_spill] sm:$0xff] }
 0x515   : > { %v10238_v8 = vrot.slane %v1479_v36, %v10233_v7  ;;  %v1569_v28 = vsub.f32 %v13750_v10, %v1496_v54  ;;  %v10249_v39 = vsub.s32 3, %v13741_v61  ;;  %v1570_v32 = vsub.f32 %v13752_v59, %v1496_v54 }
 0x516   : > { %v1597_v43 = vmul.f32 1.442695, %v1565_v22  ;;  %v1599_v16 = vmul.f32 1.442695, %v1566_v3  ;;  %v1601_v18 = vmul.f32 1.442695, %v1567_v20  ;;  %v1575_v22 = vsub.f32 %v13748_v14, %v10230_v13 }
 0x517   : > { %v10245_v3 = vsub.s32 7, %v13741_v61  ;;  %v1603_v41 = vmul.f32 1.442695, %v1568_v51  ;;  %v1500_v50 = vrot.slane %v1479_v36, %v10249_v39  ;;  %v1605_v10 = vmul.f32 1.442695, %v1569_v28 }
 0x518   : > { %7866 = vpow2.f32 %v1597_v43  ;;  %v13751_v43 = vld [vmem:[#allocation87_spill] sm:$0xff]  ;;  %v1617_v19 = vmul.f32 1.442695, %v1575_v22  ;;  %v10256_v14 = vpop.xlane.xlu0 %1481  ;;  %v1607_v22 = vmul.f32 1.442695, %v1570_v32  ;;  %v13759_v32 = vld [vmem:[#allocation62_spill] sm:$0xff] }
 0x519   : > { %7868 = vpow2.f32 %v1599_v16  ;;  %13749 = vst [vmem:[#allocation77_spill] sm:$0xff] %v10245_v3  ;;  %v10252_v20 = vrot.slane %v1479_v36, %v10245_v3  ;;  %v1577_v16 = vsub.f32 %v13751_v43, %v10238_v8  ;;  %v10262_v51 = vrot.slane %v10256_v14, %v13740_v5 }
 0x51a   : > { %7870 = vpow2.f32 %v1601_v18  ;;  %v13753_v18 = vld [vmem:[#allocation89_spill] sm:$0xff]  ;;  %v1571_v43 = vsub.f32 %v13754_v29, %v1500_v50  ;;  %v10276_v28 = vrot.slane %v10256_v14, %v10213_v2  ;;  %v1504_v29 = vrot.slane %v1479_v36, %v10270_v38  ;;  %v13762_v36 = vld [vmem:[#allocation84_spill] sm:$0xff] }
 0x51b   : > { %7872 = vpow2.f32 %v1603_v41  ;;  %v1579_v40 = vsub.f32 %v13753_v18, %v10252_v20  ;;  %v1621_v57 = vmul.f32 1.442695, %v1577_v16  ;;  %v13758_v41 = vld [vmem:[#allocation70_spill] sm:$0xff]  ;;  %v1572_v61 = vsub.f32 %v13759_v32, %v1500_v50  ;;  %v10286_v18 = vpop.permute.xlu1 %5680 }
 0x51c   : > { %7874 = vpow2.f32 %v1617_v19  ;;  %v1581_v54 = vsub.f32 %v13758_v41, %v10262_v51  ;;  %v1609_v19 = vmul.f32 1.442695, %v1571_v43  ;;  %v10290_v24 = vrot.slane %v10256_v14, %v10227_v0  ;;  %v13764_v32 = vld [vmem:[#allocation74_spill] sm:$0xff] }
 0x51d   : > { %7876 = vpow2.f32 %v1605_v10  ;;  %v1625_v16 = vmul.f32 1.442695, %v1579_v40  ;;  %v1573_v35 = vsub.f32 %v13762_v36, %v1504_v29  ;;  %v1611_v50 = vmul.f32 1.442695, %v1572_v61 }
 0x51e   : > { %7878 = vpow2.f32 %v1621_v57  ;;  %v13761_v57 = vld [vmem:[#allocation71_spill] sm:$0xff]  ;;  %v1629_v41 = vmul.f32 1.442695, %v1581_v54  ;;  %v1585_v53 = vsub.f32 %v13764_v32, %v10290_v24 }
 0x51f   : > { %7880 = vpow2.f32 %v1607_v22  ;;  %v1583_v40 = vsub.f32 %v13761_v57, %v10276_v28  ;;  %v10300_v22 = vrot.slane %v10256_v14, %v10249_v39  ;;  %v13766_v57 = vld [vmem:[#allocation66_spill] sm:$0xff]  ;;  %v1613_v61 = vmul.f32 1.442695, %v1573_v35 }
 0x520   : > { %7882 = vpow2.f32 %v1625_v16  ;;  %v10307_v16 = vpop.permute.xlu1 %5708  ;;  %v1637_v32 = vmul.f32 1.442695, %v1585_v53 }
 0x521   : > { %7884 = vpow2.f32 %v1609_v19  ;;  %v1633_v58 = vmul.f32 1.442695, %v1583_v40  ;;  %v1574_v19 = vsub.f32 %v13766_v57, %v1504_v29  ;;  %v13768_v40 = vld [vmem:[#allocation76_spill] sm:$0xff] }
 0x522   : > { %7886 = vpow2.f32 %v1629_v41  ;;  %v1587_v41 = vsub.f32 %v13768_v40, %v10300_v22  ;;  %v13770_v29 = vld [vmem:[#allocation88_spill] sm:$0xff]  ;;  %v10331_v40 = vrot.slane %v10256_v14, %v10221_v25 }
 0x523   : > { %7888 = vpow2.f32 %v1611_v50  ;;  %v1576_v35 = vsub.f32 %v13770_v29, %v10230_v13  ;;  %v1615_v50 = vmul.f32 1.442695, %v1574_v19  ;;  %v13774_v19 = vld [vmem:[#allocation90_spill] sm:$0xff] }
 0x524   : > { %7890 = vpow2.f32 %v1633_v58  ;;  %v13772_v58 = vld [vmem:[#allocation69_spill] sm:$0xff] }
 0x525   : > { %v10267_v44 = vpop.eup %7866  ;;  %7892 = vpow2.f32 %v1613_v61  ;;  %v1578_v61 = vsub.f32 %v13774_v19, %v10238_v8  ;;  %v1619_v29 = vmul.f32 1.442695, %v1576_v35  ;;  %v13778_v35 = vld [vmem:[#allocation91_spill] sm:$0xff] }
 0x526   : > { %13755 = vst [vmem:[#allocation79_spill] sm:$0xff] %v10267_v44  ;;  %v10272_v59 = vpop.eup %7868  ;;  %1694 = vperm.xlu1 %7863, %v10267_v44   ;;  %7894 = vpow2.f32 %v1637_v32  ;;  %v13776_v32 = vld [vmem:[#allocation80_spill] sm:$0xff] }
 0x527   : > { %13757 = vst [vmem:[#allocation54_spill] sm:$0xff] %v10272_v59  ;;  %1697 = vperm.xlu0 %7862, %v10272_v59   ;;  %v10284_v10 = vpop.eup %7870  ;;  %7896 = vpow2.f32 %v1615_v50  ;;  %v10345_v59 = vrot.slane %v10256_v14, %v10233_v7  ;;  %v1580_v50 = vsub.f32 %v13778_v35, %v10252_v20  ;;  %v1623_v19 = vmul.f32 1.442695, %v1578_v61  ;;  %v13782_v20 = vld [vmem:[#allocation72_spill] sm:$0xff] }
 0x528   : > { %13760 = vst [vmem:[#allocation86_spill] sm:$0xff] %v10284_v10  ;;  %v10296_v43 = vpop.eup %7872  ;;  %v1582_v61 = vsub.f32 %v13782_v20, %v10262_v51  ;;  %v13787_v51 = vld [vmem:[#allocation73_spill] sm:$0xff] }
 0x529   : > { %13763 = vst [vmem:[#allocation64_spill] sm:$0xff] %v10296_v43  ;;  %v10305_v54 = vpop.eup %7874  ;;  %v1627_v35 = vmul.f32 1.442695, %v1580_v50  ;;  %v1584_v20 = vsub.f32 %v13787_v51, %v10276_v28 }
 0x52a   : > { %1700 = vperm.xlu1 %7863, %v10284_v10   ;;  %13765 = vst [vmem:[#allocation87_spill] sm:$0xff] %v10305_v54  ;;  %v10311_v36 = vpop.eup %7876  ;;  %v10315_v10 = vrot.slane %v10256_v14, %v10270_v38 }
 0x52b   : > { %1724 = vperm.xlu0 %7862, %v10305_v54   ;;  %13767 = vst [vmem:[#allocation58_spill] sm:$0xff] %v10311_v36  ;;  %v10327_v54 = vpop.permute.xlu1 %5684  ;;  %v1635_v28 = vmul.f32 1.442695, %v1584_v20 }
 0x52c   : > { %v1589_v53 = vsub.f32 %v13772_v58, %v10315_v10 }
 0x52e   : > { %1703 = vperm.xlu1 %7863, %v10296_v43   ;;  %v10320_v43 = vpop.eup %7878  ;;  %v1645_v58 = vmul.f32 1.442695, %v1589_v53 }
 0x52f   : > { %13769 = vst [vmem:[#allocation89_spill] sm:$0xff] %v10320_v43  ;;  %1730 = vperm.xlu0 %7862, %v10320_v43   ;;  %v10325_v57 = vpop.eup %7880  ;;  %v10352_v8 = vpop.permute.xlu1 %5712 }
 0x530   : > { %13771 = vst [vmem:[#allocation68_spill] sm:$0xff] %v10325_v57  ;;  %v10336_v13 = vpop.eup %7882 }
 0x531   : > { %13773 = vst [vmem:[#allocation70_spill] sm:$0xff] %v10336_v13  ;;  %v10341_v43 = vpop.eup %7884 }
 0x532   : > { %1706 = vperm.xlu1 %7863, %v10311_v36   ;;  %v1641_v36 = vmul.f32 1.442695, %v1587_v41  ;;  %13775 = vst [vmem:[#allocation62_spill] sm:$0xff] %v10341_v43  ;;  %v1591_v41 = vsub.f32 %v13776_v32, %v10331_v40  ;;  %v10361_v32 = vrot.slane %v10256_v14, %v10245_v3 }
 0x533   : > { %1736 = vperm.xlu0 %7862, %v10336_v13  }
 0x534   : > { %7898 = vpow2.f32 %v1641_v36  ;;  %v13780_v36 = vld [vmem:[#allocation81_spill] sm:$0xff] }
 0x535   : > { %7900 = vpow2.f32 %v1619_v29  ;;  %v1593_v53 = vsub.f32 %v13780_v36, %v10345_v59  ;;  %v10370_v29 = vpop.permute.xlu0 %5682 }
 0x536   : > { %1709 = vperm.xlu1 %7863, %v10325_v57   ;;  %v10350_v57 = vpop.eup %7886  ;;  %7902 = vpow2.f32 %v1645_v58  ;;  %v13785_v58 = vld [vmem:[#allocation83_spill] sm:$0xff] }
 0x537   : > { %13777 = vst [vmem:[#allocation71_spill] sm:$0xff] %v10350_v57  ;;  %1742 = vperm.xlu0 %7862, %v10350_v57   ;;  %v10357_v13 = vpop.eup %7888  ;;  %7904 = vpow2.f32 %v1623_v19  ;;  %v10375_v57 = vpop.permute.xlu1 %5688  ;;  %v1653_v36 = vmul.f32 1.442695, %v1593_v53  ;;  %v1631_v19 = vmul.f32 1.442695, %v1582_v61 }
 0x538   : > { %13779 = vst [vmem:[#allocation84_spill] sm:$0xff] %v10357_v13  ;;  %v10366_v44 = vpop.eup %7890  ;;  %13784 = vst [vmem:[#allocation76_spill] sm:$0xff] %v10375_v57 }
 0x539   : > { %13781 = vst [vmem:[#allocation74_spill] sm:$0xff] %v10366_v44  ;;  %v10373_v14 = vpop.eup %7892  ;;  %v10387_v57 = vpop.permute.xlu0 %5710 }
 0x53a   : > { %1712 = vperm.xlu1 %7863, %v10341_v43   ;;  %v1649_v43 = vmul.f32 1.442695, %v1591_v41  ;;  %13783 = vst [vmem:[#allocation66_spill] sm:$0xff] %v10373_v14  ;;  %v1595_v41 = vsub.f32 %v13785_v58, %v10361_v32  ;;  %v13791_v58 = vld [vmem:[#allocation75_spill] sm:$0xff] }
 0x53b   : > { %1748 = vperm.xlu0 %7862, %v10366_v44   ;;  %v10392_v53 = vpop.permute.xlu1 %5716 }
 0x53c   : > { %7906 = vpow2.f32 %v1649_v43  ;;  %v1657_v44 = vmul.f32 1.442695, %v1595_v41  ;;  %13790 = vst [vmem:[#allocation80_spill] sm:$0xff] %v10392_v53  ;;  %v13794_v41 = vld [vmem:[#allocation78_spill] sm:$0xff] }
 0x53d   : > { %7908 = vpow2.f32 %v1627_v35 }
 0x53e   : > { %1715 = vperm.xlu1 %7863, %v10357_v13   ;;  %v10380_v13 = vpop.eup %7894  ;;  %7910 = vpow2.f32 %v1653_v36  ;;  %v1588_v36 = vsub.f32 %v13794_v41, %v10300_v22 }
 0x53f   : > { %13786 = vst [vmem:[#allocation88_spill] sm:$0xff] %v10380_v13  ;;  %1754 = vperm.xlu0 %7862, %v10380_v13   ;;  %v10385_v50 = vpop.eup %7896  ;;  %7912 = vpow2.f32 %v1631_v19  ;;  %v10404_v13 = vpop.permute.xlu0 %5686  ;;  %v13799_v19 = vld [vmem:[#allocation63_spill] sm:$0xff] }
 0x540   : > { %13788 = vst [vmem:[#allocation69_spill] sm:$0xff] %v10385_v50  ;;  %7914 = vpow2.f32 %v1657_v44  ;;  %13795 = vst [vmem:[#allocation72_spill] sm:$0xff] %v10404_v13  ;;  %v10409_v20 = vpop.permute.xlu1 %5692 }
 0x541   : > { %v10390_v43 = vpop.eup %7898  ;;  %7916 = vpow2.f32 %v1635_v28  ;;  %13797 = vst [vmem:[#allocation73_spill] sm:$0xff] %v10409_v20  ;;  %v13831_v20 = vld [vmem:[#allocation96_spill] sm:$0xff] }
 0x542   : > { %1718 = vperm.xlu1 %7863, %v10373_v14   ;;  %13789 = vst [vmem:[#allocation90_spill] sm:$0xff] %v10390_v43  ;;  %v1586_v14 = vsub.f32 %v13791_v58, %v10290_v24  ;;  %v10397_v61 = vpop.eup %7900  ;;  %v1590_v58 = vsub.f32 %v13799_v19, %v10315_v10 }
 0x543   : > { %1760 = vperm.xlu0 %7862, %v10390_v43   ;;  %13792 = vst [vmem:[#allocation91_spill] sm:$0xff] %v10397_v61  ;;  %v10400_v35 = vpop.eup %7902  ;;  %v1643_v43 = vmul.f32 1.442695, %v1588_v36 }
 0x544   : > { %13793 = vst [vmem:[#allocation81_spill] sm:$0xff] %v10400_v35  ;;  %v1639_v51 = vmul.f32 1.442695, %v1586_v14  ;;  %v10407_v24 = vpop.eup %7904  ;;  %v10419_v14 = vpop.permute.xlu0 %5714 }
 0x545   : > { %13796 = vst [vmem:[#allocation83_spill] sm:$0xff] %v10407_v24  ;;  %13801 = vst [vmem:[#allocation63_spill] sm:$0xff] %v10419_v14  ;;  %v10424_v41 = vpop.permute.xlu1 %5720 }
 0x546   : > { %1721 = vperm.xlu1 %7863, %v10385_v50   ;;  %7918 = vpow2.f32 %v1639_v51  ;;  %13803 = vst [vmem:[#allocation118_spill] sm:$0xff] %v10424_v41  ;;  %v13807_v51 = vld [vmem:[#allocation82_spill] sm:$0xff]  ;;  %v13827_v50 = vld [vmem:[#allocation40_spill] sm:$0xff] }
 0x547   : > { %1766 = vperm.xlu0 %7862, %v10400_v35   ;;  %v13804_v35 = vld [vmem:[#allocation67_spill] sm:$0xff]  ;;  %7920 = vpow2.f32 %v1643_v43  ;;  %v1594_v19 = vsub.f32 %v13807_v51, %v10345_v59  ;;  %v13830_v41 = vld [vmem:[#allocation94_spill] sm:$0xff] }
 0x549   : > { %v10412_v44 = vpop.eup %7906  ;;  %v10441_v43 = vpop.permute.xlu1 %5724 }
 0x54a   : > { %1727 = vperm.xlu1 %7863, %v10397_v61   ;;  %13798 = vst [vmem:[#allocation75_spill] sm:$0xff] %v10412_v44  ;;  %v10417_v22 = vpop.eup %7908  ;;  %v1647_v61 = vmul.f32 1.442695, %v1590_v58  ;;  %13810 = vst [vmem:[#allocation121_spill] sm:$0xff] %v10441_v43 }
 0x54b   : > { %1772 = vperm.xlu0 %7862, %v10412_v44   ;;  %13800 = vst [vmem:[#allocation78_spill] sm:$0xff] %v10417_v22  ;;  %v10422_v28 = vpop.eup %7910 }
 0x54c   : > { %13802 = vst [vmem:[#allocation117_spill] sm:$0xff] %v10422_v28  ;;  %v10429_v10 = vpop.eup %7912  ;;  %7922 = vpow2.f32 %v1647_v61 }
 0x54d   : > { %13805 = vst [vmem:[#allocation67_spill] sm:$0xff] %v10429_v10  ;;  %v10432_v36 = vpop.eup %7914 }
 0x54e   : > { %1733 = vperm.xlu1 %7863, %v10407_v24   ;;  %v1592_v24 = vsub.f32 %v13804_v35, %v10331_v40  ;;  %13806 = vst [vmem:[#allocation119_spill] sm:$0xff] %v10432_v36  ;;  %v10439_v40 = vpop.eup %7916  ;;  %v13811_v35 = vld [vmem:[#allocation85_spill] sm:$0xff] }
 0x54f   : > { %1778 = vperm.xlu0 %7862, %v10422_v28   ;;  %13809 = vst [vmem:[#allocation120_spill] sm:$0xff] %v10439_v40  ;;  %v1596_v58 = vsub.f32 %v13811_v35, %v10361_v32  ;;  %v1655_v28 = vmul.f32 1.442695, %v1594_v19 }
 0x550   : > { %v1651_v44 = vmul.f32 1.442695, %v1592_v24 }
 0x551   : > { %v1659_v24 = vmul.f32 1.442695, %v1596_v58 }
 0x552   : > { %1739 = vperm.xlu1 %7863, %v10417_v22   ;;  %v10436_v22 = vpop.permute.xlu0 %5690  ;;  %7924 = vpow2.f32 %v1651_v44 }
 0x553   : > { %13808 = vst [vmem:[#allocation82_spill] sm:$0xff] %v10436_v22  ;;  %1784 = vperm.xlu0 %7862, %v10432_v36   ;;  %7926 = vpow2.f32 %v1655_v28 }
 0x554   : > { %7928 = vpow2.f32 %v1659_v24 }
 0x556   : > { %1745 = vperm.xlu1 %7863, %v10429_v10   ;;  %v10446_v10 = vpop.eup %7918  ;;  %v10450_v61 = vpop.permute.xlu0 %5718 }
 0x557   : > { %13812 = vst [vmem:[#allocation85_spill] sm:$0xff] %v10446_v10  ;;  %13814 = vst [vmem:[#allocation123_spill] sm:$0xff] %v10450_v61  ;;  %v10453_v51 = vpop.eup %7920 }
 0x558   : > { %13815 = vst [vmem:[#allocation124_spill] sm:$0xff] %v10453_v51 }
 0x559   : > { %v10460_v44 = vpop.eup %7922 }
 0x55a   : > { %1751 = vperm.xlu1 %7863, %v10439_v40   ;;  %v10458_v32 = vpop.permute.xlu0 %5694  ;;  %13818 = vst [vmem:[#allocation127_spill] sm:$0xff] %v10460_v44 }
 0x55b   : > { %13817 = vst [vmem:[#allocation126_spill] sm:$0xff] %v10458_v32 }
 0x55e   : > { %1757 = vperm.xlu1 %7863, %v10446_v10   ;;  %v13826_v10 = vld [vmem:[#allocation48_spill] sm:$0xff] }
 0x55f   : > { %v10463_v19 = vpop.eup %7924 }
 0x560   : > { %13819 = vst [vmem:[#allocation128_spill] sm:$0xff] %v10463_v19  ;;  %v10470_v28 = vpop.eup %7926 }
 0x561   : > { %13822 = vst [vmem:[#allocation131_spill] sm:$0xff] %v10470_v28 }
 0x562   : > { %1763 = vperm.xlu1 %7863, %v10453_v51  }
 0x566   : > { %v10448_v59 = vpop.xlane.xlu1 %5761  ;;  %1769 = vperm.xlu1 %7863, %v10460_v44  }
 0x567   : > { %13813 = vst [vmem:[#allocation122_spill] sm:$0xff] %v10448_v59  ;;  %v10467_v59 = vpop.permute.xlu0 %5722 }
 0x568   : > { %13821 = vst [vmem:[#allocation130_spill] sm:$0xff] %v10467_v59 }
 0x56a   : > { %v10456_v36 = vpop.xlane.xlu1 %5770  ;;  %1775 = vperm.xlu1 %7863, %v10463_v19  }
 0x56b   : > { %13816 = vst [vmem:[#allocation125_spill] sm:$0xff] %v10456_v36  ;;  %v10473_v24 = vpop.permute.xlu0 %5726  ;;  %v10475_v36 = vpop.eup %7928 }
 0x56c   : > { %13823 = vst [vmem:[#allocation132_spill] sm:$0xff] %v10473_v24  ;;  %13824 = vst [vmem:[#allocation133_spill] sm:$0xff] %v10475_v36 }
 0x56e   : > { %v10465_v35 = vpop.xlane.xlu1 %5776  ;;  %1781 = vperm.xlu1 %7863, %v10470_v28  }
 0x56f   : > { %13820 = vst [vmem:[#allocation129_spill] sm:$0xff] %v10465_v35  ;;  %v10479_v51 = vpop.xlane.xlu0 %5764 }
 0x570   : > { %13825 = vst [vmem:[#allocation134_spill] sm:$0xff] %v10479_v51 }
 0x572   : > { %v3034_v58 = vpop.xlane.xlu1 %3033  ;;  %1787 = vperm.xlu1 %7863, %v10475_v36   ;;  %v13829_v36 = vld [vmem:[#allocation60_spill] sm:$0xff] }
 0x573   : > { %v3043_v44 = vrot.slane %v3034_v58, %v13740_v5  ;;  %v3047_v35 = vrot.slane %v3034_v58, %v10213_v2  ;;  %v3051_v19 = vrot.slane %v3034_v58, %v10227_v0  ;;  %v10485_v28 = vpop.xlane.xlu0 %5767  ;;  %v3055_v61 = vrot.slane %v3034_v58, %v10249_v39 }
 0x574   : > { %13828 = vst [vmem:[#allocation48_spill] sm:$0xff] %v10485_v28  ;;  %v13832_v28 = vld [vmem:[#allocation97_spill] sm:$0xff]  ;;  %v3063_v53 = vrot.slane %v3034_v58, %v10221_v25 }
 0x575   : > { %v3120_v40 = vsub.f32 %v13826_v10, %v3043_v44  ;;  %v3121_v59 = vsub.f32 %v13827_v50, %v3043_v44  ;;  %v3122_v24 = vsub.f32 %v9825_v26, %v3047_v35  ;;  %v3124_v43 = vsub.f32 %v13829_v36, %v3051_v19 }
 0x576   : > { %v3123_v51 = vsub.f32 %v13830_v41, %v3047_v35  ;;  %v3059_v10 = vrot.slane %v3034_v58, %v10270_v38  ;;  %v3126_v13 = vsub.f32 %v13831_v20, %v3055_v61  ;;  %v3125_v26 = vsub.f32 %v13832_v28, %v3051_v19 }
 0x577   : > { %v3152_v32 = vmul.f32 1.442695, %v3120_v40  ;;  %v3154_v22 = vmul.f32 1.442695, %v3121_v59  ;;  %v3156_v14 = vmul.f32 1.442695, %v3122_v24  ;;  %v10493_v44 = vpop.xlane.xlu0 %5773 }
 0x578   : > { %v3160_v50 = vmul.f32 1.442695, %v3124_v43  ;;  %v3158_v40 = vmul.f32 1.442695, %v3123_v51  ;;  %v3128_v36 = vsub.f32 %v9881_v23, %v3059_v10  ;;  %v3164_v41 = vmul.f32 1.442695, %v3126_v13 }
 0x579   : > { %7930 = vpow2.f32 %v3152_v32  ;;  %v3127_v32 = vsub.f32 %v9928_v60, %v3055_v61  ;;  %v3162_v20 = vmul.f32 1.442695, %v3125_v26  ;;  %v3130_v43 = vsub.f32 %v9955_v49, %v3063_v53 }
 0x57a   : > { %7932 = vpow2.f32 %v3154_v22  ;;  %v3067_v22 = vrot.slane %v3034_v58, %v10233_v7  ;;  %v3168_v19 = vmul.f32 1.442695, %v3128_v36  ;;  %v3071_v23 = vrot.slane %v3034_v58, %v10245_v3 }
 0x57b   : > { %7934 = vpow2.f32 %v3156_v14  ;;  %v10498_v59 = vpop.xlane.xlu0 %5809  ;;  %v3129_v14 = vsub.f32 %v9979_v52, %v3059_v10  ;;  %v3166_v51 = vmul.f32 1.442695, %v3127_v32  ;;  %v3172_v60 = vmul.f32 1.442695, %v3130_v43  ;;  %v13837_v43 = vld [vmem:[#allocation29_spill] sm:$0xff] }
 0x57c   : > { %7936 = vpow2.f32 %v3160_v50  ;;  %13833 = vst [vmem:[#allocation40_spill] sm:$0xff] %v10498_v59  ;;  %v3132_v13 = vsub.f32 %v10006_v56, %v3067_v22  ;;  %v3131_v52 = vsub.f32 %v10074_v1, %v3063_v53  ;;  %v3134_v56 = vsub.f32 %v10052_v12, %v3071_v23 }
 0x57d   : > { %7938 = vpow2.f32 %v3158_v40  ;;  %v3170_v49 = vmul.f32 1.442695, %v3129_v14  ;;  %v3133_v26 = vsub.f32 %v10083_v33, %v3067_v22  ;;  %v3135_v32 = vsub.f32 %v10098_v37, %v3071_v23  ;;  %v10540_v14 = vpop.xlane.xlu1 %4557 }
 0x57e   : > { %7940 = vpow2.f32 %v3164_v41  ;;  %v3176_v10 = vmul.f32 1.442695, %v3132_v13  ;;  %v3174_v1 = vmul.f32 1.442695, %v3131_v52  ;;  %v3180_v12 = vmul.f32 1.442695, %v3134_v56 }
 0x57f   : > { %7942 = vpow2.f32 %v3162_v20  ;;  %v10510_v28 = vpop.xlane.xlu0 %3036  ;;  %v3178_v33 = vmul.f32 1.442695, %v3133_v26  ;;  %v3182_v23 = vmul.f32 1.442695, %v3135_v32  ;;  %v13839_v52 = vld [vmem:[#allocation33_spill] sm:$0xff] }
 0x580   : > { %7944 = vpow2.f32 %v3168_v19  ;;  %v3075_v58 = vrot.slane %v10510_v28, %v13740_v5  ;;  %v3079_v40 = vrot.slane %v10510_v28, %v10213_v2  ;;  %v3083_v22 = vrot.slane %v10510_v28, %v10227_v0  ;;  %v13843_v32 = vld [vmem:[#allocation41_spill] sm:$0xff] }
 0x581   : > { %7946 = vpow2.f32 %v3166_v51  ;;  %v10555_v26 = vpop.xlane.xlu1 %5812 }
 0x582   : > { %7948 = vpow2.f32 %v3172_v60  ;;  %v3136_v36 = vsub.f32 %v9913_v42, %v3075_v58  ;;  %v3138_v19 = vsub.f32 %v13837_v43, %v3079_v40  ;;  %v3137_v37 = vsub.f32 %v9930_v34, %v3075_v58  ;;  %13840 = vst [vmem:[#allocation29_spill] sm:$0xff] %v10555_v26  ;;  %v13841_v34 = vld [vmem:[#allocation20_spill] sm:$0xff] }
 0x583   : > { %7950 = vpow2.f32 %v3170_v49  ;;  %v3087_v60 = vrot.slane %v10510_v28, %v10249_v39  ;;  %v3140_v49 = vsub.f32 %v13839_v52, %v3083_v22  ;;  %v3139_v58 = vsub.f32 %v13841_v34, %v3079_v40  ;;  %v13844_v40 = vld [vmem:[#allocation49_spill] sm:$0xff] }
 0x584   : > { %7952 = vpow2.f32 %v3176_v10  ;;  %v3184_v42 = vmul.f32 1.442695, %v3136_v36  ;;  %v3188_v56 = vmul.f32 1.442695, %v3138_v19  ;;  %v3095_v34 = vrot.slane %v10510_v28, %v10221_v25 }
 0x585   : > { %7954 = vpow2.f32 %v3174_v1  ;;  %v3186_v1 = vmul.f32 1.442695, %v3137_v37  ;;  %v3192_v43 = vmul.f32 1.442695, %v3140_v49  ;;  %v3141_v37 = vsub.f32 %v13844_v40, %v3083_v22 }
 0x586   : > { %v10504_v35 = vpop.eup %7930  ;;  %7956 = vpow2.f32 %v3180_v12  ;;  %v3091_v12 = vrot.slane %v10510_v28, %v10270_v38 }
 0x587   : > { %v10508_v61 = vpop.eup %7932  ;;  %3249 = vperm.xlu1 %7863, %v10504_v35   ;;  %7958 = vpow2.f32 %v3178_v33  ;;  %v3142_v33 = vsub.f32 %v13843_v32, %v3087_v60 }
 0x588   : > { %13834 = vst [vmem:[#allocation60_spill] sm:$0xff] %v10508_v61  ;;  %3252 = vperm.xlu0 %7862, %v10508_v61   ;;  %v10515_v24 = vpop.eup %7934  ;;  %7960 = vpow2.f32 %v3184_v42 }
 0x589   : > { %v10520_v50 = vpop.eup %7936  ;;  %7962 = vpow2.f32 %v3182_v23  ;;  %v3190_v23 = vmul.f32 1.442695, %v3139_v58  ;;  %v3196_v49 = vmul.f32 1.442695, %v3142_v33  ;;  %v3143_v58 = vsub.f32 %v9904_v11, %v3087_v60 }
 0x58a   : > { %v10525_v53 = vpop.eup %7938  ;;  %7964 = vpow2.f32 %v3188_v56  ;;  %v3144_v56 = vsub.f32 %v9853_v47, %v3091_v12  ;;  %v3099_v47 = vrot.slane %v10510_v28, %v10233_v7  ;;  %v3146_v33 = vsub.f32 %v9901_v17, %v3095_v34 }
 0x58b   : > { %3255 = vperm.xlu1 %7863, %v10515_v24   ;;  %13835 = vst [vmem:[#allocation94_spill] sm:$0xff] %v10525_v53  ;;  %v10530_v41 = vpop.eup %7940  ;;  %7966 = vpow2.f32 %v3186_v1  ;;  %v3194_v1 = vmul.f32 1.442695, %v3141_v37  ;;  %v3145_v60 = vsub.f32 %v9960_v6, %v3091_v12  ;;  %v3198_v37 = vmul.f32 1.442695, %v3143_v58 }
 0x58c   : > { %3261 = vperm.xlu0 %7862, %v10520_v50   ;;  %v10535_v20 = vpop.eup %7942  ;;  %7968 = vpow2.f32 %v3192_v43  ;;  %v3200_v43 = vmul.f32 1.442695, %v3144_v56  ;;  %v3103_v17 = vrot.slane %v10510_v28, %v10245_v3  ;;  %v3148_v56 = vsub.f32 %v9972_v63, %v3099_v47 }
 0x58d   : > { %13836 = vst [vmem:[#allocation96_spill] sm:$0xff] %v10535_v20  ;;  %v10542_v51 = vpop.eup %7944  ;;  %7970 = vpow2.f32 %v3190_v23  ;;  %v3147_v6 = vsub.f32 %v10009_v30, %v3095_v34  ;;  %v3202_v12 = vmul.f32 1.442695, %v3145_v60  ;;  %v3149_v30 = vsub.f32 %v10065_v46, %v3099_v47 }
 0x58e   : > { %v10547_v13 = vpop.eup %7946  ;;  %7972 = vpow2.f32 %v3196_v49  ;;  %v3204_v49 = vmul.f32 1.442695, %v3146_v33  ;;  %v3150_v28 = vsub.f32 %v10025_v45, %v3103_v17  ;;  %v3208_v63 = vmul.f32 1.442695, %v3148_v56 }
 0x58f   : > { %3258 = vperm.xlu1 %7863, %v10525_v53   ;;  %13838 = vst [vmem:[#allocation97_spill] sm:$0xff] %v10547_v13  ;;  %v10552_v10 = vpop.eup %7948  ;;  %7974 = vpow2.f32 %v3194_v1  ;;  %v3206_v34 = vmul.f32 1.442695, %v3147_v6 }
 0x590   : > { %3267 = vperm.xlu0 %7862, %v10530_v41   ;;  %v10559_v36 = vpop.eup %7950  ;;  %7976 = vpow2.f32 %v3200_v43  ;;  %v3212_v45 = vmul.f32 1.442695, %v3150_v28 }
 0x591   : > { %13842 = vst [vmem:[#allocation33_spill] sm:$0xff] %v10559_v36  ;;  %v10564_v19 = vpop.eup %7952  ;;  %7978 = vpow2.f32 %v3198_v37 }
 0x592   : > { %v10571_v52 = vpop.eup %7954  ;;  %7980 = vpow2.f32 %v3204_v49 }
 0x593   : > { %3264 = vperm.xlu1 %7863, %v10535_v20   ;;  %13845 = vst [vmem:[#allocation20_spill] sm:$0xff] %v10571_v52  ;;  %v10576_v32 = vpop.eup %7956  ;;  %7982 = vpow2.f32 %v3202_v12 }
 0x594   : > { %3273 = vperm.xlu0 %7862, %v10542_v51   ;;  %v10585_v40 = vpop.eup %7958  ;;  %7984 = vpow2.f32 %v3208_v63 }
 0x595   : > { %13847 = vst [vmem:[#allocation49_spill] sm:$0xff] %v10585_v40  ;;  %7986 = vpow2.f32 %v3206_v34 }
 0x596   : > { %7988 = vpow2.f32 %v3212_v45 }
 0x597   : > { %3270 = vperm.xlu1 %7863, %v10547_v13  }
 0x598   : > { %3279 = vperm.xlu0 %7862, %v10552_v10  }
 0x59b   : > { %3276 = vperm.xlu1 %7863, %v10559_v36   ;;  %v10579_v36 = vpop.xlane.xlu0 %4560 }
 0x59c   : > { %3285 = vperm.xlu0 %7862, %v10564_v19   ;;  %13846 = vst [vmem:[#allocation41_spill] sm:$0xff] %v10579_v36 }
 0x59f   : > { %3282 = vperm.xlu1 %7863, %v10571_v52   ;;  %v10590_v52 = vpop.eup %7960 }
 0x5a0   : > { %3291 = vperm.xlu0 %7862, %v10576_v32   ;;  %13848 = vst [vmem:[#allocation135_spill] sm:$0xff] %v10590_v52  ;;  %v10599_v23 = vpop.eup %7962 }
 0x5a1   : > { %v10568_v42 = vpop.permute.xlu1 %1694  ;;  %13849 = vst [vmem:[#allocation136_spill] sm:$0xff] %v10599_v23 }
 0x5a2   : > { %v10593_v13 = vpop.permute.xlu0 %1697 }
 0x5a3   : > { %3288 = vperm.xlu1 %7863, %v10585_v40   ;;  %v10604_v40 = vpop.eup %7964  ;;  %v1796_v36 = vrot.slane %v10593_v13, %v9468_v21 }
 0x5a4   : > { %3297 = vperm.xlu0 %7862, %v10590_v52   ;;  %13850 = vst [vmem:[#allocation137_spill] sm:$0xff] %v10604_v40  ;;  %v10611_v58 = vpop.eup %7966 }
 0x5a5   : > { %v10582_v22 = vpop.permute.xlu1 %1700  ;;  %13851 = vst [vmem:[#allocation138_spill] sm:$0xff] %v10611_v58  ;;  %v10616_v33 = vpop.eup %7968 }
 0x5a6   : > { %v10614_v1 = vpop.permute.xlu0 %1724  ;;  %13852 = vst [vmem:[#allocation139_spill] sm:$0xff] %v10616_v33  ;;  %v10623_v60 = vpop.eup %7970 }
 0x5a7   : > { %3294 = vperm.xlu1 %7863, %v10599_v23   ;;  %13853 = vst [vmem:[#allocation140_spill] sm:$0xff] %v10623_v60  ;;  %v10625_v37 = vpop.eup %7972  ;;  %v3210_v23 = vmul.f32 1.442695, %v3149_v30  ;;  %v1837_v52 = vrot.slane %v10614_v1, %v9458_v48 }
 0x5a8   : > { %3303 = vperm.xlu0 %7862, %v10604_v40   ;;  %13854 = vst [vmem:[#allocation141_spill] sm:$0xff] %v10625_v37  ;;  %v10632_v46 = vpop.eup %7974 }
 0x5a9   : > { %v10596_v11 = vpop.permute.xlu1 %1703  ;;  %13855 = vst [vmem:[#allocation142_spill] sm:$0xff] %v10632_v46  ;;  %v10634_v47 = vpop.eup %7976  ;;  %7990 = vpow2.f32 %v3210_v23 }
 0x5aa   : > { %v10628_v56 = vpop.permute.xlu0 %1730  ;;  %13856 = vst [vmem:[#allocation143_spill] sm:$0xff] %v10634_v47  ;;  %v10638_v28 = vpop.eup %7978 }
 0x5ab   : > { %3300 = vperm.xlu1 %7863, %v10611_v58   ;;  %v3151_v58 = vsub.f32 %v10086_v15, %v3103_v17  ;;  %13857 = vst [vmem:[#allocation144_spill] sm:$0xff] %v10638_v28 }
 0x5ac   : > { %3309 = vperm.xlu0 %7862, %v10616_v33  }
 0x5ad   : > { %v10608_v20 = vpop.permute.xlu1 %1706  ;;  %v3214_v12 = vmul.f32 1.442695, %v3151_v58 }
 0x5ae   : > { %v1737_v63 = vpop.permute.xlu0 %1736 }
 0x5af   : > { %3306 = vperm.xlu1 %7863, %v10623_v60   ;;  %v10640_v60 = vpop.eup %7980  ;;  %7992 = vpow2.f32 %v3214_v12 }
 0x5b0   : > { %3315 = vperm.xlu0 %7862, %v10625_v37   ;;  %13858 = vst [vmem:[#allocation145_spill] sm:$0xff] %v10640_v60  ;;  %v10644_v17 = vpop.eup %7982  ;;  %v1810_v37 = vrot.slane %v10608_v20, %v9458_v48 }
 0x5b1   : > { %v10620_v43 = vpop.permute.xlu1 %1709  ;;  %13859 = vst [vmem:[#allocation146_spill] sm:$0xff] %v10644_v17  ;;  %v10646_v30 = vpop.eup %7984 }
 0x5b2   : > { %13860 = vst [vmem:[#allocation147_spill] sm:$0xff] %v10646_v30  ;;  %v10649_v34 = vpop.permute.xlu0 %1742  ;;  %v10652_v58 = vpop.eup %7986 }
 0x5b3   : > { %3312 = vperm.xlu1 %7863, %v10632_v46   ;;  %13861 = vst [vmem:[#allocation148_spill] sm:$0xff] %v10652_v58  ;;  %v10654_v45 = vpop.eup %7988 }
 0x5b4   : > { %3321 = vperm.xlu0 %7862, %v10634_v47   ;;  %13862 = vst [vmem:[#allocation149_spill] sm:$0xff] %v10654_v45 }
 0x5b5   : > { %v1713_v49 = vpop.permute.xlu1 %1712 }
 0x5b6   : > { %v1749_v46 = vpop.permute.xlu0 %1748 }
 0x5b7   : > { %3318 = vperm.xlu1 %7863, %v10638_v28   ;;  %v10658_v28 = vpop.eup %7990 }
 0x5b8   : > { %3327 = vperm.xlu0 %7862, %v10640_v60   ;;  %13863 = vst [vmem:[#allocation150_spill] sm:$0xff] %v10658_v28  ;;  %v1801_v60 = vrot.slane %v10582_v22, %v9458_v48 }
 0x5b9   : > { %v1716_v6 = vpop.permute.xlu1 %1715 }
 0x5ba   : > { %v1755_v61 = vpop.permute.xlu0 %1754 }
 0x5bb   : > { %3324 = vperm.xlu1 %7863, %v10644_v17  }
 0x5bc   : > { %3333 = vperm.xlu0 %7862, %v10646_v30   ;;  %v10661_v53 = vpop.eup %7992  ;;  %v1805_v30 = vrot.slane %v10596_v11, %v9468_v21 }
 0x5bd   : > { %v1719_v15 = vpop.permute.xlu1 %1718  ;;  %13864 = vst [vmem:[#allocation151_spill] sm:$0xff] %v10661_v53 }
 0x5be   : > { %v1806_v33 = vsel %vm1317_vm2, %v1805_v30, %v1801_v60 }
 0x5bf   : > { %3330 = vperm.xlu1 %7863, %v10652_v58   ;;  %v1761_v58 = vpop.permute.xlu0 %1760 }
 0x5c0   : > { %3339 = vperm.xlu0 %7862, %v10654_v45   ;;  %v1814_v45 = vrot.slane %v10620_v43, %v9468_v21  ;;  %v1819_v43 = vrot.slane %v1713_v49, %v9458_v48  ;;  %v1846_v49 = vrot.slane %v10628_v56, %v9458_v48 }
 0x5c1   : > { %v1722_v23 = vpop.permute.xlu1 %1721 }
 0x5c2   : > { %v1832_v11 = vrot.slane %v1722_v23, %v9468_v21  ;;  %v1815_v40 = vsel %vm1317_vm2, %v1814_v45, %v1810_v37 }
 0x5c3   : > { %3336 = vperm.xlu1 %7863, %v10658_v28   ;;  %v1792_v28 = vrot.slane %v10568_v42, %v9458_v48  ;;  %v1828_v42 = vrot.slane %v1719_v15, %v9458_v48  ;;  %v1767_v23 = vpop.permute.xlu0 %1766 }
 0x5c5   : > { %v1728_v12 = vpop.permute.xlu1 %1727  ;;  %v1833_v15 = vsel %vm1317_vm2, %v1832_v11, %v1828_v42 }
 0x5c6   : > { %v1841_v13 = vrot.slane %v1728_v12, %v9468_v21 }
 0x5c7   : > { %3342 = vperm.xlu1 %7863, %v10661_v53   ;;  %v1823_v53 = vrot.slane %v1716_v6, %v9468_v21  ;;  %v1797_v6 = vsel %vm1317_vm2, %v1796_v36, %v1792_v28 }
 0x5c8   : > { %v1933_v37 = vsel %vm1454_vm3, %v1806_v33, %v1797_v6  ;;  %v1842_v28 = vsel %vm1317_vm2, %v1841_v13, %v1837_v52  ;;  %v1773_v33 = vpop.permute.xlu0 %1772  ;;  %v1873_v6 = vrot.slane %v1749_v46, %v9458_v48 }
 0x5c9   : > { %v1734_v17 = vpop.permute.xlu1 %1733  ;;  %v1824_v20 = vsel %vm1317_vm2, %v1823_v53, %v1819_v43  ;;  %v1934_v36 = vsel %vm1456_vm4, %v1815_v40, %v1933_v37 }
 0x5ca   : > { %v1850_v22 = vrot.slane %v1734_v17, %v9468_v21  ;;  %v1855_v17 = vrot.slane %v1737_v63, %v9458_v48  ;;  %v1935_v1 = vsel %vm1458_vm5, %v1824_v20, %v1934_v36 }
 0x5cc   : > { %v1851_v53 = vsel %vm1317_vm2, %v1850_v22, %v1846_v49  ;;  %v1779_v13 = vpop.permute.xlu0 %1778  ;;  %v1882_v49 = vrot.slane %v1755_v61, %v9458_v48 }
 0x5cd   : > { %v1740_v26 = vpop.permute.xlu1 %1739 }
 0x5ce   : > { %v1859_v60 = vrot.slane %v1740_v26, %v9468_v21  ;;  %v1936_v26 = vsel %vm1460_vm6, %v1833_v15, %v1935_v1  ;;  %v5814_v15 = vsel %vm1145_vm1, %v10205_v4, 0.0 }
 0x5cf   : > { %v1937_v56 = vsel %vm1462_vm7, %v1842_v28, %v1936_v26  ;;  %v1909_v28 = vrot.slane %v1773_v33, %v9458_v48 }
 0x5d0   : > { %v1860_v12 = vsel %vm1317_vm2, %v1859_v60, %v1855_v17  ;;  %v1938_v11 = vsel %vm1464_vm8, %v1851_v53, %v1937_v56  ;;  %v1891_v17 = vrot.slane %v1761_v58, %v9458_v48  ;;  %v1918_v58 = vrot.slane %v1779_v13, %v9458_v48  ;;  %v1785_v53 = vpop.permute.xlu0 %1784 }
 0x5d1   : > { %v1746_v59 = vpop.permute.xlu1 %1745  ;;  %v1939_v63 = vsel %vm1466_vm9, %v1860_v12, %v1938_v11  ;;  %v5820_v13 = vsel %vm1145_vm1, %v10209_v27, 0.0  ;;  %v5826_v27 = vsel %vm1145_vm1, %v10307_v16, 0.0  ;;  %v13865_v16 = vld [vmem:[#allocation76_spill] sm:$0xff] }
 0x5d2   : > { %v1949_v40 = vsel %vm419_vm0, %v1939_v63, 0.0  ;;  %v1868_v20 = vrot.slane %v1746_v59, %v9468_v21  ;;  %v1900_v59 = vrot.slane %v1767_v23, %v9458_v48  ;;  %v5778_v23 = vsel %vm1145_vm1, %v10207_v9, 0.0 }
 0x5d5   : > { %v1752_v47 = vpop.permute.xlu1 %1751 }
 0x5d6   : > { %v1877_v52 = vrot.slane %v1752_v47, %v9468_v21  ;;  %v1864_v47 = vrot.slane %v10649_v34, %v9458_v48 }
 0x5d8   : > { %v1869_v1 = vsel %vm1317_vm2, %v1868_v20, %v1864_v47  ;;  %v5832_v47 = vsel %vm1145_vm1, %v10352_v8, 0.0  ;;  %v13867_v8 = vld [vmem:[#allocation72_spill] sm:$0xff] }
 0x5d9   : > { %v1758_v30 = vpop.permute.xlu1 %1757 }
 0x5da   : > { %v1886_v42 = vrot.slane %v1758_v30, %v9468_v21  ;;  %v1878_v30 = vsel %vm1317_vm2, %v1877_v52, %v1873_v6 }
 0x5db   : > { %v1940_v26 = vsel %vm1454_vm3, %v1878_v30, %v1869_v1  ;;  %v13869_v1 = vld [vmem:[#allocation63_spill] sm:$0xff] }
 0x5dc   : > { %v1887_v36 = vsel %vm1317_vm2, %v1886_v42, %v1882_v49  ;;  %v5817_v49 = vsel %vm1145_vm1, %v10215_v62, 0.0  ;;  %v5787_v62 = vsel %vm1145_vm1, %v10370_v29, 0.0 }
 0x5dd   : > { %v1764_v45 = vpop.permute.xlu1 %1763  ;;  %v1941_v12 = vsel %vm1456_vm4, %v1887_v36, %v1940_v26  ;;  %v13868_v36 = vld [vmem:[#allocation73_spill] sm:$0xff]  ;;  %v13871_v26 = vld [vmem:[#allocation82_spill] sm:$0xff] }
 0x5de   : > { %v1895_v60 = vrot.slane %v1764_v45, %v9468_v21  ;;  %v5802_v29 = vsel %vm1145_vm1, %v13868_v36, 0.0 }
 0x5df   : > { %1950 = vadd.xlane.f32.xlu0 %v1949_v40 }
 0x5e0   : > { %v1896_v4 = vsel %vm1317_vm2, %v1895_v60, %v1891_v17  ;;  %v5784_v60 = vsel %vm1145_vm1, %v10286_v18, 0.0  ;;  %v5823_v18 = vsel %vm1145_vm1, %v10242_v55, 0.0  ;;  %v5796_v17 = vsel %vm1145_vm1, %v13865_v16, 0.0 }
 0x5e1   : > { %v1770_v43 = vpop.permute.xlu1 %1769  ;;  %v1942_v33 = vsel %vm1458_vm5, %v1896_v4, %v1941_v12  ;;  %v13870_v4 = vld [vmem:[#allocation118_spill] sm:$0xff] }
 0x5e2   : > { %v1904_v37 = vrot.slane %v1770_v43, %v9468_v21  ;;  %v1927_v43 = vrot.slane %v1785_v53, %v9458_v48 }
 0x5e3   : > { %5815 = vadd.xlane.f32.xlu0 %v5814_v15  ;;  %v5790_v15 = vsel %vm1145_vm1, %v10327_v54, 0.0  ;;  %v13866_v54 = vld [vmem:[#allocation80_spill] sm:$0xff] }
 0x5e4   : > { %v1905_v45 = vsel %vm1317_vm2, %v1904_v37, %v1900_v59  ;;  %v5781_v37 = vsel %vm1145_vm1, %v10224_v31, 0.0  ;;  %v5829_v31 = vsel %vm1145_vm1, %v10387_v57, 0.0  ;;  %v5838_v30 = vsel %vm1145_vm1, %v13866_v54, 0.0 }
 0x5e5   : > { %v1776_v22 = vpop.permute.xlu1 %1775  ;;  %v1943_v40 = vsel %vm1460_vm6, %v1905_v45, %v1942_v33  ;;  %v5793_v59 = vsel %vm1145_vm1, %v13867_v8, 0.0  ;;  %v5835_v57 = vsel %vm1145_vm1, %v13869_v1, 0.0  ;;  %v5799_v45 = vsel %vm1145_vm1, %v13871_v26, 0.0 }
 0x5e6   : > { %v1913_v46 = vrot.slane %v1776_v22, %v9468_v21 }
 0x5e7   : > { %5779 = vadd.xlane.f32.xlu0 %v5778_v23  ;;  %v13872_v23 = vld [vmem:[#allocation121_spill] sm:$0xff] }
 0x5e8   : > { %v1914_v56 = vsel %vm1317_vm2, %v1913_v46, %v1909_v28  ;;  %v5850_v12 = vsel %vm1145_vm1, %v13872_v23, 0.0 }
 0x5e9   : > { %v1782_v61 = vpop.permute.xlu1 %1781  ;;  %v1944_v9 = vsel %vm1462_vm7, %v1914_v56, %v1943_v40 }
 0x5ea   : > { %v1922_v34 = vrot.slane %v1782_v61, %v9468_v21 }
 0x5eb   : > { %5821 = vadd.xlane.f32.xlu0 %v5820_v13 }
 0x5ec   : > { %v1923_v11 = vsel %vm1317_vm2, %v1922_v34, %v1918_v58  ;;  %v5844_v34 = vsel %vm1145_vm1, %v13870_v4, 0.0 }
 0x5ed   : > { %v1788_v63 = vpop.permute.xlu1 %1787  ;;  %v1945_v22 = vsel %vm1464_vm8, %v1923_v11, %v1944_v9  ;;  %v13873_v11 = vld [vmem:[#allocation123_spill] sm:$0xff] }
 0x5ee   : > { %v1931_v52 = vrot.slane %v1788_v63, %v9468_v21  ;;  %v5841_v63 = vsel %vm1145_vm1, %v13873_v11, 0.0 }
 0x5ef   : > { %5785 = vadd.xlane.f32.xlu0 %v5784_v60 }
 0x5f0   : > { %v1932_v42 = vsel %vm1317_vm2, %v1931_v52, %v1927_v43  ;;  %v13874_v52 = vld [vmem:[#allocation126_spill] sm:$0xff] }
 0x5f1   : > { %v1946_v6 = vsel %vm1466_vm9, %v1932_v42, %v1945_v22  ;;  %v5805_v13 = vsel %vm1145_vm1, %v13874_v52, 0.0 }
 0x5f2   : > { %v1952_v20 = vsel %vm419_vm0, %v1946_v6, 0.0  ;;  %v13875_v6 = vld [vmem:[#allocation130_spill] sm:$0xff] }
 0x5f3   : > { %1953 = vadd.xlane.f32.xlu1 %v1952_v20  ;;  %5827 = vadd.xlane.f32.xlu0 %v5826_v27  ;;  %v5847_v20 = vsel %vm1145_vm1, %v13875_v6, 0.0 }
 0x5f7   : > { %5818 = vadd.xlane.f32.xlu1 %v5817_v49  ;;  %5791 = vadd.xlane.f32.xlu0 %v5790_v15 }
 0x5fb   : > { %5782 = vadd.xlane.f32.xlu1 %v5781_v37  ;;  %5833 = vadd.xlane.f32.xlu0 %v5832_v47 }
 0x5ff   : > { %5824 = vadd.xlane.f32.xlu1 %v5823_v18  ;;  %5797 = vadd.xlane.f32.xlu0 %v5796_v17 }
 0x602   : > { %v3250_v55 = vpop.permute.xlu1 %3249 }
 0x603   : > { %5788 = vadd.xlane.f32.xlu1 %v5787_v62  ;;  %v3253_v46 = vpop.permute.xlu0 %3252  ;;  %5839 = vadd.xlane.f32.xlu0 %v5838_v30  ;;  %v3347_v37 = vrot.slane %v3250_v55, %v9458_v48 }
 0x604   : > { %v3351_v27 = vrot.slane %v3253_v46, %v9468_v21 }
 0x606   : > { %v3256_v61 = vpop.permute.xlu1 %3255  ;;  %v3352_v8 = vsel %vm1317_vm2, %v3351_v27, %v3347_v37 }
 0x607   : > { %5830 = vadd.xlane.f32.xlu1 %v5829_v31  ;;  %v3262_v28 = vpop.permute.xlu0 %3261  ;;  %5803 = vadd.xlane.f32.xlu0 %v5802_v29  ;;  %v3356_v15 = vrot.slane %v3256_v61, %v9458_v48 }
 0x608   : > { %v3365_v62 = vrot.slane %v3262_v28, %v9458_v48 }
 0x60a   : > { %v3259_v58 = vpop.permute.xlu1 %3258 }
 0x60b   : > { %5794 = vadd.xlane.f32.xlu1 %v5793_v59  ;;  %v3268_v53 = vpop.permute.xlu0 %3267  ;;  %5845 = vadd.xlane.f32.xlu0 %v5844_v34  ;;  %v3360_v22 = vrot.slane %v3259_v58, %v9468_v21 }
 0x60c   : > { %v3374_v17 = vrot.slane %v3268_v53, %v9458_v48 }
 0x60d   : > { %v3361_v31 = vsel %vm1317_vm2, %v3360_v22, %v3356_v15 }
 0x60e   : > { %v3265_v56 = vpop.permute.xlu1 %3264  ;;  %v3488_v28 = vsel %vm1454_vm3, %v3361_v31, %v3352_v8 }
 0x60f   : > { %5836 = vadd.xlane.f32.xlu1 %v5835_v57  ;;  %v3274_v33 = vpop.permute.xlu0 %3273  ;;  %5851 = vadd.xlane.f32.xlu0 %v5850_v12  ;;  %v3369_v60 = vrot.slane %v3265_v56, %v9468_v21 }
 0x610   : > { %v3383_v30 = vrot.slane %v3274_v33, %v9458_v48 }
 0x611   : > { %v3370_v46 = vsel %vm1317_vm2, %v3369_v60, %v3365_v62 }
 0x612   : > { %v3271_v43 = vpop.permute.xlu1 %3270  ;;  %v3489_v4 = vsel %vm1456_vm4, %v3370_v46, %v3488_v28 }
 0x613   : > { %5800 = vadd.xlane.f32.xlu1 %v5799_v45  ;;  %v3280_v40 = vpop.permute.xlu0 %3279  ;;  %v3378_v18 = vrot.slane %v3271_v43, %v9468_v21 }
 0x614   : > { %v3392_v59 = vrot.slane %v3280_v40, %v9458_v48 }
 0x615   : > { %v3379_v36 = vsel %vm1317_vm2, %v3378_v18, %v3374_v17 }
 0x616   : > { %v3277_v9 = vpop.permute.xlu1 %3276  ;;  %v3490_v58 = vsel %vm1458_vm5, %v3379_v36, %v3489_v4 }
 0x617   : > { %5842 = vadd.xlane.f32.xlu1 %v5841_v63  ;;  %v3286_v42 = vpop.permute.xlu0 %3285  ;;  %v3387_v16 = vrot.slane %v3277_v9, %v9468_v21 }
 0x618   : > { %v3401_v1 = vrot.slane %v3286_v42, %v9458_v48 }
 0x619   : > { %v3388_v57 = vsel %vm1317_vm2, %v3387_v16, %v3383_v30 }
 0x61a   : > { %v3283_v49 = vpop.permute.xlu1 %3282  ;;  %v3491_v45 = vsel %vm1460_vm6, %v3388_v57, %v3490_v58 }
 0x61b   : > { %5806 = vadd.xlane.f32.xlu1 %v5805_v13  ;;  %v3292_v47 = vpop.permute.xlu0 %3291  ;;  %v3396_v54 = vrot.slane %v3283_v49, %v9468_v21 }
 0x61c   : > { %v3410_v23 = vrot.slane %v3292_v47, %v9458_v48 }
 0x61d   : > { %v3397_v34 = vsel %vm1317_vm2, %v3396_v54, %v3392_v59 }
 0x61e   : > { %v3289_v55 = vpop.permute.xlu1 %3288  ;;  %v3492_v33 = vsel %vm1462_vm7, %v3397_v34, %v3491_v45 }
 0x61f   : > { %5848 = vadd.xlane.f32.xlu1 %v5847_v20  ;;  %v3298_v29 = vpop.permute.xlu0 %3297  ;;  %v3405_v61 = vrot.slane %v3289_v55, %v9468_v21 }
 0x620   : > { %v3419_v54 = vrot.slane %v3298_v29, %v9458_v48 }
 0x621   : > { %v3406_v53 = vsel %vm1317_vm2, %v3405_v61, %v3401_v1 }
 0x622   : > { %v3295_v26 = vpop.permute.xlu1 %3294  ;;  %v3493_v63 = vsel %vm1464_vm8, %v3406_v53, %v3492_v33 }
 0x623   : > { %v3304_v12 = vpop.permute.xlu0 %3303  ;;  %v3414_v56 = vrot.slane %v3295_v26, %v9468_v21 }
 0x624   : > { %v3428_v47 = vrot.slane %v3304_v12, %v9458_v48 }
 0x625   : > { %v3415_v11 = vsel %vm1317_vm2, %v3414_v56, %v3410_v23 }
 0x626   : > { %v3301_v43 = vpop.permute.xlu1 %3300  ;;  %v3494_v40 = vsel %vm1466_vm9, %v3415_v11, %v3493_v63 }
 0x627   : > { %v3310_v52 = vpop.permute.xlu0 %3309  ;;  %v3504_v13 = vsel %vm419_vm0, %v3494_v40, 0.0  ;;  %v3423_v62 = vrot.slane %v3301_v43, %v9468_v21 }
 0x628   : > { %3505 = vadd.xlane.f32.xlu0 %v3504_v13  ;;  %v3437_v17 = vrot.slane %v3310_v52, %v9458_v48 }
 0x629   : > { %v3424_v61 = vsel %vm1317_vm2, %v3423_v62, %v3419_v54 }
 0x62a   : > { %v3307_v9 = vpop.permute.xlu1 %3306 }
 0x62b   : > { %v3316_v42 = vpop.permute.xlu0 %3315  ;;  %v3432_v27 = vrot.slane %v3307_v9, %v9468_v21 }
 0x62c   : > { %v3446_v30 = vrot.slane %v3316_v42, %v9458_v48 }
 0x62d   : > { %v3433_v46 = vsel %vm1317_vm2, %v3432_v27, %v3428_v47  ;;  %v13876_v27 = vld [vmem:[#allocation79_spill] sm:$0xff] }
 0x62e   : > { %v3313_v22 = vpop.permute.xlu1 %3312  ;;  %v3495_v29 = vsel %vm1454_vm3, %v3433_v46, %v3424_v61 }
 0x62f   : > { %v3322_v6 = vpop.permute.xlu0 %3321  ;;  %v3441_v37 = vrot.slane %v3313_v22, %v9468_v21 }
 0x630   : > { %v3455_v8 = vrot.slane %v3322_v6, %v9458_v48 }
 0x631   : > { %v3442_v59 = vsel %vm1317_vm2, %v3441_v37, %v3437_v17 }
 0x632   : > { %v3319_v20 = vpop.permute.xlu1 %3318  ;;  %v3496_v53 = vsel %vm1456_vm4, %v3442_v59, %v3495_v29  ;;  %v13881_v59 = vld [vmem:[#allocation68_spill] sm:$0xff] }
 0x633   : > { %v3328_v60 = vpop.permute.xlu0 %3327  ;;  %v3450_v16 = vrot.slane %v3319_v20, %v9468_v21 }
 0x634   : > { %v3464_v28 = vrot.slane %v3328_v60, %v9458_v48 }
 0x635   : > { %v3451_v1 = vsel %vm1317_vm2, %v3450_v16, %v3446_v30  ;;  %v13878_v16 = vld [vmem:[#allocation86_spill] sm:$0xff] }
 0x636   : > { %v3325_v49 = vpop.permute.xlu1 %3324  ;;  %v3497_v45 = vsel %vm1458_vm5, %v3451_v1, %v3496_v53 }
 0x637   : > { %v3334_v15 = vpop.permute.xlu0 %3333  ;;  %v3459_v31 = vrot.slane %v3325_v49, %v9468_v21 }
 0x638   : > { %v3473_v4 = vrot.slane %v3334_v15, %v9458_v48  ;;  %v13877_v15 = vld [vmem:[#allocation54_spill] sm:$0xff] }
 0x639   : > { %v3460_v34 = vsel %vm1317_vm2, %v3459_v31, %v3455_v8  ;;  %v13879_v31 = vld [vmem:[#allocation64_spill] sm:$0xff] }
 0x63a   : > { %v3331_v18 = vpop.permute.xlu1 %3330  ;;  %v3498_v56 = vsel %vm1460_vm6, %v3460_v34, %v3497_v45 }
 0x63b   : > { %v3468_v55 = vrot.slane %v3331_v18, %v9468_v21  ;;  %v3340_v58 = vpop.permute.xlu0 %3339 }
 0x63c   : > { %v3482_v33 = vrot.slane %v3340_v58, %v9458_v48 }
 0x63d   : > { %v3469_v26 = vsel %vm1317_vm2, %v3468_v55, %v3464_v28  ;;  %v13880_v55 = vld [vmem:[#allocation58_spill] sm:$0xff] }
 0x63e   : > { %v3337_v36 = vpop.permute.xlu1 %3336  ;;  %v3499_v63 = vsel %vm1462_vm7, %v3469_v26, %v3498_v56  ;;  %v13884_v26 = vld [vmem:[#allocation66_spill] sm:$0xff] }
 0x63f   : > { %v3477_v57 = vrot.slane %v3337_v36, %v9468_v21 }
 0x641   : > { %v3478_v23 = vsel %vm1317_vm2, %v3477_v57, %v3473_v4  ;;  %v13882_v57 = vld [vmem:[#allocation62_spill] sm:$0xff]  ;;  %v13883_v4 = vld [vmem:[#allocation84_spill] sm:$0xff] }
 0x642   : > { %v3343_v12 = vpop.permute.xlu1 %3342  ;;  %v3500_v40 = vsel %vm1464_vm8, %v3478_v23, %v3499_v63  ;;  %v13885_v23 = vld [vmem:[#allocation69_spill] sm:$0xff] }
 0x643   : > { %v3486_v11 = vrot.slane %v3343_v12, %v9468_v21 }
 0x645   : > { %v3487_v43 = vsel %vm1317_vm2, %v3486_v11, %v3482_v33  ;;  %v13886_v11 = vld [vmem:[#allocation87_spill] sm:$0xff] }
 0x646   : > { %v3501_v52 = vsel %vm1466_vm9, %v3487_v43, %v3500_v40  ;;  %v13887_v43 = vld [vmem:[#allocation91_spill] sm:$0xff] }
 0x647   : > { %v3507_v13 = vsel %vm419_vm0, %v3501_v52, 0.0 }
 0x648   : > { %3508 = vadd.xlane.f32.xlu1 %v3507_v13 }
 0x668   : > { %v1951_v9 = vpop.xlane.xlu0 %1950 }
 0x669   : > { %v1960_v42 = vrot.slane %v1951_v9, %v13740_v5  ;;  %v1964_v22 = vrot.slane %v1951_v9, %v10213_v2  ;;  %v1968_v6 = vrot.slane %v1951_v9, %v10227_v0  ;;  %v1972_v20 = vrot.slane %v1951_v9, %v10249_v39 }
 0x66a   : > { %v1976_v60 = vrot.slane %v1951_v9, %v10270_v38  ;;  %v1980_v47 = vrot.slane %v1951_v9, %v10221_v25  ;;  %v1984_v30 = vrot.slane %v1951_v9, %v10233_v7  ;;  %v1988_v61 = vrot.slane %v1951_v9, %v10245_v3 }
 0x66b   : > { %7994 = vrcp.f32 %v1960_v42 }
 0x66c   : > { %7996 = vrcp.f32 %v1964_v22  ;;  %v10877_v42 = vpop.xlane.xlu0 %5815  ;;  %v13888_v22 = vld [vmem:[#allocation89_spill] sm:$0xff] }
 0x66d   : > { %7998 = vrcp.f32 %v1968_v6 }
 0x66e   : > { %8000 = vrcp.f32 %v1972_v20  ;;  %v13889_v20 = vld [vmem:[#allocation83_spill] sm:$0xff] }
 0x66f   : > { %8002 = vrcp.f32 %v1976_v60 }
 0x670   : > { %8004 = vrcp.f32 %v1980_v47  ;;  %v13891_v47 = vld [vmem:[#allocation78_spill] sm:$0xff] }
 0x671   : > { %8006 = vrcp.f32 %v1984_v30 }
 0x672   : > { %8008 = vrcp.f32 %v1988_v61 }
 0x678   : > { %v7995_v49 = vpop.eup %7994 }
 0x679   : > { %v2038_v37 = vmul.f32 %v7995_v49, %v13876_v27  ;;  %v2039_v18 = vmul.f32 %v7995_v49, %v13877_v15  ;;  %v7997_v62 = vpop.eup %7996  ;;  %v13890_v15 = vld [vmem:[#allocation70_spill] sm:$0xff] }
 0x67a   : > { %v2041_v17 = vmul.f32 %v7997_v62, %v13878_v16  ;;  %v2042_v54 = vmul.f32 %v7997_v62, %v13879_v31  ;;  %v7999_v46 = vpop.eup %7998  ;;  %v10889_v31 = vpop.xlane.xlu0 %5779 }
 0x67b   : > { %2118 = vperm.xlu0 %7862, %v2038_v37   ;;  %2121 = vperm.xlu1 %7863, %v2039_v18   ;;  %v2044_v8 = vmul.f32 %v7999_v46, %v13880_v55  ;;  %v2045_v36 = vmul.f32 %v7999_v46, %v13881_v59  ;;  %v8001_v28 = vpop.eup %8000  ;;  %v13893_v46 = vld [vmem:[#allocation71_spill] sm:$0xff] }
 0x67c   : > { %v10861_v1 = vpop.xlane.xlu1 %1953  ;;  %v2047_v29 = vmul.f32 %v8001_v28, %v13882_v57  ;;  %v2048_v34 = vmul.f32 %v8001_v28, %v13883_v4  ;;  %v8003_v53 = vpop.eup %8002  ;;  %v13894_v28 = vld [vmem:[#allocation120_spill] sm:$0xff] }
 0x67d   : > { %v1992_v58 = vrot.slane %v10861_v1, %v13740_v5  ;;  %v2050_v45 = vmul.f32 %v8003_v53, %v13884_v26  ;;  %v2051_v12 = vmul.f32 %v8003_v53, %v13885_v23  ;;  %v1996_v56 = vrot.slane %v10861_v1, %v10213_v2  ;;  %v8005_v33 = vpop.eup %8004  ;;  %v13896_v26 = vld [vmem:[#allocation85_spill] sm:$0xff]  ;;  %v13897_v23 = vld [vmem:[#allocation88_spill] sm:$0xff] }
 0x67e   : > { %v2053_v63 = vmul.f32 %v8005_v33, %v13886_v11  ;;  %v2054_v40 = vmul.f32 %v8005_v33, %v13887_v43  ;;  %v2000_v52 = vrot.slane %v10861_v1, %v10227_v0  ;;  %v8007_v13 = vpop.eup %8006  ;;  %v2004_v49 = vrot.slane %v10861_v1, %v10249_v39  ;;  %v10897_v61 = vpop.xlane.xlu0 %5821 }
 0x67f   : > { %2124 = vperm.xlu0 %7862, %v2041_v17   ;;  %2127 = vperm.xlu1 %7863, %v2042_v54   ;;  %8010 = vrcp.f32 %v1992_v58  ;;  %v2056_v6 = vmul.f32 %v8007_v13, %v13888_v22  ;;  %v2057_v60 = vmul.f32 %v8007_v13, %v13889_v20  ;;  %v8009_v27 = vpop.eup %8008  ;;  %v2008_v16 = vrot.slane %v10861_v1, %v10270_v38  ;;  %v13892_v54 = vld [vmem:[#allocation67_spill] sm:$0xff] }
 0x680   : > { %8012 = vrcp.f32 %v1996_v56  ;;  %v10875_v9 = vpop.xlane.xlu1 %5818  ;;  %v2059_v18 = vmul.f32 %v8009_v27, %v13890_v15  ;;  %v2060_v62 = vmul.f32 %v8009_v27, %v13891_v47  ;;  %v2020_v56 = vrot.slane %v10861_v1, %v10245_v3  ;;  %v13900_v20 = vld [vmem:[#allocation127_spill] sm:$0xff] }
 0x681   : > { %8014 = vrcp.f32 %v2000_v52 }
 0x682   : > { %8016 = vrcp.f32 %v2004_v49  ;;  %v5786_v11 = vpop.xlane.xlu0 %5785  ;;  %v13901_v49 = vld [vmem:[#allocation81_spill] sm:$0xff] }
 0x683   : > { %2130 = vperm.xlu0 %7862, %v2044_v8   ;;  %2133 = vperm.xlu1 %7863, %v2045_v36   ;;  %8018 = vrcp.f32 %v2008_v16  ;;  %v2012_v8 = vrot.slane %v10861_v1, %v10221_v25 }
 0x684   : > { %v10883_v37 = vpop.xlane.xlu1 %5782 }
 0x685   : > { %8020 = vrcp.f32 %v2012_v8 }
 0x687   : > { %2136 = vperm.xlu0 %7862, %v2047_v29   ;;  %2139 = vperm.xlu1 %7863, %v2048_v34   ;;  %v13895_v29 = vld [vmem:[#allocation74_spill] sm:$0xff]  ;;  %v2016_v34 = vrot.slane %v10861_v1, %v10233_v7 }
 0x688   : > { %v10895_v36 = vpop.xlane.xlu1 %5824 }
 0x689   : > { %8022 = vrcp.f32 %v2016_v34  ;;  %v13907_v34 = vld [vmem:[#allocation119_spill] sm:$0xff] }
 0x68a   : > { %8024 = vrcp.f32 %v2020_v56  ;;  %v13908_v56 = vld [vmem:[#allocation125_spill] sm:$0xff] }
 0x68b   : > { %2142 = vperm.xlu0 %7862, %v2050_v45   ;;  %2145 = vperm.xlu1 %7863, %v2051_v12  }
 0x68c   : > { %v8011_v17 = vpop.eup %8010  ;;  %v5789_v53 = vpop.xlane.xlu1 %5788 }
 0x68d   : > { %v2063_v30 = vmul.f32 %v8011_v17, %v13892_v54  ;;  %v2062_v55 = vmul.f32 %v8011_v17, %v13893_v46  ;;  %v8013_v59 = vpop.eup %8012 }
 0x68e   : > { %v2066_v57 = vmul.f32 %v8013_v59, %v13894_v28  ;;  %v2065_v4 = vmul.f32 %v8013_v59, %v13895_v29  ;;  %v8015_v58 = vpop.eup %8014  ;;  %v13906_v29 = vld [vmem:[#allocation133_spill] sm:$0xff] }
 0x68f   : > { %2148 = vperm.xlu0 %7862, %v2053_v63   ;;  %2151 = vperm.xlu1 %7863, %v2054_v40   ;;  %v2069_v45 = vmul.f32 %v8015_v58, %v13896_v26  ;;  %v2068_v12 = vmul.f32 %v8015_v58, %v13897_v23  ;;  %v8017_v33 = vpop.eup %8016  ;;  %v13898_v63 = vld [vmem:[#allocation124_spill] sm:$0xff]  ;;  %v13899_v40 = vld [vmem:[#allocation90_spill] sm:$0xff] }
 0x690   : > { %v2072_v43 = vmul.f32 %v8017_v33, %v13898_v63  ;;  %v2071_v52 = vmul.f32 %v8017_v33, %v13899_v40  ;;  %v8019_v13 = vpop.eup %8018  ;;  %v10909_v22 = vpop.xlane.xlu1 %5830  ;;  %v10930_v33 = vmul.f32 0.17677669, %v13908_v56  ;;  %v13910_v63 = vld [vmem:[#allocation48_spill] sm:$0xff]  ;;  %v13911_v40 = vld [vmem:[#allocation129_spill] sm:$0xff] }
 0x691   : > { %v2074_v1 = vmul.f32 %v8019_v13, %v13901_v49  ;;  %v13915_v49 = vld [vmem:[#allocation134_spill] sm:$0xff] }
 0x692   : > { %v8021_v27 = vpop.eup %8020  ;;  %13909 = vst [vmem:[#allocation76_spill] sm:$0xff] %v10930_v33 }
 0x693   : > { %2154 = vperm.xlu0 %7862, %v2056_v6   ;;  %2157 = vperm.xlu1 %7863, %v2057_v60   ;;  %v10911_v6 = vpop.xlane.xlu0 %5827  ;;  %v2075_v60 = vmul.f32 %v8019_v13, %v13900_v20  ;;  %v13913_v13 = vld [vmem:[#allocation122_spill] sm:$0xff] }
 0x694   : > { %v5795_v15 = vpop.xlane.xlu1 %5794  ;;  %v10939_v20 = vmul.f32 0.17677669, %v13913_v13 }
 0x696   : > { %v8023_v17 = vpop.eup %8022 }
 0x697   : > { %2160 = vperm.xlu0 %7862, %v2059_v18   ;;  %2163 = vperm.xlu1 %7863, %v2060_v62   ;;  %v13902_v18 = vld [vmem:[#allocation128_spill] sm:$0xff]  ;;  %v13903_v62 = vld [vmem:[#allocation75_spill] sm:$0xff]  ;;  %v5792_v54 = vpop.xlane.xlu0 %5791  ;;  %v8025_v59 = vpop.eup %8024 }
 0x698   : > { %v2078_v47 = vmul.f32 %v8021_v27, %v13902_v18  ;;  %v2077_v16 = vmul.f32 %v8021_v27, %v13903_v62  ;;  %v10919_v28 = vpop.xlane.xlu1 %5836  ;;  %v2083_v58 = vmul.f32 %v8025_v59, %v13907_v34  ;;  %v10948_v27 = vmul.f32 0.17677669, %v10493_v44 }
 0x699   : > { %v10950_v18 = vmul.f32 0.17677669, %v5789_v53  ;;  %v5936_v62 = vrot.slane %v10930_v33, %v9468_v21 }
 0x69b   : > { %2169 = vperm.xlu1 %7863, %v2063_v30   ;;  %2166 = vperm.xlu0 %7862, %v2062_v55   ;;  %v13904_v30 = vld [vmem:[#allocation131_spill] sm:$0xff]  ;;  %v13905_v55 = vld [vmem:[#allocation117_spill] sm:$0xff]  ;;  %13917 = vst [vmem:[#allocation63_spill] sm:$0xff] %v10950_v18 }
 0x69c   : > { %v2081_v46 = vmul.f32 %v8023_v17, %v13904_v30  ;;  %v2080_v8 = vmul.f32 %v8023_v17, %v13905_v55  ;;  %v5801_v26 = vpop.xlane.xlu1 %5800  ;;  %v10957_v17 = vmul.f32 0.17677669, %v5795_v15  ;;  %v5923_v55 = vrot.slane %v10939_v20, %v9458_v48 }
 0x69d   : > { %v10965_v53 = vmul.f32 0.17677669, %v5801_v26 }
 0x69e   : > { %13919 = vst [vmem:[#allocation82_spill] sm:$0xff] %v10957_v17  ;;  %v5972_v26 = vrot.slane %v10957_v17, %v9468_v21 }
 0x69f   : > { %2175 = vperm.xlu1 %7863, %v2066_v57   ;;  %2172 = vperm.xlu0 %7862, %v2065_v4   ;;  %v10921_v57 = vpop.xlane.xlu0 %5833  ;;  %v2084_v4 = vmul.f32 %v8025_v59, %v13906_v29  ;;  %13921 = vst [vmem:[#allocation123_spill] sm:$0xff] %v10965_v53 }
 0x6a0   : > { %v10925_v23 = vpop.xlane.xlu1 %5842 }
 0x6a3   : > { %2181 = vperm.xlu1 %7863, %v2069_v45   ;;  %2178 = vperm.xlu0 %7862, %v2068_v12   ;;  %v5798_v45 = vpop.xlane.xlu0 %5797 }
 0x6a4   : > { %v10979_v29 = vmul.f32 0.17677669, %v5798_v45  ;;  %v5981_v45 = vrot.slane %v10965_v53, %v9468_v21 }
 0x6a6   : > { %13924 = vst [vmem:[#allocation79_spill] sm:$0xff] %v10979_v29 }
 0x6a7   : > { %2187 = vperm.xlu1 %7863, %v2072_v43   ;;  %2184 = vperm.xlu0 %7862, %v2071_v52   ;;  %v10927_v12 = vpop.xlane.xlu0 %5839  ;;  %v10933_v43 = vmul.f32 0.17677669, %v13910_v63  ;;  %v10936_v52 = vmul.f32 0.17677669, %v13911_v40 }
 0x6a9   : > { %13912 = vst [vmem:[#allocation80_spill] sm:$0xff] %v10936_v52  ;;  %v5945_v30 = vrot.slane %v10936_v52, %v9468_v21 }
 0x6ab   : > { %2193 = vperm.xlu1 %7863, %v2075_v60   ;;  %2190 = vperm.xlu0 %7862, %v2074_v1   ;;  %v10942_v60 = vmul.f32 0.17677669, %v10883_v37  ;;  %v10945_v1 = vmul.f32 0.17677669, %v13915_v49  ;;  %v5932_v37 = vrot.slane %v10933_v43, %v9458_v48  ;;  %v5804_v44 = vpop.xlane.xlu0 %5803 }
 0x6ad   : > { %13914 = vst [vmem:[#allocation72_spill] sm:$0xff] %v10942_v60  ;;  %13916 = vst [vmem:[#allocation73_spill] sm:$0xff] %v10945_v1  ;;  %v5927_v59 = vrot.slane %v10945_v1, %v9468_v21  ;;  %v5937_v34 = vsel %vm1317_vm2, %v5936_v62, %v5932_v37  ;;  %v5977_v37 = vrot.slane %v10979_v29, %v9458_v48  ;;  %v13977_v1 = vld [vmem:[#allocation145_spill] sm:$0xff] }
 0x6af   : > { %2199 = vperm.xlu1 %7863, %v2078_v47   ;;  %2196 = vperm.xlu0 %7862, %v2077_v16   ;;  %v5807_v47 = vpop.xlane.xlu1 %5806  ;;  %v10955_v16 = vmul.f32 0.17677669, %v10889_v31  ;;  %v5954_v31 = vrot.slane %v10942_v60, %v9468_v21  ;;  %v5928_v40 = vsel %vm1317_vm2, %v5927_v59, %v5923_v55 }
 0x6b0   : > { %v10973_v15 = vmul.f32 0.17677669, %v5807_v47  ;;  %v6064_v62 = vsel %vm1454_vm3, %v5937_v34, %v5928_v40 }
 0x6b1   : > { %13918 = vst [vmem:[#allocation118_spill] sm:$0xff] %v10955_v16 }
 0x6b2   : > { %13923 = vst [vmem:[#allocation130_spill] sm:$0xff] %v10973_v15  ;;  %v5990_v47 = vrot.slane %v10973_v15, %v9468_v21 }
 0x6b3   : > { %2205 = vperm.xlu1 %7863, %v2081_v46   ;;  %2202 = vperm.xlu0 %7862, %v2080_v8   ;;  %v10963_v46 = vmul.f32 0.17677669, %v5786_v11  ;;  %v10969_v8 = vmul.f32 0.17677669, %v5792_v54  ;;  %v5941_v11 = vrot.slane %v10948_v27, %v9458_v48  ;;  %v5950_v54 = vrot.slane %v10955_v16, %v9458_v48 }
 0x6b5   : > { %13920 = vst [vmem:[#allocation121_spill] sm:$0xff] %v10963_v46  ;;  %13922 = vst [vmem:[#allocation126_spill] sm:$0xff] %v10969_v8  ;;  %v5946_v56 = vsel %vm1317_vm2, %v5945_v30, %v5941_v11  ;;  %v5959_v63 = vrot.slane %v10963_v46, %v9458_v48  ;;  %v5968_v13 = vrot.slane %v10969_v8, %v9458_v48 }
 0x6b6   : > { %v5955_v49 = vsel %vm1317_vm2, %v5954_v31, %v5950_v54  ;;  %v5982_v31 = vsel %vm1317_vm2, %v5981_v45, %v5977_v37  ;;  %v11025_v45 = vrot.slane %v10540_v14, %v10227_v0 }
 0x6b7   : > { %2211 = vperm.xlu1 %7863, %v2084_v4   ;;  %2208 = vperm.xlu0 %7862, %v2083_v58   ;;  %v5963_v4 = vrot.slane %v10950_v18, %v9468_v21  ;;  %v10986_v58 = vmul.f32 0.17677669, %v5804_v44  ;;  %v6065_v44 = vsel %vm1456_vm4, %v5946_v56, %v6064_v62  ;;  %v5973_v59 = vsel %vm1317_vm2, %v5972_v26, %v5968_v13  ;;  %v13926_v13 = vld [vmem:[#allocation26_spill] sm:$0xff]  ;;  %v13927_v62 = vld [vmem:[#allocation53_spill] sm:$0xff] }
 0x6b8   : > { %v6066_v11 = vsel %vm1458_vm5, %v5955_v49, %v6065_v44  ;;  %v4648_v37 = vsub.f32 %v13927_v62, %v11025_v45 }
 0x6b9   : > { %13925 = vst [vmem:[#allocation54_spill] sm:$0xff] %v10986_v58  ;;  %v5964_v30 = vsel %vm1317_vm2, %v5963_v4, %v5959_v63  ;;  %v5986_v55 = vrot.slane %v10986_v58, %v9458_v48  ;;  %v11017_v4 = vrot.slane %v10540_v14, %v13740_v5  ;;  %v11020_v63 = vpop.xlane.xlu0 %5845 }
 0x6ba   : > { %v6067_v34 = vsel %vm1460_vm6, %v5964_v30, %v6066_v11  ;;  %v13928_v30 = vld [vmem:[#allocation132_spill] sm:$0xff] }
 0x6bb   : > { %v5991_v54 = vsel %vm1317_vm2, %v5990_v47, %v5986_v55  ;;  %v6068_v40 = vsel %vm1462_vm7, %v5973_v59, %v6067_v34  ;;  %v4645_v49 = vsub.f32 %v13926_v13, %v11017_v4  ;;  %v11031_v47 = vrot.slane %v10540_v14, %v10249_v39  ;;  %v13929_v59 = vld [vmem:[#allocation99_spill] sm:$0xff] }
 0x6bc   : > { %v6069_v15 = vsel %vm1464_vm8, %v5982_v31, %v6068_v40  ;;  %v5853_v44 = vsel %vm1145_vm1, %v13928_v30, 0.0  ;;  %v4684_v31 = vmul.f32 1.442695, %v4648_v37 }
 0x6bd   : > { %v6070_v56 = vsel %vm1466_vm9, %v5991_v54, %v6069_v15  ;;  %v4678_v15 = vmul.f32 1.442695, %v4645_v49  ;;  %v11037_v55 = vpop.xlane.xlu0 %5851  ;;  %v4650_v11 = vsub.f32 %v13929_v59, %v11031_v47  ;;  %v11047_v49 = vpop.xlane.xlu1 %5848 }
 0x6be   : > { %v6080_v26 = vsel %vm419_vm0, %v6070_v56, -inf }
 0x6bf   : > { %8026 = vpow2.f32 %v4678_v15  ;;  %v4688_v34 = vmul.f32 1.442695, %v4650_v11 }
 0x6c0   : > { %8028 = vpow2.f32 %v4684_v31 }
 0x6c1   : > { %v3506_v54 = vpop.xlane.xlu0 %3505  ;;  %8030 = vpow2.f32 %v4688_v34 }
 0x6c2   : > { %v3515_v40 = vrot.slane %v3506_v54, %v13740_v5  ;;  %v3519_v56 = vrot.slane %v3506_v54, %v10213_v2  ;;  %v3527_v62 = vrot.slane %v3506_v54, %v10249_v39  ;;  %v3535_v11 = vrot.slane %v3506_v54, %v10221_v25 }
 0x6c4   : > { %8032 = vrcp.f32 %v3515_v40 }
 0x6c5   : > { %8034 = vrcp.f32 %v3519_v56 }
 0x6cc   : > { %v11044_v13 = vpop.eup %8026 }
 0x6cd   : > { %13930 = vst [vmem:[#allocation86_spill] sm:$0xff] %v11044_v13  ;;  %v11050_v37 = vpop.eup %8028 }
 0x6ce   : > { %13931 = vst [vmem:[#allocation64_spill] sm:$0xff] %v11050_v37  ;;  %v11053_v15 = vpop.eup %8030 }
 0x6cf   : > { %13932 = vst [vmem:[#allocation58_spill] sm:$0xff] %v11053_v15 }
 0x6d1   : > { %v11055_v30 = vpop.xlane.xlu1 %3508  ;;  %v11058_v59 = vpop.eup %8032 }
 0x6d2   : > { %v3593_v40 = vmul.f32 %v11058_v59, %v10504_v35  ;;  %v11068_v56 = vpop.eup %8034  ;;  %v3543_v35 = vrot.slane %v3506_v54, %v10245_v3 }
 0x6d6   : > { %6081 = vmax.xlane.f32.xlu0 %v6080_v26  ;;  %v3523_v26 = vrot.slane %v3506_v54, %v10227_v0 }
 0x6d8   : > { %8036 = vrcp.f32 %v3523_v26  ;;  %v3539_v26 = vrot.slane %v3506_v54, %v10233_v7 }
 0x6d9   : > { %8038 = vrcp.f32 %v3527_v62 }
 0x6db   : > { %5854 = vadd.xlane.f32.xlu1 %v5853_v44  ;;  %v3531_v44 = vrot.slane %v3506_v54, %v10270_v38  ;;  %v3547_v54 = vrot.slane %v11055_v30, %v13740_v5 }
 0x6dd   : > { %8040 = vrcp.f32 %v3531_v44 }
 0x6de   : > { %8042 = vrcp.f32 %v3535_v11 }
 0x6df   : > { %8044 = vrcp.f32 %v3539_v26 }
 0x6e0   : > { %8046 = vrcp.f32 %v3543_v35 }
 0x6e1   : > { %8048 = vrcp.f32 %v3547_v54 }
 0x6ec   : > { %4776 = vperm.xlu0 %7862, %v11044_v13   ;;  %v11077_v13 = vpop.eup %8036 }
 0x6ed   : > { %v3599_v11 = vmul.f32 %v11077_v13, %v10520_v50 }
 0x6f0   : > { %4785 = vperm.xlu0 %7862, %v11050_v37  }
 0x6f4   : > { %4791 = vperm.xlu0 %7862, %v11053_v15   ;;  %v3596_v15 = vmul.f32 %v11068_v56, %v10515_v24 }
 0x6f6   : > { %v11062_v31 = vpop.permute.xlu0 %2118  ;;  %v11064_v34 = vpop.permute.xlu1 %2121 }
 0x6f7   : > { %13933 = vst [vmem:[#allocation68_spill] sm:$0xff] %v11062_v31  ;;  %13934 = vst [vmem:[#allocation62_spill] sm:$0xff] %v11064_v34 }
 0x6f8   : > { %3673 = vperm.xlu0 %7862, %v3593_v40   ;;  %v11086_v40 = vpop.eup %8038 }
 0x6f9   : > { %v11096_v26 = vpop.eup %8040 }
 0x6fa   : > { %v11071_v62 = vpop.permute.xlu0 %2124  ;;  %v11073_v37 = vpop.permute.xlu1 %2127  ;;  %v3605_v35 = vmul.f32 %v11096_v26, %v10542_v51  ;;  %v3555_v51 = vrot.slane %v11055_v30, %v10227_v0 }
 0x6fb   : > { %13935 = vst [vmem:[#allocation84_spill] sm:$0xff] %v11071_v62  ;;  %13936 = vst [vmem:[#allocation66_spill] sm:$0xff] %v11073_v37  ;;  %v11098_v29 = vpop.eup %8042  ;;  %v2229_v18 = vrot.slane %v11073_v37, %v9468_v21  ;;  %v2220_v37 = vrot.slane %v11064_v34, %v9468_v21  ;;  %v3559_v34 = vrot.slane %v11055_v30, %v10249_v39 }
 0x6fc   : > { %3679 = vperm.xlu0 %7862, %v3596_v15   ;;  %v3602_v15 = vmul.f32 %v11086_v40, %v10530_v41  ;;  %v3608_v41 = vmul.f32 %v11098_v29, %v10552_v10  ;;  %v11110_v8 = vpop.eup %8044 }
 0x6fd   : > { %v11142_v16 = vpop.eup %8046 }
 0x6fe   : > { %v11080_v44 = vpop.permute.xlu0 %2130  ;;  %v11082_v58 = vpop.permute.xlu1 %2133 }
 0x6ff   : > { %13937 = vst [vmem:[#allocation69_spill] sm:$0xff] %v11080_v44  ;;  %13938 = vst [vmem:[#allocation87_spill] sm:$0xff] %v11082_v58  ;;  %v2234_v54 = vrot.slane %v11080_v44, %v9458_v48  ;;  %v2238_v10 = vrot.slane %v11082_v58, %v9468_v21 }
 0x700   : > { %3685 = vperm.xlu0 %7862, %v3599_v11   ;;  %v3551_v11 = vrot.slane %v11055_v30, %v10213_v2 }
 0x702   : > { %v11088_v53 = vpop.permute.xlu0 %2136  ;;  %v11090_v24 = vpop.permute.xlu1 %2139  ;;  %8050 = vrcp.f32 %v3551_v11 }
 0x703   : > { %13939 = vst [vmem:[#allocation91_spill] sm:$0xff] %v11088_v53  ;;  %13940 = vst [vmem:[#allocation89_spill] sm:$0xff] %v11090_v24  ;;  %v2247_v11 = vrot.slane %v11090_v24, %v9468_v21  ;;  %8052 = vrcp.f32 %v3555_v51 }
 0x704   : > { %3691 = vperm.xlu0 %7862, %v3602_v15   ;;  %v2225_v15 = vrot.slane %v11071_v62, %v9458_v48  ;;  %v2243_v62 = vrot.slane %v11088_v53, %v9458_v48  ;;  %8054 = vrcp.f32 %v3559_v34 }
 0x706   : > { %v11100_v50 = vpop.permute.xlu0 %2142  ;;  %v11102_v17 = vpop.permute.xlu1 %2145  ;;  %v2230_v53 = vsel %vm1317_vm2, %v2229_v18, %v2225_v15  ;;  %v2248_v18 = vsel %vm1317_vm2, %v2247_v11, %v2243_v62  ;;  %v3563_v11 = vrot.slane %v11055_v30, %v10270_v38 }
 0x707   : > { %13941 = vst [vmem:[#allocation83_spill] sm:$0xff] %v11100_v50  ;;  %13942 = vst [vmem:[#allocation70_spill] sm:$0xff] %v11102_v17  ;;  %v2252_v44 = vrot.slane %v11100_v50, %v9458_v48  ;;  %v2256_v58 = vrot.slane %v11102_v17, %v9468_v21 }
 0x708   : > { %3697 = vperm.xlu0 %7862, %v3605_v35   ;;  %v2216_v35 = vrot.slane %v11062_v31, %v9458_v48  ;;  %v3611_v31 = vmul.f32 %v11110_v8, %v10564_v19  ;;  %v2239_v19 = vsel %vm1317_vm2, %v2238_v10, %v2234_v54  ;;  %v3614_v54 = vmul.f32 %v11142_v16, %v10576_v32 }
 0x709   : > { %v2257_v51 = vsel %vm1317_vm2, %v2256_v58, %v2252_v44  ;;  %v3567_v44 = vrot.slane %v11055_v30, %v10221_v25  ;;  %8056 = vrcp.f32 %v3563_v11  ;;  %v3571_v11 = vrot.slane %v11055_v30, %v10233_v7 }
 0x70a   : > { %v11116_v46 = vpop.permute.xlu0 %2148  ;;  %v11118_v60 = vpop.permute.xlu1 %2151  ;;  %v2221_v17 = vsel %vm1317_vm2, %v2220_v37, %v2216_v35 }
 0x70b   : > { %13943 = vst [vmem:[#allocation78_spill] sm:$0xff] %v11116_v46  ;;  %13944 = vst [vmem:[#allocation67_spill] sm:$0xff] %v11118_v60  ;;  %v2261_v24 = vrot.slane %v11116_v46, %v9458_v48  ;;  %v2357_v46 = vsel %vm1454_vm3, %v2230_v53, %v2221_v17  ;;  %8058 = vrcp.f32 %v3567_v44  ;;  %v11225_v44 = vrot.slane %v10540_v14, %v10221_v25 }
 0x70c   : > { %3703 = vperm.xlu0 %7862, %v3608_v41   ;;  %v2265_v41 = vrot.slane %v11118_v60, %v9468_v21  ;;  %v2358_v10 = vsel %vm1456_vm4, %v2239_v19, %v2357_v46  ;;  %8060 = vrcp.f32 %v3571_v11 }
 0x70d   : > { %v2359_v17 = vsel %vm1458_vm5, %v2248_v18, %v2358_v10  ;;  %v13951_v18 = vld [vmem:[#allocation135_spill] sm:$0xff]  ;;  %13961 = vst [vmem:[#allocation133_spill] sm:$0xff] %v11225_v44 }
 0x70e   : > { %v11149_v50 = vpop.permute.xlu0 %2154  ;;  %v11151_v52 = vpop.permute.xlu1 %2157  ;;  %v2266_v37 = vsel %vm1317_vm2, %v2265_v41, %v2261_v24  ;;  %v2360_v32 = vsel %vm1460_vm6, %v2257_v51, %v2359_v17  ;;  %v13955_v17 = vld [vmem:[#allocation137_spill] sm:$0xff] }
 0x70f   : > { %13945 = vst [vmem:[#allocation71_spill] sm:$0xff] %v11149_v50  ;;  %13946 = vst [vmem:[#allocation120_spill] sm:$0xff] %v11151_v52  ;;  %v2270_v15 = vrot.slane %v11149_v50, %v9458_v48  ;;  %v2274_v60 = vrot.slane %v11151_v52, %v9468_v21  ;;  %v2361_v34 = vsel %vm1462_vm7, %v2266_v37, %v2360_v32  ;;  %v13971_v50 = vld [vmem:[#allocation143_spill] sm:$0xff] }
 0x710   : > { %3709 = vperm.xlu0 %7862, %v3611_v31   ;;  %v11176_v31 = vpop.eup %8048 }
 0x711   : > { %v2275_v53 = vsel %vm1317_vm2, %v2274_v60, %v2270_v15  ;;  %v3617_v15 = vmul.f32 %v11176_v31, %v13951_v18  ;;  %v11196_v51 = vpop.eup %8050 }
 0x712   : > { %v11169_v35 = vpop.permute.xlu0 %2160  ;;  %v11171_v62 = vpop.permute.xlu1 %2163  ;;  %v2362_v24 = vsel %vm1464_vm8, %v2275_v53, %v2361_v34  ;;  %13952 = vst [vmem:[#allocation90_spill] sm:$0xff] %v11196_v51  ;;  %v3620_v53 = vmul.f32 %v11196_v51, %v13955_v17  ;;  %v13959_v34 = vld [vmem:[#allocation139_spill] sm:$0xff] }
 0x713   : > { %13947 = vst [vmem:[#allocation74_spill] sm:$0xff] %v11169_v35  ;;  %13948 = vst [vmem:[#allocation85_spill] sm:$0xff] %v11171_v62  ;;  %v2279_v46 = vrot.slane %v11169_v35, %v9458_v48  ;;  %v2283_v58 = vrot.slane %v11171_v62, %v9468_v21  ;;  %v11211_v32 = vpop.eup %8052  ;;  %v13965_v62 = vld [vmem:[#allocation141_spill] sm:$0xff] }
 0x714   : > { %3715 = vperm.xlu0 %7862, %v3614_v54   ;;  %13956 = vst [vmem:[#allocation128_spill] sm:$0xff] %v11211_v32  ;;  %v11221_v18 = vpop.eup %8054 }
 0x715   : > { %v2284_v41 = vsel %vm1317_vm2, %v2283_v58, %v2279_v46  ;;  %13960 = vst [vmem:[#allocation117_spill] sm:$0xff] %v11221_v18  ;;  %v3626_v11 = vmul.f32 %v11221_v18, %v13965_v62 }
 0x716   : > { %v11190_v19 = vpop.permute.xlu0 %2166  ;;  %v11192_v60 = vpop.permute.xlu1 %2169  ;;  %v2363_v54 = vsel %vm1466_vm9, %v2284_v41, %v2362_v24  ;;  %v3623_v24 = vmul.f32 %v11211_v32, %v13959_v34  ;;  %v3575_v41 = vrot.slane %v11055_v30, %v10245_v3  ;;  %v11239_v30 = vrot.slane %v10540_v14, %v10233_v7  ;;  %v13974_v7 = vld [vmem:[#allocation111_spill] sm:$0xff] }
 0x717   : > { %13949 = vst [vmem:[#allocation88_spill] sm:$0xff] %v11190_v19  ;;  %13950 = vst [vmem:[#allocation124_spill] sm:$0xff] %v11192_v60  ;;  %v11235_v34 = vpop.eup %8056 }
 0x718   : > { %3721 = vperm.xlu0 %7862, %v3617_v15   ;;  %2373 = vst.msk [vmem:[%s11199_s30] sm:$0xff] %vm419_vm0, %v2363_v54  ;;  %v13962_v15 = vld [vmem:[#allocation105_spill] sm:$0xff]  ;;  %8062 = vrcp.f32 %v3575_v41  ;;  %13966 = vst [vmem:[#allocation48_spill] sm:$0xff] %v11235_v34  ;;  %v3629_v25 = vmul.f32 %v11235_v34, %v13971_v50  ;;  %v11249_v62 = vpop.eup %8058  ;;  %v11253_v41 = vrot.slane %v10540_v14, %v10245_v3 }
 0x719   : > { %v4651_v54 = vsub.f32 %v13962_v15, %v11031_v47  ;;  %13967 = vst [vmem:[#allocation129_spill] sm:$0xff] %v11239_v30  ;;  %13972 = vst [vmem:[#allocation26_spill] sm:$0xff] %v11249_v62  ;;  %v11263_v50 = vpop.eup %8060  ;;  %v13979_v34 = vld [vmem:[#allocation41_spill] sm:$0xff] }
 0x71a   : > { %v11203_v10 = vpop.permute.xlu0 %2172  ;;  %v11205_v37 = vpop.permute.xlu1 %2175  ;;  %13973 = vst [vmem:[#allocation53_spill] sm:$0xff] %v11253_v41  ;;  %13978 = vst [vmem:[#allocation135_spill] sm:$0xff] %v11263_v50  ;;  %v11267_v18 = vrot.slane %v13979_v34, %v13740_v5 }
 0x71b   : > { %13953 = vst [vmem:[#allocation127_spill] sm:$0xff] %v11203_v10  ;;  %13954 = vst [vmem:[#allocation81_spill] sm:$0xff] %v11205_v37  ;;  %v4690_v52 = vmul.f32 1.442695, %v4651_v54  ;;  %v2297_v3 = vrot.slane %v11203_v10, %v9458_v48  ;;  %v2292_v10 = vrot.slane %v11192_v60, %v9468_v21 }
 0x71c   : > { %3727 = vperm.xlu0 %7862, %v3620_v53  }
 0x71d   : > { %8064 = vpow2.f32 %v4690_v52 }
 0x71e   : > { %v11213_v46 = vpop.permute.xlu0 %2178  ;;  %v11215_v58 = vpop.permute.xlu1 %2181 }
 0x71f   : > { %13957 = vst [vmem:[#allocation75_spill] sm:$0xff] %v11213_v46  ;;  %13958 = vst [vmem:[#allocation131_spill] sm:$0xff] %v11215_v58 }
 0x720   : > { %3733 = vperm.xlu0 %7862, %v3623_v24   ;;  %v13968_v24 = vld [vmem:[#allocation108_spill] sm:$0xff] }
 0x721   : > { %v4654_v35 = vsub.f32 %v13968_v24, %v11225_v44  ;;  %v3632_v44 = vmul.f32 %v11249_v62, %v13977_v1  ;;  %v2310_v1 = vrot.slane %v11215_v58, %v9468_v21  ;;  %v2288_v62 = vrot.slane %v11190_v19, %v9458_v48  ;;  %v13983_v19 = vld [vmem:[#allocation147_spill] sm:$0xff] }
 0x722   : > { %v11229_v17 = vpop.permute.xlu0 %2184  ;;  %v11231_v53 = vpop.permute.xlu1 %2187  ;;  %v3635_v60 = vmul.f32 %v11263_v50, %v13983_v19 }
 0x723   : > { %13963 = vst [vmem:[#allocation119_spill] sm:$0xff] %v11229_v17  ;;  %13964 = vst [vmem:[#allocation125_spill] sm:$0xff] %v11231_v53  ;;  %v4696_v24 = vmul.f32 1.442695, %v4654_v35 }
 0x724   : > { %3739 = vperm.xlu0 %7862, %v3626_v11   ;;  %v4656_v11 = vsub.f32 %v13974_v7, %v11239_v30  ;;  %v13980_v7 = vld [vmem:[#allocation115_spill] sm:$0xff]  ;;  %v2306_v30 = vrot.slane %v11213_v46, %v9458_v48 }
 0x725   : > { %v4658_v52 = vsub.f32 %v13980_v7, %v11253_v41  ;;  %v2319_v7 = vrot.slane %v11231_v53, %v9468_v21  ;;  %8066 = vpow2.f32 %v4696_v24  ;;  %v11297_v41 = vpop.eup %8062  ;;  %v13984_v53 = vld [vmem:[#allocation106_spill] sm:$0xff] }
 0x726   : > { %v11243_v47 = vpop.permute.xlu0 %2190  ;;  %v11245_v15 = vpop.permute.xlu1 %2193  ;;  %v4700_v35 = vmul.f32 1.442695, %v4656_v11  ;;  %v4660_v32 = vsub.f32 %v13984_v53, %v11267_v18  ;;  %v2311_v38 = vsel %vm1317_vm2, %v2310_v1, %v2306_v30  ;;  %v13987_v1 = vld [vmem:[#allocation149_spill] sm:$0xff] }
 0x727   : > { %13969 = vst [vmem:[#allocation122_spill] sm:$0xff] %v11243_v47  ;;  %13970 = vst [vmem:[#allocation134_spill] sm:$0xff] %v11245_v15  ;;  %v2324_v11 = vrot.slane %v11243_v47, %v9458_v48  ;;  %v2328_v58 = vrot.slane %v11245_v15, %v9468_v21  ;;  %v11306_v15 = vrot.slane %v13979_v34, %v10213_v2 }
 0x728   : > { %3745 = vperm.xlu0 %7862, %v3629_v25   ;;  %v2301_v25 = vrot.slane %v11205_v37, %v9468_v21  ;;  %v2315_v37 = vrot.slane %v11229_v17, %v9458_v48  ;;  %8068 = vpow2.f32 %v4700_v35 }
 0x729   : > { %v2329_v51 = vsel %vm1317_vm2, %v2328_v58, %v2324_v11  ;;  %v11331_v58 = vrot.slane %v13979_v34, %v10227_v0 }
 0x72a   : > { %v11257_v54 = vpop.permute.xlu0 %2196  ;;  %v11259_v33 = vpop.permute.xlu1 %2199  ;;  %v2302_v17 = vsel %vm1317_vm2, %v2301_v25, %v2297_v3  ;;  %v4704_v3 = vmul.f32 1.442695, %v4658_v52  ;;  %v2293_v25 = vsel %vm1317_vm2, %v2292_v10, %v2288_v62 }
 0x72b   : > { %13975 = vst [vmem:[#allocation132_spill] sm:$0xff] %v11257_v54  ;;  %13976 = vst [vmem:[#allocation99_spill] sm:$0xff] %v11259_v33  ;;  %v2333_v24 = vrot.slane %v11257_v54, %v9458_v48  ;;  %v2337_v47 = vrot.slane %v11259_v33, %v9468_v21  ;;  %v2320_v54 = vsel %vm1317_vm2, %v2319_v7, %v2315_v37  ;;  %v11341_v7 = vpop.eup %8064 }
 0x72c   : > { %3751 = vperm.xlu0 %7862, %v3632_v44   ;;  %v2364_v50 = vsel %vm1454_vm3, %v2302_v17, %v2293_v25  ;;  %8070 = vpow2.f32 %v4704_v3  ;;  %13989 = vst [vmem:[#allocation108_spill] sm:$0xff] %v11341_v7 }
 0x72d   : > { %v2365_v52 = vsel %vm1456_vm4, %v2311_v38, %v2364_v50  ;;  %v2338_v10 = vsel %vm1317_vm2, %v2337_v47, %v2333_v24  ;;  %v13988_v47 = vld [vmem:[#allocation52_spill] sm:$0xff] }
 0x72e   : > { %v11291_v44 = vpop.permute.xlu0 %2202  ;;  %v11293_v46 = vpop.permute.xlu1 %2205  ;;  %v2366_v37 = vsel %vm1458_vm5, %v2320_v54, %v2365_v52  ;;  %v4662_v50 = vsub.f32 %v13988_v47, %v11306_v15  ;;  %v4708_v54 = vmul.f32 1.442695, %v4660_v32  ;;  %v13990_v32 = vld [vmem:[#allocation37_spill] sm:$0xff] }
 0x72f   : > { %13981 = vst [vmem:[#allocation137_spill] sm:$0xff] %v11291_v44  ;;  %13982 = vst [vmem:[#allocation139_spill] sm:$0xff] %v11293_v46  ;;  %v2342_v19 = vrot.slane %v11291_v44, %v9458_v48  ;;  %v2346_v33 = vrot.slane %v11293_v46, %v9468_v21  ;;  %v2367_v17 = vsel %vm1460_vm6, %v2329_v51, %v2366_v37 }
 0x730   : > { %3757 = vperm.xlu0 %7862, %v3635_v60   ;;  %v3638_v60 = vmul.f32 %v11297_v41, %v13987_v1  ;;  %v4664_v3 = vsub.f32 %v13990_v32, %v11331_v58  ;;  %8072 = vpow2.f32 %v4708_v54  ;;  %v4712_v25 = vmul.f32 1.442695, %v4662_v50  ;;  %v13999_v54 = vld [vmem:[#allocation40_spill] sm:$0xff]  ;;  %v14000_v32 = vld [vmem:[#allocation29_spill] sm:$0xff] }
 0x731   : > { %v2347_v62 = vsel %vm1317_vm2, %v2346_v33, %v2342_v19  ;;  %v2368_v33 = vsel %vm1462_vm7, %v2338_v10, %v2367_v17  ;;  %v11351_v19 = vrot.slane %v13979_v34, %v10249_v39 }
 0x732   : > { %v11319_v53 = vpop.permute.xlu0 %2208  ;;  %v11321_v30 = vpop.permute.xlu1 %2211  ;;  %v2369_v11 = vsel %vm1464_vm8, %v2347_v62, %v2368_v33  ;;  %8074 = vpow2.f32 %v4712_v25  ;;  %v4716_v10 = vmul.f32 1.442695, %v4664_v3  ;;  %v11379_v33 = vmul.f32 0.17677669, %v13999_v54 }
 0x733   : > { %13985 = vst [vmem:[#allocation105_spill] sm:$0xff] %v11319_v53  ;;  %13986 = vst [vmem:[#allocation141_spill] sm:$0xff] %v11321_v30  ;;  %v2351_v35 = vrot.slane %v11319_v53, %v9458_v48  ;;  %v2355_v38 = vrot.slane %v11321_v30, %v9468_v21  ;;  %v11355_v1 = vpop.eup %8066  ;;  %v11390_v3 = vmul.f32 0.17677669, %v14000_v32  ;;  %v11415_v54 = vmul.f32 0.17677669, %v10919_v28 }
 0x734   : > { %3763 = vperm.xlu0 %7862, %v3638_v60   ;;  %13991 = vst [vmem:[#allocation143_spill] sm:$0xff] %v11355_v1  ;;  %v13992_v60 = vld [vmem:[#allocation92_spill] sm:$0xff]  ;;  %8076 = vpow2.f32 %v4716_v10  ;;  %v5995_v10 = vrot.slane %v11379_v33, %v9458_v48  ;;  %v11432_v28 = vmul.f32 0.17677669, %v11047_v49  ;;  %v11452_v53 = vmul.f32 0.17677669, %v11020_v63 }
 0x735   : > { %v2356_v24 = vsel %vm1317_vm2, %v2355_v38, %v2351_v35  ;;  %v4666_v52 = vsub.f32 %v13992_v60, %v11351_v19  ;;  %v11360_v37 = vpop.eup %8068 }
 0x736   : > { %v2370_v51 = vsel %vm1466_vm9, %v2356_v24, %v2369_v11  ;;  %13993 = vst [vmem:[#allocation111_spill] sm:$0xff] %v11360_v37  ;;  %v11382_v11 = vmul.f32 0.17677669, %v10875_v9  ;;  %v11385_v24 = vmul.f32 0.17677669, %v10895_v36  ;;  %14001 = vst [vmem:[#allocation149_spill] sm:$0xff] %v11432_v28 }
 0x737   : > { %2374 = vst.msk [vmem:[%s11199_s30 + $0x8] sm:$0xff] %vm419_vm0, %v2370_v51  ;;  %v4720_v62 = vmul.f32 1.442695, %v4666_v52  ;;  %v11401_v52 = vmul.f32 0.17677669, %v10877_v42 }
 0x738   : > { %4794 = vperm.xlu0 %7862, %v11341_v7   ;;  %v11404_v9 = vmul.f32 0.17677669, %v10897_v61  ;;  %v11407_v36 = vmul.f32 0.17677669, %v10909_v22  ;;  %v6008_v42 = vrot.slane %v11382_v11, %v9468_v21  ;;  %v11422_v61 = vmul.f32 0.17677669, %v10921_v57 }
 0x739   : > { %v11363_v17 = vpop.eup %8070  ;;  %8078 = vpow2.f32 %v4720_v62  ;;  %v11412_v62 = vmul.f32 0.17677669, %v10911_v6  ;;  %v6017_v22 = vrot.slane %v11385_v24, %v9468_v21  ;;  %v5999_v6 = vrot.slane %v11390_v3, %v9468_v21 }
 0x73a   : > { %13994 = vst [vmem:[#allocation145_spill] sm:$0xff] %v11363_v17  ;;  %v6026_v49 = vrot.slane %v11407_v36, %v9468_v21  ;;  %v6031_v44 = vrot.slane %v11422_v61, %v9458_v48  ;;  %v6053_v7 = vrot.slane %v11432_v28, %v9468_v21  ;;  %v6049_v28 = vrot.slane %v11452_v53, %v9458_v48 }
 0x73b   : > { %v6022_v30 = vrot.slane %v11412_v62, %v9458_v48 }
 0x73c   : > { %4803 = vperm.xlu0 %7862, %v11355_v1   ;;  %v11445_v1 = vmul.f32 0.17677669, %v10927_v12 }
 0x73d   : > { %v11366_v35 = vpop.eup %8072 }
 0x73e   : > { %13995 = vst [vmem:[#allocation41_spill] sm:$0xff] %v11366_v35 }
 0x73f   : > { %v11369_v38 = vpop.eup %8074 }
 0x740   : > { %4809 = vperm.xlu0 %7862, %v11360_v37   ;;  %13996 = vst [vmem:[#allocation115_spill] sm:$0xff] %v11369_v38  ;;  %v6004_v37 = vrot.slane %v11401_v52, %v9458_v48 }
 0x741   : > { %v11372_v47 = vpop.eup %8076 }
 0x742   : > { %13997 = vst [vmem:[#allocation147_spill] sm:$0xff] %v11372_v47  ;;  %v6009_v46 = vsel %vm1317_vm2, %v6008_v42, %v6004_v37  ;;  %v6040_v37 = vrot.slane %v11445_v1, %v9458_v48  ;;  %v6027_v42 = vsel %vm1317_vm2, %v6026_v49, %v6022_v30  ;;  %v14002_v49 = vld [vmem:[#allocation56_spill] sm:$0xff] }
 0x744   : > { %4815 = vperm.xlu0 %7862, %v11363_v17   ;;  %v11427_v17 = vmul.f32 0.17677669, %v10925_v23  ;;  %v6013_v23 = vrot.slane %v11404_v9, %v9458_v48 }
 0x746   : > { %v11375_v50 = vpop.eup %8078  ;;  %v6018_v12 = vsel %vm1317_vm2, %v6017_v22, %v6013_v23  ;;  %v11471_v22 = vmul.f32 0.17677669, %v11037_v55 }
 0x747   : > { %13998 = vst [vmem:[#allocation106_spill] sm:$0xff] %v11375_v50 }
 0x748   : > { %4821 = vperm.xlu0 %7862, %v11366_v35  }
 0x74c   : > { %4827 = vperm.xlu0 %7862, %v11369_v38  }
 0x750   : > { %4833 = vperm.xlu0 %7862, %v11372_v47   ;;  %v6044_v47 = vrot.slane %v11427_v17, %v9468_v21 }
 0x754   : > { %4839 = vperm.xlu0 %7862, %v11375_v50  }
 0x75f   : > { %v11387_v51 = vpop.xlane.xlu0 %6081 }
 0x760   : > { %v11394_v25 = vrot.slane %v11387_v51, %v13740_v5  ;;  %v11398_v60 = vrot.slane %v11387_v51, %v10213_v2 }
 0x762   : > { %v6168_v32 = vsub.f32 %v10939_v20, %v11394_v25  ;;  %v11436_v20 = vrot.slane %v11387_v51, %v10227_v0  ;;  %v6170_v57 = vsub.f32 %v10933_v43, %v11398_v60  ;;  %v6035_v43 = vrot.slane %v11415_v54, %v9468_v21 }
 0x764   : > { %v6200_v50 = vmul.f32 1.442695, %v6168_v32  ;;  %v6172_v63 = vsub.f32 %v10948_v27, %v11436_v20  ;;  %v6204_v38 = vmul.f32 1.442695, %v6170_v57  ;;  %v5855_v35 = vpop.xlane.xlu1 %5854  ;;  %v6000_v32 = vsel %vm1317_vm2, %v5999_v6, %v5995_v10 }
 0x765   : > { %v6071_v23 = vsel %vm1454_vm3, %v6009_v46, %v6000_v32  ;;  %v6036_v27 = vsel %vm1317_vm2, %v6035_v43, %v6031_v44  ;;  %v6045_v6 = vsel %vm1317_vm2, %v6044_v47, %v6040_v37  ;;  %v11481_v57 = vmul.f32 0.17677669, %v5855_v35 }
 0x766   : > { %8080 = vpow2.f32 %v6200_v50  ;;  %v4571_v50 = vrot.slane %v10540_v14, %v10213_v2  ;;  %v6072_v10 = vsel %vm1456_vm4, %v6018_v12, %v6071_v23  ;;  %v6208_v55 = vmul.f32 1.442695, %v6172_v63  ;;  %v14005_v23 = vld [vmem:[#allocation98_spill] sm:$0xff] }
 0x767   : > { %v6073_v30 = vsel %vm1458_vm5, %v6027_v42, %v6072_v10  ;;  %8082 = vpow2.f32 %v6204_v38  ;;  %v6054_v46 = vsel %vm1317_vm2, %v6053_v7, %v6049_v28  ;;  %v4644_v32 = vsub.f32 %v14002_v49, %v11017_v4  ;;  %v14003_v28 = vld [vmem:[#allocation95_spill] sm:$0xff] }
 0x768   : > { %v6058_v44 = vrot.slane %v11471_v22, %v9458_v48  ;;  %v6062_v43 = vrot.slane %v11481_v57, %v9468_v21  ;;  %v6074_v12 = vsel %vm1460_vm6, %v6036_v27, %v6073_v30  ;;  %8084 = vpow2.f32 %v6208_v55  ;;  %v14007_v30 = vld [vmem:[#allocation101_spill] sm:$0xff] }
 0x769   : > { %v6075_v35 = vsel %vm1462_vm7, %v6045_v6, %v6074_v12  ;;  %v4646_v63 = vsub.f32 %v14003_v28, %v4571_v50  ;;  %v4676_v4 = vmul.f32 1.442695, %v4644_v32  ;;  %v4647_v10 = vsub.f32 %v14005_v23, %v4571_v50  ;;  %v14009_v12 = vld [vmem:[#allocation60_spill] sm:$0xff] }
 0x76a   : > { %v6063_v47 = vsel %vm1317_vm2, %v6062_v43, %v6058_v44  ;;  %v6076_v38 = vsel %vm1464_vm8, %v6054_v46, %v6075_v35  ;;  %v4649_v55 = vsub.f32 %v14007_v30, %v11025_v45  ;;  %v3594_v35 = vmul.f32 %v11058_v59, %v14009_v12  ;;  %v14016_v30 = vld [vmem:[#allocation136_spill] sm:$0xff]  ;;  %v14020_v12 = vld [vmem:[#allocation57_spill] sm:$0xff] }
 0x76b   : > { %v6077_v7 = vsel %vm1466_vm9, %v6063_v47, %v6076_v38  ;;  %8086 = vpow2.f32 %v4676_v4  ;;  %v4680_v27 = vmul.f32 1.442695, %v4646_v63  ;;  %v4682_v46 = vmul.f32 1.442695, %v4647_v10  ;;  %v14010_v47 = vld [vmem:[#allocation94_spill] sm:$0xff]  ;;  %v14012_v63 = vld [vmem:[#allocation97_spill] sm:$0xff] }
 0x76c   : > { %v6083_v37 = vsel %vm419_vm0, %v6077_v7, -inf  ;;  %v4686_v32 = vmul.f32 1.442695, %v4649_v55  ;;  %v3597_v38 = vmul.f32 %v11068_v56, %v14010_v47  ;;  %v14011_v7 = vld [vmem:[#allocation96_spill] sm:$0xff]  ;;  %v3603_v4 = vmul.f32 %v11086_v40, %v14012_v63  ;;  %v14017_v55 = vld [vmem:[#allocation138_spill] sm:$0xff] }
 0x76d   : > { %6084 = vmax.xlane.f32.xlu1 %v6083_v37  ;;  %8088 = vpow2.f32 %v4680_v27  ;;  %v3600_v28 = vmul.f32 %v11077_v13, %v14011_v7  ;;  %v14013_v37 = vld [vmem:[#allocation33_spill] sm:$0xff]  ;;  %v14014_v10 = vld [vmem:[#allocation20_spill] sm:$0xff]  ;;  %v3615_v13 = vmul.f32 %v11142_v16, %v14016_v30  ;;  %v3618_v40 = vmul.f32 %v11176_v31, %v14017_v55  ;;  %v14032_v55 = vld [vmem:[#allocation26_spill] sm:$0xff] }
 0x76e   : > { %8090 = vpow2.f32 %v4682_v46  ;;  %v3606_v23 = vmul.f32 %v11096_v26, %v14013_v37  ;;  %v3609_v59 = vmul.f32 %v11098_v29, %v14014_v10  ;;  %v14015_v27 = vld [vmem:[#allocation49_spill] sm:$0xff]  ;;  %v14018_v46 = vld [vmem:[#allocation140_spill] sm:$0xff]  ;;  %v4583_v29 = vrot.slane %v10540_v14, %v14020_v12 }
 0x76f   : > { %8092 = vpow2.f32 %v4686_v32  ;;  %v3612_v56 = vmul.f32 %v11110_v8, %v14015_v27  ;;  %v14019_v32 = vld [vmem:[#allocation90_spill] sm:$0xff]  ;;  %v14022_v47 = vld [vmem:[#allocation128_spill] sm:$0xff]  ;;  %v14025_v16 = vld [vmem:[#allocation117_spill] sm:$0xff] }
 0x770   : > { %v3621_v26 = vmul.f32 %v14019_v32, %v14018_v46  ;;  %v14023_v8 = vld [vmem:[#allocation102_spill] sm:$0xff]  ;;  %v14028_v10 = vld [vmem:[#allocation48_spill] sm:$0xff]  ;;  %v14029_v27 = vld [vmem:[#allocation133_spill] sm:$0xff] }
 0x771   : > { %v4652_v7 = vsub.f32 %v14023_v8, %v4583_v29  ;;  %v14033_v46 = vld [vmem:[#allocation129_spill] sm:$0xff]  ;;  %v14034_v32 = vld [vmem:[#allocation36_spill] sm:$0xff] }
 0x772   : > { %v14037_v8 = vld [vmem:[#allocation53_spill] sm:$0xff] }
 0x773   : > { %v11498_v42 = vpop.eup %8080  ;;  %v4692_v37 = vmul.f32 1.442695, %v4652_v7  ;;  %v14038_v7 = vld [vmem:[#allocation23_spill] sm:$0xff] }
 0x774   : > { %14004 = vst [vmem:[#allocation52_spill] sm:$0xff] %v11498_v42  ;;  %6297 = vperm.xlu0 %7862, %v11498_v42   ;;  %v11502_v6 = vpop.eup %8082 }
 0x775   : > { %14006 = vst [vmem:[#allocation37_spill] sm:$0xff] %v11502_v6  ;;  %v11507_v49 = vpop.eup %8084  ;;  %8094 = vpow2.f32 %v4692_v37 }
 0x776   : > { %14008 = vst [vmem:[#allocation92_spill] sm:$0xff] %v11507_v49 }
 0x778   : > { %6303 = vperm.xlu0 %7862, %v11502_v6   ;;  %v11510_v50 = vpop.eup %8086 }
 0x77a   : > { %v11513_v44 = vpop.eup %8088 }
 0x77b   : > { %v11516_v45 = vpop.eup %8090 }
 0x77c   : > { %6309 = vperm.xlu0 %7862, %v11507_v49   ;;  %v11519_v43 = vpop.eup %8092  ;;  %v14080_v49 = vld [vmem:[#allocation8_spill] sm:$0xff] }
 0x77e   : > { %4773 = vperm.xlu1 %7863, %v11510_v50  }
 0x782   : > { %4779 = vperm.xlu1 %7863, %v11513_v44  }
 0x786   : > { %4782 = vperm.xlu1 %7863, %v11516_v45  }
 0x78a   : > { %4788 = vperm.xlu1 %7863, %v11519_v43  }
 0x78e   : > { %3676 = vperm.xlu1 %7863, %v3594_v35   ;;  %v14021_v35 = vld [vmem:[#allocation142_spill] sm:$0xff] }
 0x792   : > { %3682 = vperm.xlu1 %7863, %v3597_v38   ;;  %v3624_v38 = vmul.f32 %v14022_v47, %v14021_v35  ;;  %v14036_v47 = vld [vmem:[#allocation135_spill] sm:$0xff] }
 0x796   : > { %3688 = vperm.xlu1 %7863, %v3600_v28   ;;  %v14024_v28 = vld [vmem:[#allocation144_spill] sm:$0xff] }
 0x797   : > { %v3627_v63 = vmul.f32 %v14025_v16, %v14024_v28  ;;  %v4659_v28 = vsub.f32 %v14038_v7, %v14037_v8 }
 0x79a   : > { %3694 = vperm.xlu1 %7863, %v3603_v4   ;;  %v14026_v4 = vld [vmem:[#allocation112_spill] sm:$0xff] }
 0x79b   : > { %v4653_v31 = vsub.f32 %v14026_v4, %v4583_v29  ;;  %v14035_v29 = vld [vmem:[#allocation150_spill] sm:$0xff] }
 0x79d   : > { %v4694_v30 = vmul.f32 1.442695, %v4653_v31  ;;  %v14040_v31 = vld [vmem:[#allocation107_spill] sm:$0xff] }
 0x79e   : > { %3700 = vperm.xlu1 %7863, %v3606_v23   ;;  %v14027_v23 = vld [vmem:[#allocation146_spill] sm:$0xff]  ;;  %v4661_v37 = vsub.f32 %v14040_v31, %v11267_v18 }
 0x79f   : > { %8096 = vpow2.f32 %v4694_v30 }
 0x7a2   : > { %3706 = vperm.xlu1 %7863, %v3609_v59   ;;  %v3630_v59 = vmul.f32 %v14028_v10, %v14027_v23  ;;  %v4706_v23 = vmul.f32 1.442695, %v4659_v28  ;;  %v11566_v10 = vpop.eup %8094  ;;  %v14051_v28 = vld [vmem:[#allocation80_spill] sm:$0xff] }
 0x7a3   : > { %14041 = vst [vmem:[#allocation40_spill] sm:$0xff] %v11566_v10 }
 0x7a6   : > { %3712 = vperm.xlu1 %7863, %v3612_v56   ;;  %v14030_v56 = vld [vmem:[#allocation32_spill] sm:$0xff] }
 0x7a7   : > { %v4655_v14 = vsub.f32 %v14030_v56, %v14029_v27  ;;  %v4710_v56 = vmul.f32 1.442695, %v4661_v37 }
 0x7a9   : > { %v4698_v35 = vmul.f32 1.442695, %v4655_v14 }
 0x7aa   : > { %3718 = vperm.xlu1 %7863, %v3615_v13   ;;  %v14031_v13 = vld [vmem:[#allocation148_spill] sm:$0xff] }
 0x7ab   : > { %8098 = vpow2.f32 %v4698_v35 }
 0x7ac   : > { %v11571_v14 = vpop.eup %8096 }
 0x7ad   : > { %14043 = vst [vmem:[#allocation29_spill] sm:$0xff] %v11571_v14 }
 0x7ae   : > { %3724 = vperm.xlu1 %7863, %v3618_v40   ;;  %v3633_v40 = vmul.f32 %v14032_v55, %v14031_v13  ;;  %v14046_v55 = vld [vmem:[#allocation104_spill] sm:$0xff] }
 0x7b2   : > { %3730 = vperm.xlu1 %7863, %v3621_v26   ;;  %v4657_v26 = vsub.f32 %v14034_v32, %v14033_v46  ;;  %v11581_v46 = vpop.permute.xlu0 %4776 }
 0x7b4   : > { %v4702_v16 = vmul.f32 1.442695, %v4657_v26 }
 0x7b6   : > { %3736 = vperm.xlu1 %7863, %v3624_v38   ;;  %v3636_v38 = vmul.f32 %v14036_v47, %v14035_v29  ;;  %8100 = vpow2.f32 %v4702_v16  ;;  %v11590_v47 = vpop.permute.xlu0 %4785  ;;  %v6173_v16 = vsub.f32 %v14051_v28, %v11436_v20 }
 0x7b7   : > { %8102 = vpow2.f32 %v4706_v23 }
 0x7b8   : > { %8104 = vpow2.f32 %v4710_v56  ;;  %v11576_v13 = vpop.eup %8098  ;;  %v6210_v31 = vmul.f32 1.442695, %v6173_v16 }
 0x7b9   : > { %14045 = vst [vmem:[#allocation56_spill] sm:$0xff] %v11576_v13 }
 0x7ba   : > { %3742 = vperm.xlu1 %7863, %v3627_v63   ;;  %v14039_v63 = vld [vmem:[#allocation151_spill] sm:$0xff] }
 0x7bb   : > { %v3639_v4 = vmul.f32 %v11297_v41, %v14039_v63  ;;  %v14044_v41 = vld [vmem:[#allocation93_spill] sm:$0xff]  ;;  %v11600_v63 = vpop.permute.xlu0 %4791 }
 0x7bc   : > { %v4665_v30 = vsub.f32 %v14044_v41, %v11331_v58  ;;  %v14048_v58 = vld [vmem:[#allocation73_spill] sm:$0xff] }
 0x7bd   : > { %v6169_v35 = vsub.f32 %v14048_v58, %v11394_v25  ;;  %v6103_v58 = vrot.slane %v11387_v51, %v10249_v39 }
 0x7be   : > { %3748 = vperm.xlu1 %7863, %v3630_v59   ;;  %v14042_v59 = vld [vmem:[#allocation44_spill] sm:$0xff] }
 0x7bf   : > { %v4663_v27 = vsub.f32 %v14042_v59, %v11306_v15  ;;  %v4718_v15 = vmul.f32 1.442695, %v4665_v30  ;;  %v6202_v8 = vmul.f32 1.442695, %v6169_v35 }
 0x7c1   : > { %v4714_v18 = vmul.f32 1.442695, %v4663_v27 }
 0x7c2   : > { %3754 = vperm.xlu1 %7863, %v3633_v40   ;;  %v4667_v40 = vsub.f32 %v14046_v55, %v11351_v19  ;;  %v14050_v19 = vld [vmem:[#allocation76_spill] sm:$0xff] }
 0x7c3   : > { %8106 = vpow2.f32 %v4714_v18  ;;  %v11583_v32 = vpop.eup %8100 }
 0x7c4   : > { %14047 = vst [vmem:[#allocation95_spill] sm:$0xff] %v11583_v32  ;;  %8108 = vpow2.f32 %v4718_v15  ;;  %v4722_v26 = vmul.f32 1.442695, %v4667_v40  ;;  %v11588_v29 = vpop.eup %8102 }
 0x7c5   : > { %14049 = vst [vmem:[#allocation98_spill] sm:$0xff] %v11588_v29  ;;  %v11595_v7 = vpop.eup %8104 }
 0x7c6   : > { %3760 = vperm.xlu1 %7863, %v3636_v38   ;;  %8110 = vpow2.f32 %v4722_v26  ;;  %v6171_v38 = vsub.f32 %v14050_v19, %v11398_v60  ;;  %v11607_v60 = vpop.permute.xlu0 %3673 }
 0x7c7   : > { %8112 = vpow2.f32 %v6202_v8  ;;  %14053 = vst [vmem:[#allocation60_spill] sm:$0xff] %v11607_v60 }
 0x7c8   : > { %v6206_v25 = vmul.f32 1.442695, %v6171_v38 }
 0x7ca   : > { %3766 = vperm.xlu1 %7863, %v3639_v4   ;;  %8114 = vpow2.f32 %v6206_v25  ;;  %v11613_v20 = vpop.permute.xlu0 %3679 }
 0x7cb   : > { %8116 = vpow2.f32 %v6210_v31  ;;  %14055 = vst [vmem:[#allocation96_spill] sm:$0xff] %v11613_v20 }
 0x7ce   : > { %4797 = vperm.xlu1 %7863, %v11566_v10   ;;  %v11620_v56 = vpop.permute.xlu0 %3685 }
 0x7cf   : > { %14057 = vst [vmem:[#allocation33_spill] sm:$0xff] %v11620_v56 }
 0x7d0   : > { %v11602_v4 = vpop.eup %8106 }
 0x7d1   : > { %v11605_v37 = vpop.eup %8108 }
 0x7d2   : > { %4800 = vperm.xlu1 %7863, %v11571_v14   ;;  %14052 = vst [vmem:[#allocation101_spill] sm:$0xff] %v11605_v37  ;;  %v11639_v19 = vpop.permute.xlu0 %3691 }
 0x7d3   : > { %v11610_v23 = vpop.eup %8110  ;;  %14059 = vst [vmem:[#allocation49_spill] sm:$0xff] %v11639_v19 }
 0x7d4   : > { %14054 = vst [vmem:[#allocation94_spill] sm:$0xff] %v11610_v23  ;;  %v11615_v59 = vpop.eup %8112 }
 0x7d6   : > { %4806 = vperm.xlu1 %7863, %v11576_v13  }
 0x7d7   : > { %v11618_v27 = vpop.eup %8114 }
 0x7d8   : > { %14056 = vst [vmem:[#allocation97_spill] sm:$0xff] %v11618_v27  ;;  %v11629_v55 = vpop.eup %8116 }
 0x7d9   : > { %14058 = vst [vmem:[#allocation20_spill] sm:$0xff] %v11629_v55 }
 0x7da   : > { %4812 = vperm.xlu1 %7863, %v11583_v32  }
 0x7de   : > { %4818 = vperm.xlu1 %7863, %v11588_v29  }
 0x7e2   : > { %4824 = vperm.xlu1 %7863, %v11595_v7  }
 0x7e6   : > { %4830 = vperm.xlu1 %7863, %v11602_v4  }
 0x7ea   : > { %4836 = vperm.xlu1 %7863, %v11605_v37  }
 0x7ee   : > { %4842 = vperm.xlu1 %7863, %v11610_v23  }
 0x7f2   : > { %6300 = vperm.xlu1 %7863, %v11615_v59  }
 0x7f6   : > { %6306 = vperm.xlu1 %7863, %v11618_v27   ;;  %v11623_v41 = vpop.xlane.xlu1 %6084 }
 0x7f7   : > { %v6123_v30 = vrot.slane %v11623_v41, %v13740_v5  ;;  %v6127_v18 = vrot.slane %v11623_v41, %v10213_v2 }
 0x7f9   : > { %v6184_v40 = vsub.f32 %v11379_v33, %v6123_v30  ;;  %v6185_v15 = vsub.f32 %v11390_v3, %v6123_v30  ;;  %v6186_v35 = vsub.f32 %v11401_v52, %v6127_v18  ;;  %v6187_v38 = vsub.f32 %v11382_v11, %v6127_v18  ;;  %v14060_v33 = vld [vmem:[#allocation118_spill] sm:$0xff]  ;;  %v14061_v30 = vld [vmem:[#allocation72_spill] sm:$0xff]  ;;  %v11648_v52 = vpop.permute.xlu0 %3697 }
 0x7fa   : > { %6312 = vperm.xlu1 %7863, %v11629_v55   ;;  %v11634_v26 = vpop.permute.xlu1 %4773  ;;  %v6174_v25 = vsub.f32 %v14060_v33, %v6103_v58  ;;  %v6131_v3 = vrot.slane %v11623_v41, %v10227_v0  ;;  %v6175_v29 = vsub.f32 %v14061_v30, %v6103_v58  ;;  %14062 = vst [vmem:[#allocation136_spill] sm:$0xff] %v11648_v52  ;;  %v14063_v58 = vld [vmem:[#allocation100_spill] sm:$0xff]  ;;  %v14064_v30 = vld [vmem:[#allocation109_spill] sm:$0xff] }
 0x7fb   : > { %v6232_v8 = vmul.f32 1.442695, %v6184_v40  ;;  %v6234_v28 = vmul.f32 1.442695, %v6185_v15  ;;  %v6236_v31 = vmul.f32 1.442695, %v6186_v35  ;;  %v4615_v11 = vrot.slane %v13979_v34, %v14020_v12 }
 0x7fc   : > { %v6238_v32 = vmul.f32 1.442695, %v6187_v38  ;;  %v6212_v18 = vmul.f32 1.442695, %v6174_v25  ;;  %v6188_v40 = vsub.f32 %v11404_v9, %v6131_v3  ;;  %v6214_v15 = vmul.f32 1.442695, %v6175_v29 }
 0x7fd   : > { %8118 = vpow2.f32 %v6232_v8  ;;  %v6189_v33 = vsub.f32 %v11385_v24, %v6131_v3  ;;  %v4668_v8 = vsub.f32 %v14063_v58, %v4615_v11  ;;  %v6107_v38 = vrot.slane %v11387_v51, %v14020_v12  ;;  %v11662_v25 = vpop.permute.xlu0 %3703  ;;  %v14066_v24 = vld [vmem:[#allocation121_spill] sm:$0xff] }
 0x7fe   : > { %v11642_v16 = vpop.permute.xlu1 %4779  ;;  %8120 = vpow2.f32 %v6234_v28  ;;  %v6240_v28 = vmul.f32 1.442695, %v6188_v40  ;;  %v4669_v23 = vsub.f32 %v14064_v30, %v4615_v11  ;;  %14065 = vst [vmem:[#allocation138_spill] sm:$0xff] %v11662_v25  ;;  %v6135_v3 = vrot.slane %v11623_v41, %v10249_v39 }
 0x7ff   : > { %8122 = vpow2.f32 %v6236_v31  ;;  %v6242_v9 = vmul.f32 1.442695, %v6189_v33  ;;  %v4724_v29 = vmul.f32 1.442695, %v4668_v8  ;;  %v14071_v8 = vld [vmem:[#allocation9_spill] sm:$0xff]  ;;  %v4623_v55 = vrot.slane %v13979_v34, %v14080_v49 }
 0x800   : > { %8124 = vpow2.f32 %v6238_v32  ;;  %v6176_v32 = vsub.f32 %v14066_v24, %v6107_v38  ;;  %v4726_v10 = vmul.f32 1.442695, %v4669_v23  ;;  %v4619_v30 = vrot.slane %v13979_v34, %v14071_v8 }
 0x801   : > { %8126 = vpow2.f32 %v6212_v18  ;;  %v14068_v18 = vld [vmem:[#allocation63_spill] sm:$0xff]  ;;  %v6190_v23 = vsub.f32 %v11412_v62, %v6135_v3  ;;  %v6111_v14 = vrot.slane %v11387_v51, %v14071_v8 }
 0x802   : > { %v11650_v13 = vpop.permute.xlu1 %4782  ;;  %8128 = vpow2.f32 %v6214_v15  ;;  %v6177_v40 = vsub.f32 %v14068_v18, %v6107_v38  ;;  %v11675_v15 = vpop.permute.xlu0 %3709 }
 0x803   : > { %8130 = vpow2.f32 %v6240_v28  ;;  %14070 = vst [vmem:[#allocation142_spill] sm:$0xff] %v11675_v15  ;;  %v6216_v28 = vmul.f32 1.442695, %v6176_v32  ;;  %v6244_v62 = vmul.f32 1.442695, %v6190_v23 }
 0x804   : > { %8132 = vpow2.f32 %v6242_v9  ;;  %v6218_v38 = vmul.f32 1.442695, %v6177_v40  ;;  %v6191_v9 = vsub.f32 %v11407_v36, %v6135_v3 }
 0x805   : > { %8134 = vpow2.f32 %v4724_v29  ;;  %v14075_v29 = vld [vmem:[#allocation103_spill] sm:$0xff] }
 0x806   : > { %v11656_v35 = vpop.permute.xlu1 %4788  ;;  %8136 = vpow2.f32 %v4726_v10  ;;  %v4670_v32 = vsub.f32 %v14075_v29, %v4619_v30  ;;  %v14077_v10 = vld [vmem:[#allocation113_spill] sm:$0xff]  ;;  %v11698_v36 = vpop.permute.xlu0 %3715  ;;  %v6246_v3 = vmul.f32 1.442695, %v6191_v9  ;;  %v14084_v29 = vld [vmem:[#allocation82_spill] sm:$0xff] }
 0x807   : > { %8138 = vpow2.f32 %v6216_v28  ;;  %v4671_v40 = vsub.f32 %v14077_v10, %v4619_v30  ;;  %14078 = vst [vmem:[#allocation112_spill] sm:$0xff] %v11698_v36  ;;  %v6139_v30 = vrot.slane %v11623_v41, %v14020_v12  ;;  %v6179_v10 = vsub.f32 %v14084_v29, %v6111_v14 }
 0x808   : > { %8140 = vpow2.f32 %v6218_v38  ;;  %v4728_v23 = vmul.f32 1.442695, %v4670_v32  ;;  %v11721_v32 = vrot.slane %v11387_v51, %v14080_v49 }
 0x809   : > { %8142 = vpow2.f32 %v6244_v62  ;;  %v4730_v9 = vmul.f32 1.442695, %v4671_v40 }
 0x80a   : > { %v11664_v31 = vpop.permute.xlu1 %3676  ;;  %v11669_v58 = vpop.eup %8118  ;;  %8144 = vpow2.f32 %v6246_v3 }
 0x80b   : > { %14067 = vst [vmem:[#allocation140_spill] sm:$0xff] %v11669_v58  ;;  %v11672_v11 = vpop.eup %8120  ;;  %6345 = vperm.xlu0 %7862, %v11669_v58   ;;  %v11723_v62 = vpop.permute.xlu0 %3721  ;;  %8146 = vpow2.f32 %v4728_v23 }
 0x80c   : > { %14069 = vst [vmem:[#allocation90_spill] sm:$0xff] %v11672_v11  ;;  %6348 = vperm.xlu1 %7863, %v11672_v11   ;;  %v11683_v24 = vpop.eup %8122  ;;  %14088 = vst [vmem:[#allocation148_spill] sm:$0xff] %v11723_v62  ;;  %8148 = vpow2.f32 %v4730_v9 }
 0x80d   : > { %14072 = vst [vmem:[#allocation128_spill] sm:$0xff] %v11683_v24  ;;  %v11686_v18 = vpop.eup %8124 }
 0x80e   : > { %v11678_v33 = vpop.permute.xlu1 %3682  ;;  %14073 = vst [vmem:[#allocation102_spill] sm:$0xff] %v11686_v18  ;;  %v11695_v11 = vpop.eup %8126 }
 0x80f   : > { %6351 = vperm.xlu0 %7862, %v11683_v24   ;;  %14076 = vst [vmem:[#allocation117_spill] sm:$0xff] %v11695_v11  ;;  %v11700_v24 = vpop.eup %8128 }
 0x810   : > { %6354 = vperm.xlu1 %7863, %v11686_v18   ;;  %14079 = vst [vmem:[#allocation146_spill] sm:$0xff] %v11700_v24  ;;  %v14081_v18 = vld [vmem:[#allocation126_spill] sm:$0xff]  ;;  %v11711_v38 = vpop.eup %8130 }
 0x811   : > { %v6178_v37 = vsub.f32 %v14081_v18, %v6111_v14  ;;  %14083 = vst [vmem:[#allocation133_spill] sm:$0xff] %v11711_v38  ;;  %v11714_v6 = vpop.eup %8132  ;;  %v14087_v18 = vld [vmem:[#allocation114_spill] sm:$0xff]  ;;  %v6192_v14 = vsub.f32 %v11422_v61, %v6139_v30  ;;  %v14093_v61 = vld [vmem:[#allocation123_spill] sm:$0xff] }
 0x812   : > { %v11692_v58 = vpop.permute.xlu1 %3688  ;;  %14085 = vst [vmem:[#allocation32_spill] sm:$0xff] %v11714_v6  ;;  %v4673_v42 = vsub.f32 %v14087_v18, %v4623_v55  ;;  %v11729_v3 = vpop.eup %8134  ;;  %v6181_v12 = vsub.f32 %v14093_v61, %v11721_v32 }
 0x813   : > { %14074 = vst [vmem:[#allocation144_spill] sm:$0xff] %v11692_v58  ;;  %6315 = vperm.xlu0 %7862, %v11695_v11   ;;  %v14086_v11 = vld [vmem:[#allocation110_spill] sm:$0xff]  ;;  %14090 = vst [vmem:[#allocation129_spill] sm:$0xff] %v11729_v3  ;;  %v11732_v29 = vpop.eup %8136  ;;  %v3793_v9 = vrot.slane %v11692_v58, %v9468_v21 }
 0x814   : > { %6318 = vperm.xlu1 %7863, %v11700_v24   ;;  %v4672_v27 = vsub.f32 %v14086_v11, %v4623_v55  ;;  %v6220_v24 = vmul.f32 1.442695, %v6178_v37  ;;  %v6222_v55 = vmul.f32 1.442695, %v6179_v10  ;;  %v6193_v11 = vsub.f32 %v11415_v54, %v6139_v30  ;;  %14091 = vst [vmem:[#allocation36_spill] sm:$0xff] %v11732_v29  ;;  %v11752_v10 = vpop.eup %8138 }
 0x815   : > { %v3784_v37 = vrot.slane %v11678_v33, %v9468_v21  ;;  %v3775_v30 = vrot.slane %v11664_v31, %v9468_v21  ;;  %14095 = vst [vmem:[#allocation135_spill] sm:$0xff] %v11752_v10 }
 0x816   : > { %v11707_v28 = vpop.permute.xlu1 %3694  ;;  %v4732_v18 = vmul.f32 1.442695, %v4672_v27  ;;  %8150 = vpow2.f32 %v6220_v24  ;;  %v6248_v27 = vmul.f32 1.442695, %v6192_v14  ;;  %v3789_v24 = vrot.slane %v11620_v56, %v9458_v48 }
 0x817   : > { %14082 = vst [vmem:[#allocation48_spill] sm:$0xff] %v11707_v28  ;;  %6357 = vperm.xlu0 %7862, %v11711_v38   ;;  %v4734_v38 = vmul.f32 1.442695, %v4673_v42  ;;  %v3780_v42 = vrot.slane %v11613_v20, %v9458_v48  ;;  %8152 = vpow2.f32 %v6222_v55  ;;  %v6250_v61 = vmul.f32 1.442695, %v6193_v11 }
 0x818   : > { %6360 = vperm.xlu1 %7863, %v11714_v6   ;;  %v14092_v6 = vld [vmem:[#allocation79_spill] sm:$0xff]  ;;  %v3771_v14 = vrot.slane %v11607_v60, %v9458_v48  ;;  %v3807_v11 = vrot.slane %v11648_v52, %v9458_v48  ;;  %v6143_v56 = vrot.slane %v11623_v41, %v14071_v8  ;;  %v3794_v20 = vsel %vm1317_vm2, %v3793_v9, %v3789_v24 }
 0x819   : > { %v6180_v23 = vsub.f32 %v14092_v6, %v11721_v32  ;;  %v3802_v6 = vrot.slane %v11707_v28, %v9468_v21  ;;  %v11756_v32 = vpop.permute.xlu0 %3727  ;;  %v3798_v28 = vrot.slane %v11639_v19, %v9458_v48  ;;  %v3785_v58 = vsel %vm1317_vm2, %v3784_v37, %v3780_v42 }
 0x81a   : > { %v11726_v40 = vpop.permute.xlu1 %3700  ;;  %14096 = vst [vmem:[#allocation53_spill] sm:$0xff] %v11756_v32  ;;  %8154 = vpow2.f32 %v6248_v27  ;;  %v3776_v37 = vsel %vm1317_vm2, %v3775_v30, %v3771_v14  ;;  %v14101_v27 = vld [vmem:[#allocation77_spill] sm:$0xff] }
 0x81b   : > { %14089 = vst [vmem:[#allocation26_spill] sm:$0xff] %v11726_v40  ;;  %4845 = vperm.xlu0 %7862, %v11729_v3   ;;  %v3811_v3 = vrot.slane %v11726_v40, %v9468_v21  ;;  %v3816_v40 = vrot.slane %v11662_v25, %v9458_v48  ;;  %v3803_v42 = vsel %vm1317_vm2, %v3802_v6, %v3798_v28  ;;  %8156 = vpow2.f32 %v6250_v61 }
 0x81c   : > { %4848 = vperm.xlu1 %7863, %v11732_v29   ;;  %v11760_v29 = vpop.eup %8140  ;;  %v3825_v25 = vrot.slane %v11675_v15, %v9458_v48  ;;  %v3912_v9 = vsel %vm1454_vm3, %v3785_v58, %v3776_v37  ;;  %v4627_v30 = vrot.slane %v13979_v34, %v14101_v27  ;;  %8158 = vpow2.f32 %v4732_v18 }
 0x81d   : > { %14097 = vst [vmem:[#allocation23_spill] sm:$0xff] %v11760_v29  ;;  %v11784_v52 = vpop.eup %8142  ;;  %v3812_v24 = vsel %vm1317_vm2, %v3811_v3, %v3807_v11  ;;  %v3913_v28 = vsel %vm1456_vm4, %v3794_v20, %v3912_v9  ;;  %v6224_v14 = vmul.f32 1.442695, %v6180_v23  ;;  %v3834_v34 = vrot.slane %v11698_v36, %v9458_v48 }
 0x81e   : > { %v11744_v54 = vpop.permute.xlu1 %3706  ;;  %14099 = vst [vmem:[#allocation107_spill] sm:$0xff] %v11784_v52  ;;  %v3914_v61 = vsel %vm1458_vm5, %v3803_v42, %v3913_v28  ;;  %v6194_v20 = vsub.f32 %v11445_v1, %v6143_v56  ;;  %8160 = vpow2.f32 %v4734_v38  ;;  %v14109_v28 = vld [vmem:[#allocation116_spill] sm:$0xff] }
 0x81f   : > { %14094 = vst [vmem:[#allocation150_spill] sm:$0xff] %v11744_v54  ;;  %v3820_v55 = vrot.slane %v11744_v54, %v9468_v21  ;;  %6321 = vperm.xlu0 %7862, %v11752_v10   ;;  %v11790_v10 = vpop.eup %8144  ;;  %8162 = vpow2.f32 %v6224_v14 }
 0x820   : > { %6324 = vperm.xlu1 %7863, %v11760_v29   ;;  %14100 = vst [vmem:[#allocation44_spill] sm:$0xff] %v11790_v10  ;;  %v11810_v23 = vpop.eup %8146 }
 0x821   : > { %v3821_v6 = vsel %vm1317_vm2, %v3820_v55, %v3816_v40  ;;  %v3915_v40 = vsel %vm1460_vm6, %v3812_v24, %v3914_v61  ;;  %14104 = vst [vmem:[#allocation73_spill] sm:$0xff] %v11810_v23  ;;  %v6226_v55 = vmul.f32 1.442695, %v6181_v12  ;;  %v11814_v11 = vpop.eup %8148  ;;  %v14108_v12 = vld [vmem:[#allocation45_spill] sm:$0xff]  ;;  %v6252_v24 = vmul.f32 1.442695, %v6194_v20 }
 0x822   : > { %v11778_v19 = vpop.permute.xlu1 %3712  ;;  %14105 = vst [vmem:[#allocation76_spill] sm:$0xff] %v11814_v11  ;;  %v6147_v20 = vrot.slane %v11623_v41, %v14080_v49 }
 0x823   : > { %14098 = vst [vmem:[#allocation151_spill] sm:$0xff] %v11778_v19  ;;  %v3829_v54 = vrot.slane %v11778_v19, %v9468_v21  ;;  %6363 = vperm.xlu0 %7862, %v11784_v52   ;;  %v11797_v19 = vpop.permute.xlu0 %3733  ;;  %v11823_v38 = vpop.eup %8150  ;;  %8164 = vpow2.f32 %v6226_v55 }
 0x824   : > { %14102 = vst [vmem:[#allocation93_spill] sm:$0xff] %v11797_v19  ;;  %6366 = vperm.xlu1 %7863, %v11790_v10   ;;  %14107 = vst [vmem:[#allocation118_spill] sm:$0xff] %v11823_v38  ;;  %8166 = vpow2.f32 %v6252_v24  ;;  %v6151_v24 = vrot.slane %v11623_v41, %v14101_v27 }
 0x825   : > { %v3830_v58 = vsel %vm1317_vm2, %v3829_v54, %v3825_v25  ;;  %v6195_v25 = vsub.f32 %v11427_v17, %v6143_v56  ;;  %v3916_v54 = vsel %vm1462_vm7, %v3821_v6, %v3915_v40  ;;  %v4674_v17 = vsub.f32 %v14108_v12, %v4627_v30 }
 0x826   : > { %v11802_v3 = vpop.permute.xlu1 %3718  ;;  %v3917_v37 = vsel %vm1464_vm8, %v3830_v58, %v3916_v54  ;;  %v6119_v56 = vrot.slane %v11387_v51, %v14101_v27  ;;  %v4675_v6 = vsub.f32 %v14109_v28, %v4627_v30  ;;  %v14113_v51 = vld [vmem:[#allocation54_spill] sm:$0xff]  ;;  %v6199_v41 = vsub.f32 %v11481_v57, %v6151_v24 }
 0x827   : > { %14103 = vst [vmem:[#allocation104_spill] sm:$0xff] %v11802_v3  ;;  %v3838_v18 = vrot.slane %v11802_v3, %v9468_v21  ;;  %4851 = vperm.xlu0 %7862, %v11810_v23   ;;  %v11831_v61 = vpop.permute.xlu0 %3739  ;;  %v6254_v58 = vmul.f32 1.442695, %v6195_v25  ;;  %v14115_v54 = vld [vmem:[#allocation130_spill] sm:$0xff] }
 0x828   : > { %4854 = vperm.xlu1 %7863, %v11814_v11   ;;  %14110 = vst [vmem:[#allocation72_spill] sm:$0xff] %v11831_v61  ;;  %v6182_v14 = vsub.f32 %v14113_v51, %v6119_v56  ;;  %v4738_v55 = vmul.f32 1.442695, %v4675_v6  ;;  %v6183_v25 = vsub.f32 %v14115_v54, %v6119_v56  ;;  %v6196_v56 = vsub.f32 %v11452_v53, %v6147_v20  ;;  %v14120_v6 = vld [vmem:[#allocation149_spill] sm:$0xff] }
 0x829   : > { %v3839_v1 = vsel %vm1317_vm2, %v3838_v18, %v3834_v34  ;;  %v11833_v34 = vpop.eup %8152  ;;  %v4736_v18 = vmul.f32 1.442695, %v4674_v17  ;;  %8168 = vpow2.f32 %v6254_v58  ;;  %v6197_v58 = vsub.f32 %v14120_v6, %v6147_v20 }
 0x82a   : > { %v3918_v42 = vsel %vm1466_vm9, %v3839_v1, %v3917_v37  ;;  %v11821_v9 = vpop.permute.xlu1 %3724  ;;  %14111 = vst [vmem:[#allocation100_spill] sm:$0xff] %v11833_v34  ;;  %v11842_v30 = vpop.eup %8154  ;;  %v6228_v17 = vmul.f32 1.442695, %v6182_v14  ;;  %v6230_v28 = vmul.f32 1.442695, %v6183_v25 }
 0x82b   : > { %14106 = vst [vmem:[#allocation80_spill] sm:$0xff] %v11821_v9  ;;  %7665 = vst.msk [vmem:[%s11199_s30 + $0x10] sm:$0xff] %vm419_vm0, %v3918_v42  ;;  %6327 = vperm.xlu0 %7862, %v11823_v38   ;;  %v11845_v37 = vpop.eup %8156  ;;  %v11848_v1 = vpop.permute.xlu0 %3745  ;;  %8170 = vpow2.f32 %v4736_v18  ;;  %v6198_v18 = vsub.f32 %v11471_v22, %v6151_v24  ;;  %v6256_v14 = vmul.f32 1.442695, %v6196_v56  ;;  %v6258_v20 = vmul.f32 1.442695, %v6197_v58 }
 0x82c   : > { %6330 = vperm.xlu1 %7863, %v11833_v34   ;;  %14114 = vst [vmem:[#allocation121_spill] sm:$0xff] %v11842_v30  ;;  %14116 = vst [vmem:[#allocation63_spill] sm:$0xff] %v11845_v37  ;;  %v11853_v12 = vpop.eup %8158  ;;  %8172 = vpow2.f32 %v4738_v55  ;;  %v6262_v56 = vmul.f32 1.442695, %v6199_v41 }
 0x82d   : > { %14117 = vst [vmem:[#allocation9_spill] sm:$0xff] %v11848_v1  ;;  %14119 = vst [vmem:[#allocation113_spill] sm:$0xff] %v11853_v12  ;;  %v11859_v51 = vpop.eup %8160  ;;  %8174 = vpow2.f32 %v6228_v17  ;;  %v6260_v17 = vmul.f32 1.442695, %v6198_v18  ;;  %v3852_v18 = vrot.slane %v11756_v32, %v9458_v48 }
 0x82e   : > { %v11837_v40 = vpop.permute.xlu1 %3730  ;;  %14121 = vst [vmem:[#allocation8_spill] sm:$0xff] %v11859_v51  ;;  %8176 = vpow2.f32 %v6230_v28 }
 0x82f   : > { %14112 = vst [vmem:[#allocation109_spill] sm:$0xff] %v11837_v40  ;;  %6369 = vperm.xlu0 %7862, %v11842_v30   ;;  %v11866_v30 = vpop.eup %8162  ;;  %v11868_v53 = vpop.permute.xlu0 %3751  ;;  %8178 = vpow2.f32 %v6256_v14  ;;  %v3856_v57 = vrot.slane %v11837_v40, %v9468_v21  ;;  %v3847_v14 = vrot.slane %v11821_v9, %v9468_v21 }
 0x830   : > { %6372 = vperm.xlu1 %7863, %v11845_v37   ;;  %14123 = vst [vmem:[#allocation82_spill] sm:$0xff] %v11866_v30  ;;  %14124 = vst [vmem:[#allocation110_spill] sm:$0xff] %v11868_v53  ;;  %v11871_v55 = vpop.eup %8164  ;;  %8180 = vpow2.f32 %v6258_v20  ;;  %v3888_v9 = vrot.slane %v11868_v53, %v9458_v48 }
 0x831   : > { %14125 = vst [vmem:[#allocation114_spill] sm:$0xff] %v11871_v55  ;;  %v11877_v22 = vpop.eup %8166  ;;  %8182 = vpow2.f32 %v6260_v17  ;;  %v3843_v17 = vrot.slane %v11723_v62, %v9458_v48 }
 0x832   : > { %v11851_v42 = vpop.permute.xlu1 %3736  ;;  %14127 = vst [vmem:[#allocation123_spill] sm:$0xff] %v11877_v22  ;;  %8184 = vpow2.f32 %v6262_v56  ;;  %v3879_v56 = vrot.slane %v11848_v1, %v9458_v48 }
 0x833   : > { %14118 = vst [vmem:[#allocation103_spill] sm:$0xff] %v11851_v42  ;;  %4857 = vperm.xlu0 %7862, %v11853_v12   ;;  %v11884_v24 = vpop.permute.xlu0 %3757  ;;  %v3865_v6 = vrot.slane %v11851_v42, %v9468_v21  ;;  %v3857_v12 = vsel %vm1317_vm2, %v3856_v57, %v3852_v18  ;;  %v3848_v37 = vsel %vm1317_vm2, %v3847_v14, %v3843_v17 }
 0x834   : > { %4860 = vperm.xlu1 %7863, %v11859_v51   ;;  %14129 = vst [vmem:[#allocation116_spill] sm:$0xff] %v11884_v24 }
 0x836   : > { %v11863_v54 = vpop.permute.xlu1 %3742  ;;  %v11879_v28 = vpop.eup %8168 }
 0x837   : > { %14122 = vst [vmem:[#allocation126_spill] sm:$0xff] %v11863_v54  ;;  %6333 = vperm.xlu0 %7862, %v11866_v30   ;;  %14128 = vst [vmem:[#allocation45_spill] sm:$0xff] %v11879_v28  ;;  %v3874_v41 = vrot.slane %v11863_v54, %v9468_v21 }
 0x838   : > { %6336 = vperm.xlu1 %7863, %v11871_v55   ;;  %v11897_v20 = vpop.eup %8170  ;;  %v3870_v55 = vrot.slane %v11831_v61, %v9458_v48 }
 0x839   : > { %14131 = vst [vmem:[#allocation130_spill] sm:$0xff] %v11897_v20  ;;  %v11903_v30 = vpop.eup %8172 }
 0x83a   : > { %v11875_v25 = vpop.permute.xlu1 %3748  ;;  %14132 = vst [vmem:[#allocation149_spill] sm:$0xff] %v11903_v30  ;;  %v3875_v57 = vsel %vm1317_vm2, %v3874_v41, %v3870_v55 }
 0x83b   : > { %14126 = vst [vmem:[#allocation79_spill] sm:$0xff] %v11875_v25  ;;  %6375 = vperm.xlu0 %7862, %v11877_v22   ;;  %v3861_v22 = vrot.slane %v11797_v19, %v9458_v48 }
 0x83c   : > { %6378 = vperm.xlu1 %7863, %v11879_v28   ;;  %v3883_v28 = vrot.slane %v11875_v25, %v9468_v21 }
 0x83d   : > { %v3866_v25 = vsel %vm1317_vm2, %v3865_v6, %v3861_v22  ;;  %v11929_v22 = vpop.permute.xlu0 %3763  ;;  %v3919_v6 = vsel %vm1454_vm3, %v3857_v12, %v3848_v37 }
 0x83e   : > { %v11889_v58 = vpop.permute.xlu1 %3754  ;;  %14135 = vst [vmem:[#allocation154_spill] sm:$0xff] %v11929_v22  ;;  %v3920_v14 = vsel %vm1456_vm4, %v3866_v25, %v3919_v6  ;;  %v3906_v37 = vrot.slane %v11929_v22, %v9458_v48 }
 0x83f   : > { %14130 = vst [vmem:[#allocation54_spill] sm:$0xff] %v11889_v58  ;;  %v3892_v51 = vrot.slane %v11889_v58, %v9468_v21  ;;  %4863 = vperm.xlu0 %7862, %v11897_v20   ;;  %v11925_v20 = vpop.eup %8174  ;;  %v3897_v58 = vrot.slane %v11884_v24, %v9458_v48  ;;  %v3921_v41 = vsel %vm1458_vm5, %v3875_v57, %v3920_v14 }
 0x840   : > { %4866 = vperm.xlu1 %7863, %v11903_v30   ;;  %14134 = vst [vmem:[#allocation153_spill] sm:$0xff] %v11925_v20  ;;  %v3884_v30 = vsel %vm1317_vm2, %v3883_v28, %v3879_v56  ;;  %v11933_v42 = vpop.eup %8176 }
 0x841   : > { %14136 = vst [vmem:[#allocation155_spill] sm:$0xff] %v11933_v42  ;;  %v3893_v55 = vsel %vm1317_vm2, %v3892_v51, %v3888_v9  ;;  %v3922_v12 = vsel %vm1460_vm6, %v3884_v30, %v3921_v41  ;;  %v11948_v9 = vpop.eup %8178  ;;  %v4795_v57 = vpop.permute.xlu0 %4794 }
 0x842   : > { %v11917_v54 = vpop.permute.xlu1 %3760  ;;  %14138 = vst [vmem:[#allocation157_spill] sm:$0xff] %v11948_v9  ;;  %v3923_v51 = vsel %vm1462_vm7, %v3893_v55, %v3922_v12  ;;  %v11951_v28 = vpop.eup %8180 }
 0x843   : > { %14133 = vst [vmem:[#allocation152_spill] sm:$0xff] %v11917_v54  ;;  %v3901_v18 = vrot.slane %v11917_v54, %v9468_v21  ;;  %6339 = vperm.xlu0 %7862, %v11925_v20   ;;  %14139 = vst [vmem:[#allocation158_spill] sm:$0xff] %v11951_v28  ;;  %v11960_v6 = vpop.eup %8182  ;;  %v4902_v20 = vrot.slane %v4795_v57, %v9468_v21 }
 0x844   : > { %6342 = vperm.xlu1 %7863, %v11933_v42   ;;  %14140 = vst [vmem:[#allocation159_spill] sm:$0xff] %v11960_v6  ;;  %v11962_v14 = vpop.eup %8184 }
 0x845   : > { %v3902_v17 = vsel %vm1317_vm2, %v3901_v18, %v3897_v58  ;;  %14141 = vst [vmem:[#allocation160_spill] sm:$0xff] %v11962_v14  ;;  %v4804_v41 = vpop.permute.xlu0 %4803 }
 0x846   : > { %v11941_v54 = vpop.permute.xlu1 %3766  ;;  %v3924_v58 = vsel %vm1464_vm8, %v3902_v17, %v3923_v51  ;;  %v4893_v51 = vrot.slane %v11656_v35, %v9468_v21 }
 0x847   : > { %14137 = vst [vmem:[#allocation156_spill] sm:$0xff] %v11941_v54  ;;  %v3910_v25 = vrot.slane %v11941_v54, %v9468_v21  ;;  %6381 = vperm.xlu0 %7862, %v11948_v9   ;;  %v4875_v9 = vrot.slane %v11581_v46, %v9468_v21  ;;  %v4898_v46 = vrot.slane %v11600_v63, %v9458_v48 }
 0x848   : > { %6384 = vperm.xlu1 %7863, %v11951_v28  }
 0x849   : > { %v3911_v56 = vsel %vm1317_vm2, %v3910_v25, %v3906_v37  ;;  %v4810_v37 = vpop.permute.xlu0 %4809  ;;  %v4884_v25 = vrot.slane %v11650_v13, %v9468_v21 }
 0x84a   : > { %v3925_v18 = vsel %vm1466_vm9, %v3911_v56, %v3924_v58  ;;  %v4798_v30 = vpop.permute.xlu1 %4797  ;;  %v4871_v58 = vrot.slane %v11634_v26, %v9458_v48  ;;  %v4880_v56 = vrot.slane %v11642_v16, %v9458_v48 }
 0x84b   : > { %7666 = vst.msk [vmem:[%s11199_s30 + $0x18] sm:$0xff] %vm419_vm0, %v3925_v18  ;;  %6387 = vperm.xlu0 %7862, %v11960_v6   ;;  %v4889_v6 = vrot.slane %v11590_v47, %v9458_v48  ;;  %v4907_v47 = vrot.slane %v4798_v30, %v9458_v48  ;;  %v4903_v30 = vsel %vm1317_vm2, %v4902_v20, %v4898_v46 }
 0x84c   : > { %6390 = vperm.xlu1 %7863, %v11962_v14   ;;  %v4885_v28 = vsel %vm1317_vm2, %v4884_v25, %v4880_v56  ;;  %v4876_v26 = vsel %vm1317_vm2, %v4875_v9, %v4871_v58  ;;  %v4916_v25 = vrot.slane %v4804_v41, %v9458_v48  ;;  %v4925_v9 = vrot.slane %v4810_v37, %v9458_v48 }
 0x84d   : > { %v4816_v14 = vpop.permute.xlu0 %4815  ;;  %v4894_v13 = vsel %vm1317_vm2, %v4893_v51, %v4889_v6  ;;  %v5012_v42 = vsel %vm1454_vm3, %v4885_v28, %v4876_v26 }
 0x84e   : > { %v4801_v55 = vpop.permute.xlu1 %4800  ;;  %v5013_v6 = vsel %vm1456_vm4, %v4894_v13, %v5012_v42 }
 0x84f   : > { %v4911_v35 = vrot.slane %v4801_v55, %v9468_v21  ;;  %v5014_v41 = vsel %vm1458_vm5, %v4903_v30, %v5013_v6 }
 0x851   : > { %v4912_v28 = vsel %vm1317_vm2, %v4911_v35, %v4907_v47 }
 0x852   : > { %v4807_v17 = vpop.permute.xlu1 %4806  ;;  %v5015_v51 = vsel %vm1460_vm6, %v4912_v28, %v5014_v41 }
 0x853   : > { %v4920_v16 = vrot.slane %v4807_v17, %v9468_v21  ;;  %v11995_v17 = vpop.permute.xlu0 %4821 }
 0x854   : > { %v4943_v36 = vrot.slane %v11995_v17, %v9458_v48 }
 0x855   : > { %v4921_v63 = vsel %vm1317_vm2, %v4920_v16, %v4916_v25 }
 0x856   : > { %v4813_v12 = vpop.permute.xlu1 %4812  ;;  %v5016_v37 = vsel %vm1462_vm7, %v4921_v63, %v5015_v51 }
 0x857   : > { %v4929_v54 = vrot.slane %v4813_v12, %v9468_v21  ;;  %v4934_v12 = vrot.slane %v4816_v14, %v9458_v48  ;;  %v4828_v13 = vpop.permute.xlu0 %4827 }
 0x858   : > { %v4952_v61 = vrot.slane %v4828_v13, %v9458_v48 }
 0x859   : > { %v4930_v42 = vsel %vm1317_vm2, %v4929_v54, %v4925_v9 }
 0x85a   : > { %v4819_v18 = vpop.permute.xlu1 %4818 }
 0x85b   : > { %v4938_v55 = vrot.slane %v4819_v18, %v9468_v21  ;;  %v5017_v18 = vsel %vm1464_vm8, %v4930_v42, %v5016_v37  ;;  %v4834_v26 = vpop.permute.xlu0 %4833 }
 0x85c   : > { %v4961_v27 = vrot.slane %v4834_v26, %v9458_v48 }
 0x85d   : > { %v4939_v58 = vsel %vm1317_vm2, %v4938_v55, %v4934_v12 }
 0x85e   : > { %v11992_v57 = vpop.permute.xlu1 %4824  ;;  %v5018_v20 = vsel %vm1466_vm9, %v4939_v58, %v5017_v18 }
 0x85f   : > { %v5028_v14 = vsel %vm419_vm0, %v5018_v20, 0.0  ;;  %v4840_v47 = vpop.permute.xlu0 %4839  ;;  %v4947_v19 = vrot.slane %v11992_v57, %v9468_v21 }
 0x860   : > { %v4970_v13 = vrot.slane %v4840_v47, %v9458_v48 }
 0x862   : > { %v4831_v56 = vpop.permute.xlu1 %4830 }
 0x863   : > { %v6298_v54 = vpop.permute.xlu0 %6297  ;;  %v4956_v53 = vrot.slane %v4831_v56, %v9468_v21 }
 0x865   : > { %v4957_v15 = vsel %vm1317_vm2, %v4956_v53, %v4952_v61  ;;  %v6395_v61 = vrot.slane %v6298_v54, %v9458_v48 }
 0x866   : > { %v4837_v35 = vpop.permute.xlu1 %4836 }
 0x867   : > { %v6304_v25 = vpop.permute.xlu0 %6303  ;;  %v4965_v62 = vrot.slane %v4837_v35, %v9468_v21 }
 0x868   : > { %v6404_v57 = vrot.slane %v6304_v25, %v9458_v48 }
 0x86a   : > { %5029 = vadd.xlane.f32.xlu0 %v5028_v14  ;;  %v4843_v16 = vpop.permute.xlu1 %4842 }
 0x86b   : > { %v6310_v55 = vpop.permute.xlu0 %6309  ;;  %v4974_v52 = vrot.slane %v4843_v16, %v9468_v21  ;;  %v4948_v16 = vsel %vm1317_vm2, %v4947_v19, %v4943_v36 }
 0x86c   : > { %v6413_v35 = vrot.slane %v6310_v55, %v9458_v48  ;;  %v5019_v53 = vsel %vm1454_vm3, %v4957_v15, %v4948_v16 }
 0x86d   : > { %v4975_v26 = vsel %vm1317_vm2, %v4974_v52, %v4970_v13 }
 0x86e   : > { %v6301_v46 = vpop.permute.xlu1 %6300 }
 0x86f   : > { %v6399_v60 = vrot.slane %v6301_v46, %v9468_v21 }
 0x872   : > { %v6307_v6 = vpop.permute.xlu1 %6306 }
 0x873   : > { %v6408_v10 = vrot.slane %v6307_v6, %v9468_v21  ;;  %v4966_v6 = vsel %vm1317_vm2, %v4965_v62, %v4961_v27 }
 0x874   : > { %v5020_v52 = vsel %vm1456_vm4, %v4966_v6, %v5019_v53 }
 0x875   : > { %v6409_v47 = vsel %vm1317_vm2, %v6408_v10, %v6404_v57  ;;  %v6400_v10 = vsel %vm1317_vm2, %v6399_v60, %v6395_v61 }
 0x876   : > { %v6313_v9 = vpop.permute.xlu1 %6312 }
 0x877   : > { %v6417_v56 = vrot.slane %v6313_v9, %v9468_v21 }
 0x879   : > { %v6418_v9 = vsel %vm1317_vm2, %v6417_v56, %v6413_v35 }
 0x886   : > { %v12009_v28 = vpop.permute.xlu0 %6345 }
 0x887   : > { %v12011_v30 = vpop.permute.xlu1 %6348  ;;  %v6467_v60 = vrot.slane %v12009_v28, %v9458_v48 }
 0x88a   : > { %v12013_v12 = vpop.permute.xlu0 %6351 }
 0x88b   : > { %v12015_v63 = vpop.permute.xlu1 %6354  ;;  %v6476_v53 = vrot.slane %v12013_v12, %v9458_v48 }
 0x88e   : > { %v12017_v41 = vpop.permute.xlu0 %6315 }
 0x88f   : > { %v6319_v42 = vpop.permute.xlu1 %6318  ;;  %v6422_v19 = vrot.slane %v12017_v41, %v9458_v48  ;;  %v5021_v41 = vsel %vm1458_vm5, %v4975_v26, %v5020_v52 }
 0x890   : > { %v6426_v36 = vrot.slane %v6319_v42, %v9468_v21  ;;  %v6536_v42 = vsel %vm1454_vm3, %v6409_v47, %v6400_v10 }
 0x892   : > { %v12019_v51 = vpop.permute.xlu0 %6357  ;;  %v6427_v56 = vsel %vm1317_vm2, %v6426_v36, %v6422_v19 }
 0x893   : > { %v12021_v58 = vpop.permute.xlu1 %6360 }
 0x896   : > { %v4846_v37 = vpop.permute.xlu0 %4845 }
 0x897   : > { %v4849_v18 = vpop.permute.xlu1 %4848  ;;  %v4979_v25 = vrot.slane %v4846_v37, %v9458_v48 }
 0x898   : > { %v4983_v55 = vrot.slane %v4849_v18, %v9468_v21  ;;  %v6537_v18 = vsel %vm1456_vm4, %v6418_v9, %v6536_v42  ;;  %v6489_v9 = vrot.slane %v12021_v58, %v9468_v21 }
 0x899   : > { %v6538_v47 = vsel %vm1458_vm5, %v6427_v56, %v6537_v18 }
 0x89a   : > { %v12023_v20 = vpop.permute.xlu0 %6321 }
 0x89b   : > { %v12025_v14 = vpop.permute.xlu1 %6324 }
 0x89e   : > { %v12027_v40 = vpop.permute.xlu0 %6363 }
 0x89f   : > { %v12029_v3 = vpop.permute.xlu1 %6366  ;;  %v6494_v52 = vrot.slane %v12027_v40, %v9458_v48 }
 0x8a0   : > { %v6498_v58 = vrot.slane %v12029_v3, %v9468_v21 }
 0x8a2   : > { %v4852_v38 = vpop.permute.xlu0 %4851 }
 0x8a3   : > { %v4855_v34 = vpop.permute.xlu1 %4854  ;;  %v4988_v54 = vrot.slane %v4852_v38, %v9458_v48  ;;  %v6431_v38 = vrot.slane %v12023_v20, %v9458_v48 }
 0x8a4   : > { %v4992_v15 = vrot.slane %v4855_v34, %v9468_v21  ;;  %v6435_v34 = vrot.slane %v12025_v14, %v9468_v21 }
 0x8a6   : > { %v12031_v22 = vpop.permute.xlu0 %6327  ;;  %v4993_v13 = vsel %vm1317_vm2, %v4992_v15, %v4988_v54 }
 0x8a7   : > { %v12033_v23 = vpop.permute.xlu1 %6330  ;;  %v6440_v20 = vrot.slane %v12031_v22, %v9458_v48  ;;  %v6436_v22 = vsel %vm1317_vm2, %v6435_v34, %v6431_v38 }
 0x8a8   : > { %v6444_v14 = vrot.slane %v12033_v23, %v9468_v21  ;;  %v6480_v23 = vrot.slane %v12015_v63, %v9468_v21  ;;  %v6539_v36 = vsel %vm1460_vm6, %v6436_v22, %v6538_v47 }
 0x8aa   : > { %v12035_v24 = vpop.permute.xlu0 %6369  ;;  %v6445_v12 = vsel %vm1317_vm2, %v6444_v14, %v6440_v20  ;;  %v6499_v14 = vsel %vm1317_vm2, %v6498_v58, %v6494_v52  ;;  %v14143_v58 = vld [vmem:[#allocation64_spill] sm:$0xff] }
 0x8ab   : > { %v12037_v11 = vpop.permute.xlu1 %6372  ;;  %v6540_v38 = vsel %vm1462_vm7, %v6445_v12, %v6539_v36 }
 0x8ac   : > { %v6507_v42 = vrot.slane %v12037_v11, %v9468_v21 }
 0x8ae   : > { %v4858_v1 = vpop.permute.xlu0 %4857 }
 0x8af   : > { %v4861_v32 = vpop.permute.xlu1 %4860  ;;  %v4997_v27 = vrot.slane %v4858_v1, %v9458_v48  ;;  %v4984_v1 = vsel %vm1317_vm2, %v4983_v55, %v4979_v25 }
 0x8b0   : > { %v5001_v46 = vrot.slane %v4861_v32, %v9468_v21  ;;  %v6471_v32 = vrot.slane %v12011_v30, %v9468_v21  ;;  %v5022_v6 = vsel %vm1460_vm6, %v4984_v1, %v5021_v41  ;;  %v6503_v41 = vrot.slane %v12035_v24, %v9458_v48 }
 0x8b2   : > { %v6334_v29 = vpop.permute.xlu0 %6333  ;;  %v5002_v35 = vsel %vm1317_vm2, %v5001_v46, %v4997_v27  ;;  %v6481_v46 = vsel %vm1317_vm2, %v6480_v23, %v6476_v53  ;;  %v6472_v20 = vsel %vm1317_vm2, %v6471_v32, %v6467_v60 }
 0x8b3   : > { %v6337_v17 = vpop.permute.xlu1 %6336  ;;  %v6449_v28 = vrot.slane %v6334_v29, %v9458_v48  ;;  %v6485_v29 = vrot.slane %v12019_v51, %v9458_v48 }
 0x8b4   : > { %v6453_v16 = vrot.slane %v6337_v17, %v9468_v21  ;;  %v5023_v17 = vsel %vm1462_vm7, %v4993_v13, %v5022_v6 }
 0x8b5   : > { %v5024_v19 = vsel %vm1464_vm8, %v5002_v35, %v5023_v17  ;;  %v6490_v56 = vsel %vm1317_vm2, %v6489_v9, %v6485_v29  ;;  %v6508_v35 = vsel %vm1317_vm2, %v6507_v42, %v6503_v41  ;;  %v14144_v41 = vld [vmem:[#allocation12_spill] sm:$0xff] }
 0x8b6   : > { %v12069_v62 = vpop.permute.xlu0 %6375  ;;  %v6454_v63 = vsel %vm1317_vm2, %v6453_v16, %v6449_v28  ;;  %v14145_v42 = vld [vmem:[#allocation68_spill] sm:$0xff] }
 0x8b7   : > { %v12075_v37 = vpop.permute.xlu1 %6378  ;;  %v6512_v40 = vrot.slane %v12069_v62, %v9458_v48  ;;  %v6541_v1 = vsel %vm1464_vm8, %v6454_v63, %v6540_v38  ;;  %v14146_v38 = vld [vmem:[#allocation11_spill] sm:$0xff] }
 0x8b8   : > { %v6516_v3 = vrot.slane %v12075_v37, %v9468_v21 }
 0x8ba   : > { %v4864_v57 = vpop.permute.xlu0 %4863  ;;  %v6517_v16 = vsel %vm1317_vm2, %v6516_v3, %v6512_v40  ;;  %v14147_v40 = vld [vmem:[#allocation62_spill] sm:$0xff] }
 0x8bb   : > { %v5006_v30 = vrot.slane %v4864_v57, %v9458_v48  ;;  %v4867_v61 = vpop.permute.xlu1 %4866  ;;  %v6543_v57 = vsel %vm1454_vm3, %v6481_v46, %v6472_v20  ;;  %v2408_v3 = vmul.f32 %v14147_v40, %v14146_v38  ;;  %v14152_v20 = vld [vmem:[#allocation21_spill] sm:$0xff]  ;;  %v14163_v40 = vld [vmem:[#allocation70_spill] sm:$0xff] }
 0x8bc   : > { %v5010_v26 = vrot.slane %v4867_v61, %v9468_v21  ;;  %v6544_v28 = vsel %vm1456_vm4, %v6490_v56, %v6543_v57  ;;  %v14148_v56 = vld [vmem:[#allocation16_spill] sm:$0xff]  ;;  %v14155_v57 = vld [vmem:[#allocation87_spill] sm:$0xff] }
 0x8bd   : > { %v6545_v61 = vsel %vm1458_vm5, %v6499_v14, %v6544_v28  ;;  %v14153_v14 = vld [vmem:[#allocation69_spill] sm:$0xff] }
 0x8be   : > { %v6340_v25 = vpop.permute.xlu0 %6339  ;;  %v5011_v55 = vsel %vm1317_vm2, %v5010_v26, %v5006_v30  ;;  %v6546_v6 = vsel %vm1460_vm6, %v6508_v35, %v6545_v61 }
 0x8bf   : > { %v6458_v54 = vrot.slane %v6340_v25, %v9458_v48  ;;  %v6343_v15 = vpop.permute.xlu1 %6342  ;;  %v5025_v51 = vsel %vm1466_vm9, %v5011_v55, %v5024_v19  ;;  %v6547_v26 = vsel %vm1462_vm7, %v6517_v16, %v6546_v6 }
 0x8c0   : > { %v6462_v10 = vrot.slane %v6343_v15, %v9468_v21  ;;  %v5031_v27 = vsel %vm419_vm0, %v5025_v51, 0.0 }
 0x8c1   : > { %5032 = vadd.xlane.f32.xlu1 %v5031_v27 }
 0x8c2   : > { %v6382_v34 = vpop.permute.xlu0 %6381  ;;  %v6463_v18 = vsel %vm1317_vm2, %v6462_v10, %v6458_v54  ;;  %v14142_v54 = vld [vmem:[#allocation86_spill] sm:$0xff] }
 0x8c3   : > { %v6521_v24 = vrot.slane %v6382_v34, %v9458_v48  ;;  %v6385_v13 = vpop.permute.xlu1 %6384  ;;  %v6542_v11 = vsel %vm1466_vm9, %v6463_v18, %v6541_v1 }
 0x8c4   : > { %v6525_v62 = vrot.slane %v6385_v13, %v9468_v21  ;;  %v6552_v37 = vsel %vm419_vm0, %v6542_v11, 0.0  ;;  %v14150_v13 = vld [vmem:[#allocation14_spill] sm:$0xff] }
 0x8c5   : > { %6553 = vadd.xlane.f32.xlu0 %v6552_v37  ;;  %v14151_v11 = vld [vmem:[#allocation66_spill] sm:$0xff] }
 0x8c6   : > { %v6388_v30 = vpop.permute.xlu0 %6387  ;;  %v6526_v60 = vsel %vm1317_vm2, %v6525_v62, %v6521_v24  ;;  %v14149_v24 = vld [vmem:[#allocation84_spill] sm:$0xff]  ;;  %v2411_v62 = vmul.f32 %v14153_v14, %v14152_v20  ;;  %v14154_v37 = vld [vmem:[#allocation18_spill] sm:$0xff] }
 0x8c7   : > { %v6530_v32 = vrot.slane %v6388_v30, %v9458_v48  ;;  %v6391_v53 = vpop.permute.xlu1 %6390  ;;  %v6548_v47 = vsel %vm1464_vm8, %v6526_v60, %v6547_v26  ;;  %v2412_v35 = vmul.f32 %v14155_v57, %v14154_v37  ;;  %v14157_v26 = vld [vmem:[#allocation91_spill] sm:$0xff] }
 0x8c8   : > { %v6534_v22 = vrot.slane %v6391_v53, %v9468_v21  ;;  %v2458_v53 = vsel %vm2439_vm10, %v2411_v62, 0.0 }
 0x8c9   : > { %v2459_v6 = vsel %vm2439_vm10, %v2412_v35, 0.0 }
 0x8ca   : > { %v6535_v23 = vsel %vm1317_vm2, %v6534_v22, %v6530_v32  ;;  %v14156_v22 = vld [vmem:[#allocation27_spill] sm:$0xff] }
 0x8cb   : > { %v6549_v29 = vsel %vm1466_vm9, %v6535_v23, %v6548_v47  ;;  %v2413_v23 = vmul.f32 %v14157_v26, %v14156_v22  ;;  %v14158_v47 = vld [vmem:[#allocation24_spill] sm:$0xff] }
 0x8cc   : > { %v6555_v17 = vsel %vm419_vm0, %v6549_v29, 0.0  ;;  %v14159_v29 = vld [vmem:[#allocation89_spill] sm:$0xff]  ;;  %v14171_v26 = vld [vmem:[#allocation120_spill] sm:$0xff] }
 0x8cd   : > { %6556 = vadd.xlane.f32.xlu0 %v6555_v17  ;;  %v2414_v17 = vmul.f32 %v14159_v29, %v14158_v47 }
 0x8f3   : > { %v12158_v9 = vpop.xlane.xlu0 %5029 }
 0x8f4   : > { %v5039_v12 = vrot.slane %v12158_v9, %v13740_v5  ;;  %v5043_v25 = vrot.slane %v12158_v9, %v10213_v2  ;;  %v5047_v55 = vrot.slane %v12158_v9, %v10227_v0  ;;  %v5051_v14 = vrot.slane %v12158_v9, %v10249_v39 }
 0x8f6   : > { %8186 = vrcp.f32 %v5039_v12 }
 0x8f7   : > { %8188 = vrcp.f32 %v5043_v25 }
 0x8f8   : > { %8190 = vrcp.f32 %v5047_v55 }
 0x903   : > { %v8187_v19 = vpop.eup %8186 }
 0x904   : > { %v8189_v36 = vpop.eup %8188  ;;  %v5117_v63 = vmul.f32 %v8187_v19, %v11510_v50  ;;  %v5118_v15 = vmul.f32 %v8187_v19, %v14142_v54  ;;  %v2407_v50 = vmul.f32 %v14145_v42, %v14144_v41  ;;  %v2460_v19 = vadd.f32 %v2459_v6, %v2458_v53  ;;  %v14170_v6 = vld [vmem:[#allocation46_spill] sm:$0xff] }
 0x905   : > { %v8191_v51 = vpop.eup %8190  ;;  %v5120_v52 = vmul.f32 %v8189_v36, %v11513_v44  ;;  %v5121_v27 = vmul.f32 %v8189_v36, %v11516_v45  ;;  %v2441_v44 = vsel %vm2439_vm10, %v2408_v3, 0.0  ;;  %v2409_v45 = vmul.f32 %v14149_v24, %v14148_v56  ;;  %v14167_v24 = vld [vmem:[#allocation67_spill] sm:$0xff] }
 0x906   : > { %5197 = vperm.xlu1 %7863, %v5117_v63   ;;  %5200 = vperm.xlu0 %7862, %v5118_v15   ;;  %v5123_v10 = vmul.f32 %v8191_v51, %v14143_v58  ;;  %v5124_v46 = vmul.f32 %v8191_v51, %v11519_v43  ;;  %v2440_v34 = vsel %vm2439_vm10, %v2407_v50, 0.0  ;;  %v2410_v43 = vmul.f32 %v14151_v11, %v14150_v13  ;;  %v14162_v50 = vld [vmem:[#allocation30_spill] sm:$0xff] }
 0x907   : > { %v2442_v18 = vadd.f32 %v2441_v44, %v2440_v34  ;;  %v2449_v60 = vsel %vm2439_vm10, %v2409_v45, 0.0  ;;  %v2467_v36 = vsel %vm2439_vm10, %v2413_v23, 0.0  ;;  %v2468_v63 = vsel %vm2439_vm10, %v2414_v17, 0.0  ;;  %v14164_v34 = vld [vmem:[#allocation42_spill] sm:$0xff] }
 0x908   : > { %v2450_v32 = vsel %vm2439_vm10, %v2410_v43, 0.0  ;;  %v2461_v58 = vrot.slane %v2460_v19, 4  ;;  %v2416_v3 = vmul.f32 %v14163_v40, %v14162_v50  ;;  %v14165_v44 = vld [vmem:[#allocation78_spill] sm:$0xff]  ;;  %v2420_v23 = vmul.f32 %v14171_v26, %v14170_v6  ;;  %v14190_v6 = vld [vmem:[#allocation131_spill] sm:$0xff] }
 0x909   : > { %v2443_v1 = vrot.slane %v2442_v18, 4  ;;  %v2451_v55 = vadd.f32 %v2450_v32, %v2449_v60  ;;  %v14168_v60 = vld [vmem:[#allocation50_spill] sm:$0xff]  ;;  %v14169_v32 = vld [vmem:[#allocation71_spill] sm:$0xff] }
 0x90a   : > { %5203 = vperm.xlu1 %7863, %v5120_v52   ;;  %5209 = vperm.xlu0 %7862, %v5123_v10   ;;  %v2469_v10 = vadd.f32 %v2468_v63, %v2467_v36  ;;  %v2462_v62 = vadd.f32 %v2461_v58, %v2460_v19  ;;  %v2419_v53 = vmul.f32 %v14169_v32, %v14168_v60  ;;  %v2495_v40 = vsel %vm2439_vm10, %v2420_v23, 0.0  ;;  %v14179_v32 = vld [vmem:[#allocation61_spill] sm:$0xff] }
 0x90b   : > { %v2444_v16 = vadd.f32 %v2443_v1, %v2442_v18  ;;  %v2452_v51 = vrot.slane %v2451_v55, 4  ;;  %v2417_v18 = vmul.f32 %v14165_v44, %v14164_v34  ;;  %v14166_v1 = vld [vmem:[#allocation38_spill] sm:$0xff] }
 0x90c   : > { %v2418_v45 = vmul.f32 %v14167_v24, %v14166_v1  ;;  %v2470_v57 = vrot.slane %v2469_v10, 4  ;;  %v2463_v58 = vrot.slane %v2462_v62, 2  ;;  %v14174_v44 = vld [vmem:[#allocation74_spill] sm:$0xff]  ;;  %v14176_v24 = vld [vmem:[#allocation85_spill] sm:$0xff] }
 0x90d   : > { %v2445_v25 = vrot.slane %v2444_v16, 2  ;;  %v2453_v43 = vadd.f32 %v2452_v51, %v2451_v55  ;;  %v14172_v55 = vld [vmem:[#allocation41_spill] sm:$0xff] }
 0x90e   : > { %5206 = vperm.xlu1 %7863, %v5121_v27   ;;  %v14160_v27 = vld [vmem:[#allocation34_spill] sm:$0xff] }
 0x90f   : > { %v2446_v15 = vadd.f32 %v2445_v25, %v2444_v16  ;;  %v2477_v16 = vsel %vm2439_vm10, %v2416_v3, 0.0  ;;  %v14173_v3 = vld [vmem:[#allocation59_spill] sm:$0xff] }
 0x911   : > { %v2447_v11 = vrot.slane %v2446_v15, 1 }
 0x912   : > { %5212 = vperm.xlu1 %7863, %v5124_v46   ;;  %v14161_v46 = vld [vmem:[#allocation83_spill] sm:$0xff] }
 0x913   : > { %v2415_v42 = vmul.f32 %v14161_v46, %v14160_v27  ;;  %v12230_v63 = vadd.f32 %v2447_v11, %v2446_v15  ;;  %v2471_v46 = vadd.f32 %v2470_v57, %v2469_v10  ;;  %v14178_v15 = vld [vmem:[#allocation88_spill] sm:$0xff] }
 0x915   : > { %v2476_v35 = vsel %vm2439_vm10, %v2415_v42, 0.0  ;;  %v2494_v42 = vsel %vm2439_vm10, %v2419_v53, 0.0 }
 0x916   : > { %v2478_v51 = vadd.f32 %v2477_v16, %v2476_v35  ;;  %v14180_v35 = vld [vmem:[#allocation124_spill] sm:$0xff] }
 0x917   : > { %v2424_v16 = vmul.f32 %v14180_v35, %v14179_v32  ;;  %v14184_v35 = vld [vmem:[#allocation10_spill] sm:$0xff] }
 0x918   : > { %v2479_v26 = vrot.slane %v2478_v51, 4 }
 0x94a   : > { %v12186_v28 = vpop.xlane.xlu1 %5032 }
 0x94b   : > { %v5071_v30 = vrot.slane %v12186_v28, %v13740_v5  ;;  %v5075_v61 = vrot.slane %v12186_v28, %v10213_v2  ;;  %v5079_v17 = vrot.slane %v12186_v28, %v10227_v0 }
 0x94d   : > { %8192 = vrcp.f32 %v5071_v30  ;;  %v2485_v30 = vsel %vm2439_vm10, %v2417_v18, 0.0  ;;  %v2421_v18 = vmul.f32 %v14174_v44, %v14173_v3  ;;  %v14182_v44 = vld [vmem:[#allocation13_spill] sm:$0xff] }
 0x94e   : > { %v12200_v12 = vpop.xlane.xlu0 %6553  ;;  %8194 = vrcp.f32 %v5075_v61  ;;  %v2486_v61 = vsel %vm2439_vm10, %v2418_v45, 0.0 }
 0x94f   : > { %v6563_v54 = vrot.slane %v12200_v12, %v13740_v5  ;;  %v6567_v52 = vrot.slane %v12200_v12, %v10213_v2  ;;  %v6571_v10 = vrot.slane %v12200_v12, %v10227_v0 }
 0x951   : > { %8196 = vrcp.f32 %v6563_v54  ;;  %v2454_v54 = vrot.slane %v2453_v43, 2 }
 0x952   : > { %8198 = vrcp.f32 %v6567_v52  ;;  %v2487_v52 = vadd.f32 %v2486_v61, %v2485_v30  ;;  %v14181_v30 = vld [vmem:[#allocation115_spill] sm:$0xff] }
 0x953   : > { %8200 = vrcp.f32 %v5051_v14  ;;  %v14177_v14 = vld [vmem:[#allocation65_spill] sm:$0xff]  ;;  %v2455_v53 = vadd.f32 %v2454_v54, %v2453_v43  ;;  %v2513_v54 = vsel %vm2439_vm10, %v2424_v16, 0.0 }
 0x954   : > { %v2423_v11 = vmul.f32 %v14178_v15, %v14177_v14  ;;  %8202 = vrcp.f32 %v5079_v17  ;;  %v2488_v23 = vrot.slane %v2487_v52, 4  ;;  %v14185_v17 = vld [vmem:[#allocation81_spill] sm:$0xff] }
 0x955   : > { %v2426_v32 = vmul.f32 %v14185_v17, %v14184_v35  ;;  %8204 = vrcp.f32 %v6571_v10  ;;  %v14188_v35 = vld [vmem:[#allocation75_spill] sm:$0xff] }
 0x956   : > { %v14189_v10 = vld [vmem:[#allocation15_spill] sm:$0xff] }
 0x957   : > { %v2428_v1 = vmul.f32 %v14190_v6, %v14189_v10 }
 0x95a   : > { %v8193_v29 = vpop.eup %8192 }
 0x95b   : > { %v5142_v25 = vmul.f32 %v8193_v29, %v11595_v7  ;;  %v5141_v19 = vmul.f32 %v8193_v29, %v14172_v55  ;;  %v8195_v36 = vpop.eup %8194  ;;  %v14175_v7 = vld [vmem:[#allocation55_spill] sm:$0xff]  ;;  %v2496_v29 = vadd.f32 %v2495_v40, %v2494_v42  ;;  %v2464_v55 = vadd.f32 %v2463_v58, %v2462_v62  ;;  %v14186_v42 = vld [vmem:[#allocation52_spill] sm:$0xff] }
 0x95c   : > { %v2422_v45 = vmul.f32 %v14176_v24, %v14175_v7  ;;  %v5145_v57 = vmul.f32 %v8195_v36, %v11602_v4  ;;  %v5144_v61 = vmul.f32 %v8195_v36, %v14181_v30  ;;  %v14183_v24 = vld [vmem:[#allocation127_spill] sm:$0xff]  ;;  %v2503_v4 = vsel %vm2439_vm10, %v2421_v18, 0.0 }
 0x95d   : > { %5248 = vperm.xlu1 %7863, %v5142_v25   ;;  %5245 = vperm.xlu0 %7862, %v5141_v19   ;;  %v12246_v25 = vpop.xlane.xlu0 %6556  ;;  %v2472_v19 = vrot.slane %v2471_v46, 2  ;;  %v2425_v15 = vmul.f32 %v14183_v24, %v14182_v44  ;;  %v2512_v36 = vsel %vm2439_vm10, %v2423_v11, 0.0  ;;  %v2489_v24 = vadd.f32 %v2488_v23, %v2487_v52  ;;  %v14187_v11 = vld [vmem:[#allocation17_spill] sm:$0xff] }
 0x95e   : > { %v8197_v7 = vpop.eup %8196  ;;  %v2504_v43 = vsel %vm2439_vm10, %v2422_v45, 0.0  ;;  %v6595_v62 = vrot.slane %v12246_v25, %v13740_v5  ;;  %v2497_v17 = vrot.slane %v2496_v29, 4  ;;  %v2522_v45 = vsel %vm2439_vm10, %v2426_v32, 0.0  ;;  %v14191_v52 = vld [vmem:[#allocation97_spill] sm:$0xff] }
 0x95f   : > { %v6642_v58 = vmul.f32 %v8197_v7, %v11615_v59  ;;  %v6641_v40 = vmul.f32 %v8197_v7, %v14186_v42  ;;  %v8199_v30 = vpop.eup %8198  ;;  %v2521_v18 = vsel %vm2439_vm10, %v2425_v15, 0.0  ;;  %v2427_v16 = vmul.f32 %v14188_v35, %v14187_v11  ;;  %v14192_v23 = vld [vmem:[#allocation37_spill] sm:$0xff] }
 0x960   : > { %v2465_v5 = vrot.slane %v2464_v55, 1  ;;  %v2473_v59 = vadd.f32 %v2472_v19, %v2471_v46  ;;  %v2505_v7 = vadd.f32 %v2504_v43, %v2503_v4  ;;  %v2514_v42 = vadd.f32 %v2513_v54, %v2512_v36  ;;  %v8201_v15 = vpop.eup %8200  ;;  %v14193_v46 = vld [vmem:[#allocation22_spill] sm:$0xff]  ;;  %v14194_v19 = vld [vmem:[#allocation119_spill] sm:$0xff]  ;;  %v14196_v36 = vld [vmem:[#allocation125_spill] sm:$0xff] }
 0x961   : > { %5254 = vperm.xlu1 %7863, %v5145_v57   ;;  %5251 = vperm.xlu0 %7862, %v5144_v61   ;;  %v2456_v57 = vrot.slane %v2455_v53, 1  ;;  %v2480_v61 = vadd.f32 %v2479_v26, %v2478_v51  ;;  %v6599_v51 = vrot.slane %v12246_v25, %v10213_v2  ;;  %8206 = vrcp.f32 %v6595_v62  ;;  %v14195_v43 = vld [vmem:[#allocation19_spill] sm:$0xff] }
 0x962   : > { %v6645_v26 = vmul.f32 %v8199_v30, %v14191_v52  ;;  %v6644_v32 = vmul.f32 %v8199_v30, %v14192_v23  ;;  %v2490_v35 = vrot.slane %v2489_v24, 2  ;;  %v2498_v11 = vadd.f32 %v2497_v17, %v2496_v29  ;;  %v14197_v52 = vld [vmem:[#allocation57_spill] sm:$0xff]  ;;  %v14198_v17 = vld [vmem:[#allocation108_spill] sm:$0xff] }
 0x963   : > { %v2481_v50 = vrot.slane %v2480_v61, 2  ;;  %v2523_v44 = vadd.f32 %v2522_v45, %v2521_v18  ;;  %v2530_v6 = vsel %vm2439_vm10, %v2427_v16, 0.0  ;;  %v2429_v4 = vmul.f32 %v14194_v19, %v14193_v46  ;;  %v14199_v45 = vld [vmem:[#allocation58_spill] sm:$0xff]  ;;  %v8203_v16 = vpop.eup %8202 }
 0x964   : > { %v2430_v2 = vmul.f32 %v14196_v36, %v14195_v43  ;;  %v2457_v54 = vadd.f32 %v2456_v57, %v2455_v53  ;;  %v2474_v62 = vrot.slane %v2473_v59, 1  ;;  %v2515_v30 = vrot.slane %v2514_v42, 4 }
 0x965   : > { %6724 = vperm.xlu1 %7863, %v6642_v58   ;;  %6721 = vperm.xlu0 %7862, %v6641_v40   ;;  %v2531_v58 = vsel %vm2439_vm10, %v2428_v1, 0.0  ;;  %v2506_v40 = vrot.slane %v2505_v7, 4  ;;  %v5055_v29 = vrot.slane %v12158_v9, %v14197_v52  ;;  %8208 = vrcp.f32 %v6599_v51 }
 0x966   : > { %v5127_v18 = vmul.f32 %v8201_v15, %v14198_v17  ;;  %v5126_v1 = vmul.f32 %v8201_v15, %v14199_v45  ;;  %v2466_v23 = vadd.f32 %v2465_v5, %v2464_v55  ;;  %v2482_v19 = vadd.f32 %v2481_v50, %v2480_v61  ;;  %v14200_v55 = vld [vmem:[#allocation101_spill] sm:$0xff]  ;;  %v8205_v15 = vpop.eup %8204 }
 0x967   : > { %v2524_v10 = vrot.slane %v2523_v44, 4  ;;  %v2532_v46 = vadd.f32 %v2531_v58, %v2530_v6  ;;  %v2491_v36 = vadd.f32 %v2490_v35, %v2489_v24  ;;  %v2539_v53 = vsel %vm2439_vm10, %v2429_v4, 0.0  ;;  %v14201_v24 = vld [vmem:[#allocation147_spill] sm:$0xff] }
 0x968   : > { %v2540_v57 = vsel %vm2439_vm10, %v2430_v2, 0.0  ;;  %v2507_v43 = vadd.f32 %v2506_v40, %v2505_v7  ;;  %v2516_v51 = vadd.f32 %v2515_v30, %v2514_v42  ;;  %v7204_v17 = vsel %vm1454_vm3, %v2457_v54, %v12230_v63  ;;  %v14202_v40 = vld [vmem:[#allocation20_spill] sm:$0xff] }
 0x969   : > { %6730 = vperm.xlu1 %7863, %v6645_v26   ;;  %6727 = vperm.xlu0 %7862, %v6644_v32   ;;  %v2499_v26 = vrot.slane %v2498_v11, 2  ;;  %v2475_v32 = vadd.f32 %v2474_v62, %v2473_v59  ;;  %8210 = vrcp.f32 %v5055_v29  ;;  %v5083_v50 = vrot.slane %v12186_v28, %v10249_v39  ;;  %v14203_v29 = vld [vmem:[#allocation92_spill] sm:$0xff] }
 0x96a   : > { %v5148_v61 = vmul.f32 %v8203_v16, %v14200_v55  ;;  %v5147_v5 = vmul.f32 %v8203_v16, %v14201_v24  ;;  %v2483_v35 = vrot.slane %v2482_v19, 1  ;;  %v2525_v6 = vadd.f32 %v2524_v10, %v2523_v44  ;;  %v14204_v16 = vld [vmem:[#allocation28_spill] sm:$0xff] }
 0x96b   : > { %v2533_v58 = vrot.slane %v2532_v46, 4  ;;  %v2541_v4 = vadd.f32 %v2540_v57, %v2539_v53  ;;  %v2492_v2 = vrot.slane %v2491_v36, 1  ;;  %v2500_v59 = vadd.f32 %v2499_v26, %v2498_v11  ;;  %v14205_v26 = vld [vmem:[#allocation122_spill] sm:$0xff]  ;;  %v14206_v53 = vld [vmem:[#allocation25_spill] sm:$0xff]  ;;  %v14209_v24 = vld [vmem:[#allocation132_spill] sm:$0xff] }
 0x96c   : > { %v7205_v7 = vsel %vm1456_vm4, %v2466_v23, %v7204_v17  ;;  %v2508_v63 = vrot.slane %v2507_v43, 2  ;;  %v2517_v42 = vrot.slane %v2516_v51, 2  ;;  %8212 = vrcp.f32 %v5083_v50  ;;  %v14207_v57 = vld [vmem:[#allocation134_spill] sm:$0xff] }
 0x96d   : > { %5218 = vperm.xlu1 %7863, %v5127_v18   ;;  %5215 = vperm.xlu0 %7862, %v5126_v1   ;;  %v7206_v54 = vsel %vm1458_vm5, %v2475_v32, %v7205_v7  ;;  %v6575_v62 = vrot.slane %v12200_v12, %v10249_v39  ;;  %v6648_v30 = vmul.f32 %v8205_v15, %v14202_v40  ;;  %v2526_v45 = vrot.slane %v2525_v6, 2  ;;  %v14211_v7 = vld [vmem:[#allocation99_spill] sm:$0xff] }
 0x96e   : > { %v6647_v44 = vmul.f32 %v8205_v15, %v14203_v29  ;;  %v8207_v10 = vpop.eup %8206  ;;  %v2484_v18 = vadd.f32 %v2483_v35, %v2482_v19  ;;  %v2534_v11 = vadd.f32 %v2533_v58, %v2532_v46  ;;  %v2542_v1 = vrot.slane %v2541_v4, 4  ;;  %v14210_v15 = vld [vmem:[#allocation31_spill] sm:$0xff]  ;;  %v14212_v58 = vld [vmem:[#allocation90_spill] sm:$0xff]  ;;  %v14213_v29 = vld [vmem:[#allocation140_spill] sm:$0xff] }
 0x96f   : > { %v2431_v23 = vmul.f32 %v14205_v26, %v14204_v16  ;;  %v2432_v17 = vmul.f32 %v14207_v57, %v14206_v53  ;;  %v2493_v32 = vadd.f32 %v2492_v2, %v2491_v36  ;;  %v2501_v50 = vrot.slane %v2500_v59, 1 }
 0x970   : > { %v2518_v55 = vadd.f32 %v2517_v42, %v2516_v51  ;;  %v2434_v19 = vmul.f32 %v14211_v7, %v14210_v15  ;;  %v2509_v35 = vadd.f32 %v2508_v63, %v2507_v43  ;;  %8214 = vrcp.f32 %v6575_v62  ;;  %v14216_v7 = vld [vmem:[#allocation43_spill] sm:$0xff] }
 0x971   : > { %5260 = vperm.xlu1 %7863, %v5148_v61   ;;  %5257 = vperm.xlu0 %7862, %v5147_v5   ;;  %v14208_v61 = vld [vmem:[#allocation35_spill] sm:$0xff]  ;;  %v6603_v46 = vrot.slane %v12246_v25, %v10227_v0  ;;  %v6666_v40 = vmul.f32 %v8207_v10, %v14212_v58  ;;  %v6665_v26 = vmul.f32 %v8207_v10, %v14213_v29  ;;  %v2535_v36 = vrot.slane %v2534_v11, 2  ;;  %v14217_v58 = vld [vmem:[#allocation137_spill] sm:$0xff] }
 0x972   : > { %v2433_v5 = vmul.f32 %v14209_v24, %v14208_v61  ;;  %v2543_v2 = vadd.f32 %v2542_v1, %v2541_v4  ;;  %v7207_v51 = vsel %vm1460_vm6, %v2484_v18, %v7206_v54  ;;  %v2548_v42 = vsel %vm2439_vm10, %v2431_v23, 0.0  ;;  %v14214_v4 = vld [vmem:[#allocation102_spill] sm:$0xff]  ;;  %v14215_v18 = vld [vmem:[#allocation128_spill] sm:$0xff] }
 0x973   : > { %v2549_v57 = vsel %vm2439_vm10, %v2432_v17, 0.0  ;;  %v2502_v43 = vadd.f32 %v2501_v50, %v2500_v59  ;;  %v7208_v63 = vsel %vm1462_vm7, %v2493_v32, %v7207_v51  ;;  %v2519_v0 = vrot.slane %v2518_v55, 1 }
 0x974   : > { %v2557_v62 = vsel %vm2439_vm10, %v2433_v5, 0.0  ;;  %v2558_v10 = vsel %vm2439_vm10, %v2434_v19, 0.0  ;;  %v2510_v24 = vrot.slane %v2509_v35, 1  ;;  %8216 = vrcp.f32 %v6603_v46  ;;  %v14219_v19 = vld [vmem:[#allocation139_spill] sm:$0xff] }
 0x975   : > { %6736 = vperm.xlu1 %7863, %v6648_v30   ;;  %6733 = vperm.xlu0 %7862, %v6647_v44   ;;  %v8209_v30 = vpop.eup %8208  ;;  %v2527_v44 = vadd.f32 %v2526_v45, %v2525_v6  ;;  %v5059_v6 = vrot.slane %v12158_v9, %v14071_v8  ;;  %v2536_v17 = vadd.f32 %v2535_v36, %v2534_v11  ;;  %v2544_v59 = vrot.slane %v2543_v2, 2 }
 0x976   : > { %v6669_v54 = vmul.f32 %v8209_v30, %v14214_v4  ;;  %v6668_v45 = vmul.f32 %v8209_v30, %v14215_v18  ;;  %v8211_v1 = vpop.eup %8210  ;;  %v2550_v50 = vadd.f32 %v2549_v57, %v2548_v42  ;;  %v2559_v32 = vadd.f32 %v2558_v10, %v2557_v62  ;;  %v14222_v30 = vld [vmem:[#allocation29_spill] sm:$0xff]  ;;  %v14223_v42 = vld [vmem:[#allocation40_spill] sm:$0xff] }
 0x977   : > { %v2528_v23 = vrot.slane %v2527_v44, 1  ;;  %v2435_v5 = vmul.f32 %v14217_v58, %v14216_v7  ;;  %v12320_v46 = vadd.f32 %v2510_v24, %v2509_v35  ;;  %v12323_v51 = vsel %vm1464_vm8, %v2502_v43, %v7208_v63 }
 0x978   : > { %14221 = vst [vmem:[#allocation64_spill] sm:$0xff] %v12323_v51  ;;  %8218 = vrcp.f32 %v5059_v6  ;;  %v5087_v11 = vrot.slane %v12186_v28, %v14197_v52  ;;  %v5130_v36 = vmul.f32 %v8211_v1, %v14222_v30  ;;  %v5129_v57 = vmul.f32 %v8211_v1, %v14223_v42  ;;  %v14224_v1 = vld [vmem:[#allocation94_spill] sm:$0xff]  ;;  %v14226_v42 = vld [vmem:[#allocation51_spill] sm:$0xff] }
 0x979   : > { %6772 = vperm.xlu1 %7863, %v6666_v40   ;;  %6769 = vperm.xlu0 %7862, %v6665_v26   ;;  %v14218_v40 = vld [vmem:[#allocation39_spill] sm:$0xff]  ;;  %v2520_v26 = vadd.f32 %v2519_v0, %v2518_v55  ;;  %14220 = vst [vmem:[#allocation86_spill] sm:$0xff] %v12320_v46  ;;  %v8213_v62 = vpop.eup %8212  ;;  %v2529_v10 = vadd.f32 %v2528_v23, %v2527_v44  ;;  %v2537_v4 = vrot.slane %v2536_v17, 1  ;;  %v2560_v55 = vrot.slane %v2559_v32, 4 }
 0x97a   : > { %v2436_v29 = vmul.f32 %v14219_v19, %v14218_v40  ;;  %v12329_v18 = vadd.f32 %v2544_v59, %v2543_v2  ;;  %v2566_v35 = vsel %vm2439_vm10, %v2435_v5, 0.0  ;;  %8220 = vrcp.f32 %v5087_v11  ;;  %v14225_v59 = vld [vmem:[#allocation106_spill] sm:$0xff]  ;;  %v14229_v11 = vld [vmem:[#allocation141_spill] sm:$0xff] }
 0x97b   : > { %v5151_v23 = vmul.f32 %v8213_v62, %v14224_v1  ;;  %v5150_v58 = vmul.f32 %v8213_v62, %v14225_v59  ;;  %v12348_v62 = vadd.f32 %v2537_v4, %v2536_v17  ;;  %v14231_v59 = vld [vmem:[#allocation117_spill] sm:$0xff] }
 0x97c   : > { %v2567_v43 = vsel %vm2439_vm10, %v2436_v29, 0.0 }
 0x97d   : > { %6778 = vperm.xlu1 %7863, %v6669_v54   ;;  %6775 = vperm.xlu0 %7862, %v6668_v45   ;;  %v2551_v54 = vrot.slane %v2550_v50, 4  ;;  %v6579_v45 = vrot.slane %v12200_v12, %v14197_v52  ;;  %v8215_v5 = vpop.eup %8214  ;;  %v2568_v19 = vadd.f32 %v2567_v43, %v2566_v35  ;;  %v6607_v43 = vrot.slane %v12246_v25, %v10249_v39 }
 0x97f   : > { %v2552_v35 = vadd.f32 %v2551_v54, %v2550_v50  ;;  %8222 = vrcp.f32 %v6579_v45  ;;  %v3966_v54 = vmul.f32 %v11678_v33, %v14150_v13 }
 0x980   : > { %8224 = vrcp.f32 %v6607_v43 }
 0x981   : > { %5224 = vperm.xlu1 %7863, %v5130_v36   ;;  %5221 = vperm.xlu0 %7862, %v5129_v57   ;;  %v5201_v63 = vpop.permute.xlu0 %5200  ;;  %v5198_v0 = vpop.permute.xlu1 %5197  ;;  %v14227_v57 = vld [vmem:[#allocation105_spill] sm:$0xff] }
 0x982   : > { %v5299_v24 = vrot.slane %v5201_v63, %v9468_v21  ;;  %v5488_v6 = vmul.f32 %v5201_v63, %v14146_v38  ;;  %v5295_v44 = vrot.slane %v5198_v0, %v9458_v48  ;;  %v5487_v2 = vmul.f32 %v5198_v0, %v14144_v41  ;;  %v14228_v0 = vld [vmem:[#allocation47_spill] sm:$0xff] }
 0x983   : > { %v2437_v63 = vmul.f32 %v14227_v57, %v14226_v42  ;;  %v2438_v46 = vmul.f32 %v14229_v11, %v14228_v0  ;;  %v6650_v57 = vmul.f32 %v8215_v5, %v14231_v59  ;;  %v8217_v11 = vpop.eup %8216  ;;  %v14235_v59 = vld [vmem:[#allocation96_spill] sm:$0xff] }
 0x984   : > { %v5521_v29 = vsel %vm5519_vm11, %v5488_v6, 0.0  ;;  %v5300_v30 = vsel %vm1317_vm2, %v5299_v24, %v5295_v44  ;;  %v5520_v36 = vsel %vm5519_vm11, %v5487_v2, 0.0  ;;  %v12353_v24 = vsel %vm1454_vm3, %v2529_v10, %v2520_v26  ;;  %v14230_v44 = vld [vmem:[#allocation146_spill] sm:$0xff] }
 0x985   : > { %v5522_v51 = vadd.f32 %v5521_v29, %v5520_v36  ;;  %5266 = vperm.xlu1 %7863, %v5151_v23   ;;  %5263 = vperm.xlu0 %7862, %v5150_v58   ;;  %v5204_v1 = vpop.permute.xlu1 %5203  ;;  %v6651_v2 = vmul.f32 %v8215_v5, %v14230_v44  ;;  %v2561_v58 = vadd.f32 %v2560_v55, %v2559_v32  ;;  %v2569_v29 = vrot.slane %v2568_v19, 4 }
 0x986   : > { %v5489_v17 = vmul.f32 %v5204_v1, %v14148_v56  ;;  %v2575_v50 = vsel %vm2439_vm10, %v2437_v63, 0.0  ;;  %v2576_v39 = vsel %vm2439_vm10, %v2438_v46, 0.0  ;;  %v3964_v26 = vmul.f32 %v11664_v31, %v14146_v38  ;;  %v14232_v46 = vld [vmem:[#allocation32_spill] sm:$0xff]  ;;  %v14233_v31 = vld [vmem:[#allocation133_spill] sm:$0xff]  ;;  %v8219_v63 = vpop.eup %8218 }
 0x987   : > { %v5523_v6 = vrot.slane %v5522_v51, 4  ;;  %v5304_v45 = vrot.slane %v5204_v1, %v9458_v48  ;;  %v5063_v5 = vrot.slane %v12158_v9, %v14080_v49  ;;  %v6672_v36 = vmul.f32 %v8217_v11, %v14232_v46  ;;  %v8221_v23 = vpop.eup %8220 }
 0x988   : > { %v5529_v33 = vsel %vm5519_vm11, %v5489_v17, 0.0  ;;  %v4006_v17 = vsel %vm3995_vm12, %v3966_v54, 0.0 }
 0x989   : > { %v5524_v10 = vadd.f32 %v5523_v6, %v5522_v51  ;;  %6742 = vperm.xlu1 %7863, %v6651_v2   ;;  %6739 = vperm.xlu0 %7862, %v6650_v57   ;;  %v5207_v4 = vpop.permute.xlu1 %5206  ;;  %v6671_v51 = vmul.f32 %v8217_v11, %v14233_v31  ;;  %v14234_v6 = vld [vmem:[#allocation60_spill] sm:$0xff]  ;;  %v3965_v57 = vmul.f32 %v14235_v59, %v14148_v56  ;;  %v2553_v11 = vrot.slane %v2552_v35, 2  ;;  %v14240_v56 = vld [vmem:[#allocation33_spill] sm:$0xff] }
 0x98a   : > { %v5308_v32 = vrot.slane %v5207_v4, %v9468_v21  ;;  %v5490_v55 = vmul.f32 %v5207_v4, %v14150_v13  ;;  %v3963_v44 = vmul.f32 %v14234_v6, %v14144_v41  ;;  %v2562_v31 = vrot.slane %v2561_v58, 2 }
 0x98b   : > { %v5525_v4 = vrot.slane %v5524_v10, 2  ;;  %v3997_v6 = vsel %vm3995_vm12, %v3964_v26, 0.0  ;;  %8226 = vrcp.f32 %v5063_v5  ;;  %v2570_v13 = vadd.f32 %v2569_v29, %v2568_v19  ;;  %v14239_v26 = vld [vmem:[#allocation144_spill] sm:$0xff] }
 0x98c   : > { %v5309_v1 = vsel %vm1317_vm2, %v5308_v32, %v5304_v45  ;;  %v5530_v2 = vsel %vm5519_vm11, %v5490_v55, 0.0  ;;  %v5091_v45 = vrot.slane %v12186_v28, %v14071_v8  ;;  %v14237_v55 = vld [vmem:[#allocation56_spill] sm:$0xff]  ;;  %v6583_v29 = vrot.slane %v12200_v12, %v14071_v8 }
 0x98d   : > { %v12380_v43 = vsel %vm1454_vm3, %v5309_v1, %v5300_v30  ;;  %v5531_v46 = vadd.f32 %v5530_v2, %v5529_v33  ;;  %6784 = vperm.xlu1 %7863, %v6672_v36   ;;  %6781 = vperm.xlu0 %7862, %v6671_v51   ;;  %v5133_v59 = vmul.f32 %v8219_v63, %v14237_v55  ;;  %v3996_v33 = vsel %vm3995_vm12, %v3963_v44, 0.0  ;;  %v14238_v36 = vld [vmem:[#allocation143_spill] sm:$0xff]  ;;  %v8223_v44 = vpop.eup %8222 }
 0x98e   : > { %14236 = vst [vmem:[#allocation12_spill] sm:$0xff] %v12380_v43  ;;  %v2577_v30 = vadd.f32 %v2576_v39, %v2575_v50  ;;  %v5132_v51 = vmul.f32 %v8219_v63, %v14238_v36  ;;  %v4005_v1 = vsel %vm3995_vm12, %v3965_v57, 0.0  ;;  %v3968_v2 = vmul.f32 %v14239_v26, %v14154_v37  ;;  %v14241_v39 = vld [vmem:[#allocation36_spill] sm:$0xff]  ;;  %v14244_v26 = vld [vmem:[#allocation135_spill] sm:$0xff]  ;;  %v14261_v36 = vld [vmem:[#allocation93_spill] sm:$0xff] }
 0x98f   : > { %v5532_v32 = vrot.slane %v5531_v46, 4  ;;  %v5526_v54 = vadd.f32 %v5525_v4, %v5524_v10  ;;  %v12392_v43 = vadd.f32 %v2553_v11, %v2552_v35  ;;  %v3967_v55 = vmul.f32 %v14240_v56, %v14152_v20  ;;  %v14242_v4 = vld [vmem:[#allocation129_spill] sm:$0xff] }
 0x990   : > { %v3998_v38 = vadd.f32 %v3997_v6, %v3996_v33  ;;  %v4007_v19 = vadd.f32 %v4006_v17, %v4005_v1  ;;  %8228 = vrcp.f32 %v5091_v45  ;;  %v5154_v63 = vmul.f32 %v8221_v23, %v14241_v39  ;;  %v8225_v33 = vpop.eup %8224 }
 0x991   : > { %v5533_v5 = vadd.f32 %v5532_v32, %v5531_v46  ;;  %5230 = vperm.xlu1 %7863, %v5133_v59   ;;  %5227 = vperm.xlu0 %7862, %v5132_v51   ;;  %v12399_v57 = vadd.f32 %v2562_v31, %v2561_v58  ;;  %v2571_v10 = vrot.slane %v2570_v13, 2  ;;  %v5153_v35 = vmul.f32 %v8221_v23, %v14242_v4  ;;  %v14247_v4 = vld [vmem:[#allocation138_spill] sm:$0xff] }
 0x992   : > { %v12405_v56 = vsel %vm1456_vm4, %v12348_v62, %v12353_v24  ;;  %v2578_v46 = vrot.slane %v2577_v30, 4  ;;  %v4015_v11 = vsel %vm3995_vm12, %v3968_v2, 0.0  ;;  %v5527_v6 = vrot.slane %v5526_v54, 1  ;;  %v14243_v62 = vld [vmem:[#allocation23_spill] sm:$0xff] }
 0x993   : > { %v5534_v50 = vrot.slane %v5533_v5, 2  ;;  %v4014_v32 = vsel %vm3995_vm12, %v3967_v55, 0.0  ;;  %v3999_v58 = vrot.slane %v3998_v38, 4  ;;  %v4008_v31 = vrot.slane %v4007_v19, 4  ;;  %v14245_v55 = vld [vmem:[#allocation49_spill] sm:$0xff] }
 0x994   : > { %8230 = vrcp.f32 %v6583_v29  ;;  %v6611_v23 = vrot.slane %v12246_v25, %v14197_v52  ;;  %v6654_v24 = vmul.f32 %v8223_v44, %v14243_v62  ;;  %v12414_v51 = vadd.f32 %v2571_v10, %v2570_v13  ;;  %v14246_v52 = vld [vmem:[#allocation136_spill] sm:$0xff]  ;;  %v14248_v10 = vld [vmem:[#allocation77_spill] sm:$0xff] }
 0x995   : > { %v5535_v17 = vadd.f32 %v5534_v50, %v5533_v5  ;;  %5272 = vperm.xlu1 %7863, %v5154_v63   ;;  %5269 = vperm.xlu0 %7862, %v5153_v35   ;;  %v4016_v1 = vadd.f32 %v4015_v11, %v4014_v32  ;;  %v6653_v2 = vmul.f32 %v8223_v44, %v14244_v26  ;;  %v14252_v32 = vld [vmem:[#allocation112_spill] sm:$0xff] }
 0x996   : > { %v12417_v5 = vadd.f32 %v2578_v46, %v2577_v30  ;;  %v3969_v50 = vmul.f32 %v14245_v55, %v14156_v22  ;;  %v5528_v29 = vadd.f32 %v5527_v6, %v5526_v54  ;;  %v3971_v63 = vmul.f32 %v14246_v52, %v14160_v27  ;;  %v14250_v46 = vld [vmem:[#allocation44_spill] sm:$0xff]  ;;  %v14251_v6 = vld [vmem:[#allocation142_spill] sm:$0xff]  ;;  %v14268_v27 = vld [vmem:[#allocation73_spill] sm:$0xff] }
 0x997   : > { %v5536_v59 = vrot.slane %v5535_v17, 1  ;;  %v3973_v35 = vmul.f32 %v14247_v4, %v14164_v34  ;;  %v4000_v62 = vadd.f32 %v3999_v58, %v3998_v38  ;;  %v4009_v13 = vadd.f32 %v4008_v31, %v4007_v19  ;;  %v14253_v38 = vld [vmem:[#allocation107_spill] sm:$0xff]  ;;  %v14263_v58 = vld [vmem:[#allocation72_spill] sm:$0xff] }
 0x998   : > { %v5067_v44 = vrot.slane %v12158_v9, %v14248_v10  ;;  %8232 = vrcp.f32 %v6611_v23  ;;  %v6675_v54 = vmul.f32 %v8225_v33, %v14250_v46  ;;  %v8227_v11 = vpop.eup %8226  ;;  %v6674_v19 = vmul.f32 %v8225_v33, %v14253_v38  ;;  %v14254_v9 = vld [vmem:[#allocation148_spill] sm:$0xff]  ;;  %v14256_v46 = vld [vmem:[#allocation95_spill] sm:$0xff] }
 0x999   : > { %v5537_v39 = vadd.f32 %v5536_v59, %v5535_v17  ;;  %6748 = vperm.xlu1 %7863, %v6654_v24   ;;  %6745 = vperm.xlu0 %7862, %v6653_v2   ;;  %v3975_v17 = vmul.f32 %v14251_v6, %v14168_v60  ;;  %v3977_v59 = vmul.f32 %v14252_v32, %v14173_v3  ;;  %v4017_v24 = vrot.slane %v4016_v1, 4  ;;  %v14255_v23 = vld [vmem:[#allocation48_spill] sm:$0xff]  ;;  %v14257_v38 = vld [vmem:[#allocation111_spill] sm:$0xff]  ;;  %v14260_v2 = vld [vmem:[#allocation17_spill] sm:$0xff] }
 0x99a   : > { %v3979_v31 = vmul.f32 %v14254_v9, %v14177_v14  ;;  %v3970_v26 = vmul.f32 %v14255_v23, %v14158_v47  ;;  %v4023_v55 = vsel %vm3995_vm12, %v3969_v50, 0.0  ;;  %v4001_v33 = vrot.slane %v4000_v62, 2 }
 0x99b   : > { %v12428_v30 = vsel %vm1454_vm3, %v5537_v39, %v5528_v29  ;;  %v12444_v29 = vsel %vm3995_vm12, %v3971_v63, 0.0  ;;  %v12447_v39 = vsel %vm3995_vm12, %v3973_v35, 0.0  ;;  %v4010_v52 = vrot.slane %v4009_v13, 2 }
 0x99c   : > { %14249 = vst [vmem:[#allocation68_spill] sm:$0xff] %v12428_v30  ;;  %8234 = vrcp.f32 %v5067_v44  ;;  %v5095_v4 = vrot.slane %v12186_v28, %v14080_v49  ;;  %v5136_v6 = vmul.f32 %v8227_v11, %v14256_v46  ;;  %v12453_v32 = vsel %vm3995_vm12, %v3975_v17, 0.0  ;;  %v14259_v44 = vld [vmem:[#allocation53_spill] sm:$0xff]  ;;  %v14262_v17 = vld [vmem:[#allocation22_spill] sm:$0xff] }
 0x99d   : > { %6790 = vperm.xlu1 %7863, %v6675_v54   ;;  %6787 = vperm.xlu0 %7862, %v6674_v19   ;;  %v8229_v54 = vpop.eup %8228  ;;  %v12456_v50 = vsel %vm3995_vm12, %v3977_v59, 0.0  ;;  %v4018_v63 = vadd.f32 %v4017_v24, %v4016_v1  ;;  %v5135_v35 = vmul.f32 %v8227_v11, %v14257_v38  ;;  %v12460_v9 = vsel %vm3995_vm12, %v3979_v31, 0.0  ;;  %v14258_v19 = vld [vmem:[#allocation13_spill] sm:$0xff]  ;;  %v14265_v11 = vld [vmem:[#allocation110_spill] sm:$0xff] }
 0x99e   : > { %v3981_v23 = vmul.f32 %v14259_v44, %v14258_v19  ;;  %v3983_v45 = vmul.f32 %v14261_v36, %v14260_v2  ;;  %v4024_v46 = vsel %vm3995_vm12, %v3970_v26, 0.0  ;;  %v3985_v3 = vmul.f32 %v14263_v58, %v14262_v17  ;;  %v14264_v59 = vld [vmem:[#allocation9_spill] sm:$0xff]  ;;  %v14266_v36 = vld [vmem:[#allocation76_spill] sm:$0xff]  ;;  %v14280_v30 = vld [vmem:[#allocation10_spill] sm:$0xff] }
 0x99f   : > { %v3987_v1 = vmul.f32 %v14264_v59, %v14204_v16  ;;  %v3989_v24 = vmul.f32 %v14265_v11, %v14208_v61  ;;  %v4002_v31 = vadd.f32 %v4001_v33, %v4000_v62  ;;  %v4011_v38 = vadd.f32 %v4010_v52, %v4009_v13  ;;  %v14269_v13 = vld [vmem:[#allocation154_spill] sm:$0xff]  ;;  %v14277_v61 = vld [vmem:[#allocation151_spill] sm:$0xff]  ;;  %v14281_v2 = vld [vmem:[#allocation109_spill] sm:$0xff] }
 0x9a0   : > { %8236 = vrcp.f32 %v5095_v4  ;;  %v6587_v44 = vrot.slane %v12200_v12, %v14080_v49  ;;  %v5157_v60 = vmul.f32 %v8229_v54, %v14266_v36  ;;  %v4019_v58 = vrot.slane %v4018_v63, 2  ;;  %v14270_v52 = vld [vmem:[#allocation30_spill] sm:$0xff] }
 0x9a1   : > { %5236 = vperm.xlu1 %7863, %v5136_v6   ;;  %5233 = vperm.xlu0 %7862, %v5135_v35   ;;  %v8231_v26 = vpop.eup %8230  ;;  %v14267_v6 = vld [vmem:[#allocation116_spill] sm:$0xff]  ;;  %v4025_v17 = vadd.f32 %v4024_v46, %v4023_v55  ;;  %v5156_v59 = vmul.f32 %v8229_v54, %v14268_v27  ;;  %v12480_v16 = vsel %vm3995_vm12, %v3981_v23, 0.0  ;;  %v12483_v62 = vsel %vm3995_vm12, %v3983_v45, 0.0  ;;  %v14271_v4 = vld [vmem:[#allocation26_spill] sm:$0xff] }
 0x9a2   : > { %v3991_v34 = vmul.f32 %v14267_v6, %v14216_v7  ;;  %v3993_v33 = vmul.f32 %v14269_v13, %v14226_v42  ;;  %v3972_v35 = vmul.f32 %v14271_v4, %v14270_v52  ;;  %v12490_v11 = vsel %vm3995_vm12, %v3985_v3, 0.0  ;;  %v14272_v46 = vld [vmem:[#allocation100_spill] sm:$0xff]  ;;  %v14273_v13 = vld [vmem:[#allocation118_spill] sm:$0xff] }
 0x9a3   : > { %v12493_v55 = vsel %vm3995_vm12, %v3987_v1, 0.0  ;;  %v12496_v27 = vsel %vm3995_vm12, %v3989_v24, 0.0  ;;  %v4003_v54 = vrot.slane %v4002_v31, 1  ;;  %v4012_v45 = vrot.slane %v4011_v38, 1  ;;  %v14275_v42 = vld [vmem:[#allocation150_spill] sm:$0xff] }
 0x9a4   : > { %8238 = vrcp.f32 %v6587_v44  ;;  %v6615_v23 = vrot.slane %v12246_v25, %v14071_v8  ;;  %v6657_v36 = vmul.f32 %v8231_v26, %v14272_v46  ;;  %v12504_v3 = vadd.f32 %v4019_v58, %v4018_v63  ;;  %v14274_v44 = vld [vmem:[#allocation38_spill] sm:$0xff]  ;;  %v14279_v63 = vld [vmem:[#allocation104_spill] sm:$0xff] }
 0x9a5   : > { %5278 = vperm.xlu1 %7863, %v5157_v60   ;;  %5275 = vperm.xlu0 %7862, %v5156_v59   ;;  %v8233_v6 = vpop.eup %8232  ;;  %v12502_v60 = vsel %vm3995_vm12, %v3991_v34, 0.0  ;;  %v4026_v1 = vrot.slane %v4025_v17, 4  ;;  %v6656_v4 = vmul.f32 %v8231_v26, %v14273_v13  ;;  %v12508_v24 = vsel %vm3995_vm12, %v3993_v33, 0.0  ;;  %v14276_v8 = vld [vmem:[#allocation46_spill] sm:$0xff]  ;;  %v14278_v34 = vld [vmem:[#allocation55_spill] sm:$0xff] }
 0x9a6   : > { %v4033_v59 = vsel %vm3995_vm12, %v3972_v35, 0.0  ;;  %v3974_v7 = vmul.f32 %v14275_v42, %v14274_v44  ;;  %v3976_v46 = vmul.f32 %v14277_v61, %v14276_v8  ;;  %v12515_v52 = vadd.f32 %v4003_v54, %v4002_v31  ;;  %v14282_v13 = vld [vmem:[#allocation15_spill] sm:$0xff]  ;;  %v14294_v54 = vld [vmem:[#allocation145_spill] sm:$0xff] }
 0x9a7   : > { %v3978_v58 = vmul.f32 %v14279_v63, %v14278_v34  ;;  %v3982_v26 = vmul.f32 %v14281_v2, %v14280_v30  ;;  %v14283_v33 = vld [vmem:[#allocation103_spill] sm:$0xff]  ;;  %v12523_v35 = vadd.f32 %v4012_v45, %v4011_v38  ;;  %v5099_v42 = vrot.slane %v12186_v28, %v14248_v10  ;;  %v14285_v2 = vld [vmem:[#allocation121_spill] sm:$0xff] }
 0x9a8   : > { %v3984_v47 = vmul.f32 %v14283_v33, %v14282_v13  ;;  %8240 = vrcp.f32 %v6615_v23  ;;  %v14284_v61 = vld [vmem:[#allocation63_spill] sm:$0xff]  ;;  %v12529_v8 = vadd.f32 %v4026_v1, %v4025_v17  ;;  %v4034_v63 = vadd.f32 %v4033_v59, %v12444_v29  ;;  %v14286_v45 = vld [vmem:[#allocation61_spill] sm:$0xff]  ;;  %v14289_v23 = vld [vmem:[#allocation126_spill] sm:$0xff] }
 0x9a9   : > { %6754 = vperm.xlu1 %7863, %v6657_v36   ;;  %6751 = vperm.xlu0 %7862, %v6656_v4   ;;  %v6678_v36 = vmul.f32 %v8233_v6, %v14284_v61  ;;  %v8235_v31 = vpop.eup %8234  ;;  %v6677_v34 = vmul.f32 %v8233_v6, %v14285_v2  ;;  %v4042_v33 = vsel %vm3995_vm12, %v3974_v7, 0.0  ;;  %v4051_v38 = vsel %vm3995_vm12, %v3976_v46, 0.0  ;;  %v14287_v4 = vld [vmem:[#allocation80_spill] sm:$0xff]  ;;  %v14288_v28 = vld [vmem:[#allocation19_spill] sm:$0xff]  ;;  %v14291_v7 = vld [vmem:[#allocation54_spill] sm:$0xff] }
 0x9aa   : > { %v3980_v44 = vmul.f32 %v14287_v4, %v14286_v45  ;;  %v3986_v13 = vmul.f32 %v14289_v23, %v14288_v28  ;;  %v4060_v61 = vsel %vm3995_vm12, %v3978_v58, 0.0  ;;  %v4078_v17 = vsel %vm3995_vm12, %v3982_v26, 0.0  ;;  %v14290_v29 = vld [vmem:[#allocation79_spill] sm:$0xff]  ;;  %v14292_v2 = vld [vmem:[#allocation98_spill] sm:$0xff]  ;;  %v14293_v26 = vld [vmem:[#allocation152_spill] sm:$0xff] }
 0x9ab   : > { %v4087_v1 = vsel %vm3995_vm12, %v3984_v47, 0.0  ;;  %v3988_v6 = vmul.f32 %v14290_v29, %v14206_v53  ;;  %v3990_v59 = vmul.f32 %v14291_v7, %v14210_v15  ;;  %8242 = vrcp.f32 %v5099_v42  ;;  %v14295_v7 = vld [vmem:[#allocation156_spill] sm:$0xff] }
 0x9ac   : > { %v6591_v46 = vrot.slane %v12200_v12, %v14248_v10  ;;  %v5139_v4 = vmul.f32 %v8235_v31, %v14292_v2  ;;  %v4035_v23 = vrot.slane %v4034_v63, 4  ;;  %v4043_v58 = vadd.f32 %v4042_v33, %v12447_v39 }
 0x9ad   : > { %6796 = vperm.xlu1 %7863, %v6678_v36   ;;  %6793 = vperm.xlu0 %7862, %v6677_v34   ;;  %v8237_v36 = vpop.eup %8236  ;;  %v3992_v47 = vmul.f32 %v14293_v26, %v14218_v40  ;;  %v5138_v28 = vmul.f32 %v8235_v31, %v14294_v54  ;;  %v4052_v34 = vadd.f32 %v4051_v38, %v12453_v32  ;;  %v4069_v29 = vsel %vm3995_vm12, %v3980_v44, 0.0  ;;  %v14296_v44 = vld [vmem:[#allocation8_spill] sm:$0xff] }
 0x9ae   : > { %v4096_v42 = vsel %vm3995_vm12, %v3986_v13, 0.0  ;;  %v3994_v12 = vmul.f32 %v14295_v7, %v14228_v0  ;;  %v4061_v2 = vadd.f32 %v4060_v61, %v12456_v50  ;;  %v4079_v15 = vadd.f32 %v4078_v17, %v12480_v16  ;;  %v14297_v61 = vld [vmem:[#allocation113_spill] sm:$0xff]  ;;  %v14299_v7 = vld [vmem:[#allocation82_spill] sm:$0xff] }
 0x9af   : > { %v4088_v39 = vadd.f32 %v4087_v1, %v12483_v62  ;;  %v4105_v33 = vsel %vm3995_vm12, %v3988_v6, 0.0  ;;  %v4114_v31 = vsel %vm3995_vm12, %v3990_v59, 0.0  ;;  %8244 = vrcp.f32 %v6591_v46 }
 0x9b0   : > { %v6619_v32 = vrot.slane %v12246_v25, %v14080_v49  ;;  %v5160_v13 = vmul.f32 %v8237_v36, %v14296_v44  ;;  %v4070_v38 = vadd.f32 %v4069_v29, %v12460_v9  ;;  %v4097_v50 = vadd.f32 %v4096_v42, %v12490_v11 }
 0x9b1   : > { %5242 = vperm.xlu1 %7863, %v5139_v4   ;;  %5239 = vperm.xlu0 %7862, %v5138_v28   ;;  %v8239_v54 = vpop.eup %8238  ;;  %v4123_v16 = vsel %vm3995_vm12, %v3992_v47, 0.0  ;;  %v5159_v62 = vmul.f32 %v8237_v36, %v14297_v61  ;;  %v4044_v17 = vrot.slane %v4043_v58, 4  ;;  %v4053_v1 = vrot.slane %v4052_v34, 4  ;;  %v14298_v36 = vld [vmem:[#allocation114_spill] sm:$0xff]  ;;  %v14300_v61 = vld [vmem:[#allocation45_spill] sm:$0xff] }
 0x9b2   : > { %v4106_v28 = vadd.f32 %v4105_v33, %v12493_v55  ;;  %v4132_v6 = vsel %vm3995_vm12, %v3994_v12, 0.0  ;;  %v4062_v59 = vrot.slane %v4061_v2, 4  ;;  %v4080_v49 = vrot.slane %v4079_v15, 4 }
 0x9b3   : > { %v4089_v46 = vrot.slane %v4088_v39, 4  ;;  %v4115_v4 = vadd.f32 %v4114_v31, %v12496_v27  ;;  %v4124_v9 = vadd.f32 %v4123_v16, %v12502_v60  ;;  %v6623_v11 = vrot.slane %v12246_v25, %v14248_v10 }
 0x9b4   : > { %8246 = vrcp.f32 %v6619_v32  ;;  %v6660_v26 = vmul.f32 %v8239_v54, %v14298_v36  ;;  %v4071_v29 = vrot.slane %v4070_v38, 4  ;;  %v4098_v55 = vrot.slane %v4097_v50, 4 }
 0x9b5   : > { %5284 = vperm.xlu1 %7863, %v5160_v13   ;;  %5281 = vperm.xlu0 %7862, %v5159_v62   ;;  %v8241_v47 = vpop.eup %8240  ;;  %v4133_v42 = vadd.f32 %v4132_v6, %v12508_v24  ;;  %v6659_v12 = vmul.f32 %v8239_v54, %v14299_v7  ;;  %v4028_v33 = vrot.slane %v12529_v8, 2  ;;  %v4036_v44 = vadd.f32 %v4035_v23, %v4034_v63  ;;  %v14301_v7 = vld [vmem:[#allocation123_spill] sm:$0xff] }
 0x9b6   : > { %v4045_v27 = vadd.f32 %v4044_v17, %v4043_v58  ;;  %v4107_v31 = vrot.slane %v4106_v28, 4  ;;  %v4054_v60 = vadd.f32 %v4053_v1, %v4052_v34  ;;  %v4063_v13 = vadd.f32 %v4062_v59, %v4061_v2  ;;  %v14302_v59 = vld [vmem:[#allocation149_spill] sm:$0xff] }
 0x9b7   : > { %v4081_v16 = vadd.f32 %v4080_v49, %v4079_v15  ;;  %v4116_v25 = vrot.slane %v4115_v4, 4  ;;  %v4090_v10 = vadd.f32 %v4089_v46, %v4088_v39  ;;  %v4125_v32 = vrot.slane %v4124_v9, 4 }
 0x9b8   : > { %8248 = vrcp.f32 %v6623_v11  ;;  %v6681_v62 = vmul.f32 %v8241_v47, %v14300_v61  ;;  %v8243_v36 = vpop.eup %8242  ;;  %v4072_v24 = vadd.f32 %v4071_v29, %v4070_v38  ;;  %v4099_v6 = vadd.f32 %v4098_v55, %v4097_v50 }
 0x9b9   : > { %6760 = vperm.xlu1 %7863, %v6660_v26   ;;  %6757 = vperm.xlu0 %7862, %v6659_v12   ;;  %v4134_v54 = vrot.slane %v4133_v42, 4  ;;  %v6680_v0 = vmul.f32 %v8241_v47, %v14301_v7  ;;  %v4029_v63 = vadd.f32 %v4028_v33, %v12529_v8  ;;  %v4037_v23 = vrot.slane %v4036_v44, 2 }
 0x9ba   : > { %v4108_v58 = vadd.f32 %v4107_v31, %v4106_v28  ;;  %v7240_v15 = vsel %vm1454_vm3, %v12523_v35, %v12515_v52  ;;  %v4046_v34 = vrot.slane %v4045_v27, 2  ;;  %v4055_v2 = vrot.slane %v4054_v60, 2  ;;  %v14303_v28 = vld [vmem:[#allocation130_spill] sm:$0xff] }
 0x9bb   : > { %v4082_v39 = vrot.slane %v4081_v16, 2  ;;  %v4117_v17 = vadd.f32 %v4116_v25, %v4115_v4  ;;  %v4064_v1 = vrot.slane %v4063_v13, 2  ;;  %v4091_v38 = vrot.slane %v4090_v10, 2 }
 0x9bc   : > { %v4126_v50 = vadd.f32 %v4125_v32, %v4124_v9  ;;  %v5163_v49 = vmul.f32 %v8243_v36, %v14302_v59  ;;  %v8245_v46 = vpop.eup %8244  ;;  %v4073_v11 = vrot.slane %v4072_v24, 2  ;;  %v4100_v8 = vrot.slane %v4099_v6, 2  ;;  %v14305_v32 = vld [vmem:[#allocation155_spill] sm:$0xff]  ;;  %v14306_v59 = vld [vmem:[#allocation153_spill] sm:$0xff] }
 0x9bd   : > { %6802 = vperm.xlu1 %7863, %v6681_v62   ;;  %6799 = vperm.xlu0 %7862, %v6680_v0   ;;  %v4135_v26 = vadd.f32 %v4134_v54, %v4133_v42  ;;  %v5162_v47 = vmul.f32 %v8243_v36, %v14303_v28  ;;  %v14304_v29 = vrot.slane %v12504_v3, 1  ;;  %v4030_v35 = vrot.slane %v4029_v63, 1 }
 0x9be   : > { %v4038_v55 = vadd.f32 %v4037_v23, %v4036_v44  ;;  %v4109_v12 = vrot.slane %v4108_v58, 2  ;;  %v4047_v0 = vadd.f32 %v4046_v34, %v4045_v27  ;;  %v4056_v4 = vadd.f32 %v4055_v2, %v4054_v60 }
 0x9bf   : > { %v4022_v52 = vadd.f32 %v14304_v29, %v12504_v3  ;;  %v4083_v33 = vadd.f32 %v4082_v39, %v4081_v16  ;;  %v4118_v9 = vrot.slane %v4117_v17, 2  ;;  %v4092_v31 = vadd.f32 %v4091_v38, %v4090_v10 }
 0x9c0   : > { %v4127_v25 = vrot.slane %v4126_v50, 2  ;;  %v6663_v61 = vmul.f32 %v8245_v46, %v14305_v32  ;;  %v4065_v42 = vadd.f32 %v4064_v1, %v4063_v13  ;;  %v4074_v36 = vadd.f32 %v4073_v11, %v4072_v24  ;;  %v14307_v13 = vld [vmem:[#allocation158_spill] sm:$0xff] }
 0x9c1   : > { %5290 = vperm.xlu1 %7863, %v5163_v49   ;;  %5287 = vperm.xlu0 %7862, %v5162_v47   ;;  %v8247_v62 = vpop.eup %8246  ;;  %v4101_v54 = vadd.f32 %v4100_v8, %v4099_v6  ;;  %v4136_v7 = vrot.slane %v4135_v26, 2  ;;  %v6662_v3 = vmul.f32 %v8245_v46, %v14306_v59  ;;  %v4031_v28 = vadd.f32 %v4030_v35, %v4029_v63  ;;  %v14308_v46 = vld [vmem:[#allocation157_spill] sm:$0xff] }
 0x9c2   : > { %v4039_v44 = vrot.slane %v4038_v55, 1  ;;  %v4110_v23 = vadd.f32 %v4109_v12, %v4108_v58  ;;  %v7241_v27 = vsel %vm1456_vm4, %v4022_v52, %v7240_v15  ;;  %v4048_v60 = vrot.slane %v4047_v0, 1 }
 0x9c3   : > { %v4084_v16 = vrot.slane %v4083_v33, 1  ;;  %v4119_v34 = vadd.f32 %v4118_v9, %v4117_v17  ;;  %v4057_v10 = vrot.slane %v4056_v4, 1  ;;  %v4093_v2 = vrot.slane %v4092_v31, 1  ;;  %v14310_v9 = vld [vmem:[#allocation160_spill] sm:$0xff] }
 0x9c4   : > { %v4128_v39 = vadd.f32 %v4127_v25, %v4126_v50  ;;  %v6684_v1 = vmul.f32 %v8247_v62, %v14307_v13  ;;  %v4066_v24 = vrot.slane %v4065_v42, 1  ;;  %v4075_v38 = vrot.slane %v4074_v36, 1 }
 0x9c5   : > { %6766 = vperm.xlu1 %7863, %v6663_v61   ;;  %6763 = vperm.xlu0 %7862, %v6662_v3   ;;  %v8249_v6 = vpop.eup %8248  ;;  %v4102_v49 = vrot.slane %v4101_v54, 1  ;;  %v6683_v63 = vmul.f32 %v8247_v62, %v14308_v46  ;;  %v4137_v11 = vadd.f32 %v4136_v7, %v4135_v26  ;;  %v4040_v58 = vadd.f32 %v4039_v44, %v4038_v55  ;;  %v14311_v62 = vld [vmem:[#allocation159_spill] sm:$0xff] }
 0x9c6   : > { %v4111_v8 = vrot.slane %v4110_v23, 1  ;;  %v7242_v15 = vsel %vm1458_vm5, %v4031_v28, %v7241_v27  ;;  %v14309_v17 = vrot.slane %v12417_v5, 2  ;;  %v4085_v29 = vadd.f32 %v4084_v16, %v4083_v33  ;;  %v12616_v16 = vpop.permute.xlu1 %5212 }
 0x9c7   : > { %v4120_v50 = vrot.slane %v4119_v34, 1  ;;  %v4049_v52 = vadd.f32 %v4048_v60, %v4047_v0  ;;  %v4058_v35 = vadd.f32 %v4057_v10, %v4056_v4  ;;  %v4094_v12 = vadd.f32 %v4093_v2, %v4092_v31 }
 0x9c8   : > { %v2581_v47 = vadd.f32 %v14309_v17, %v12417_v5  ;;  %v6687_v25 = vmul.f32 %v8249_v6, %v14310_v9  ;;  %v4067_v32 = vadd.f32 %v4066_v24, %v4065_v42  ;;  %v4129_v61 = vrot.slane %v4128_v39, 1  ;;  %v14317_v24 = vld [vmem:[#allocation86_spill] sm:$0xff] }
 0x9c9   : > { %6808 = vperm.xlu1 %7863, %v6684_v1   ;;  %6805 = vperm.xlu0 %7862, %v6683_v63   ;;  %v4076_v26 = vadd.f32 %v4075_v38, %v4074_v36  ;;  %v4103_v55 = vadd.f32 %v4102_v49, %v4101_v54  ;;  %v6686_v7 = vmul.f32 %v8249_v6, %v14311_v62  ;;  %v4138_v59 = vrot.slane %v4137_v11, 1  ;;  %v5210_v1 = vpop.permute.xlu0 %5209 }
 0x9ca   : > { %v14312_v3 = vrot.slane %v12329_v18, 1  ;;  %v4112_v5 = vadd.f32 %v4111_v8, %v4110_v23  ;;  %v7243_v33 = vsel %vm1460_vm6, %v4040_v58, %v7242_v15  ;;  %v2582_v0 = vrot.slane %v2581_v47, 1 }
 0x9cb   : > { %v14313_v4 = vrot.slane %v12392_v43, 1  ;;  %v7244_v42 = vsel %vm1462_vm7, %v4049_v52, %v7243_v33  ;;  %v4121_v36 = vadd.f32 %v4120_v50, %v4119_v34  ;;  %v7247_v54 = vsel %vm1454_vm3, %v4085_v29, %v4076_v26 }
 0x9cc   : > { %v2547_v28 = vadd.f32 %v14312_v3, %v12329_v18  ;;  %v7245_v44 = vsel %vm1464_vm8, %v4058_v35, %v7244_v42  ;;  %v4130_v27 = vadd.f32 %v4129_v61, %v4128_v39  ;;  %v7248_v18 = vsel %vm1456_vm4, %v4094_v12, %v7247_v54  ;;  %v14316_v39 = vld [vmem:[#allocation64_spill] sm:$0xff] }
 0x9cd   : > { %6814 = vperm.xlu1 %7863, %v6687_v25   ;;  %v2556_v31 = vadd.f32 %v14313_v4, %v12392_v43  ;;  %6811 = vperm.xlu0 %7862, %v6686_v7   ;;  %v14314_v23 = vrot.slane %v12399_v57, 1  ;;  %v7246_v10 = vsel %vm1466_vm9, %v4067_v32, %v7245_v44  ;;  %v4139_v43 = vadd.f32 %v4138_v59, %v4137_v11 }
 0x9ce   : > { %v7249_v2 = vsel %vm1458_vm5, %v4103_v55, %v7248_v18  ;;  %v14315_v34 = vrot.slane %v12414_v51, 1  ;;  %v7210_v6 = vsel %vm1466_vm9, %v14317_v24, %v14316_v39  ;;  %v2583_v38 = vadd.f32 %v2582_v0, %v2581_v47 }
 0x9cf   : > { %v2565_v60 = vadd.f32 %v14314_v23, %v12399_v57  ;;  %v7250_v57 = vsel %vm1460_vm6, %v4112_v5, %v7249_v2  ;;  %v7213_v49 = vsel %vm1458_vm5, %v2547_v28, %v12405_v56  ;;  %v5491_v8 = vmul.f32 %v5210_v1, %v14152_v20 }
 0x9d0   : > { %v2574_v13 = vadd.f32 %v14315_v34, %v12414_v51  ;;  %v7251_v46 = vsel %vm1462_vm7, %v4121_v36, %v7250_v57  ;;  %v7214_v63 = vsel %vm1460_vm6, %v2556_v31, %v7213_v49  ;;  %v5492_v51 = vmul.f32 %v12616_v16, %v14154_v37  ;;  %v14318_v34 = vld [vmem:[#allocation11_spill] sm:$0xff] }
 0x9d1   : > { %7254 = vrot.lane.b32.xlu1 %v7246_v10, %s8359_s15  ;;  %7218 = vrot.lane.b32.xlu0 %v7210_v6, %s8359_s15  ;;  %v7252_v11 = vsel %vm1464_vm8, %v4130_v27, %v7251_v46  ;;  %v7215_v58 = vsel %vm1462_vm7, %v2565_v60, %v7214_v63  ;;  %v5538_v29 = vsel %vm5519_vm11, %v5491_v8, 0.0  ;;  %v5317_v54 = vrot.slane %v12616_v16, %v9468_v21 }
 0x9d2   : > { %v7253_v15 = vsel %vm1466_vm9, %v4139_v43, %v7252_v11  ;;  %v7216_v17 = vsel %vm1464_vm8, %v2574_v13, %v7215_v58  ;;  %v5539_v47 = vsel %vm5519_vm11, %v5492_v51, 0.0  ;;  %v5313_v39 = vrot.slane %v5210_v1, %v9458_v48 }
 0x9d3   : > { %v7217_v56 = vsel %vm1466_vm9, %v2583_v38, %v7216_v17  ;;  %v5540_v32 = vadd.f32 %v5539_v47, %v5538_v29 }
 0x9d4   : > { %v5318_v46 = vsel %vm1317_vm2, %v5317_v54, %v5313_v39 }
 0x9d5   : > { %7256 = vrot.lane.b32.xlu1 %v7253_v15, %s8359_s15  ;;  %7220 = vrot.lane.b32.xlu0 %v7217_v56, %s8359_s15  ;;  %v5541_v0 = vrot.slane %v5540_v32, 4  ;;  %v14319_v15 = vld [vmem:[#allocation16_spill] sm:$0xff]  ;;  %v14320_v56 = vld [vmem:[#allocation14_spill] sm:$0xff] }
 0x9d7   : > { %v5542_v24 = vadd.f32 %v5541_v0, %v5540_v32  ;;  %v14321_v32 = vld [vmem:[#allocation12_spill] sm:$0xff] }
 0x9d8   : > { %v5246_v50 = vpop.permute.xlu0 %5245  ;;  %v5249_v52 = vpop.permute.xlu1 %5248 }
 0x9d9   : > { %v5367_v35 = vrot.slane %v5246_v50, %v9458_v48  ;;  %v5503_v12 = vmul.f32 %v5246_v50, %v14177_v14  ;;  %v5371_v9 = vrot.slane %v5249_v52, %v9468_v21  ;;  %v5504_v25 = vmul.f32 %v5249_v52, %v14286_v45 }
 0x9da   : > { %v5543_v29 = vrot.slane %v5542_v24, 2 }
 0x9db   : > { %v5592_v61 = vsel %vm5519_vm11, %v5503_v12, 0.0  ;;  %v5372_v26 = vsel %vm1317_vm2, %v5371_v9, %v5367_v35  ;;  %v5593_v55 = vsel %vm5519_vm11, %v5504_v25, 0.0 }
 0x9dc   : > { %v5594_v62 = vadd.f32 %v5593_v55, %v5592_v61  ;;  %v5252_v7 = vpop.permute.xlu0 %5251  ;;  %v5255_v59 = vpop.permute.xlu1 %5254  ;;  %v5437_v61 = vsel %vm1456_vm4, %v5318_v46, %v14321_v32  ;;  %v5544_v0 = vadd.f32 %v5543_v29, %v5542_v24  ;;  %v14324_v46 = vld [vmem:[#allocation15_spill] sm:$0xff] }
 0x9dd   : > { %v5376_v3 = vrot.slane %v5252_v7, %v9458_v48  ;;  %v5505_v28 = vmul.f32 %v5252_v7, %v14258_v19  ;;  %v5380_v5 = vrot.slane %v5255_v59, %v9468_v21  ;;  %v5506_v33 = vmul.f32 %v5255_v59, %v14280_v30 }
 0x9de   : > { %v5595_v4 = vrot.slane %v5594_v62, 4 }
 0x9df   : > { %v5601_v31 = vsel %vm5519_vm11, %v5505_v28, 0.0  ;;  %v5381_v42 = vsel %vm1317_vm2, %v5380_v5, %v5376_v3  ;;  %v5602_v36 = vsel %vm5519_vm11, %v5506_v33, 0.0 }
 0x9e0   : > { %v5596_v44 = vadd.f32 %v5595_v4, %v5594_v62  ;;  %v12662_v27 = vsel %vm1454_vm3, %v5381_v42, %v5372_v26  ;;  %v5603_v18 = vadd.f32 %v5602_v36, %v5601_v31  ;;  %v6722_v23 = vpop.permute.xlu0 %6721  ;;  %v6725_v60 = vpop.permute.xlu1 %6724  ;;  %v14322_v42 = vld [vmem:[#allocation24_spill] sm:$0xff] }
 0x9e1   : > { %v6819_v10 = vrot.slane %v6722_v23, %v9458_v48  ;;  %v7011_v43 = vmul.f32 %v6722_v23, %v14144_v41  ;;  %v6823_v2 = vrot.slane %v6725_v60, %v9468_v21  ;;  %v7012_v13 = vmul.f32 %v6725_v60, %v14318_v34 }
 0x9e2   : > { %v5597_v6 = vrot.slane %v5596_v44, 2  ;;  %v5604_v16 = vrot.slane %v5603_v18, 4 }
 0x9e3   : > { %v7044_v57 = vsel %vm7043_vm13, %v7011_v43, 0.0  ;;  %v6824_v38 = vsel %vm1317_vm2, %v6823_v2, %v6819_v10  ;;  %v7045_v49 = vsel %vm7043_vm13, %v7012_v13, 0.0 }
 0x9e4   : > { %v5598_v63 = vadd.f32 %v5597_v6, %v5596_v44  ;;  %v5605_v51 = vadd.f32 %v5604_v16, %v5603_v18  ;;  %v7046_v41 = vadd.f32 %v7045_v49, %v7044_v57  ;;  %v6728_v11 = vpop.permute.xlu0 %6727  ;;  %v6731_v58 = vpop.permute.xlu1 %6730  ;;  %v14323_v16 = vld [vmem:[#allocation17_spill] sm:$0xff] }
 0x9e5   : > { %v6828_v8 = vrot.slane %v6728_v11, %v9458_v48  ;;  %v7013_v1 = vmul.f32 %v6728_v11, %v14319_v15  ;;  %v6832_v17 = vrot.slane %v6731_v58, %v9468_v21  ;;  %v7014_v47 = vmul.f32 %v6731_v58, %v14320_v56 }
 0x9e6   : > { %v5606_v50 = vrot.slane %v5605_v51, 2  ;;  %v7047_v52 = vrot.slane %v7046_v41, 4  ;;  %v5599_v35 = vrot.slane %v5598_v63, 1 }
 0x9e7   : > { %v7053_v12 = vsel %vm7043_vm13, %v7013_v1, 0.0  ;;  %v6833_v9 = vsel %vm1317_vm2, %v6832_v17, %v6828_v8  ;;  %v7054_v25 = vsel %vm7043_vm13, %v7014_v47, 0.0 }
 0x9e8   : > { %v5607_v26 = vadd.f32 %v5606_v50, %v5605_v51  ;;  %v7048_v55 = vadd.f32 %v7047_v52, %v7046_v41  ;;  %v6960_v62 = vsel %vm1454_vm3, %v6833_v9, %v6824_v38  ;;  %v5216_v7 = vpop.permute.xlu0 %5215  ;;  %v5219_v59 = vpop.permute.xlu1 %5218  ;;  %v7055_v3 = vadd.f32 %v7054_v25, %v7053_v12 }
 0x9e9   : > { %v5322_v28 = vrot.slane %v5216_v7, %v9458_v48  ;;  %v5493_v5 = vmul.f32 %v5216_v7, %v14156_v22  ;;  %v5326_v33 = vrot.slane %v5219_v59, %v9468_v21  ;;  %v5494_v36 = vmul.f32 %v5219_v59, %v14322_v42 }
 0x9ea   : > { %v5608_v4 = vrot.slane %v5607_v26, 1  ;;  %v7049_v31 = vrot.slane %v7048_v55, 2  ;;  %v5600_v54 = vadd.f32 %v5599_v35, %v5598_v63  ;;  %v7056_v44 = vrot.slane %v7055_v3, 4 }
 0x9eb   : > { %v5547_v18 = vsel %vm5519_vm11, %v5493_v5, 0.0  ;;  %v5327_v23 = vsel %vm1317_vm2, %v5326_v33, %v5322_v28  ;;  %v5548_v2 = vsel %vm5519_vm11, %v5494_v36, 0.0  ;;  %v5545_v51 = vrot.slane %v5544_v0, 1 }
 0x9ec   : > { %v5609_v60 = vadd.f32 %v5608_v4, %v5607_v26  ;;  %v7050_v10 = vadd.f32 %v7049_v31, %v7048_v55  ;;  %v12690_v43 = vsel %vm1458_vm5, %v5327_v23, %v5437_v61  ;;  %v5258_v34 = vpop.permute.xlu0 %5257  ;;  %v5261_v13 = vpop.permute.xlu1 %5260  ;;  %v7057_v39 = vadd.f32 %v7056_v44, %v7055_v3 }
 0x9ed   : > { %v5549_v24 = vadd.f32 %v5548_v2, %v5547_v18  ;;  %v5385_v6 = vrot.slane %v5258_v34, %v9458_v48  ;;  %v5507_v57 = vmul.f32 %v5258_v34, %v14323_v16  ;;  %v5389_v49 = vrot.slane %v5261_v13, %v9468_v21 }
 0x9ee   : > { %v12696_v38 = vsel %vm1454_vm3, %v5609_v60, %v5600_v54  ;;  %v5508_v63 = vmul.f32 %v5261_v13, %v14324_v46  ;;  %v7058_v41 = vrot.slane %v7057_v39, 2  ;;  %v7051_v8 = vrot.slane %v7050_v10, 1 }
 0x9ef   : > { %v5550_v11 = vrot.slane %v5549_v24, 4  ;;  %v5610_v58 = vsel %vm5519_vm11, %v5507_v57, 0.0  ;;  %v5390_v15 = vsel %vm1317_vm2, %v5389_v49, %v5385_v6  ;;  %v5546_v32 = vadd.f32 %v5545_v51, %v5544_v0 }
 0x9f0   : > { %v5611_v1 = vsel %vm5519_vm11, %v5508_v63, 0.0  ;;  %v6734_v17 = vpop.permute.xlu0 %6733  ;;  %v6737_v56 = vpop.permute.xlu1 %6736  ;;  %v7059_v47 = vadd.f32 %v7058_v41, %v7057_v39  ;;  %v12705_v50 = vsel %vm1456_vm4, %v5390_v15, %v12662_v27  ;;  %v7052_v7 = vadd.f32 %v7051_v8, %v7050_v10  ;;  %v14325_v39 = vld [vmem:[#allocation68_spill] sm:$0xff] }
 0x9f1   : > { %v5551_v29 = vadd.f32 %v5550_v11, %v5549_v24  ;;  %v5612_v52 = vadd.f32 %v5611_v1, %v5610_v58  ;;  %v6837_v35 = vrot.slane %v6734_v17, %v9458_v48  ;;  %v7015_v12 = vmul.f32 %v6734_v17, %v14152_v20 }
 0x9f2   : > { %v6841_v9 = vrot.slane %v6737_v56, %v9468_v21  ;;  %v7016_v25 = vmul.f32 %v6737_v56, %v14154_v37  ;;  %v7060_v61 = vrot.slane %v7059_v47, 1  ;;  %v7277_v24 = vsel %vm1456_vm4, %v5546_v32, %v14325_v39 }
 0x9f3   : > { %v5552_v26 = vrot.slane %v5551_v29, 2  ;;  %v5613_v55 = vrot.slane %v5612_v52, 4  ;;  %v7062_v59 = vsel %vm7043_vm13, %v7015_v12, 0.0 }
 0x9f4   : > { %v6842_v3 = vsel %vm1317_vm2, %v6841_v9, %v6837_v35  ;;  %v7063_v27 = vsel %vm7043_vm13, %v7016_v25, 0.0  ;;  %v6770_v28 = vpop.permute.xlu0 %6769  ;;  %v6773_v5 = vpop.permute.xlu1 %6772  ;;  %v7061_v33 = vadd.f32 %v7060_v61, %v7059_v47  ;;  %v14326_v25 = vld [vmem:[#allocation34_spill] sm:$0xff] }
 0x9f5   : > { %v5553_v4 = vadd.f32 %v5552_v26, %v5551_v29  ;;  %v5614_v20 = vadd.f32 %v5613_v55, %v5612_v52  ;;  %v12715_v31 = vsel %vm1456_vm4, %v6842_v3, %v6960_v62  ;;  %v7064_v37 = vadd.f32 %v7063_v27, %v7062_v59  ;;  %v14327_v61 = vld [vmem:[#allocation30_spill] sm:$0xff] }
 0x9f6   : > { %v6891_v0 = vrot.slane %v6770_v28, %v9458_v48  ;;  %v7027_v36 = vmul.f32 %v6770_v28, %v14177_v14  ;;  %v6895_v54 = vrot.slane %v6773_v5, %v9468_v21  ;;  %v7312_v44 = vsel %vm1454_vm3, %v7061_v33, %v7052_v7 }
 0x9f7   : > { %v5554_v18 = vrot.slane %v5553_v4, 1  ;;  %v5615_v23 = vrot.slane %v5614_v20, 2  ;;  %v7028_v60 = vmul.f32 %v6773_v5, %v14286_v45  ;;  %v7065_v10 = vrot.slane %v7064_v37, 4 }
 0x9f8   : > { %v7116_v2 = vsel %vm7043_vm13, %v7027_v36, 0.0  ;;  %v6896_v34 = vsel %vm1317_vm2, %v6895_v54, %v6891_v0  ;;  %v6776_v62 = vpop.permute.xlu0 %6775  ;;  %v6779_v13 = vpop.permute.xlu1 %6778 }
 0x9f9   : > { %v5555_v6 = vadd.f32 %v5554_v18, %v5553_v4  ;;  %v5616_v14 = vadd.f32 %v5615_v23, %v5614_v20  ;;  %v7117_v57 = vsel %vm7043_vm13, %v7028_v60, 0.0  ;;  %v6900_v49 = vrot.slane %v6776_v62, %v9458_v48  ;;  %v14328_v4 = vld [vmem:[#allocation22_spill] sm:$0xff]  ;;  %v14329_v23 = vld [vmem:[#allocation19_spill] sm:$0xff] }
 0x9fa   : > { %v7066_v63 = vadd.f32 %v7065_v10, %v7064_v37  ;;  %v7118_v51 = vadd.f32 %v7117_v57, %v7116_v2  ;;  %v7029_v45 = vmul.f32 %v6776_v62, %v14258_v19  ;;  %v6904_v41 = vrot.slane %v6779_v13, %v9468_v21 }
 0x9fb   : > { %v5617_v11 = vrot.slane %v5616_v14, 1  ;;  %v7030_v58 = vmul.f32 %v6779_v13, %v14280_v30  ;;  %v12732_v8 = vsel %vm1458_vm5, %v5555_v6, %v7277_v24 }
 0x9fc   : > { %v7067_v15 = vrot.slane %v7066_v63, 2  ;;  %v7119_v1 = vrot.slane %v7118_v51, 4  ;;  %v7125_v17 = vsel %vm7043_vm13, %v7029_v45, 0.0  ;;  %v6905_v56 = vsel %vm1317_vm2, %v6904_v41, %v6900_v49  ;;  %v12736_v47 = vpop.permute.xlu0 %5221  ;;  %v5225_v29 = vpop.permute.xlu1 %5224 }
 0x9fd   : > { %v5618_v52 = vadd.f32 %v5617_v11, %v5616_v14  ;;  %v12739_v19 = vsel %vm1454_vm3, %v6905_v56, %v6896_v34  ;;  %v7126_v35 = vsel %vm7043_vm13, %v7030_v58, 0.0  ;;  %v5495_v32 = vmul.f32 %v12736_v47, %v14326_v25 }
 0x9fe   : > { %v7068_v12 = vadd.f32 %v7067_v15, %v7066_v63  ;;  %v7120_v30 = vadd.f32 %v7119_v1, %v7118_v51  ;;  %v7127_v9 = vadd.f32 %v7126_v35, %v7125_v17  ;;  %v5496_v26 = vmul.f32 %v5225_v29, %v14327_v61 }
 0x9ff   : > { %v12747_v55 = vsel %vm1456_vm4, %v5618_v52, %v12696_v38  ;;  %v5556_v27 = vsel %vm5519_vm11, %v5495_v32, 0.0  ;;  %v5331_v17 = vrot.slane %v12736_v47, %v9458_v48 }
 0xa00   : > { %v7069_v7 = vrot.slane %v7068_v12, 1  ;;  %v7121_v59 = vrot.slane %v7120_v30, 2  ;;  %v7128_v3 = vrot.slane %v7127_v9, 4  ;;  %v5264_v28 = vpop.permute.xlu0 %5263  ;;  %v5267_v5 = vpop.permute.xlu1 %5266  ;;  %v5557_v33 = vsel %vm5519_vm11, %v5496_v26, 0.0 }
 0xa01   : > { %v5509_v20 = vmul.f32 %v5264_v28, %v14328_v4  ;;  %v5558_v54 = vadd.f32 %v5557_v33, %v5556_v27  ;;  %v5510_v38 = vmul.f32 %v5267_v5, %v14329_v23  ;;  %v5398_v32 = vrot.slane %v5267_v5, %v9468_v21  ;;  %v14330_v33 = vld [vmem:[#allocation42_spill] sm:$0xff] }
 0xa02   : > { %v7070_v37 = vadd.f32 %v7069_v7, %v7068_v12  ;;  %v7122_v0 = vadd.f32 %v7121_v59, %v7120_v30  ;;  %v7129_v36 = vadd.f32 %v7128_v3, %v7127_v9  ;;  %v5394_v9 = vrot.slane %v5264_v28, %v9458_v48  ;;  %v14331_v28 = vld [vmem:[#allocation38_spill] sm:$0xff] }
 0xa03   : > { %v5619_v18 = vsel %vm5519_vm11, %v5509_v20, 0.0  ;;  %v5620_v62 = vsel %vm5519_vm11, %v5510_v38, 0.0  ;;  %v5559_v24 = vrot.slane %v5558_v54, 4 }
 0xa04   : > { %v7130_v60 = vrot.slane %v7129_v36, 2  ;;  %v6740_v10 = vpop.permute.xlu0 %6739  ;;  %v6743_v2 = vpop.permute.xlu1 %6742  ;;  %v12755_v34 = vsel %vm1456_vm4, %v7070_v37, %v7312_v44  ;;  %v7123_v13 = vrot.slane %v7122_v0, 1  ;;  %v5621_v6 = vadd.f32 %v5620_v62, %v5619_v18 }
 0xa05   : > { %v7017_v14 = vmul.f32 %v6740_v10, %v14156_v22  ;;  %v7018_v57 = vmul.f32 %v6743_v2, %v14322_v42  ;;  %v5560_v15 = vadd.f32 %v5559_v24, %v5558_v54  ;;  %v5335_v22 = vrot.slane %v5225_v29, %v9468_v21 }
 0xa06   : > { %v7131_v39 = vadd.f32 %v7130_v60, %v7129_v36  ;;  %v5622_v63 = vrot.slane %v5621_v6, 4  ;;  %v7124_v11 = vadd.f32 %v7123_v13, %v7122_v0  ;;  %v6850_v37 = vrot.slane %v6743_v2, %v9468_v21 }
 0xa07   : > { %v7071_v41 = vsel %vm7043_vm13, %v7017_v14, 0.0  ;;  %v7072_v44 = vsel %vm7043_vm13, %v7018_v57, 0.0  ;;  %v5561_v29 = vrot.slane %v5560_v15, 2  ;;  %v5399_v36 = vsel %vm1317_vm2, %v5398_v32, %v5394_v9 }
 0xa08   : > { %v7132_v49 = vrot.slane %v7131_v39, 1  ;;  %v12760_v51 = vpop.permute.xlu0 %6781  ;;  %v12762_v45 = vpop.permute.xlu1 %6784  ;;  %v7073_v1 = vadd.f32 %v7072_v44, %v7071_v41  ;;  %v5623_v42 = vadd.f32 %v5622_v63, %v5621_v6  ;;  %v14332_v6 = vld [vmem:[#allocation28_spill] sm:$0xff]  ;;  %v5445_v14 = vsel %vm1458_vm5, %v5399_v36, %v12705_v50 }
 0xa09   : > { %v7031_v56 = vmul.f32 %v12760_v51, %v14323_v16  ;;  %v7032_v12 = vmul.f32 %v12762_v45, %v14324_v46  ;;  %v5336_v16 = vsel %vm1317_vm2, %v5335_v22, %v5331_v17  ;;  %v6846_v46 = vrot.slane %v6740_v10, %v9458_v48 }
 0xa0a   : > { %v7133_v58 = vadd.f32 %v7132_v49, %v7131_v39  ;;  %v7074_v35 = vrot.slane %v7073_v1, 4  ;;  %v5624_v3 = vrot.slane %v5623_v42, 2  ;;  %v5439_v60 = vsel %vm1460_vm6, %v5336_v16, %v12690_v43 }
 0xa0b   : > { %v7134_v47 = vsel %vm7043_vm13, %v7031_v56, 0.0  ;;  %v7135_v59 = vsel %vm7043_vm13, %v7032_v12, 0.0  ;;  %v5562_v62 = vadd.f32 %v5561_v29, %v5560_v15  ;;  %v6851_v57 = vsel %vm1317_vm2, %v6850_v37, %v6846_v46 }
 0xa0c   : > { %v12772_v52 = vsel %vm1454_vm3, %v7133_v58, %v7124_v11  ;;  %v5231_v30 = vpop.permute.xlu1 %5230  ;;  %v5228_v26 = vpop.permute.xlu0 %5227  ;;  %v7075_v7 = vadd.f32 %v7074_v35, %v7073_v1  ;;  %v7136_v27 = vadd.f32 %v7135_v59, %v7134_v47  ;;  %v5625_v39 = vadd.f32 %v5624_v3, %v5623_v42 }
 0xa0d   : > { %v5497_v20 = vmul.f32 %v5228_v26, %v14330_v33  ;;  %v5498_v0 = vmul.f32 %v5231_v30, %v14331_v28  ;;  %v6909_v49 = vrot.slane %v12760_v51, %v9458_v48  ;;  %v6913_v44 = vrot.slane %v12762_v45, %v9468_v21 }
 0xa0e   : > { %v7076_v54 = vrot.slane %v7075_v7, 2  ;;  %v7137_v24 = vrot.slane %v7136_v27, 4  ;;  %v5563_v1 = vrot.slane %v5562_v62, 1  ;;  %v5340_v50 = vrot.slane %v5228_v26, %v9458_v48 }
 0xa0f   : > { %v5565_v18 = vsel %vm5519_vm11, %v5497_v20, 0.0  ;;  %v5566_v13 = vsel %vm5519_vm11, %v5498_v0, 0.0  ;;  %v5344_v17 = vrot.slane %v5231_v30, %v9468_v21  ;;  %v5626_v22 = vrot.slane %v5625_v39, 1 }
 0xa10   : > { %v5273_v5 = vpop.permute.xlu1 %5272  ;;  %v5270_v38 = vpop.permute.xlu0 %5269  ;;  %v5567_v10 = vadd.f32 %v5566_v13, %v5565_v18  ;;  %v7077_v43 = vadd.f32 %v7076_v54, %v7075_v7  ;;  %v7138_v42 = vadd.f32 %v7137_v24, %v7136_v27  ;;  %v6914_v30 = vsel %vm1317_vm2, %v6913_v44, %v6909_v49  ;;  %v14334_v44 = vld [vmem:[#allocation50_spill] sm:$0xff] }
 0xa11   : > { %v5511_v2 = vmul.f32 %v5270_v38, %v14332_v6  ;;  %v5512_v63 = vmul.f32 %v5273_v5, %v14206_v53  ;;  %v5403_v45 = vrot.slane %v5270_v38, %v9458_v48  ;;  %v5407_v9 = vrot.slane %v5273_v5, %v9468_v21 }
 0xa12   : > { %v5568_v11 = vrot.slane %v5567_v10, 4  ;;  %v7078_v26 = vrot.slane %v7077_v43, 1  ;;  %v5564_v16 = vadd.f32 %v5563_v1, %v5562_v62  ;;  %v5627_v20 = vadd.f32 %v5626_v22, %v5625_v39 }
 0xa13   : > { %v5628_v58 = vsel %vm5519_vm11, %v5511_v2, 0.0  ;;  %v5629_v51 = vsel %vm5519_vm11, %v5512_v63, 0.0  ;;  %v7139_v46 = vrot.slane %v7138_v42, 2  ;;  %v5408_v5 = vsel %vm1317_vm2, %v5407_v9, %v5403_v45  ;;  %v14336_v45 = vld [vmem:[#allocation31_spill] sm:$0xff] }
 0xa14   : > { %v12797_v41 = vpop.permute.xlu1 %6748  ;;  %v12802_v15 = vpop.permute.xlu0 %6745  ;;  %v5630_v56 = vadd.f32 %v5629_v51, %v5628_v58  ;;  %v5569_v12 = vadd.f32 %v5568_v11, %v5567_v10  ;;  %v7079_v38 = vadd.f32 %v7078_v26, %v7077_v43  ;;  %v6968_v62 = vsel %vm1456_vm4, %v6914_v30, %v12739_v19 }
 0xa15   : > { %v7019_v35 = vmul.f32 %v12802_v15, %v14326_v25  ;;  %v7020_v32 = vmul.f32 %v12797_v41, %v14327_v61  ;;  %v5345_v25 = vsel %vm1317_vm2, %v5344_v17, %v5340_v50  ;;  %v12822_v61 = vsel %vm1458_vm5, %v6851_v57, %v12715_v31  ;;  %v14333_v31 = vld [vmem:[#allocation46_spill] sm:$0xff] }
 0xa16   : > { %v5631_v29 = vrot.slane %v5630_v56, 4  ;;  %v5570_v0 = vrot.slane %v5569_v12, 2  ;;  %v12837_v57 = vsel %vm1460_vm6, %v5564_v16, %v12732_v8  ;;  %v12842_v49 = vsel %vm1460_vm6, %v5408_v5, %v5445_v14 }
 0xa17   : > { %v7080_v7 = vsel %vm7043_vm13, %v7019_v35, 0.0  ;;  %v7081_v3 = vsel %vm7043_vm13, %v7020_v32, 0.0  ;;  %v6855_v43 = vrot.slane %v12802_v15, %v9458_v48  ;;  %v6859_v1 = vrot.slane %v12797_v41, %v9468_v21 }
 0xa18   : > { %v12813_v47 = vpop.permute.xlu1 %6790  ;;  %v6788_v59 = vpop.permute.xlu0 %6787  ;;  %v5632_v37 = vadd.f32 %v5631_v29, %v5630_v56  ;;  %v7082_v36 = vadd.f32 %v7081_v3, %v7080_v7  ;;  %v5571_v63 = vadd.f32 %v5570_v0, %v5569_v12  ;;  %v12856_v51 = vsel %vm1458_vm5, %v7079_v38, %v12755_v34 }
 0xa19   : > { %v7033_v27 = vmul.f32 %v6788_v59, %v14328_v4  ;;  %v7034_v54 = vmul.f32 %v12813_v47, %v14329_v23  ;;  %v12830_v4 = vsel %vm1462_vm7, %v5345_v25, %v5439_v60  ;;  %v12839_v23 = vadd.f32 %v7139_v46, %v7138_v42  ;;  %v14335_v42 = vld [vmem:[#allocation35_spill] sm:$0xff] }
 0xa1a   : > { %v7083_v24 = vrot.slane %v7082_v36, 4  ;;  %v5633_v19 = vrot.slane %v5632_v37, 2  ;;  %v12846_v60 = vsel %vm1458_vm5, %v5627_v20, %v12747_v55  ;;  %v6918_v55 = vrot.slane %v6788_v59, %v9458_v48 }
 0xa1b   : > { %v7143_v10 = vsel %vm7043_vm13, %v7033_v27, 0.0  ;;  %v7144_v2 = vsel %vm7043_vm13, %v7034_v54, 0.0  ;;  %v6922_v15 = vrot.slane %v12813_v47, %v9468_v21  ;;  %v7141_v35 = vrot.slane %v12839_v23, 1 }
 0xa1c   : > { %v5237_v18 = vpop.permute.xlu1 %5236  ;;  %v5234_v13 = vpop.permute.xlu0 %5233  ;;  %v7084_v50 = vadd.f32 %v7083_v24, %v7082_v36  ;;  %v7145_v14 = vadd.f32 %v7144_v2, %v7143_v10  ;;  %v5634_v12 = vadd.f32 %v5633_v19, %v5632_v37  ;;  %v5572_v32 = vrot.slane %v5571_v63, 1 }
 0xa1d   : > { %v5500_v39 = vmul.f32 %v5237_v18, %v14333_v31  ;;  %v5499_v11 = vmul.f32 %v5234_v13, %v14334_v44  ;;  %v5349_v26 = vrot.slane %v5234_v13, %v9458_v48  ;;  %v5353_v34 = vrot.slane %v5237_v18, %v9468_v21 }
 0xa1e   : > { %v7085_v47 = vrot.slane %v7084_v50, 2  ;;  %v7146_v7 = vrot.slane %v7145_v14, 4  ;;  %v6860_v3 = vsel %vm1317_vm2, %v6859_v1, %v6855_v43  ;;  %v6923_v27 = vsel %vm1317_vm2, %v6922_v15, %v6918_v55 }
 0xa1f   : > { %v5575_v58 = vsel %vm5519_vm11, %v5500_v39, 0.0  ;;  %v5574_v22 = vsel %vm5519_vm11, %v5499_v11, 0.0  ;;  %v5635_v37 = vrot.slane %v5634_v12, 1  ;;  %v5354_v54 = vsel %vm1317_vm2, %v5353_v34, %v5349_v26  ;;  %v14337_v34 = vld [vmem:[#allocation59_spill] sm:$0xff] }
 0xa20   : > { %v5279_v8 = vpop.permute.xlu1 %5278  ;;  %v5276_v17 = vpop.permute.xlu0 %5275  ;;  %v5576_v41 = vadd.f32 %v5575_v58, %v5574_v22  ;;  %v5573_v24 = vadd.f32 %v5572_v32, %v5571_v63  ;;  %v7086_v10 = vadd.f32 %v7085_v47, %v7084_v50  ;;  %v7147_v2 = vadd.f32 %v7146_v7, %v7145_v14  ;;  %v14338_v47 = vld [vmem:[#allocation55_spill] sm:$0xff] }
 0xa21   : > { %v5513_v56 = vmul.f32 %v5276_v17, %v14335_v42  ;;  %v5514_v9 = vmul.f32 %v5279_v8, %v14336_v45  ;;  %v5412_v0 = vrot.slane %v5276_v17, %v9458_v48  ;;  %v5416_v5 = vrot.slane %v5279_v8, %v9468_v21 }
 0xa22   : > { %v5577_v59 = vrot.slane %v5576_v41, 4  ;;  %v12883_v43 = vsel %vm1460_vm6, %v6860_v3, %v12822_v61  ;;  %v12886_v11 = vsel %vm1458_vm5, %v6923_v27, %v6968_v62  ;;  %v5636_v8 = vadd.f32 %v5635_v37, %v5634_v12 }
 0xa23   : > { %v5637_v30 = vsel %vm5519_vm11, %v5513_v56, 0.0  ;;  %v5638_v16 = vsel %vm5519_vm11, %v5514_v9, 0.0  ;;  %v5441_v1 = vsel %vm1464_vm8, %v5354_v54, %v12830_v4  ;;  %v5417_v63 = vsel %vm1317_vm2, %v5416_v5, %v5412_v0 }
 0xa24   : > { %v12868_v29 = vpop.permute.xlu1 %6754  ;;  %v6752_v25 = vpop.permute.xlu0 %6751  ;;  %v5639_v20 = vadd.f32 %v5638_v16, %v5637_v30  ;;  %v5578_v18 = vadd.f32 %v5577_v59, %v5576_v41  ;;  %v7087_v22 = vrot.slane %v7086_v10, 1  ;;  %v7148_v56 = vrot.slane %v7147_v2, 2 }
 0xa25   : > { %v7021_v46 = vmul.f32 %v6752_v25, %v14330_v33  ;;  %v7022_v36 = vmul.f32 %v12868_v29, %v14331_v28  ;;  %v12896_v12 = vsel %vm1462_vm7, %v5573_v24, %v12837_v57  ;;  %v6864_v4 = vrot.slane %v6752_v25, %v9458_v48 }
 0xa26   : > { %v5640_v38 = vrot.slane %v5639_v20, 4  ;;  %v5579_v14 = vrot.slane %v5578_v18, 2  ;;  %v12911_v0 = vadd.f32 %v7148_v56, %v7147_v2  ;;  %v12915_v5 = vsel %vm1462_vm7, %v5417_v63, %v12842_v49 }
 0xa27   : > { %v7089_v13 = vsel %vm7043_vm13, %v7021_v46, 0.0  ;;  %v7090_v33 = vsel %vm7043_vm13, %v7022_v36, 0.0  ;;  %v12926_v24 = vsel %vm1460_vm6, %v5636_v8, %v12846_v60  ;;  %v7342_v8 = vld [vmem:[%s13163_s4 + $0x18] sm:$0xff] }
 0xa28   : > { %v6797_v39 = vpop.permute.xlu1 %6796  ;;  %v6794_v19 = vpop.permute.xlu0 %6793  ;;  %v5641_v28 = vadd.f32 %v5640_v38, %v5639_v20  ;;  %v7091_v58 = vadd.f32 %v7090_v33, %v7089_v13  ;;  %v5580_v59 = vadd.f32 %v5579_v14, %v5578_v18  ;;  %v12918_v18 = vadd.f32 %v7087_v22, %v7086_v10  ;;  %v14339_v13 = vld [vmem:[#allocation43_spill] sm:$0xff]  ;;  %7779 = vmatprep.subr.mxu1 %v7342_v8 }
 0xa29   : > { %v7035_v50 = vmul.f32 %v6794_v19, %v14332_v6  ;;  %v7036_v15 = vmul.f32 %v6797_v39, %v14206_v53  ;;  %v6868_v6 = vrot.slane %v12868_v29, %v9468_v21  ;;  %v6927_v53 = vrot.slane %v6794_v19, %v9458_v48  ;;  %7780 = vmatpush3.msra.mxu1 %v7342_v8 }
 0xa2a   : > { %v5642_v17 = vrot.slane %v5641_v28, 2  ;;  %v7092_v55 = vrot.slane %v7091_v58, 4  ;;  %v6931_v25 = vrot.slane %v6797_v39, %v9468_v21  ;;  %v5581_v2 = vrot.slane %v5580_v59, 1 }
 0xa2b   : > { %v7152_v9 = vsel %vm7043_vm13, %v7035_v50, 0.0  ;;  %v7153_v32 = vsel %vm7043_vm13, %v7036_v15, 0.0  ;;  %v6869_v38 = vsel %vm1317_vm2, %v6868_v6, %v6864_v4  ;;  %v7341_v15 = vld [vmem:[%s13163_s4 + $0x10] sm:$0xff] }
 0xa2c   : > { %v5243_v61 = vpop.permute.xlu1 %5242  ;;  %v5240_v62 = vpop.permute.xlu0 %5239  ;;  %v5643_v57 = vadd.f32 %v5642_v17, %v5641_v28  ;;  %v7093_v16 = vadd.f32 %v7092_v55, %v7091_v58  ;;  %v7154_v29 = vadd.f32 %v7153_v32, %v7152_v9  ;;  %v6932_v10 = vsel %vm1317_vm2, %v6931_v25, %v6927_v53  ;;  %v7340_v53 = vld [vmem:[%s13163_s4 + $0x8] sm:$0xff]  ;;  %7781 = vmatprep.subr.mxu1 %v7341_v15 }
 0xa2d   : > { %v5362_v41 = vrot.slane %v5243_v61, %v9468_v21  ;;  %v5358_v26 = vrot.slane %v5240_v62, %v9458_v48  ;;  %v5501_v30 = vmul.f32 %v5240_v62, %v14337_v34  ;;  %v5502_v7 = vmul.f32 %v5243_v61, %v14338_v47  ;;  %7782 = vmatpush3.msra.mxu1 %v7341_v15 }
 0xa2e   : > { %v7094_v33 = vrot.slane %v7093_v16, 2  ;;  %v5644_v58 = vrot.slane %v5643_v57, 1  ;;  %v7150_v61 = vrot.slane %v12911_v0, 1  ;;  %v12943_v22 = vsel %vm1462_vm7, %v6869_v38, %v12883_v43  ;;  %7783 = vmatprep.subr.mxu1 %v7340_v53 }
 0xa2f   : > { %v5583_v27 = vsel %vm5519_vm11, %v5501_v30, 0.0  ;;  %v5363_v20 = vsel %vm1317_vm2, %v5362_v41, %v5358_v26  ;;  %v5584_v46 = vsel %vm5519_vm11, %v5502_v7, 0.0  ;;  %v5582_v32 = vadd.f32 %v5581_v2, %v5580_v59  ;;  %7784 = vmatpush3.msra.mxu1 %v7340_v53 }
 0xa30   : > { %v5285_v3 = vpop.permute.xlu1 %5284  ;;  %v5282_v37 = vpop.permute.xlu0 %5281  ;;  %v5442_v36 = vsel %vm1466_vm9, %v5363_v20, %v5441_v1  ;;  %v5585_v54 = vadd.f32 %v5584_v46, %v5583_v27  ;;  %v7155_v1 = vrot.slane %v7154_v29, 4  ;;  %v7095_v41 = vadd.f32 %v7094_v33, %v7093_v16 }
 0xa31   : > { %7667 = vst.msk [vmem:[%s11199_s30 + $0x20] sm:$0xff] %vm419_vm0, %v5442_v36  ;;  %v5515_v39 = vmul.f32 %v5282_v37, %v14339_v13  ;;  %v5516_v49 = vmul.f32 %v5285_v3, %v14218_v40  ;;  %v5421_v17 = vrot.slane %v5282_v37, %v9458_v48  ;;  %v5425_v55 = vrot.slane %v5285_v3, %v9468_v21 }
 0xa32   : > { %v5586_v19 = vrot.slane %v5585_v54, 4  ;;  %v12952_v26 = vadd.f32 %v5644_v58, %v5643_v57  ;;  %v12956_v43 = vsel %vm1460_vm6, %v6932_v10, %v12886_v11  ;;  %v7096_v20 = vrot.slane %v7095_v41, 1 }
 0xa33   : > { %v5646_v63 = vsel %vm5519_vm11, %v5515_v39, 0.0  ;;  %v5647_v60 = vsel %vm5519_vm11, %v5516_v49, 0.0  ;;  %v5426_v59 = vsel %vm1317_vm2, %v5425_v55, %v5421_v17  ;;  %v7281_v36 = vsel %vm1464_vm8, %v5582_v32, %v12896_v12  ;;  %v14340_v49 = vld [vmem:[#allocation51_spill] sm:$0xff] }
 0xa34   : > { %v6761_v28 = vpop.permute.xlu1 %6760  ;;  %v6758_v50 = vpop.permute.xlu0 %6757  ;;  %v5587_v14 = vadd.f32 %v5586_v19, %v5585_v54  ;;  %v5648_v56 = vadd.f32 %v5647_v60, %v5646_v63 }
 0xa35   : > { %v7023_v62 = vmul.f32 %v6758_v50, %v14334_v44  ;;  %v7024_v6 = vmul.f32 %v6761_v28, %v14333_v31  ;;  %v12959_v31 = vadd.f32 %v7155_v1, %v7154_v29  ;;  %v6873_v57 = vrot.slane %v6758_v50, %v9458_v48 }
 0xa36   : > { %v5588_v4 = vrot.slane %v5587_v14, 2  ;;  %v5649_v44 = vrot.slane %v5648_v56, 4  ;;  %v6877_v3 = vrot.slane %v6761_v28, %v9468_v21 }
 0xa37   : > { %v7098_v30 = vsel %vm7043_vm13, %v7023_v62, 0.0  ;;  %v7099_v25 = vsel %vm7043_vm13, %v7024_v6, 0.0 }
 0xa38   : > { %v12947_v9 = vpop.permute.xlu1 %6802  ;;  %v6800_v7 = vpop.permute.xlu0 %6799  ;;  %v5589_v16 = vadd.f32 %v5588_v4, %v5587_v14  ;;  %v7100_v27 = vadd.f32 %v7099_v25, %v7098_v30  ;;  %v5650_v54 = vadd.f32 %v5649_v44, %v5648_v56  ;;  %v6878_v12 = vsel %vm1317_vm2, %v6877_v3, %v6873_v57  ;;  %v14341_v14 = vld [vmem:[#allocation47_spill] sm:$0xff] }
 0xa39   : > { %v7037_v11 = vmul.f32 %v6800_v7, %v14335_v42  ;;  %v7038_v46 = vmul.f32 %v12947_v9, %v14336_v45  ;;  %v5448_v42 = vsel %vm1464_vm8, %v5426_v59, %v12915_v5  ;;  %v6936_v10 = vrot.slane %v6800_v7, %v9458_v48 }
 0xa3a   : > { %v5590_v37 = vrot.slane %v5589_v16, 1  ;;  %v7101_v38 = vrot.slane %v7100_v27, 4  ;;  %v5651_v60 = vrot.slane %v5650_v54, 2  ;;  %v6940_v8 = vrot.slane %v12947_v9, %v9468_v21 }
 0xa3b   : > { %v7161_v39 = vsel %vm7043_vm13, %v7037_v11, 0.0  ;;  %v7162_v19 = vsel %vm7043_vm13, %v7038_v46, 0.0  ;;  %v12991_v44 = vadd.f32 %v7096_v20, %v7095_v41  ;;  %v7157_v30 = vrot.slane %v12959_v31, 2 }
 0xa3c   : > { %v5291_v29 = vpop.permute.xlu1 %5290  ;;  %v5288_v2 = vpop.permute.xlu0 %5287  ;;  %v7102_v58 = vadd.f32 %v7101_v38, %v7100_v27  ;;  %v7163_v1 = vadd.f32 %v7162_v19, %v7161_v39  ;;  %v5591_v5 = vadd.f32 %v5590_v37, %v5589_v16  ;;  %v6965_v16 = vsel %vm1464_vm8, %v6878_v12, %v12943_v22 }
 0xa3d   : > { %v5434_v33 = vrot.slane %v5291_v29, %v9468_v21  ;;  %v5430_v45 = vrot.slane %v5288_v2, %v9458_v48  ;;  %v5517_v28 = vmul.f32 %v5288_v2, %v14340_v49  ;;  %v5518_v17 = vmul.f32 %v5291_v29, %v14341_v14 }
 0xa3e   : > { %v7164_v15 = vrot.slane %v7163_v1, 4  ;;  %v7282_v6 = vsel %vm1466_vm9, %v5591_v5, %v7281_v36  ;;  %v7103_v59 = vrot.slane %v7102_v58, 2  ;;  %v6941_v41 = vsel %vm1317_vm2, %v6940_v8, %v6936_v10 }
 0xa3f   : > { %v5655_v63 = vsel %vm5519_vm11, %v5517_v28, 0.0  ;;  %v5435_v50 = vsel %vm1317_vm2, %v5434_v33, %v5430_v45  ;;  %v5656_v4 = vsel %vm5519_vm11, %v5518_v17, 0.0  ;;  %7290 = vrot.lane.b32.xlu0 %v7282_v6, %s8359_s15  ;;  %v7158_v39 = vadd.f32 %v7157_v30, %v12959_v31 }
 0xa40   : > { %v6767_v55 = vpop.permute.xlu1 %6766  ;;  %v5449_v56 = vsel %vm1466_vm9, %v5435_v50, %v5448_v42  ;;  %v6764_v62 = vpop.permute.xlu0 %6763  ;;  %v5657_v7 = vadd.f32 %v5656_v4, %v5655_v63  ;;  %v7165_v46 = vadd.f32 %v7164_v15, %v7163_v1  ;;  %v7104_v2 = vadd.f32 %v7103_v59, %v7102_v58  ;;  %v7339_v1 = vld [vmem:[%s13163_s4] sm:$0xff] }
 0xa41   : > { %7668 = vst.msk [vmem:[%s11199_s30 + $0x28] sm:$0xff] %vm419_vm0, %v5449_v56  ;;  %v6882_v32 = vrot.slane %v6764_v62, %v9458_v48  ;;  %v7025_v53 = vmul.f32 %v6764_v62, %v14337_v34  ;;  %v6886_v9 = vrot.slane %v6767_v55, %v9468_v21  ;;  %v7026_v57 = vmul.f32 %v6767_v55, %v14338_v47 }
 0xa42   : > { %v5652_v34 = vadd.f32 %v5651_v60, %v5650_v54  ;;  %v5658_v27 = vrot.slane %v5657_v7, 4  ;;  %v6971_v45 = vsel %vm1462_vm7, %v6941_v41, %v12956_v43  ;;  %v7166_v63 = vrot.slane %v7165_v46, 2  ;;  %7785 = vmatprep.subr.mxu1 %v7339_v1 }
 0xa43   : > { %v7107_v25 = vsel %vm7043_vm13, %v7025_v53, 0.0  ;;  %v6887_v11 = vsel %vm1317_vm2, %v6886_v9, %v6882_v32  ;;  %v7108_v37 = vsel %vm7043_vm13, %v7026_v57, 0.0  ;;  %7786 = vmatpush3.msra.mxu1 %v7339_v1  ;;  %v7105_v55 = vrot.slane %v7104_v2, 1 }
 0xa44   : > { %v6809_v3 = vpop.permute.xlu1 %6808  ;;  %v6806_v20 = vpop.permute.xlu0 %6805  ;;  %v6966_v29 = vsel %vm1466_vm9, %v6887_v11, %v6965_v16  ;;  %v5659_v36 = vadd.f32 %v5658_v27, %v5657_v7  ;;  %v7109_v38 = vadd.f32 %v7108_v37, %v7107_v25  ;;  %v5653_v19 = vrot.slane %v5652_v34, 1 }
 0xa45   : > { %v7039_v22 = vmul.f32 %v6806_v20, %v14339_v13  ;;  %7669 = vst.msk [vmem:[%s11199_s30 + $0x30] sm:$0xff] %vm419_vm0, %v6966_v29  ;;  %v6945_v47 = vrot.slane %v6806_v20, %v9458_v48  ;;  %v6949_v54 = vrot.slane %v6809_v3, %v9468_v21  ;;  %v7040_v42 = vmul.f32 %v6809_v3, %v14218_v40 }
 0xa46   : > { %v5660_v13 = vrot.slane %v5659_v36, 2  ;;  %v7110_v28 = vrot.slane %v7109_v38, 4  ;;  %v7106_v59 = vadd.f32 %v7105_v55, %v7104_v2  ;;  %v7315_v25 = vsel %vm1460_vm6, %v12918_v18, %v12856_v51 }
 0xa47   : > { %v7170_v33 = vsel %vm7043_vm13, %v7039_v22, 0.0  ;;  %v7171_v31 = vsel %vm7043_vm13, %v7040_v42, 0.0  ;;  %v6950_v43 = vsel %vm1317_vm2, %v6949_v54, %v6945_v47  ;;  %v7159_v27 = vrot.slane %v7158_v39, 1 }
 0xa48   : > { %v6812_v12 = vpop.permute.xlu0 %6811  ;;  %v6815_v10 = vpop.permute.xlu1 %6814  ;;  %v5661_v40 = vadd.f32 %v5660_v13, %v5659_v36  ;;  %v7111_v17 = vadd.f32 %v7110_v28, %v7109_v38  ;;  %v7172_v5 = vadd.f32 %v7171_v31, %v7170_v33  ;;  %v6972_v6 = vsel %vm1464_vm8, %v6950_v43, %v6971_v45 }
 0xa49   : > { %v6954_v58 = vrot.slane %v6812_v12, %v9458_v48  ;;  %v7041_v50 = vmul.f32 %v6812_v12, %v14340_v49  ;;  %v6958_v8 = vrot.slane %v6815_v10, %v9468_v21  ;;  %v7042_v15 = vmul.f32 %v6815_v10, %v14341_v14 }
 0xa4a   : > { %v7112_v56 = vrot.slane %v7111_v17, 2  ;;  %v7173_v62 = vrot.slane %v7172_v5, 4  ;;  %v5654_v48 = vadd.f32 %v5653_v19, %v5652_v34  ;;  %v5662_v4 = vrot.slane %v5661_v40, 1 }
 0xa4b   : > { %v7179_v60 = vsel %vm7043_vm13, %v7041_v50, 0.0  ;;  %v7167_v49 = vadd.f32 %v7166_v63, %v7165_v46  ;;  %v6959_v32 = vsel %vm1317_vm2, %v6958_v8, %v6954_v58  ;;  %v7180_v53 = vsel %vm7043_vm13, %v7042_v15, 0.0 }
 0xa4c   : > { %v7113_v30 = vadd.f32 %v7112_v56, %v7111_v17  ;;  %v7174_v7 = vadd.f32 %v7173_v62, %v7172_v5  ;;  %v6973_v9 = vsel %vm1466_vm9, %v6959_v32, %v6972_v6  ;;  %v7181_v16 = vadd.f32 %v7180_v53, %v7179_v60  ;;  %v7219_v45 = vpop.permute.xlu0 %7218  ;;  %v7255_v28 = vpop.permute.xlu1 %7254 }
 0xa4d   : > { %7670 = vst.msk [vmem:[%s11199_s30 + $0x38] sm:$0xff] %vm419_vm0, %v6973_v9  ;;  %v5663_v21 = vadd.f32 %v5662_v4, %v5661_v40  ;;  %v7287_v14 = vsel %vm1462_vm7, %v12952_v26, %v12926_v24  ;;  %v7316_v20 = vsel %vm1462_vm7, %v12991_v44, %v7315_v25  ;;  %v7168_v46 = vrot.slane %v7167_v49, 1 }
 0xa4e   : > { %v7175_v57 = vrot.slane %v7174_v7, 2  ;;  %v7182_v3 = vrot.slane %v7181_v16, 4  ;;  %v7288_v34 = vsel %vm1464_vm8, %v5654_v48, %v7287_v14  ;;  %v7114_v41 = vrot.slane %v7113_v30, 1 }
 0xa4f   : > { %v7289_v11 = vsel %vm1466_vm9, %v5663_v21, %v7288_v34  ;;  %v7142_v51 = vadd.f32 %v7141_v35, %v12839_v23  ;;  %v7317_v18 = vsel %vm1464_vm8, %v7106_v59, %v7316_v20  ;;  %v7151_v26 = vadd.f32 %v7150_v61, %v12911_v0 }
 0xa50   : > { %v7176_v29 = vadd.f32 %v7175_v57, %v7174_v7  ;;  %v7183_v37 = vadd.f32 %v7182_v3, %v7181_v16  ;;  %7292 = vrot.lane.b32.xlu1 %v7289_v11, %s8359_s15  ;;  %v7115_v24 = vadd.f32 %v7114_v41, %v7113_v30  ;;  %v7160_v38 = vadd.f32 %v7159_v27, %v7158_v39  ;;  %v7221_v13 = vpop.permute.xlu0 %7220  ;;  %v7257_v10 = vpop.permute.xlu1 %7256 }
 0xa51   : > { %v7169_v47 = vadd.f32 %v7168_v46, %v7167_v49  ;;  %v7320_v33 = vsel %vm1456_vm4, %v7142_v51, %v12772_v52  ;;  %v7332_v52 = vsel %vm1145_vm1, %v7219_v45, %v7255_v28  ;;  %v7333_v50 = vsel %vm1145_vm1, %v7221_v13, %v7257_v10 }
 0xa52   : > { %v7177_v22 = vrot.slane %v7176_v29, 1  ;;  %v7184_v36 = vrot.slane %v7183_v37, 2  ;;  %v7318_v44 = vsel %vm1466_vm9, %v7115_v24, %v7317_v18  ;;  %v7321_v35 = vsel %vm1458_vm5, %v7151_v26, %v7320_v33 }
 0xa53   : > { %7326 = vrot.lane.b32.xlu0 %v7318_v44, %s8359_s15  ;;  %v7322_v42 = vsel %vm1460_vm6, %v7160_v38, %v7321_v35 }
 0xa54   : > { %v7185_v54 = vadd.f32 %v7184_v36, %v7183_v37  ;;  %v7178_v2 = vadd.f32 %v7177_v22, %v7176_v29  ;;  %v7323_v0 = vsel %vm1462_vm7, %v7169_v47, %v7322_v42 }
 0xa56   : > { %v7186_v23 = vrot.slane %v7185_v54, 1  ;;  %v7324_v61 = vsel %vm1464_vm8, %v7178_v2, %v7323_v0 }
 0xa58   : > { %v7187_v19 = vadd.f32 %v7186_v23, %v7185_v54 }
 0xa5a   : > { %v7325_v39 = vsel %vm1466_vm9, %v7187_v19, %v7324_v61 }
 0xa5b   : > { %7328 = vrot.lane.b32.xlu1 %v7325_v39, %s8359_s15  ;;  %s7686_s15 = sshll.u32 %s8348_s27, 10 }
 0xa5c   : > { %s13068_s8 = scalar_lea.hbm %s13166_s7, %s7686_s15 }
 0xab1   : > { %v7291_v12 = vpop.permute.xlu0 %7290 }
 0xab2   : > { %v7334_v1 = vsel %vm419_vm0, %v7332_v52, %v7291_v12 }
 0xac2   : > { %v7293_v58 = vpop.permute.xlu1 %7292 }
 0xac3   : > { %v7335_v40 = vsel %vm419_vm0, %v7333_v50, %v7293_v58 }
 0xac5   : > { %v7327_v63 = vpop.permute.xlu0 %7326 }
 0xac6   : > { %v7337_v31 = vsel %vm7336_vm14, %v7334_v1, %v7327_v63 }
 0xac7   : > { %7787 = vmatprep.mubr.msk.f32.mxu1 %vm7350_vm15, %v7337_v31 }
 0xacd   : > { %v7329_v17 = vpop.permute.xlu1 %7328 }
 0xace   : > { %v7338_v43 = vsel %vm7336_vm14, %v7335_v40, %v7329_v17 }
 0xacf   : > { %7788 = vmatmul.mubr.msk.f32.vlgmr.msra.gmra.mxu1 %vm7350_vm15, %v7338_v43 }
 0xad0   : > { %8263 = shalt.err (!%p8260_p5)
}
 0xad1   : > { %s8264_s30 = scalar_lea.hbm %s13068_s8, 1024  ;;  %s8268_s21 = scalar_lea.hbm %s13166_s7, 2048 }
 0xad2   : > { %p8265_p6 = scmp.ne.s32.totalorder %s13068_s8, %s8264_s30  ;;  %p8269_p10 = scmp.lt.s32.totalorder %s13068_s8, %s13166_s7 }
 0xad3   : > { %p8270_p11 = scmp.lt.s32.totalorder %s8268_s21, %s8264_s30 }
 0xad4   : > { %p8266_p7 = pnand %p8265_p6, %p8448_p4 }
 0xad5   : > { %p8271_p12 = por %p8270_p11, %p8269_p10 }
 0xad6   : > { %p8267_p9 = pneg %p8266_p7 }
 0xad8   : > { %p8272_p13 = pnand %p8271_p12, %p8267_p9 }
 0xada   : > { %8275 = shalt.err (!%p8272_p13)
}
 0xadb   : > { %s8365_s16 = smov 128   ;;  %s8366_s18 = smov 8   ;;  %v7671_v5 = vld [vmem:[%s13164_s5] ss:$0 sm:$0xff] }
 0xadc   : > { %7795 = dma.vmem_to_hbm [thread:$0]  (%p8448_p4), %s13071_s10, 1024, %s13068_s8, %s7440_s12, %s8365_s16, %s8365_s16, %s8366_s18  }
 0xadd   : > { %s7625_s19 = sshll.u32 %s11155_s22, 4  ;;  %s7685_s23 = sshll.u32 %s8348_s27, 8 }
 0xade   : > { %s345_s15 = scalar_lea.vmem [#allocation2], %s7625_s19  ;;  %s13110_s12 = scalar_lea.hbm %s13165_s6, %s7685_s23 }
 0xadf   : > { %s7455_s21 = sshll.u32 %s345_s15, 4  ;;  %s7435_s17 = scalar_lea.sflag [#allocation3], %s11155_s22  ;;  %s13104_s21 = int_to_ptr.vmem [resolvable:$true] %s7455_s21 }
 0xae0   : > { %s8276_s19 = scalar_lea.vmem %s13104_s21, 256  ;;  %s8367_s27 = smov [#allocation2]  }
 0xae1   : > { %p8277_p0 = scmp.ne.s32.totalorder %s13104_s21, %s8276_s19  ;;  %s8280_s30 = sshll.u32 %s8367_s27, 4  ;;  %s8281_s30 = int_to_ptr.vmem [resolvable:$false] %s8280_s30 }
 0xae2   : > { %s8282_s20 = scalar_lea.vmem %s8281_s30, 512  ;;  %p8283_p3 = scmp.lt.s32.totalorder %s13104_s21, %s8281_s30 }
 0xae3   : > { %p8278_p1 = pnand %p8277_p0, %p8448_p4  ;;  %p8284_p5 = scmp.lt.s32.totalorder %s8282_s20, %s8276_s19 }
 0xae5   : > { %p8279_p2 = pneg %p8278_p1  ;;  %p8285_p6 = por %p8284_p5, %p8283_p3 }
 0xae7   : > { %p8286_p7 = pnand %p8285_p6, %p8279_p2 }
 0xb8f   : > { %v7789_v55 = vpop.f32.mrf.mxu1 }
 0xb90   : > { %v7429_v60 = vadd.f32 %v7789_v55, %v7671_v5 }
 0xb91   : > { %v7423_v8 = vpop.f32.mrf.mxu1 }
 0xb92   : > { %7433 = vst.msk [vmem:[%s345_s15 + $0x8] sm:$0xff] %vm7350_vm15, %v7429_v60  ;;  %v7424_v15 = vadd.f32 %v7671_v5, %v7423_v8 }
 0xb94   : > { %7432 = vst.msk [vmem:[%s345_s15] sm:$0xff] %vm7350_vm15, %v7424_v15 }
 0xb95   : > { %8289 = shalt.err (!%p8286_p7)
}
 0xb96   : > { %s8290_s15 = scalar_lea.hbm %s13110_s12, 256  ;;  %s8294_s8 = scalar_lea.hbm %s13165_s6, 512 }
 0xb97   : > { %p8291_p9 = scmp.ne.s32.totalorder %s13110_s12, %s8290_s15  ;;  %p8295_p12 = scmp.lt.s32.totalorder %s13110_s12, %s13165_s6 }
 0xb98   : > { %p8296_p13 = scmp.lt.s32.totalorder %s8294_s8, %s8290_s15 }
 0xb99   : > { %p8292_p10 = pnand %p8291_p9, %p8448_p4 }
 0xb9a   : > { %p8297_p0 = por %p8296_p13, %p8295_p12 }
 0xb9b   : > { %p8293_p11 = pneg %p8292_p10 }
 0xb9d   : > { %p8298_p1 = pnand %p8297_p0, %p8293_p11 }
 0xb9f   : > { %8301 = shalt.err (!%p8298_p1)
}
 0xba0   : > { %7794 = dma.vmem_to_hbm [thread:$0]  (%p8448_p4), %s13104_s21, 256, %s13110_s12, %s7435_s17, %s8365_s16, %s8365_s16, %s8366_s18  }
 0xba1 PF: > { %p7805_p2 = scmp.ge.s32.totalorder %s8356_s29, 2  ;;  %s7488_s19 = sand.u32 1, %s8336_s24  }
 0xba2   : > { %s7489_s30 = scalar_lea.sflag [#allocation3], %s7488_s19 }
 0xba3   : > { %p7799_p3 = pnand %p7805_p2, %p8455_p8 }
 0xba5   : > { %p7800_p5 = pneg %p7799_p3 }
 0xba7   : > { %8327 = dma.done.wait (%p7800_p5), %s7489_s30, 256  }
 0xba8   : > { %8329 = vsyncadd (%p7800_p5), %s7489_s30, 4294967040  ;;  %s7498_s20 = scalar_lea.sflag [#allocation5], %s7488_s19 }
 0xba9   : > { %8331 = dma.done.wait (%p7800_p5), %s7498_s20, 1024  }
 0xbaa   : > { %8333 = vsyncadd (%p7800_p5), %s7498_s20, 4294966272  ;;  %s24_s29 = sadd.s32 1, %s8356_s29   ;;  %s14342_s24 = smov %s8340_s25 }
 0xbab   : > { %p21_p6 = scmp.ge.s32.totalorder %s24_s29, 4   ;;  %s14343_s25 = smov %s8344_s26 }
 0xbac   : > { %s14344_s26 = smov %s8461_s14  ;;  %s14345_s27 = smov %s8352_s28 }
 0xbad   : > { %s14346_s28 = smov %s14348_s9  ;;  %23 = sbr.rel (!%p21_p6) target bundleno = 6 (0x6), region = 105 }
 0xbb2   :  { %7503 = vsyncpa [#allocation3], 1 }
 0xbb3   :  { %7505 = vsyncpa [#allocation3 + $0x1], 1 }
 0xbb4   :  { %7506 = vsyncpa [#allocation5], 1 }
 0xbb5   :  { %7508 = vsyncpa [#allocation5 + $0x1], 1 }

</bundles_post_ra>
